<compile_context>
chip_gen: v7x
topology: tpu7x:2x2x1
jax: 0.10.0
libtpu: 0.0.40
codegen_flags: <defaults>
</compile_context>

<pallas_src>
import functools

import jax
import jax.numpy as jnp
from jax import lax
from jax.experimental import pallas as pl
from jax.experimental.pallas import tpu as pltpu


# ------------------------- in-kernel math helpers -------------------------

def _layernorm(x, g, b, eps=1e-5):
    mu = jnp.mean(x, axis=-1, keepdims=True)
    xc = x - mu
    var = jnp.mean(xc * xc, axis=-1, keepdims=True)
    return xc * lax.rsqrt(var + eps) * g + b


def _sigmoid(x):
    # sigmoid(x) == 0.5 * (1 + tanh(x/2)): stable, rides the EUP tanh unit.
    return 0.5 * jnp.tanh(0.5 * x) + 0.5


def _softmax_last(x):
    m = jnp.max(x, axis=-1, keepdims=True)
    e = jnp.exp(x - m)
    return e * pl.reciprocal(jnp.sum(e, axis=-1, keepdims=True), approx=True)


# ------------------------------ Pallas kernel ------------------------------

def dnc_kernel(x_ref, norms_ref, biases_ref, w_lstm_ref, w_heads_ref, w_proj_ref,
               out_ref, mem_ref, h_ref, c_ref,
               po_buf,
               *, num_reads, head_size, hidden_size, input_size, seq_len):
    B = h_ref.shape[0]
    H, Hd, R, E, L = hidden_size, head_size, num_reads, input_size, seq_len
    Cin = E + R * Hd
    Tout = H + R * Hd
    O = out_ref.shape[1]
    Dh = w_heads_ref.shape[1]            # padded head-projection width
    f32, bf16 = jnp.float32, jnp.bfloat16

    # ---- loop-invariant parameter loads (hoisted once) ----
    # norm slab lane layout: [input(Cin) | ctrl(H) | read_key(Hd) | mem(Hd) | pre_out(Tout)]
    o_in, o_cn = 0, Cin
    o_rk, o_mn = Cin + H, Cin + H + Hd
    o_po = Cin + H + 2 * Hd
    in_g_x = norms_ref[0:1, o_in:o_in + E]
    in_b_x = norms_ref[1:2, o_in:o_in + E]
    in_g_rv = [norms_ref[0:1, o_in + E + r * Hd:o_in + E + (r + 1) * Hd] for r in range(R)]
    in_b_rv = [norms_ref[1:2, o_in + E + r * Hd:o_in + E + (r + 1) * Hd] for r in range(R)]
    cn_g, cn_b = norms_ref[0:1, o_cn:o_cn + H], norms_ref[1:2, o_cn:o_cn + H]
    rk_g, rk_b = norms_ref[0:1, o_rk:o_rk + Hd], norms_ref[1:2, o_rk:o_rk + Hd]
    mn_g, mn_b = norms_ref[0:1, o_mn:o_mn + Hd], norms_ref[1:2, o_mn:o_mn + Hd]
    po_g, po_b = norms_ref[0:1, o_po:o_po + Tout], norms_ref[1:2, o_po:o_po + Tout]

    # bias row layout: [b_lstm(4H) | b_heads(Dh) | b_proj(O)]
    b_lstm = biases_ref[0:1, 0:4 * H]
    b_heads = biases_ref[0:1, 4 * H:4 * H + Dh]
    b_proj = biases_ref[0:1, 4 * H + Dh:4 * H + Dh + O]

    # packed LSTM weights: rows [0:E)=W_ih(x), [E:Cin)=W_ih(rv per head), [Cin:Cin+H)=W_hh
    w_ih_x = w_lstm_ref[0:E, :]
    w_ih_rv = [w_lstm_ref[E + r * Hd:E + (r + 1) * Hd, :] for r in range(R)]
    w_hh = w_lstm_ref[Cin:Cin + H, :]
    w_heads = w_heads_ref[...]
    w_proj = w_proj_ref[...]

    # recurrent state lives in vregs across the fully-unrolled time loop
    # (hidden=None / memory=None path of the PyTorch module)
    h = jnp.zeros((B, H), f32)
    c = jnp.zeros((B, H), f32)
    memory = jnp.zeros(mem_ref.shape, f32)
    rv = [jnp.zeros((B, Hd), f32) for _ in range(R)]   # initial read vector (zeros)

    inv_cin = 1.0 / Cin

    for t in range(L):
        x_t = x_ref[t]                                           # (B, E)

        # ---- input LayerNorm over the virtual concat [x_t | rv] (no materialization) ----
        s = jnp.sum(x_t, axis=-1, keepdims=True)
        for r in range(R):
            s = s + jnp.sum(rv[r], axis=-1, keepdims=True)
        mu = s * inv_cin
        xc = x_t - mu
        rvc = [rv[r] - mu for r in range(R)]
        ssq = jnp.sum(xc * xc, axis=-1, keepdims=True)
        for r in range(R):
            ssq = ssq + jnp.sum(rvc[r] * rvc[r], axis=-1, keepdims=True)
        inv_std = lax.rsqrt(ssq * inv_cin + 1e-5)
        x_n = xc * inv_std * in_g_x + in_b_x
        rv_n = [rvc[r] * inv_std * in_g_rv[r] + in_b_rv[r] for r in range(R)]

        # ---- single-step LSTM cell (PyTorch gate order: i, f, g, o) ----
        gates = (jnp.dot(x_n.astype(bf16), w_ih_x, preferred_element_type=f32)
                 + jnp.dot(h.astype(bf16), w_hh, preferred_element_type=f32)
                 + b_lstm)                                       # (B, 4H)
        for r in range(R):
            gates = gates + jnp.dot(rv_n[r].astype(bf16), w_ih_rv[r],
                                    preferred_element_type=f32)
        i_g = _sigmoid(gates[:, 0 * H:1 * H])
        f_g = _sigmoid(gates[:, 1 * H:2 * H])
        g_g = jnp.tanh(gates[:, 2 * H:3 * H])
        o_g = _sigmoid(gates[:, 3 * H:4 * H])
        c = f_g * c + i_g * g_g
        h = o_g * jnp.tanh(c)
        h_n = _layernorm(h, cn_g, cn_b)                          # (B, H)

        # ---- fused head projection: [read_keys | erase | add | strength | pad] ----
        heads = jnp.dot(h_n.astype(bf16), w_heads,
                        preferred_element_type=f32) + b_heads    # (B, Dh)
        erase_vec = _sigmoid(heads[:, R * Hd:R * Hd + Hd])               # (B, Hd)
        write_vec = jnp.tanh(heads[:, R * Hd + Hd:R * Hd + 2 * Hd])      # (B, Hd)
        write_str = _sigmoid(heads[:, R * Hd + 2 * Hd:R * Hd + 2 * Hd + 1])  # (B, 1)

        # ---- write memory: softmax write weights sum to 1 over slots, so the
        #      reference torch.einsum('bij,bk->bik') erase/write terms collapse
        #      exactly to write_str * vec broadcast over all memory slots ----
        memory = (memory * (1.0 - (write_str * erase_vec)[:, None, :])
                  + (write_str * write_vec)[:, None, :])         # (B, M, Hd)

        # ---- read memory (per head; MXU einsums, bf16 operands, f32 accum) ----
        mem_n = _layernorm(memory, mn_g, mn_b).astype(bf16)      # (B, M, Hd)
        mem_b = memory.astype(bf16)
        po_buf[t * B:(t + 1) * B, 0:H] = h_n
        for r in range(R):
            rk_r = _layernorm(heads[:, r * Hd:(r + 1) * Hd], rk_g, rk_b)   # (B, Hd)
            sc = jnp.einsum('bqd,bmd->bqm', rk_r[:, None, :].astype(bf16), mem_n,
                            preferred_element_type=f32)          # (B, 1, M)
            rw = _softmax_last(sc)
            rv3 = jnp.einsum('bqm,bmd->bqd', rw.astype(bf16), mem_b,
                             preferred_element_type=f32)         # (B, 1, Hd)
            rv_r = jnp.sum(rv3, axis=1)                          # (B, Hd)
            rv[r] = rv_r
            po_buf[t * B:(t + 1) * B, H + r * Hd:H + (r + 1) * Hd] = rv_r

    # final recurrent state
    mem_ref[...] = memory
    h_ref[...] = h
    c_ref[...] = c

    # ---- epilogue: one batched LayerNorm + one projection matmul + one store ----
    pre = _layernorm(po_buf[...], po_g, po_b)                    # (L*B, Tout)
    out_ref[...] = (jnp.dot(pre.astype(bf16), w_proj,
                            preferred_element_type=f32) + b_proj).astype(out_ref.dtype)


# ------------------------------- wrapper ------------------------------------

def make_params(key, input_size, output_size, hidden_size, memory_size,
                head_size, num_reads):
    """Deterministic synthetic parameters, packed into few fused operands."""
    del memory_size
    E, H, Hd, R, O = input_size, hidden_size, head_size, num_reads, output_size
    Cin = E + R * Hd
    Tout = H + R * Hd
    Dh = R * Hd + 2 * Hd + 1            # [read_keys | erase | add | strength]
    Dh_pad = ((Dh + 7) // 8) * 8        # pad head-proj width to a multiple of 8 lanes
    ks = iter(jax.random.split(key, 8))

    # norm slab: row 0 = gamma, row 1 = beta
    n_tot = Cin + H + 2 * Hd + Tout
    norms = jnp.concatenate([jnp.ones((1, n_tot), jnp.float32),
                             jnp.zeros((1, n_tot), jnp.float32)], axis=0)

    def lin_w(kk, din, dout):           # xavier-uniform-like, (in, out) layout
        lim = (6.0 / (din + dout)) ** 0.5
        return jax.random.uniform(kk, (din, dout), jnp.float32, -lim, lim)

    w_lstm = 0.1 * jax.random.normal(next(ks), (Cin + H, 4 * H), jnp.float32)
    b_lstm = jnp.zeros((4 * H,), jnp.float32)

    w_heads = jnp.zeros((H, Dh_pad), jnp.float32)
    w_heads = w_heads.at[:, :Dh].set(
        jnp.concatenate([lin_w(next(ks), H, R * Hd),
                         lin_w(next(ks), H, Hd),
                         lin_w(next(ks), H, Hd),
                         lin_w(next(ks), H, 1)], axis=1))
    b_heads = jnp.zeros((Dh_pad,), jnp.float32)

    w_proj = lin_w(next(ks), Tout, O)
    b_proj = jnp.zeros((O,), jnp.float32)

    biases = jnp.concatenate([b_lstm, b_heads, b_proj])[None, :]  # (1, 4H+Dh_pad+O)

    return (norms, biases,
            w_lstm.astype(jnp.bfloat16),
            w_heads.astype(jnp.bfloat16),
            w_proj.astype(jnp.bfloat16))


def dnc_forward(x_emb, params, *, output_size, hidden_size, memory_size,
                head_size, num_reads):
    B, L, E = x_emb.shape
    x_tmaj = jnp.transpose(x_emb, (1, 0, 2)).astype(jnp.float32)   # (L, B, E)
    Tout = hidden_size + num_reads * head_size

    def full_spec(arr):
        nd = arr.ndim
        return pl.BlockSpec(arr.shape, lambda i, _nd=nd: (0,) * _nd)

    in_specs = [full_spec(x_tmaj)] + [full_spec(p) for p in params]

    out_shapes = (
        jax.ShapeDtypeStruct((L * B, output_size), jnp.float32),
        jax.ShapeDtypeStruct((B, memory_size, head_size), jnp.float32),
        jax.ShapeDtypeStruct((B, hidden_size), jnp.float32),
        jax.ShapeDtypeStruct((B, hidden_size), jnp.float32),
    )
    out_specs = (
        pl.BlockSpec((L * B, output_size), lambda i: (0, 0)),
        pl.BlockSpec((B, memory_size, head_size), lambda i: (0, 0, 0)),
        pl.BlockSpec((B, hidden_size), lambda i: (0, 0)),
        pl.BlockSpec((B, hidden_size), lambda i: (0, 0)),
    )

    kernel = functools.partial(
        dnc_kernel,
        num_reads=num_reads,
        head_size=head_size,
        hidden_size=hidden_size,
        input_size=E,
        seq_len=L,
    )

    grid_spec = pltpu.PrefetchScalarGridSpec(
        num_scalar_prefetch=0,
        grid=(1,),                                     # whole recurrence in one step
        in_specs=in_specs,
        out_specs=out_specs,
        scratch_shapes=[
            pltpu.VMEM((L * B, Tout), jnp.float32),    # pre-output slab [h | rv]
        ],
    )

    logits, memory, h, c = pl.pallas_call(
        kernel,
        out_shape=out_shapes,
        grid_spec=grid_spec,
        compiler_params=pltpu.CompilerParams(
            dimension_semantics=("arbitrary",)),
    )(x_tmaj, *params)

    outputs = jnp.transpose(logits.reshape(L, B, output_size), (1, 0, 2))  # (B, L, O)
    hidden = (h[None, :, :], c[None, :, :])            # PyTorch (1, B, H)
    return outputs, memory, hidden


if __name__ == "__main__":
    # small shapes consistent with the module
    B, L = 2, 8
    input_size = 16      # == embed dim E
    output_size = 16
    hidden_size = 32
    memory_size = 16
    head_size = 8
    num_heads = 2

    key = jax.random.PRNGKey(0)
    kx, kp = jax.random.split(key)
    x_emb = jax.random.normal(kx, (B, L, input_size), jnp.float32)
    params = make_params(kp, input_size, output_size, hidden_size,
                         memory_size, head_size, num_heads)

    outputs, memory, (h, c) = dnc_forward(
        x_emb, params,
        output_size=output_size, hidden_size=hidden_size,
        memory_size=memory_size, head_size=head_size, num_reads=num_heads)

    jax.block_until_ready((outputs, memory, h, c))
    assert outputs.shape == (B, L, output_size)
    assert memory.shape == (B, memory_size, head_size)
    assert h.shape == (1, B, hidden_size) and c.shape == (1, B, hidden_size)
    print("KERNEL_OK")
</pallas_src>

<mosaic_0001>
module attributes {stable_mosaic.version = 11 : i64} {
  func.func @dnc_kernel(%arg0: i32, %arg1: memref<8x2x16xf32, #tpu.memory_space<vmem>>, %arg2: memref<2x128xf32, #tpu.memory_space<vmem>>, %arg3: memref<1x184xf32, #tpu.memory_space<vmem>>, %arg4: memref<64x128xbf16, #tpu.memory_space<vmem>>, %arg5: memref<32x40xbf16, #tpu.memory_space<vmem>>, %arg6: memref<48x16xbf16, #tpu.memory_space<vmem>>, %arg7: memref<16x16xf32, #tpu.memory_space<vmem>>, %arg8: memref<2x16x8xf32, #tpu.memory_space<vmem>>, %arg9: memref<2x32xf32, #tpu.memory_space<vmem>>, %arg10: memref<2x32xf32, #tpu.memory_space<vmem>>, %arg11: memref<16x48xf32, #tpu.memory_space<vmem>>) attributes {dimension_semantics = [#tpu.dimension_semantics<arbitrary>], iteration_bounds = array<i64: 1>, scalar_prefetch = 0 : i64, scratch_operands = 1 : i64, tpu.core_type = #tpu.core_type<tc>, window_params = [{pipeline_mode = #tpu.pipeline_mode<synchronous>, transform_indices = @transform_0, window_bounds = array<i64: 8, 2, 16>}, {pipeline_mode = #tpu.pipeline_mode<synchronous>, transform_indices = @transform_1, window_bounds = array<i64: 2, 128>}, {pipeline_mode = #tpu.pipeline_mode<synchronous>, transform_indices = @transform_2, window_bounds = array<i64: 1, 184>}, {pipeline_mode = #tpu.pipeline_mode<synchronous>, transform_indices = @transform_3, window_bounds = array<i64: 64, 128>}, {pipeline_mode = #tpu.pipeline_mode<synchronous>, transform_indices = @transform_4, window_bounds = array<i64: 32, 40>}, {pipeline_mode = #tpu.pipeline_mode<synchronous>, transform_indices = @transform_5, window_bounds = array<i64: 48, 16>}, {pipeline_mode = #tpu.pipeline_mode<synchronous>, transform_indices = @transform_6, window_bounds = array<i64: 16, 16>}, {pipeline_mode = #tpu.pipeline_mode<synchronous>, transform_indices = @transform_7, window_bounds = array<i64: 2, 16, 8>}, {pipeline_mode = #tpu.pipeline_mode<synchronous>, transform_indices = @transform_8, window_bounds = array<i64: 2, 32>}, {pipeline_mode = #tpu.pipeline_mode<synchronous>, transform_indices = @transform_9, window_bounds = array<i64: 2, 32>}]} {
    %c0 = arith.constant 0 : index
    %c0_0 = arith.constant 0 : index
    %0 = vector.load %arg2[%c0, %c0_0] : memref<2x128xf32, #tpu.memory_space<vmem>>, vector<1x16xf32>
    %c1 = arith.constant 1 : index
    %c0_1 = arith.constant 0 : index
    %1 = vector.load %arg2[%c1, %c0_1] : memref<2x128xf32, #tpu.memory_space<vmem>>, vector<1x16xf32>
    %c0_2 = arith.constant 0 : index
    %c16 = arith.constant 16 : index
    %2 = vector.load %arg2[%c0_2, %c16] : memref<2x128xf32, #tpu.memory_space<vmem>>, vector<1x8xf32>
    %c0_3 = arith.constant 0 : index
    %c24 = arith.constant 24 : index
    %3 = vector.load %arg2[%c0_3, %c24] : memref<2x128xf32, #tpu.memory_space<vmem>>, vector<1x8xf32>
    %c1_4 = arith.constant 1 : index
    %c16_5 = arith.constant 16 : index
    %4 = vector.load %arg2[%c1_4, %c16_5] : memref<2x128xf32, #tpu.memory_space<vmem>>, vector<1x8xf32>
    %c1_6 = arith.constant 1 : index
    %c24_7 = arith.constant 24 : index
    %5 = vector.load %arg2[%c1_6, %c24_7] : memref<2x128xf32, #tpu.memory_space<vmem>>, vector<1x8xf32>
    %c0_8 = arith.constant 0 : index
    %c32 = arith.constant 32 : index
    %6 = vector.load %arg2[%c0_8, %c32] : memref<2x128xf32, #tpu.memory_space<vmem>>, vector<1x32xf32>
    %c1_9 = arith.constant 1 : index
    %c32_10 = arith.constant 32 : index
    %7 = vector.load %arg2[%c1_9, %c32_10] : memref<2x128xf32, #tpu.memory_space<vmem>>, vector<1x32xf32>
    %c0_11 = arith.constant 0 : index
    %c64 = arith.constant 64 : index
    %8 = vector.load %arg2[%c0_11, %c64] : memref<2x128xf32, #tpu.memory_space<vmem>>, vector<1x8xf32>
    %c1_12 = arith.constant 1 : index
    %c64_13 = arith.constant 64 : index
    %9 = vector.load %arg2[%c1_12, %c64_13] : memref<2x128xf32, #tpu.memory_space<vmem>>, vector<1x8xf32>
    %c0_14 = arith.constant 0 : index
    %c72 = arith.constant 72 : index
    %10 = vector.load %arg2[%c0_14, %c72] : memref<2x128xf32, #tpu.memory_space<vmem>>, vector<1x8xf32>
    %c1_15 = arith.constant 1 : index
    %c72_16 = arith.constant 72 : index
    %11 = vector.load %arg2[%c1_15, %c72_16] : memref<2x128xf32, #tpu.memory_space<vmem>>, vector<1x8xf32>
    %c0_17 = arith.constant 0 : index
    %c80 = arith.constant 80 : index
    %12 = vector.load %arg2[%c0_17, %c80] : memref<2x128xf32, #tpu.memory_space<vmem>>, vector<1x48xf32>
    %c1_18 = arith.constant 1 : index
    %c80_19 = arith.constant 80 : index
    %13 = vector.load %arg2[%c1_18, %c80_19] : memref<2x128xf32, #tpu.memory_space<vmem>>, vector<1x48xf32>
    %c0_20 = arith.constant 0 : index
    %c0_21 = arith.constant 0 : index
    %14 = vector.load %arg3[%c0_20, %c0_21] : memref<1x184xf32, #tpu.memory_space<vmem>>, vector<1x128xf32>
    %c0_22 = arith.constant 0 : index
    %c128 = arith.constant 128 : index
    %15 = vector.load %arg3[%c0_22, %c128] : memref<1x184xf32, #tpu.memory_space<vmem>>, vector<1x40xf32>
    %c0_23 = arith.constant 0 : index
    %c168 = arith.constant 168 : index
    %16 = vector.load %arg3[%c0_23, %c168] : memref<1x184xf32, #tpu.memory_space<vmem>>, vector<1x16xf32>
    %c0_24 = arith.constant 0 : index
    %c0_25 = arith.constant 0 : index
    %17 = vector.load %arg4[%c0_24, %c0_25] : memref<64x128xbf16, #tpu.memory_space<vmem>>, vector<16x128xbf16>
    %c16_26 = arith.constant 16 : index
    %c0_27 = arith.constant 0 : index
    %18 = vector.load %arg4[%c16_26, %c0_27] : memref<64x128xbf16, #tpu.memory_space<vmem>>, vector<8x128xbf16>
    %c24_28 = arith.constant 24 : index
    %c0_29 = arith.constant 0 : index
    %19 = vector.load %arg4[%c24_28, %c0_29] : memref<64x128xbf16, #tpu.memory_space<vmem>>, vector<8x128xbf16>
    %c32_30 = arith.constant 32 : index
    %c0_31 = arith.constant 0 : index
    %20 = vector.load %arg4[%c32_30, %c0_31] : memref<64x128xbf16, #tpu.memory_space<vmem>>, vector<32x128xbf16>
    %c0_32 = arith.constant 0 : index
    %c0_33 = arith.constant 0 : index
    %21 = vector.load %arg5[%c0_32, %c0_33] : memref<32x40xbf16, #tpu.memory_space<vmem>>, vector<32x40xbf16>
    %c0_34 = arith.constant 0 : index
    %c0_35 = arith.constant 0 : index
    %22 = vector.load %arg6[%c0_34, %c0_35] : memref<48x16xbf16, #tpu.memory_space<vmem>>, vector<48x16xbf16>
    %cst = arith.constant 0.000000e+00 : f32
    %23 = vector.broadcast %cst : f32 to vector<2x32xf32>
    %cst_36 = arith.constant 0.000000e+00 : f32
    %24 = vector.broadcast %cst_36 : f32 to vector<2x32xf32>
    %cst_37 = arith.constant 0.000000e+00 : f32
    %25 = vector.broadcast %cst_37 : f32 to vector<2x16x8xf32>
    %cst_38 = arith.constant 0.000000e+00 : f32
    %26 = vector.broadcast %cst_38 : f32 to vector<2x8xf32>
    %cst_39 = arith.constant 0.000000e+00 : f32
    %27 = vector.broadcast %cst_39 : f32 to vector<2x8xf32>
    %c0_40 = arith.constant 0 : index
    %c0_41 = arith.constant 0 : index
    %c0_42 = arith.constant 0 : index
    %28 = vector.load %arg1[%c0_40, %c0_41, %c0_42] : memref<8x2x16xf32, #tpu.memory_space<vmem>>, vector<1x2x16xf32>
    %29 = vector.shape_cast %28 : vector<1x2x16xf32> to vector<2x16xf32>
    %cst_43 = arith.constant dense<0.000000e+00> : vector<2xf32>
    %30 = vector.multi_reduction <add>, %29, %cst_43 [1] : vector<2x16xf32> to vector<2xf32>
    %31 = vector.shape_cast %30 : vector<2xf32> to vector<2x1xf32>
    %cst_44 = arith.constant dense<0.000000e+00> : vector<2xf32>
    %32 = vector.multi_reduction <add>, %26, %cst_44 [1] : vector<2x8xf32> to vector<2xf32>
    %33 = vector.shape_cast %32 : vector<2xf32> to vector<2x1xf32>
    %34 = arith.addf %31, %33 : vector<2x1xf32>
    %cst_45 = arith.constant dense<0.000000e+00> : vector<2xf32>
    %35 = vector.multi_reduction <add>, %27, %cst_45 [1] : vector<2x8xf32> to vector<2xf32>
    %36 = vector.shape_cast %35 : vector<2xf32> to vector<2x1xf32>
    %37 = arith.addf %34, %36 : vector<2x1xf32>
    %cst_46 = arith.constant 3.125000e-02 : f32
    %38 = vector.broadcast %cst_46 : f32 to vector<2x1xf32>
    %39 = arith.mulf %37, %38 : vector<2x1xf32>
    %40 = vector.broadcast %39 : vector<2x1xf32> to vector<2x16xf32>
    %41 = arith.subf %29, %40 : vector<2x16xf32>
    %42 = vector.broadcast %39 : vector<2x1xf32> to vector<2x8xf32>
    %43 = arith.subf %26, %42 : vector<2x8xf32>
    %44 = vector.broadcast %39 : vector<2x1xf32> to vector<2x8xf32>
    %45 = arith.subf %27, %44 : vector<2x8xf32>
    %46 = arith.mulf %41, %41 : vector<2x16xf32>
    %cst_47 = arith.constant dense<0.000000e+00> : vector<2xf32>
    %47 = vector.multi_reduction <add>, %46, %cst_47 [1] : vector<2x16xf32> to vector<2xf32>
    %48 = vector.shape_cast %47 : vector<2xf32> to vector<2x1xf32>
    %49 = arith.mulf %43, %43 : vector<2x8xf32>
    %cst_48 = arith.constant dense<0.000000e+00> : vector<2xf32>
    %50 = vector.multi_reduction <add>, %49, %cst_48 [1] : vector<2x8xf32> to vector<2xf32>
    %51 = vector.shape_cast %50 : vector<2xf32> to vector<2x1xf32>
    %52 = arith.addf %48, %51 : vector<2x1xf32>
    %53 = arith.mulf %45, %45 : vector<2x8xf32>
    %cst_49 = arith.constant dense<0.000000e+00> : vector<2xf32>
    %54 = vector.multi_reduction <add>, %53, %cst_49 [1] : vector<2x8xf32> to vector<2xf32>
    %55 = vector.shape_cast %54 : vector<2xf32> to vector<2x1xf32>
    %56 = arith.addf %52, %55 : vector<2x1xf32>
    %cst_50 = arith.constant 3.125000e-02 : f32
    %57 = vector.broadcast %cst_50 : f32 to vector<2x1xf32>
    %58 = arith.mulf %56, %57 : vector<2x1xf32>
    %cst_51 = arith.constant 9.99999974E-6 : f32
    %59 = vector.broadcast %cst_51 : f32 to vector<2x1xf32>
    %60 = arith.addf %58, %59 : vector<2x1xf32>
    %61 = math.rsqrt %60 : vector<2x1xf32>
    %62 = vector.broadcast %61 : vector<2x1xf32> to vector<2x16xf32>
    %63 = arith.mulf %41, %62 : vector<2x16xf32>
    %64 = vector.broadcast %0 : vector<1x16xf32> to vector<2x16xf32>
    %65 = arith.mulf %63, %64 : vector<2x16xf32>
    %66 = vector.broadcast %1 : vector<1x16xf32> to vector<2x16xf32>
    %67 = arith.addf %65, %66 : vector<2x16xf32>
    %68 = vector.broadcast %61 : vector<2x1xf32> to vector<2x8xf32>
    %69 = arith.mulf %43, %68 : vector<2x8xf32>
    %70 = vector.broadcast %2 : vector<1x8xf32> to vector<2x8xf32>
    %71 = arith.mulf %69, %70 : vector<2x8xf32>
    %72 = vector.broadcast %4 : vector<1x8xf32> to vector<2x8xf32>
    %73 = arith.addf %71, %72 : vector<2x8xf32>
    %74 = vector.broadcast %61 : vector<2x1xf32> to vector<2x8xf32>
    %75 = arith.mulf %45, %74 : vector<2x8xf32>
    %76 = vector.broadcast %3 : vector<1x8xf32> to vector<2x8xf32>
    %77 = arith.mulf %75, %76 : vector<2x8xf32>
    %78 = vector.broadcast %5 : vector<1x8xf32> to vector<2x8xf32>
    %79 = arith.addf %77, %78 : vector<2x8xf32>
    %80 = arith.truncf %67 : vector<2x16xf32> to vector<2x16xbf16>
    %cst_52 = arith.constant dense<0.000000e+00> : vector<2x128xf32>
    %81 = tpu.matmul %80, %17, %cst_52 {dimension_numbers = #tpu.dot_dimension_numbers<[1], [0], [0], [1], [0, 0, 1, 1], [], []>} : vector<2x16xbf16>, vector<16x128xbf16>, vector<2x128xf32> -> vector<2x128xf32>
    %82 = arith.truncf %23 : vector<2x32xf32> to vector<2x32xbf16>
    %cst_53 = arith.constant dense<0.000000e+00> : vector<2x128xf32>
    %83 = tpu.matmul %82, %20, %cst_53 {dimension_numbers = #tpu.dot_dimension_numbers<[1], [0], [0], [1], [0, 0, 1, 1], [], []>} : vector<2x32xbf16>, vector<32x128xbf16>, vector<2x128xf32> -> vector<2x128xf32>
    %84 = arith.addf %81, %83 : vector<2x128xf32>
    %85 = vector.broadcast %14 : vector<1x128xf32> to vector<2x128xf32>
    %86 = arith.addf %84, %85 : vector<2x128xf32>
    %87 = arith.truncf %73 : vector<2x8xf32> to vector<2x8xbf16>
    %cst_54 = arith.constant dense<0.000000e+00> : vector<2x128xf32>
    %88 = tpu.matmul %87, %18, %cst_54 {dimension_numbers = #tpu.dot_dimension_numbers<[1], [0], [0], [1], [0, 0, 1, 1], [], []>} : vector<2x8xbf16>, vector<8x128xbf16>, vector<2x128xf32> -> vector<2x128xf32>
    %89 = arith.addf %86, %88 : vector<2x128xf32>
    %90 = arith.truncf %79 : vector<2x8xf32> to vector<2x8xbf16>
    %cst_55 = arith.constant dense<0.000000e+00> : vector<2x128xf32>
    %91 = tpu.matmul %90, %19, %cst_55 {dimension_numbers = #tpu.dot_dimension_numbers<[1], [0], [0], [1], [0, 0, 1, 1], [], []>} : vector<2x8xbf16>, vector<8x128xbf16>, vector<2x128xf32> -> vector<2x128xf32>
    %92 = arith.addf %89, %91 : vector<2x128xf32>
    %93 = vector.extract_strided_slice %92 {offsets = [0, 0], sizes = [2, 32], strides = [1, 1]} : vector<2x128xf32> to vector<2x32xf32>
    %cst_56 = arith.constant 5.000000e-01 : f32
    %94 = vector.broadcast %cst_56 : f32 to vector<2x32xf32>
    %95 = arith.mulf %94, %93 : vector<2x32xf32>
    %96 = math.tanh %95 : vector<2x32xf32>
    %cst_57 = arith.constant 5.000000e-01 : f32
    %97 = vector.broadcast %cst_57 : f32 to vector<2x32xf32>
    %98 = arith.mulf %97, %96 : vector<2x32xf32>
    %cst_58 = arith.constant 5.000000e-01 : f32
    %99 = vector.broadcast %cst_58 : f32 to vector<2x32xf32>
    %100 = arith.addf %98, %99 : vector<2x32xf32>
    %101 = vector.extract_strided_slice %92 {offsets = [0, 32], sizes = [2, 32], strides = [1, 1]} : vector<2x128xf32> to vector<2x32xf32>
    %cst_59 = arith.constant 5.000000e-01 : f32
    %102 = vector.broadcast %cst_59 : f32 to vector<2x32xf32>
    %103 = arith.mulf %102, %101 : vector<2x32xf32>
    %104 = math.tanh %103 : vector<2x32xf32>
    %cst_60 = arith.constant 5.000000e-01 : f32
    %105 = vector.broadcast %cst_60 : f32 to vector<2x32xf32>
    %106 = arith.mulf %105, %104 : vector<2x32xf32>
    %cst_61 = arith.constant 5.000000e-01 : f32
    %107 = vector.broadcast %cst_61 : f32 to vector<2x32xf32>
    %108 = arith.addf %106, %107 : vector<2x32xf32>
    %109 = vector.extract_strided_slice %92 {offsets = [0, 64], sizes = [2, 32], strides = [1, 1]} : vector<2x128xf32> to vector<2x32xf32>
    %110 = math.tanh %109 : vector<2x32xf32>
    %111 = vector.extract_strided_slice %92 {offsets = [0, 96], sizes = [2, 32], strides = [1, 1]} : vector<2x128xf32> to vector<2x32xf32>
    %cst_62 = arith.constant 5.000000e-01 : f32
    %112 = vector.broadcast %cst_62 : f32 to vector<2x32xf32>
    %113 = arith.mulf %112, %111 : vector<2x32xf32>
    %114 = math.tanh %113 : vector<2x32xf32>
    %cst_63 = arith.constant 5.000000e-01 : f32
    %115 = vector.broadcast %cst_63 : f32 to vector<2x32xf32>
    %116 = arith.mulf %115, %114 : vector<2x32xf32>
    %cst_64 = arith.constant 5.000000e-01 : f32
    %117 = vector.broadcast %cst_64 : f32 to vector<2x32xf32>
    %118 = arith.addf %116, %117 : vector<2x32xf32>
    %119 = arith.mulf %108, %24 : vector<2x32xf32>
    %120 = arith.mulf %100, %110 : vector<2x32xf32>
    %121 = arith.addf %119, %120 : vector<2x32xf32>
    %122 = math.tanh %121 : vector<2x32xf32>
    %123 = arith.mulf %118, %122 : vector<2x32xf32>
    %cst_65 = arith.constant dense<0.000000e+00> : vector<2xf32>
    %124 = vector.multi_reduction <add>, %123, %cst_65 [1] : vector<2x32xf32> to vector<2xf32>
    %125 = vector.shape_cast %124 : vector<2xf32> to vector<2x1xf32>
    %cst_66 = arith.constant 3.200000e+01 : f32
    %126 = vector.broadcast %cst_66 : f32 to vector<2x1xf32>
    %127 = arith.divf %125, %126 : vector<2x1xf32>
    %128 = vector.broadcast %127 : vector<2x1xf32> to vector<2x32xf32>
    %129 = arith.subf %123, %128 : vector<2x32xf32>
    %130 = arith.mulf %129, %129 : vector<2x32xf32>
    %cst_67 = arith.constant dense<0.000000e+00> : vector<2xf32>
    %131 = vector.multi_reduction <add>, %130, %cst_67 [1] : vector<2x32xf32> to vector<2xf32>
    %132 = vector.shape_cast %131 : vector<2xf32> to vector<2x1xf32>
    %cst_68 = arith.constant 3.200000e+01 : f32
    %133 = vector.broadcast %cst_68 : f32 to vector<2x1xf32>
    %134 = arith.divf %132, %133 : vector<2x1xf32>
    %cst_69 = arith.constant 9.99999974E-6 : f32
    %135 = vector.broadcast %cst_69 : f32 to vector<2x1xf32>
    %136 = arith.addf %134, %135 : vector<2x1xf32>
    %137 = math.rsqrt %136 : vector<2x1xf32>
    %138 = vector.broadcast %137 : vector<2x1xf32> to vector<2x32xf32>
    %139 = arith.mulf %129, %138 : vector<2x32xf32>
    %140 = vector.broadcast %6 : vector<1x32xf32> to vector<2x32xf32>
    %141 = arith.mulf %139, %140 : vector<2x32xf32>
    %142 = vector.broadcast %7 : vector<1x32xf32> to vector<2x32xf32>
    %143 = arith.addf %141, %142 : vector<2x32xf32>
    %144 = arith.truncf %143 : vector<2x32xf32> to vector<2x32xbf16>
    %cst_70 = arith.constant dense<0.000000e+00> : vector<2x40xf32>
    %145 = tpu.matmul %144, %21, %cst_70 {dimension_numbers = #tpu.dot_dimension_numbers<[1], [0], [0], [1], [0, 0, 1, 1], [], []>} : vector<2x32xbf16>, vector<32x40xbf16>, vector<2x40xf32> -> vector<2x40xf32>
    %146 = vector.broadcast %15 : vector<1x40xf32> to vector<2x40xf32>
    %147 = arith.addf %145, %146 : vector<2x40xf32>
    %148 = vector.extract_strided_slice %147 {offsets = [0, 16], sizes = [2, 8], strides = [1, 1]} : vector<2x40xf32> to vector<2x8xf32>
    %cst_71 = arith.constant 5.000000e-01 : f32
    %149 = vector.broadcast %cst_71 : f32 to vector<2x8xf32>
    %150 = arith.mulf %149, %148 : vector<2x8xf32>
    %151 = math.tanh %150 : vector<2x8xf32>
    %cst_72 = arith.constant 5.000000e-01 : f32
    %152 = vector.broadcast %cst_72 : f32 to vector<2x8xf32>
    %153 = arith.mulf %152, %151 : vector<2x8xf32>
    %cst_73 = arith.constant 5.000000e-01 : f32
    %154 = vector.broadcast %cst_73 : f32 to vector<2x8xf32>
    %155 = arith.addf %153, %154 : vector<2x8xf32>
    %156 = vector.extract_strided_slice %147 {offsets = [0, 24], sizes = [2, 8], strides = [1, 1]} : vector<2x40xf32> to vector<2x8xf32>
    %157 = math.tanh %156 : vector<2x8xf32>
    %158 = vector.extract_strided_slice %147 {offsets = [0, 32], sizes = [2, 1], strides = [1, 1]} : vector<2x40xf32> to vector<2x1xf32>
    %cst_74 = arith.constant 5.000000e-01 : f32
    %159 = vector.broadcast %cst_74 : f32 to vector<2x1xf32>
    %160 = arith.mulf %159, %158 : vector<2x1xf32>
    %161 = math.tanh %160 : vector<2x1xf32>
    %cst_75 = arith.constant 5.000000e-01 : f32
    %162 = vector.broadcast %cst_75 : f32 to vector<2x1xf32>
    %163 = arith.mulf %162, %161 : vector<2x1xf32>
    %cst_76 = arith.constant 5.000000e-01 : f32
    %164 = vector.broadcast %cst_76 : f32 to vector<2x1xf32>
    %165 = arith.addf %163, %164 : vector<2x1xf32>
    %166 = vector.broadcast %165 : vector<2x1xf32> to vector<2x8xf32>
    %167 = arith.mulf %166, %155 : vector<2x8xf32>
    %168 = vector.shape_cast %167 : vector<2x8xf32> to vector<2x1x8xf32>
    %cst_77 = arith.constant 1.000000e+00 : f32
    %169 = vector.broadcast %cst_77 : f32 to vector<2x1x8xf32>
    %170 = arith.subf %169, %168 : vector<2x1x8xf32>
    %171 = vector.broadcast %170 : vector<2x1x8xf32> to vector<2x16x8xf32>
    %172 = arith.mulf %25, %171 : vector<2x16x8xf32>
    %173 = vector.broadcast %165 : vector<2x1xf32> to vector<2x8xf32>
    %174 = arith.mulf %173, %157 : vector<2x8xf32>
    %175 = vector.shape_cast %174 : vector<2x8xf32> to vector<2x1x8xf32>
    %176 = vector.broadcast %175 : vector<2x1x8xf32> to vector<2x16x8xf32>
    %177 = arith.addf %172, %176 : vector<2x16x8xf32>
    %cst_78 = arith.constant dense<0.000000e+00> : vector<2x16xf32>
    %178 = vector.multi_reduction <add>, %177, %cst_78 [2] : vector<2x16x8xf32> to vector<2x16xf32>
    %179 = vector.shape_cast %178 : vector<2x16xf32> to vector<2x16x1xf32>
    %cst_79 = arith.constant 8.000000e+00 : f32
    %180 = vector.broadcast %cst_79 : f32 to vector<2x16x1xf32>
    %181 = arith.divf %179, %180 : vector<2x16x1xf32>
    %182 = vector.broadcast %181 : vector<2x16x1xf32> to vector<2x16x8xf32>
    %183 = arith.subf %177, %182 : vector<2x16x8xf32>
    %184 = arith.mulf %183, %183 : vector<2x16x8xf32>
    %cst_80 = arith.constant dense<0.000000e+00> : vector<2x16xf32>
    %185 = vector.multi_reduction <add>, %184, %cst_80 [2] : vector<2x16x8xf32> to vector<2x16xf32>
    %186 = vector.shape_cast %185 : vector<2x16xf32> to vector<2x16x1xf32>
    %cst_81 = arith.constant 8.000000e+00 : f32
    %187 = vector.broadcast %cst_81 : f32 to vector<2x16x1xf32>
    %188 = arith.divf %186, %187 : vector<2x16x1xf32>
    %cst_82 = arith.constant 9.99999974E-6 : f32
    %189 = vector.broadcast %cst_82 : f32 to vector<2x16x1xf32>
    %190 = arith.addf %188, %189 : vector<2x16x1xf32>
    %191 = math.rsqrt %190 : vector<2x16x1xf32>
    %192 = vector.broadcast %191 : vector<2x16x1xf32> to vector<2x16x8xf32>
    %193 = arith.mulf %183, %192 : vector<2x16x8xf32>
    %194 = vector.shape_cast %10 : vector<1x8xf32> to vector<1x1x8xf32>
    %195 = vector.broadcast %194 : vector<1x1x8xf32> to vector<2x16x8xf32>
    %196 = arith.mulf %193, %195 : vector<2x16x8xf32>
    %197 = vector.shape_cast %11 : vector<1x8xf32> to vector<1x1x8xf32>
    %198 = vector.broadcast %197 : vector<1x1x8xf32> to vector<2x16x8xf32>
    %199 = arith.addf %196, %198 : vector<2x16x8xf32>
    %200 = arith.truncf %199 : vector<2x16x8xf32> to vector<2x16x8xbf16>
    %201 = arith.truncf %177 : vector<2x16x8xf32> to vector<2x16x8xbf16>
    %c0_83 = arith.constant 0 : index
    %c0_84 = arith.constant 0 : index
    %202 = vector.load %arg11[%c0_83, %c0_84] : memref<16x48xf32, #tpu.memory_space<vmem>>, vector<2x32xf32>
    tpu.vector_store %arg11[%c0_83, %c0_84], %143 {strides = array<i32>} : memref<16x48xf32, #tpu.memory_space<vmem>>, vector<2x32xf32>,
    %203 = vector.extract_strided_slice %147 {offsets = [0, 0], sizes = [2, 8], strides = [1, 1]} : vector<2x40xf32> to vector<2x8xf32>
    %cst_85 = arith.constant dense<0.000000e+00> : vector<2xf32>
    %204 = vector.multi_reduction <add>, %203, %cst_85 [1] : vector<2x8xf32> to vector<2xf32>
    %205 = vector.shape_cast %204 : vector<2xf32> to vector<2x1xf32>
    %cst_86 = arith.constant 8.000000e+00 : f32
    %206 = vector.broadcast %cst_86 : f32 to vector<2x1xf32>
    %207 = arith.divf %205, %206 : vector<2x1xf32>
    %208 = vector.broadcast %207 : vector<2x1xf32> to vector<2x8xf32>
    %209 = arith.subf %203, %208 : vector<2x8xf32>
    %210 = arith.mulf %209, %209 : vector<2x8xf32>
    %cst_87 = arith.constant dense<0.000000e+00> : vector<2xf32>
    %211 = vector.multi_reduction <add>, %210, %cst_87 [1] : vector<2x8xf32> to vector<2xf32>
    %212 = vector.shape_cast %211 : vector<2xf32> to vector<2x1xf32>
    %cst_88 = arith.constant 8.000000e+00 : f32
    %213 = vector.broadcast %cst_88 : f32 to vector<2x1xf32>
    %214 = arith.divf %212, %213 : vector<2x1xf32>
    %cst_89 = arith.constant 9.99999974E-6 : f32
    %215 = vector.broadcast %cst_89 : f32 to vector<2x1xf32>
    %216 = arith.addf %214, %215 : vector<2x1xf32>
    %217 = math.rsqrt %216 : vector<2x1xf32>
    %218 = vector.broadcast %217 : vector<2x1xf32> to vector<2x8xf32>
    %219 = arith.mulf %209, %218 : vector<2x8xf32>
    %220 = vector.broadcast %8 : vector<1x8xf32> to vector<2x8xf32>
    %221 = arith.mulf %219, %220 : vector<2x8xf32>
    %222 = vector.broadcast %9 : vector<1x8xf32> to vector<2x8xf32>
    %223 = arith.addf %221, %222 : vector<2x8xf32>
    %224 = vector.shape_cast %223 : vector<2x8xf32> to vector<2x1x8xf32>
    %225 = arith.truncf %224 : vector<2x1x8xf32> to vector<2x1x8xbf16>
    "tpu.trace_start"() <{level = 10 : i32, message = "bqd,bmd->bqm"}> : () -> ()
    %cst_90 = arith.constant dense<0.000000e+00> : vector<2x1x16xf32>
    %226 = tpu.matmul %225, %200, %cst_90 {dimension_numbers = #tpu.dot_dimension_numbers<[2], [2], [1], [1], [0, 0, 0, 1, 1, 1], [0], [0]>} : vector<2x1x8xbf16>, vector<2x16x8xbf16>, vector<2x1x16xf32> -> vector<2x1x16xf32>
    "tpu.trace_stop"() : () -> ()
    %cst_91 = arith.constant dense<0xFF800000> : vector<2x1xf32>
    %227 = vector.multi_reduction <maximumf>, %226, %cst_91 [2] : vector<2x1x16xf32> to vector<2x1xf32>
    %228 = vector.shape_cast %227 : vector<2x1xf32> to vector<2x1x1xf32>
    %229 = vector.broadcast %228 : vector<2x1x1xf32> to vector<2x1x16xf32>
    %230 = arith.subf %226, %229 : vector<2x1x16xf32>
    %231 = math.exp %230 : vector<2x1x16xf32>
    %cst_92 = arith.constant dense<0.000000e+00> : vector<2x1xf32>
    %232 = vector.multi_reduction <add>, %231, %cst_92 [2] : vector<2x1x16xf32> to vector<2x1xf32>
    %233 = vector.shape_cast %232 : vector<2x1xf32> to vector<2x1x1xf32>
    %234 = tpu.reciprocal %233 {approx = true} : vector<2x1x1xf32> -> vector<2x1x1xf32>
    %235 = vector.broadcast %234 : vector<2x1x1xf32> to vector<2x1x16xf32>
    %236 = arith.mulf %231, %235 : vector<2x1x16xf32>
    %237 = arith.truncf %236 : vector<2x1x16xf32> to vector<2x1x16xbf16>
    "tpu.trace_start"() <{level = 10 : i32, message = "bqm,bmd->bqd"}> : () -> ()
    %cst_93 = arith.constant dense<0.000000e+00> : vector<2x1x8xf32>
    %238 = tpu.matmul %237, %201, %cst_93 {dimension_numbers = #tpu.dot_dimension_numbers<[2], [1], [1], [2], [0, 0, 0, 1, 1, 2], [0], [0]>} : vector<2x1x16xbf16>, vector<2x16x8xbf16>, vector<2x1x8xf32> -> vector<2x1x8xf32>
    "tpu.trace_stop"() : () -> ()
    %cst_94 = arith.constant dense<0.000000e+00> : vector<2x8xf32>
    %239 = vector.multi_reduction <add>, %238, %cst_94 [1] : vector<2x1x8xf32> to vector<2x8xf32>
    %c0_95 = arith.constant 0 : index
    %c32_96 = arith.constant 32 : index
    %240 = vector.load %arg11[%c0_95, %c32_96] : memref<16x48xf32, #tpu.memory_space<vmem>>, vector<2x8xf32>
    tpu.vector_store %arg11[%c0_95, %c32_96], %239 {strides = array<i32>} : memref<16x48xf32, #tpu.memory_space<vmem>>, vector<2x8xf32>,
    %241 = vector.extract_strided_slice %147 {offsets = [0, 8], sizes = [2, 8], strides = [1, 1]} : vector<2x40xf32> to vector<2x8xf32>
    %cst_97 = arith.constant dense<0.000000e+00> : vector<2xf32>
    %242 = vector.multi_reduction <add>, %241, %cst_97 [1] : vector<2x8xf32> to vector<2xf32>
    %243 = vector.shape_cast %242 : vector<2xf32> to vector<2x1xf32>
    %cst_98 = arith.constant 8.000000e+00 : f32
    %244 = vector.broadcast %cst_98 : f32 to vector<2x1xf32>
    %245 = arith.divf %243, %244 : vector<2x1xf32>
    %246 = vector.broadcast %245 : vector<2x1xf32> to vector<2x8xf32>
    %247 = arith.subf %241, %246 : vector<2x8xf32>
    %248 = arith.mulf %247, %247 : vector<2x8xf32>
    %cst_99 = arith.constant dense<0.000000e+00> : vector<2xf32>
    %249 = vector.multi_reduction <add>, %248, %cst_99 [1] : vector<2x8xf32> to vector<2xf32>
    %250 = vector.shape_cast %249 : vector<2xf32> to vector<2x1xf32>
    %cst_100 = arith.constant 8.000000e+00 : f32
    %251 = vector.broadcast %cst_100 : f32 to vector<2x1xf32>
    %252 = arith.divf %250, %251 : vector<2x1xf32>
    %cst_101 = arith.constant 9.99999974E-6 : f32
    %253 = vector.broadcast %cst_101 : f32 to vector<2x1xf32>
    %254 = arith.addf %252, %253 : vector<2x1xf32>
    %255 = math.rsqrt %254 : vector<2x1xf32>
    %256 = vector.broadcast %255 : vector<2x1xf32> to vector<2x8xf32>
    %257 = arith.mulf %247, %256 : vector<2x8xf32>
    %258 = vector.broadcast %8 : vector<1x8xf32> to vector<2x8xf32>
    %259 = arith.mulf %257, %258 : vector<2x8xf32>
    %260 = vector.broadcast %9 : vector<1x8xf32> to vector<2x8xf32>
    %261 = arith.addf %259, %260 : vector<2x8xf32>
    %262 = vector.shape_cast %261 : vector<2x8xf32> to vector<2x1x8xf32>
    %263 = arith.truncf %262 : vector<2x1x8xf32> to vector<2x1x8xbf16>
    "tpu.trace_start"() <{level = 10 : i32, message = "bqd,bmd->bqm"}> : () -> ()
    %cst_102 = arith.constant dense<0.000000e+00> : vector<2x1x16xf32>
    %264 = tpu.matmul %263, %200, %cst_102 {dimension_numbers = #tpu.dot_dimension_numbers<[2], [2], [1], [1], [0, 0, 0, 1, 1, 1], [0], [0]>} : vector<2x1x8xbf16>, vector<2x16x8xbf16>, vector<2x1x16xf32> -> vector<2x1x16xf32>
    "tpu.trace_stop"() : () -> ()
    %cst_103 = arith.constant dense<0xFF800000> : vector<2x1xf32>
    %265 = vector.multi_reduction <maximumf>, %264, %cst_103 [2] : vector<2x1x16xf32> to vector<2x1xf32>
    %266 = vector.shape_cast %265 : vector<2x1xf32> to vector<2x1x1xf32>
    %267 = vector.broadcast %266 : vector<2x1x1xf32> to vector<2x1x16xf32>
    %268 = arith.subf %264, %267 : vector<2x1x16xf32>
    %269 = math.exp %268 : vector<2x1x16xf32>
    %cst_104 = arith.constant dense<0.000000e+00> : vector<2x1xf32>
    %270 = vector.multi_reduction <add>, %269, %cst_104 [2] : vector<2x1x16xf32> to vector<2x1xf32>
    %271 = vector.shape_cast %270 : vector<2x1xf32> to vector<2x1x1xf32>
    %272 = tpu.reciprocal %271 {approx = true} : vector<2x1x1xf32> -> vector<2x1x1xf32>
    %273 = vector.broadcast %272 : vector<2x1x1xf32> to vector<2x1x16xf32>
    %274 = arith.mulf %269, %273 : vector<2x1x16xf32>
    %275 = arith.truncf %274 : vector<2x1x16xf32> to vector<2x1x16xbf16>
    "tpu.trace_start"() <{level = 10 : i32, message = "bqm,bmd->bqd"}> : () -> ()
    %cst_105 = arith.constant dense<0.000000e+00> : vector<2x1x8xf32>
    %276 = tpu.matmul %275, %201, %cst_105 {dimension_numbers = #tpu.dot_dimension_numbers<[2], [1], [1], [2], [0, 0, 0, 1, 1, 2], [0], [0]>} : vector<2x1x16xbf16>, vector<2x16x8xbf16>, vector<2x1x8xf32> -> vector<2x1x8xf32>
    "tpu.trace_stop"() : () -> ()
    %cst_106 = arith.constant dense<0.000000e+00> : vector<2x8xf32>
    %277 = vector.multi_reduction <add>, %276, %cst_106 [1] : vector<2x1x8xf32> to vector<2x8xf32>
    %c0_107 = arith.constant 0 : index
    %c40 = arith.constant 40 : index
    %278 = vector.load %arg11[%c0_107, %c40] : memref<16x48xf32, #tpu.memory_space<vmem>>, vector<2x8xf32>
    tpu.vector_store %arg11[%c0_107, %c40], %277 {strides = array<i32>} : memref<16x48xf32, #tpu.memory_space<vmem>>, vector<2x8xf32>,
    %c1_108 = arith.constant 1 : index
    %c0_109 = arith.constant 0 : index
    %c0_110 = arith.constant 0 : index
    %279 = vector.load %arg1[%c1_108, %c0_109, %c0_110] : memref<8x2x16xf32, #tpu.memory_space<vmem>>, vector<1x2x16xf32>
    %280 = vector.shape_cast %279 : vector<1x2x16xf32> to vector<2x16xf32>
    %cst_111 = arith.constant dense<0.000000e+00> : vector<2xf32>
    %281 = vector.multi_reduction <add>, %280, %cst_111 [1] : vector<2x16xf32> to vector<2xf32>
    %282 = vector.shape_cast %281 : vector<2xf32> to vector<2x1xf32>
    %cst_112 = arith.constant dense<0.000000e+00> : vector<2xf32>
    %283 = vector.multi_reduction <add>, %239, %cst_112 [1] : vector<2x8xf32> to vector<2xf32>
    %284 = vector.shape_cast %283 : vector<2xf32> to vector<2x1xf32>
    %285 = arith.addf %282, %284 : vector<2x1xf32>
    %cst_113 = arith.constant dense<0.000000e+00> : vector<2xf32>
    %286 = vector.multi_reduction <add>, %277, %cst_113 [1] : vector<2x8xf32> to vector<2xf32>
    %287 = vector.shape_cast %286 : vector<2xf32> to vector<2x1xf32>
    %288 = arith.addf %285, %287 : vector<2x1xf32>
    %cst_114 = arith.constant 3.125000e-02 : f32
    %289 = vector.broadcast %cst_114 : f32 to vector<2x1xf32>
    %290 = arith.mulf %288, %289 : vector<2x1xf32>
    %291 = vector.broadcast %290 : vector<2x1xf32> to vector<2x16xf32>
    %292 = arith.subf %280, %291 : vector<2x16xf32>
    %293 = vector.broadcast %290 : vector<2x1xf32> to vector<2x8xf32>
    %294 = arith.subf %239, %293 : vector<2x8xf32>
    %295 = vector.broadcast %290 : vector<2x1xf32> to vector<2x8xf32>
    %296 = arith.subf %277, %295 : vector<2x8xf32>
    %297 = arith.mulf %292, %292 : vector<2x16xf32>
    %cst_115 = arith.constant dense<0.000000e+00> : vector<2xf32>
    %298 = vector.multi_reduction <add>, %297, %cst_115 [1] : vector<2x16xf32> to vector<2xf32>
    %299 = vector.shape_cast %298 : vector<2xf32> to vector<2x1xf32>
    %300 = arith.mulf %294, %294 : vector<2x8xf32>
    %cst_116 = arith.constant dense<0.000000e+00> : vector<2xf32>
    %301 = vector.multi_reduction <add>, %300, %cst_116 [1] : vector<2x8xf32> to vector<2xf32>
    %302 = vector.shape_cast %301 : vector<2xf32> to vector<2x1xf32>
    %303 = arith.addf %299, %302 : vector<2x1xf32>
    %304 = arith.mulf %296, %296 : vector<2x8xf32>
    %cst_117 = arith.constant dense<0.000000e+00> : vector<2xf32>
    %305 = vector.multi_reduction <add>, %304, %cst_117 [1] : vector<2x8xf32> to vector<2xf32>
    %306 = vector.shape_cast %305 : vector<2xf32> to vector<2x1xf32>
    %307 = arith.addf %303, %306 : vector<2x1xf32>
    %cst_118 = arith.constant 3.125000e-02 : f32
    %308 = vector.broadcast %cst_118 : f32 to vector<2x1xf32>
    %309 = arith.mulf %307, %308 : vector<2x1xf32>
    %cst_119 = arith.constant 9.99999974E-6 : f32
    %310 = vector.broadcast %cst_119 : f32 to vector<2x1xf32>
    %311 = arith.addf %309, %310 : vector<2x1xf32>
    %312 = math.rsqrt %311 : vector<2x1xf32>
    %313 = vector.broadcast %312 : vector<2x1xf32> to vector<2x16xf32>
    %314 = arith.mulf %292, %313 : vector<2x16xf32>
    %315 = vector.broadcast %0 : vector<1x16xf32> to vector<2x16xf32>
    %316 = arith.mulf %314, %315 : vector<2x16xf32>
    %317 = vector.broadcast %1 : vector<1x16xf32> to vector<2x16xf32>
    %318 = arith.addf %316, %317 : vector<2x16xf32>
    %319 = vector.broadcast %312 : vector<2x1xf32> to vector<2x8xf32>
    %320 = arith.mulf %294, %319 : vector<2x8xf32>
    %321 = vector.broadcast %2 : vector<1x8xf32> to vector<2x8xf32>
    %322 = arith.mulf %320, %321 : vector<2x8xf32>
    %323 = vector.broadcast %4 : vector<1x8xf32> to vector<2x8xf32>
    %324 = arith.addf %322, %323 : vector<2x8xf32>
    %325 = vector.broadcast %312 : vector<2x1xf32> to vector<2x8xf32>
    %326 = arith.mulf %296, %325 : vector<2x8xf32>
    %327 = vector.broadcast %3 : vector<1x8xf32> to vector<2x8xf32>
    %328 = arith.mulf %326, %327 : vector<2x8xf32>
    %329 = vector.broadcast %5 : vector<1x8xf32> to vector<2x8xf32>
    %330 = arith.addf %328, %329 : vector<2x8xf32>
    %331 = arith.truncf %318 : vector<2x16xf32> to vector<2x16xbf16>
    %cst_120 = arith.constant dense<0.000000e+00> : vector<2x128xf32>
    %332 = tpu.matmul %331, %17, %cst_120 {dimension_numbers = #tpu.dot_dimension_numbers<[1], [0], [0], [1], [0, 0, 1, 1], [], []>} : vector<2x16xbf16>, vector<16x128xbf16>, vector<2x128xf32> -> vector<2x128xf32>
    %333 = arith.truncf %123 : vector<2x32xf32> to vector<2x32xbf16>
    %cst_121 = arith.constant dense<0.000000e+00> : vector<2x128xf32>
    %334 = tpu.matmul %333, %20, %cst_121 {dimension_numbers = #tpu.dot_dimension_numbers<[1], [0], [0], [1], [0, 0, 1, 1], [], []>} : vector<2x32xbf16>, vector<32x128xbf16>, vector<2x128xf32> -> vector<2x128xf32>
    %335 = arith.addf %332, %334 : vector<2x128xf32>
    %336 = vector.broadcast %14 : vector<1x128xf32> to vector<2x128xf32>
    %337 = arith.addf %335, %336 : vector<2x128xf32>
    %338 = arith.truncf %324 : vector<2x8xf32> to vector<2x8xbf16>
    %cst_122 = arith.constant dense<0.000000e+00> : vector<2x128xf32>
    %339 = tpu.matmul %338, %18, %cst_122 {dimension_numbers = #tpu.dot_dimension_numbers<[1], [0], [0], [1], [0, 0, 1, 1], [], []>} : vector<2x8xbf16>, vector<8x128xbf16>, vector<2x128xf32> -> vector<2x128xf32>
    %340 = arith.addf %337, %339 : vector<2x128xf32>
    %341 = arith.truncf %330 : vector<2x8xf32> to vector<2x8xbf16>
    %cst_123 = arith.constant dense<0.000000e+00> : vector<2x128xf32>
    %342 = tpu.matmul %341, %19, %cst_123 {dimension_numbers = #tpu.dot_dimension_numbers<[1], [0], [0], [1], [0, 0, 1, 1], [], []>} : vector<2x8xbf16>, vector<8x128xbf16>, vector<2x128xf32> -> vector<2x128xf32>
    %343 = arith.addf %340, %342 : vector<2x128xf32>
    %344 = vector.extract_strided_slice %343 {offsets = [0, 0], sizes = [2, 32], strides = [1, 1]} : vector<2x128xf32> to vector<2x32xf32>
    %cst_124 = arith.constant 5.000000e-01 : f32
    %345 = vector.broadcast %cst_124 : f32 to vector<2x32xf32>
    %346 = arith.mulf %345, %344 : vector<2x32xf32>
    %347 = math.tanh %346 : vector<2x32xf32>
    %cst_125 = arith.constant 5.000000e-01 : f32
    %348 = vector.broadcast %cst_125 : f32 to vector<2x32xf32>
    %349 = arith.mulf %348, %347 : vector<2x32xf32>
    %cst_126 = arith.constant 5.000000e-01 : f32
    %350 = vector.broadcast %cst_126 : f32 to vector<2x32xf32>
    %351 = arith.addf %349, %350 : vector<2x32xf32>
    %352 = vector.extract_strided_slice %343 {offsets = [0, 32], sizes = [2, 32], strides = [1, 1]} : vector<2x128xf32> to vector<2x32xf32>
    %cst_127 = arith.constant 5.000000e-01 : f32
    %353 = vector.broadcast %cst_127 : f32 to vector<2x32xf32>
    %354 = arith.mulf %353, %352 : vector<2x32xf32>
    %355 = math.tanh %354 : vector<2x32xf32>
    %cst_128 = arith.constant 5.000000e-01 : f32
    %356 = vector.broadcast %cst_128 : f32 to vector<2x32xf32>
    %357 = arith.mulf %356, %355 : vector<2x32xf32>
    %cst_129 = arith.constant 5.000000e-01 : f32
    %358 = vector.broadcast %cst_129 : f32 to vector<2x32xf32>
    %359 = arith.addf %357, %358 : vector<2x32xf32>
    %360 = vector.extract_strided_slice %343 {offsets = [0, 64], sizes = [2, 32], strides = [1, 1]} : vector<2x128xf32> to vector<2x32xf32>
    %361 = math.tanh %360 : vector<2x32xf32>
    %362 = vector.extract_strided_slice %343 {offsets = [0, 96], sizes = [2, 32], strides = [1, 1]} : vector<2x128xf32> to vector<2x32xf32>
    %cst_130 = arith.constant 5.000000e-01 : f32
    %363 = vector.broadcast %cst_130 : f32 to vector<2x32xf32>
    %364 = arith.mulf %363, %362 : vector<2x32xf32>
    %365 = math.tanh %364 : vector<2x32xf32>
    %cst_131 = arith.constant 5.000000e-01 : f32
    %366 = vector.broadcast %cst_131 : f32 to vector<2x32xf32>
    %367 = arith.mulf %366, %365 : vector<2x32xf32>
    %cst_132 = arith.constant 5.000000e-01 : f32
    %368 = vector.broadcast %cst_132 : f32 to vector<2x32xf32>
    %369 = arith.addf %367, %368 : vector<2x32xf32>
    %370 = arith.mulf %359, %121 : vector<2x32xf32>
    %371 = arith.mulf %351, %361 : vector<2x32xf32>
    %372 = arith.addf %370, %371 : vector<2x32xf32>
    %373 = math.tanh %372 : vector<2x32xf32>
    %374 = arith.mulf %369, %373 : vector<2x32xf32>
    %cst_133 = arith.constant dense<0.000000e+00> : vector<2xf32>
    %375 = vector.multi_reduction <add>, %374, %cst_133 [1] : vector<2x32xf32> to vector<2xf32>
    %376 = vector.shape_cast %375 : vector<2xf32> to vector<2x1xf32>
    %cst_134 = arith.constant 3.200000e+01 : f32
    %377 = vector.broadcast %cst_134 : f32 to vector<2x1xf32>
    %378 = arith.divf %376, %377 : vector<2x1xf32>
    %379 = vector.broadcast %378 : vector<2x1xf32> to vector<2x32xf32>
    %380 = arith.subf %374, %379 : vector<2x32xf32>
    %381 = arith.mulf %380, %380 : vector<2x32xf32>
    %cst_135 = arith.constant dense<0.000000e+00> : vector<2xf32>
    %382 = vector.multi_reduction <add>, %381, %cst_135 [1] : vector<2x32xf32> to vector<2xf32>
    %383 = vector.shape_cast %382 : vector<2xf32> to vector<2x1xf32>
    %cst_136 = arith.constant 3.200000e+01 : f32
    %384 = vector.broadcast %cst_136 : f32 to vector<2x1xf32>
    %385 = arith.divf %383, %384 : vector<2x1xf32>
    %cst_137 = arith.constant 9.99999974E-6 : f32
    %386 = vector.broadcast %cst_137 : f32 to vector<2x1xf32>
    %387 = arith.addf %385, %386 : vector<2x1xf32>
    %388 = math.rsqrt %387 : vector<2x1xf32>
    %389 = vector.broadcast %388 : vector<2x1xf32> to vector<2x32xf32>
    %390 = arith.mulf %380, %389 : vector<2x32xf32>
    %391 = vector.broadcast %6 : vector<1x32xf32> to vector<2x32xf32>
    %392 = arith.mulf %390, %391 : vector<2x32xf32>
    %393 = vector.broadcast %7 : vector<1x32xf32> to vector<2x32xf32>
    %394 = arith.addf %392, %393 : vector<2x32xf32>
    %395 = arith.truncf %394 : vector<2x32xf32> to vector<2x32xbf16>
    %cst_138 = arith.constant dense<0.000000e+00> : vector<2x40xf32>
    %396 = tpu.matmul %395, %21, %cst_138 {dimension_numbers = #tpu.dot_dimension_numbers<[1], [0], [0], [1], [0, 0, 1, 1], [], []>} : vector<2x32xbf16>, vector<32x40xbf16>, vector<2x40xf32> -> vector<2x40xf32>
    %397 = vector.broadcast %15 : vector<1x40xf32> to vector<2x40xf32>
    %398 = arith.addf %396, %397 : vector<2x40xf32>
    %399 = vector.extract_strided_slice %398 {offsets = [0, 16], sizes = [2, 8], strides = [1, 1]} : vector<2x40xf32> to vector<2x8xf32>
    %cst_139 = arith.constant 5.000000e-01 : f32
    %400 = vector.broadcast %cst_139 : f32 to vector<2x8xf32>
    %401 = arith.mulf %400, %399 : vector<2x8xf32>
    %402 = math.tanh %401 : vector<2x8xf32>
    %cst_140 = arith.constant 5.000000e-01 : f32
    %403 = vector.broadcast %cst_140 : f32 to vector<2x8xf32>
    %404 = arith.mulf %403, %402 : vector<2x8xf32>
    %cst_141 = arith.constant 5.000000e-01 : f32
    %405 = vector.broadcast %cst_141 : f32 to vector<2x8xf32>
    %406 = arith.addf %404, %405 : vector<2x8xf32>
    %407 = vector.extract_strided_slice %398 {offsets = [0, 24], sizes = [2, 8], strides = [1, 1]} : vector<2x40xf32> to vector<2x8xf32>
    %408 = math.tanh %407 : vector<2x8xf32>
    %409 = vector.extract_strided_slice %398 {offsets = [0, 32], sizes = [2, 1], strides = [1, 1]} : vector<2x40xf32> to vector<2x1xf32>
    %cst_142 = arith.constant 5.000000e-01 : f32
    %410 = vector.broadcast %cst_142 : f32 to vector<2x1xf32>
    %411 = arith.mulf %410, %409 : vector<2x1xf32>
    %412 = math.tanh %411 : vector<2x1xf32>
    %cst_143 = arith.constant 5.000000e-01 : f32
    %413 = vector.broadcast %cst_143 : f32 to vector<2x1xf32>
    %414 = arith.mulf %413, %412 : vector<2x1xf32>
    %cst_144 = arith.constant 5.000000e-01 : f32
    %415 = vector.broadcast %cst_144 : f32 to vector<2x1xf32>
    %416 = arith.addf %414, %415 : vector<2x1xf32>
    %417 = vector.broadcast %416 : vector<2x1xf32> to vector<2x8xf32>
    %418 = arith.mulf %417, %406 : vector<2x8xf32>
    %419 = vector.shape_cast %418 : vector<2x8xf32> to vector<2x1x8xf32>
    %cst_145 = arith.constant 1.000000e+00 : f32
    %420 = vector.broadcast %cst_145 : f32 to vector<2x1x8xf32>
    %421 = arith.subf %420, %419 : vector<2x1x8xf32>
    %422 = vector.broadcast %421 : vector<2x1x8xf32> to vector<2x16x8xf32>
    %423 = arith.mulf %177, %422 : vector<2x16x8xf32>
    %424 = vector.broadcast %416 : vector<2x1xf32> to vector<2x8xf32>
    %425 = arith.mulf %424, %408 : vector<2x8xf32>
    %426 = vector.shape_cast %425 : vector<2x8xf32> to vector<2x1x8xf32>
    %427 = vector.broadcast %426 : vector<2x1x8xf32> to vector<2x16x8xf32>
    %428 = arith.addf %423, %427 : vector<2x16x8xf32>
    %cst_146 = arith.constant dense<0.000000e+00> : vector<2x16xf32>
    %429 = vector.multi_reduction <add>, %428, %cst_146 [2] : vector<2x16x8xf32> to vector<2x16xf32>
    %430 = vector.shape_cast %429 : vector<2x16xf32> to vector<2x16x1xf32>
    %cst_147 = arith.constant 8.000000e+00 : f32
    %431 = vector.broadcast %cst_147 : f32 to vector<2x16x1xf32>
    %432 = arith.divf %430, %431 : vector<2x16x1xf32>
    %433 = vector.broadcast %432 : vector<2x16x1xf32> to vector<2x16x8xf32>
    %434 = arith.subf %428, %433 : vector<2x16x8xf32>
    %435 = arith.mulf %434, %434 : vector<2x16x8xf32>
    %cst_148 = arith.constant dense<0.000000e+00> : vector<2x16xf32>
    %436 = vector.multi_reduction <add>, %435, %cst_148 [2] : vector<2x16x8xf32> to vector<2x16xf32>
    %437 = vector.shape_cast %436 : vector<2x16xf32> to vector<2x16x1xf32>
    %cst_149 = arith.constant 8.000000e+00 : f32
    %438 = vector.broadcast %cst_149 : f32 to vector<2x16x1xf32>
    %439 = arith.divf %437, %438 : vector<2x16x1xf32>
    %cst_150 = arith.constant 9.99999974E-6 : f32
    %440 = vector.broadcast %cst_150 : f32 to vector<2x16x1xf32>
    %441 = arith.addf %439, %440 : vector<2x16x1xf32>
    %442 = math.rsqrt %441 : vector<2x16x1xf32>
    %443 = vector.broadcast %442 : vector<2x16x1xf32> to vector<2x16x8xf32>
    %444 = arith.mulf %434, %443 : vector<2x16x8xf32>
    %445 = vector.shape_cast %10 : vector<1x8xf32> to vector<1x1x8xf32>
    %446 = vector.broadcast %445 : vector<1x1x8xf32> to vector<2x16x8xf32>
    %447 = arith.mulf %444, %446 : vector<2x16x8xf32>
    %448 = vector.shape_cast %11 : vector<1x8xf32> to vector<1x1x8xf32>
    %449 = vector.broadcast %448 : vector<1x1x8xf32> to vector<2x16x8xf32>
    %450 = arith.addf %447, %449 : vector<2x16x8xf32>
    %451 = arith.truncf %450 : vector<2x16x8xf32> to vector<2x16x8xbf16>
    %452 = arith.truncf %428 : vector<2x16x8xf32> to vector<2x16x8xbf16>
    %c2 = arith.constant 2 : index
    %c0_151 = arith.constant 0 : index
    %453 = vector.load %arg11[%c2, %c0_151] : memref<16x48xf32, #tpu.memory_space<vmem>>, vector<2x32xf32>
    tpu.vector_store %arg11[%c2, %c0_151], %394 {strides = array<i32>} : memref<16x48xf32, #tpu.memory_space<vmem>>, vector<2x32xf32>,
    %454 = vector.extract_strided_slice %398 {offsets = [0, 0], sizes = [2, 8], strides = [1, 1]} : vector<2x40xf32> to vector<2x8xf32>
    %cst_152 = arith.constant dense<0.000000e+00> : vector<2xf32>
    %455 = vector.multi_reduction <add>, %454, %cst_152 [1] : vector<2x8xf32> to vector<2xf32>
    %456 = vector.shape_cast %455 : vector<2xf32> to vector<2x1xf32>
    %cst_153 = arith.constant 8.000000e+00 : f32
    %457 = vector.broadcast %cst_153 : f32 to vector<2x1xf32>
    %458 = arith.divf %456, %457 : vector<2x1xf32>
    %459 = vector.broadcast %458 : vector<2x1xf32> to vector<2x8xf32>
    %460 = arith.subf %454, %459 : vector<2x8xf32>
    %461 = arith.mulf %460, %460 : vector<2x8xf32>
    %cst_154 = arith.constant dense<0.000000e+00> : vector<2xf32>
    %462 = vector.multi_reduction <add>, %461, %cst_154 [1] : vector<2x8xf32> to vector<2xf32>
    %463 = vector.shape_cast %462 : vector<2xf32> to vector<2x1xf32>
    %cst_155 = arith.constant 8.000000e+00 : f32
    %464 = vector.broadcast %cst_155 : f32 to vector<2x1xf32>
    %465 = arith.divf %463, %464 : vector<2x1xf32>
    %cst_156 = arith.constant 9.99999974E-6 : f32
    %466 = vector.broadcast %cst_156 : f32 to vector<2x1xf32>
    %467 = arith.addf %465, %466 : vector<2x1xf32>
    %468 = math.rsqrt %467 : vector<2x1xf32>
    %469 = vector.broadcast %468 : vector<2x1xf32> to vector<2x8xf32>
    %470 = arith.mulf %460, %469 : vector<2x8xf32>
    %471 = vector.broadcast %8 : vector<1x8xf32> to vector<2x8xf32>
    %472 = arith.mulf %470, %471 : vector<2x8xf32>
    %473 = vector.broadcast %9 : vector<1x8xf32> to vector<2x8xf32>
    %474 = arith.addf %472, %473 : vector<2x8xf32>
    %475 = vector.shape_cast %474 : vector<2x8xf32> to vector<2x1x8xf32>
    %476 = arith.truncf %475 : vector<2x1x8xf32> to vector<2x1x8xbf16>
    "tpu.trace_start"() <{level = 10 : i32, message = "bqd,bmd->bqm"}> : () -> ()
    %cst_157 = arith.constant dense<0.000000e+00> : vector<2x1x16xf32>
    %477 = tpu.matmul %476, %451, %cst_157 {dimension_numbers = #tpu.dot_dimension_numbers<[2], [2], [1], [1], [0, 0, 0, 1, 1, 1], [0], [0]>} : vector<2x1x8xbf16>, vector<2x16x8xbf16>, vector<2x1x16xf32> -> vector<2x1x16xf32>
    "tpu.trace_stop"() : () -> ()
    %cst_158 = arith.constant dense<0xFF800000> : vector<2x1xf32>
    %478 = vector.multi_reduction <maximumf>, %477, %cst_158 [2] : vector<2x1x16xf32> to vector<2x1xf32>
    %479 = vector.shape_cast %478 : vector<2x1xf32> to vector<2x1x1xf32>
    %480 = vector.broadcast %479 : vector<2x1x1xf32> to vector<2x1x16xf32>
    %481 = arith.subf %477, %480 : vector<2x1x16xf32>
    %482 = math.exp %481 : vector<2x1x16xf32>
    %cst_159 = arith.constant dense<0.000000e+00> : vector<2x1xf32>
    %483 = vector.multi_reduction <add>, %482, %cst_159 [2] : vector<2x1x16xf32> to vector<2x1xf32>
    %484 = vector.shape_cast %483 : vector<2x1xf32> to vector<2x1x1xf32>
    %485 = tpu.reciprocal %484 {approx = true} : vector<2x1x1xf32> -> vector<2x1x1xf32>
    %486 = vector.broadcast %485 : vector<2x1x1xf32> to vector<2x1x16xf32>
    %487 = arith.mulf %482, %486 : vector<2x1x16xf32>
    %488 = arith.truncf %487 : vector<2x1x16xf32> to vector<2x1x16xbf16>
    "tpu.trace_start"() <{level = 10 : i32, message = "bqm,bmd->bqd"}> : () -> ()
    %cst_160 = arith.constant dense<0.000000e+00> : vector<2x1x8xf32>
    %489 = tpu.matmul %488, %452, %cst_160 {dimension_numbers = #tpu.dot_dimension_numbers<[2], [1], [1], [2], [0, 0, 0, 1, 1, 2], [0], [0]>} : vector<2x1x16xbf16>, vector<2x16x8xbf16>, vector<2x1x8xf32> -> vector<2x1x8xf32>
    "tpu.trace_stop"() : () -> ()
    %cst_161 = arith.constant dense<0.000000e+00> : vector<2x8xf32>
    %490 = vector.multi_reduction <add>, %489, %cst_161 [1] : vector<2x1x8xf32> to vector<2x8xf32>
    %c2_162 = arith.constant 2 : index
    %c32_163 = arith.constant 32 : index
    %491 = vector.load %arg11[%c2_162, %c32_163] : memref<16x48xf32, #tpu.memory_space<vmem>>, vector<2x8xf32>
    tpu.vector_store %arg11[%c2_162, %c32_163], %490 {strides = array<i32>} : memref<16x48xf32, #tpu.memory_space<vmem>>, vector<2x8xf32>,
    %492 = vector.extract_strided_slice %398 {offsets = [0, 8], sizes = [2, 8], strides = [1, 1]} : vector<2x40xf32> to vector<2x8xf32>
    %cst_164 = arith.constant dense<0.000000e+00> : vector<2xf32>
    %493 = vector.multi_reduction <add>, %492, %cst_164 [1] : vector<2x8xf32> to vector<2xf32>
    %494 = vector.shape_cast %493 : vector<2xf32> to vector<2x1xf32>
    %cst_165 = arith.constant 8.000000e+00 : f32
    %495 = vector.broadcast %cst_165 : f32 to vector<2x1xf32>
    %496 = arith.divf %494, %495 : vector<2x1xf32>
    %497 = vector.broadcast %496 : vector<2x1xf32> to vector<2x8xf32>
    %498 = arith.subf %492, %497 : vector<2x8xf32>
    %499 = arith.mulf %498, %498 : vector<2x8xf32>
    %cst_166 = arith.constant dense<0.000000e+00> : vector<2xf32>
    %500 = vector.multi_reduction <add>, %499, %cst_166 [1] : vector<2x8xf32> to vector<2xf32>
    %501 = vector.shape_cast %500 : vector<2xf32> to vector<2x1xf32>
    %cst_167 = arith.constant 8.000000e+00 : f32
    %502 = vector.broadcast %cst_167 : f32 to vector<2x1xf32>
    %503 = arith.divf %501, %502 : vector<2x1xf32>
    %cst_168 = arith.constant 9.99999974E-6 : f32
    %504 = vector.broadcast %cst_168 : f32 to vector<2x1xf32>
    %505 = arith.addf %503, %504 : vector<2x1xf32>
    %506 = math.rsqrt %505 : vector<2x1xf32>
    %507 = vector.broadcast %506 : vector<2x1xf32> to vector<2x8xf32>
    %508 = arith.mulf %498, %507 : vector<2x8xf32>
    %509 = vector.broadcast %8 : vector<1x8xf32> to vector<2x8xf32>
    %510 = arith.mulf %508, %509 : vector<2x8xf32>
    %511 = vector.broadcast %9 : vector<1x8xf32> to vector<2x8xf32>
    %512 = arith.addf %510, %511 : vector<2x8xf32>
    %513 = vector.shape_cast %512 : vector<2x8xf32> to vector<2x1x8xf32>
    %514 = arith.truncf %513 : vector<2x1x8xf32> to vector<2x1x8xbf16>
    "tpu.trace_start"() <{level = 10 : i32, message = "bqd,bmd->bqm"}> : () -> ()
    %cst_169 = arith.constant dense<0.000000e+00> : vector<2x1x16xf32>
    %515 = tpu.matmul %514, %451, %cst_169 {dimension_numbers = #tpu.dot_dimension_numbers<[2], [2], [1], [1], [0, 0, 0, 1, 1, 1], [0], [0]>} : vector<2x1x8xbf16>, vector<2x16x8xbf16>, vector<2x1x16xf32> -> vector<2x1x16xf32>
    "tpu.trace_stop"() : () -> ()
    %cst_170 = arith.constant dense<0xFF800000> : vector<2x1xf32>
    %516 = vector.multi_reduction <maximumf>, %515, %cst_170 [2] : vector<2x1x16xf32> to vector<2x1xf32>
    %517 = vector.shape_cast %516 : vector<2x1xf32> to vector<2x1x1xf32>
    %518 = vector.broadcast %517 : vector<2x1x1xf32> to vector<2x1x16xf32>
    %519 = arith.subf %515, %518 : vector<2x1x16xf32>
    %520 = math.exp %519 : vector<2x1x16xf32>
    %cst_171 = arith.constant dense<0.000000e+00> : vector<2x1xf32>
    %521 = vector.multi_reduction <add>, %520, %cst_171 [2] : vector<2x1x16xf32> to vector<2x1xf32>
    %522 = vector.shape_cast %521 : vector<2x1xf32> to vector<2x1x1xf32>
    %523 = tpu.reciprocal %522 {approx = true} : vector<2x1x1xf32> -> vector<2x1x1xf32>
    %524 = vector.broadcast %523 : vector<2x1x1xf32> to vector<2x1x16xf32>
    %525 = arith.mulf %520, %524 : vector<2x1x16xf32>
    %526 = arith.truncf %525 : vector<2x1x16xf32> to vector<2x1x16xbf16>
    "tpu.trace_start"() <{level = 10 : i32, message = "bqm,bmd->bqd"}> : () -> ()
    %cst_172 = arith.constant dense<0.000000e+00> : vector<2x1x8xf32>
    %527 = tpu.matmul %526, %452, %cst_172 {dimension_numbers = #tpu.dot_dimension_numbers<[2], [1], [1], [2], [0, 0, 0, 1, 1, 2], [0], [0]>} : vector<2x1x16xbf16>, vector<2x16x8xbf16>, vector<2x1x8xf32> -> vector<2x1x8xf32>
    "tpu.trace_stop"() : () -> ()
    %cst_173 = arith.constant dense<0.000000e+00> : vector<2x8xf32>
    %528 = vector.multi_reduction <add>, %527, %cst_173 [1] : vector<2x1x8xf32> to vector<2x8xf32>
    %c2_174 = arith.constant 2 : index
    %c40_175 = arith.constant 40 : index
    %529 = vector.load %arg11[%c2_174, %c40_175] : memref<16x48xf32, #tpu.memory_space<vmem>>, vector<2x8xf32>
    tpu.vector_store %arg11[%c2_174, %c40_175], %528 {strides = array<i32>} : memref<16x48xf32, #tpu.memory_space<vmem>>, vector<2x8xf32>,
    %c2_176 = arith.constant 2 : index
    %c0_177 = arith.constant 0 : index
    %c0_178 = arith.constant 0 : index
    %530 = vector.load %arg1[%c2_176, %c0_177, %c0_178] : memref<8x2x16xf32, #tpu.memory_space<vmem>>, vector<1x2x16xf32>
    %531 = vector.shape_cast %530 : vector<1x2x16xf32> to vector<2x16xf32>
    %cst_179 = arith.constant dense<0.000000e+00> : vector<2xf32>
    %532 = vector.multi_reduction <add>, %531, %cst_179 [1] : vector<2x16xf32> to vector<2xf32>
    %533 = vector.shape_cast %532 : vector<2xf32> to vector<2x1xf32>
    %cst_180 = arith.constant dense<0.000000e+00> : vector<2xf32>
    %534 = vector.multi_reduction <add>, %490, %cst_180 [1] : vector<2x8xf32> to vector<2xf32>
    %535 = vector.shape_cast %534 : vector<2xf32> to vector<2x1xf32>
    %536 = arith.addf %533, %535 : vector<2x1xf32>
    %cst_181 = arith.constant dense<0.000000e+00> : vector<2xf32>
    %537 = vector.multi_reduction <add>, %528, %cst_181 [1] : vector<2x8xf32> to vector<2xf32>
    %538 = vector.shape_cast %537 : vector<2xf32> to vector<2x1xf32>
    %539 = arith.addf %536, %538 : vector<2x1xf32>
    %cst_182 = arith.constant 3.125000e-02 : f32
    %540 = vector.broadcast %cst_182 : f32 to vector<2x1xf32>
    %541 = arith.mulf %539, %540 : vector<2x1xf32>
    %542 = vector.broadcast %541 : vector<2x1xf32> to vector<2x16xf32>
    %543 = arith.subf %531, %542 : vector<2x16xf32>
    %544 = vector.broadcast %541 : vector<2x1xf32> to vector<2x8xf32>
    %545 = arith.subf %490, %544 : vector<2x8xf32>
    %546 = vector.broadcast %541 : vector<2x1xf32> to vector<2x8xf32>
    %547 = arith.subf %528, %546 : vector<2x8xf32>
    %548 = arith.mulf %543, %543 : vector<2x16xf32>
    %cst_183 = arith.constant dense<0.000000e+00> : vector<2xf32>
    %549 = vector.multi_reduction <add>, %548, %cst_183 [1] : vector<2x16xf32> to vector<2xf32>
    %550 = vector.shape_cast %549 : vector<2xf32> to vector<2x1xf32>
    %551 = arith.mulf %545, %545 : vector<2x8xf32>
    %cst_184 = arith.constant dense<0.000000e+00> : vector<2xf32>
    %552 = vector.multi_reduction <add>, %551, %cst_184 [1] : vector<2x8xf32> to vector<2xf32>
    %553 = vector.shape_cast %552 : vector<2xf32> to vector<2x1xf32>
    %554 = arith.addf %550, %553 : vector<2x1xf32>
    %555 = arith.mulf %547, %547 : vector<2x8xf32>
    %cst_185 = arith.constant dense<0.000000e+00> : vector<2xf32>
    %556 = vector.multi_reduction <add>, %555, %cst_185 [1] : vector<2x8xf32> to vector<2xf32>
    %557 = vector.shape_cast %556 : vector<2xf32> to vector<2x1xf32>
    %558 = arith.addf %554, %557 : vector<2x1xf32>
    %cst_186 = arith.constant 3.125000e-02 : f32
    %559 = vector.broadcast %cst_186 : f32 to vector<2x1xf32>
    %560 = arith.mulf %558, %559 : vector<2x1xf32>
    %cst_187 = arith.constant 9.99999974E-6 : f32
    %561 = vector.broadcast %cst_187 : f32 to vector<2x1xf32>
    %562 = arith.addf %560, %561 : vector<2x1xf32>
    %563 = math.rsqrt %562 : vector<2x1xf32>
    %564 = vector.broadcast %563 : vector<2x1xf32> to vector<2x16xf32>
    %565 = arith.mulf %543, %564 : vector<2x16xf32>
    %566 = vector.broadcast %0 : vector<1x16xf32> to vector<2x16xf32>
    %567 = arith.mulf %565, %566 : vector<2x16xf32>
    %568 = vector.broadcast %1 : vector<1x16xf32> to vector<2x16xf32>
    %569 = arith.addf %567, %568 : vector<2x16xf32>
    %570 = vector.broadcast %563 : vector<2x1xf32> to vector<2x8xf32>
    %571 = arith.mulf %545, %570 : vector<2x8xf32>
    %572 = vector.broadcast %2 : vector<1x8xf32> to vector<2x8xf32>
    %573 = arith.mulf %571, %572 : vector<2x8xf32>
    %574 = vector.broadcast %4 : vector<1x8xf32> to vector<2x8xf32>
    %575 = arith.addf %573, %574 : vector<2x8xf32>
    %576 = vector.broadcast %563 : vector<2x1xf32> to vector<2x8xf32>
    %577 = arith.mulf %547, %576 : vector<2x8xf32>
    %578 = vector.broadcast %3 : vector<1x8xf32> to vector<2x8xf32>
    %579 = arith.mulf %577, %578 : vector<2x8xf32>
    %580 = vector.broadcast %5 : vector<1x8xf32> to vector<2x8xf32>
    %581 = arith.addf %579, %580 : vector<2x8xf32>
    %582 = arith.truncf %569 : vector<2x16xf32> to vector<2x16xbf16>
    %cst_188 = arith.constant dense<0.000000e+00> : vector<2x128xf32>
    %583 = tpu.matmul %582, %17, %cst_188 {dimension_numbers = #tpu.dot_dimension_numbers<[1], [0], [0], [1], [0, 0, 1, 1], [], []>} : vector<2x16xbf16>, vector<16x128xbf16>, vector<2x128xf32> -> vector<2x128xf32>
    %584 = arith.truncf %374 : vector<2x32xf32> to vector<2x32xbf16>
    %cst_189 = arith.constant dense<0.000000e+00> : vector<2x128xf32>
    %585 = tpu.matmul %584, %20, %cst_189 {dimension_numbers = #tpu.dot_dimension_numbers<[1], [0], [0], [1], [0, 0, 1, 1], [], []>} : vector<2x32xbf16>, vector<32x128xbf16>, vector<2x128xf32> -> vector<2x128xf32>
    %586 = arith.addf %583, %585 : vector<2x128xf32>
    %587 = vector.broadcast %14 : vector<1x128xf32> to vector<2x128xf32>
    %588 = arith.addf %586, %587 : vector<2x128xf32>
    %589 = arith.truncf %575 : vector<2x8xf32> to vector<2x8xbf16>
    %cst_190 = arith.constant dense<0.000000e+00> : vector<2x128xf32>
    %590 = tpu.matmul %589, %18, %cst_190 {dimension_numbers = #tpu.dot_dimension_numbers<[1], [0], [0], [1], [0, 0, 1, 1], [], []>} : vector<2x8xbf16>, vector<8x128xbf16>, vector<2x128xf32> -> vector<2x128xf32>
    %591 = arith.addf %588, %590 : vector<2x128xf32>
    %592 = arith.truncf %581 : vector<2x8xf32> to vector<2x8xbf16>
    %cst_191 = arith.constant dense<0.000000e+00> : vector<2x128xf32>
    %593 = tpu.matmul %592, %19, %cst_191 {dimension_numbers = #tpu.dot_dimension_numbers<[1], [0], [0], [1], [0, 0, 1, 1], [], []>} : vector<2x8xbf16>, vector<8x128xbf16>, vector<2x128xf32> -> vector<2x128xf32>
    %594 = arith.addf %591, %593 : vector<2x128xf32>
    %595 = vector.extract_strided_slice %594 {offsets = [0, 0], sizes = [2, 32], strides = [1, 1]} : vector<2x128xf32> to vector<2x32xf32>
    %cst_192 = arith.constant 5.000000e-01 : f32
    %596 = vector.broadcast %cst_192 : f32 to vector<2x32xf32>
    %597 = arith.mulf %596, %595 : vector<2x32xf32>
    %598 = math.tanh %597 : vector<2x32xf32>
    %cst_193 = arith.constant 5.000000e-01 : f32
    %599 = vector.broadcast %cst_193 : f32 to vector<2x32xf32>
    %600 = arith.mulf %599, %598 : vector<2x32xf32>
    %cst_194 = arith.constant 5.000000e-01 : f32
    %601 = vector.broadcast %cst_194 : f32 to vector<2x32xf32>
    %602 = arith.addf %600, %601 : vector<2x32xf32>
    %603 = vector.extract_strided_slice %594 {offsets = [0, 32], sizes = [2, 32], strides = [1, 1]} : vector<2x128xf32> to vector<2x32xf32>
    %cst_195 = arith.constant 5.000000e-01 : f32
    %604 = vector.broadcast %cst_195 : f32 to vector<2x32xf32>
    %605 = arith.mulf %604, %603 : vector<2x32xf32>
    %606 = math.tanh %605 : vector<2x32xf32>
    %cst_196 = arith.constant 5.000000e-01 : f32
    %607 = vector.broadcast %cst_196 : f32 to vector<2x32xf32>
    %608 = arith.mulf %607, %606 : vector<2x32xf32>
    %cst_197 = arith.constant 5.000000e-01 : f32
    %609 = vector.broadcast %cst_197 : f32 to vector<2x32xf32>
    %610 = arith.addf %608, %609 : vector<2x32xf32>
    %611 = vector.extract_strided_slice %594 {offsets = [0, 64], sizes = [2, 32], strides = [1, 1]} : vector<2x128xf32> to vector<2x32xf32>
    %612 = math.tanh %611 : vector<2x32xf32>
    %613 = vector.extract_strided_slice %594 {offsets = [0, 96], sizes = [2, 32], strides = [1, 1]} : vector<2x128xf32> to vector<2x32xf32>
    %cst_198 = arith.constant 5.000000e-01 : f32
    %614 = vector.broadcast %cst_198 : f32 to vector<2x32xf32>
    %615 = arith.mulf %614, %613 : vector<2x32xf32>
    %616 = math.tanh %615 : vector<2x32xf32>
    %cst_199 = arith.constant 5.000000e-01 : f32
    %617 = vector.broadcast %cst_199 : f32 to vector<2x32xf32>
    %618 = arith.mulf %617, %616 : vector<2x32xf32>
    %cst_200 = arith.constant 5.000000e-01 : f32
    %619 = vector.broadcast %cst_200 : f32 to vector<2x32xf32>
    %620 = arith.addf %618, %619 : vector<2x32xf32>
    %621 = arith.mulf %610, %372 : vector<2x32xf32>
    %622 = arith.mulf %602, %612 : vector<2x32xf32>
    %623 = arith.addf %621, %622 : vector<2x32xf32>
    %624 = math.tanh %623 : vector<2x32xf32>
    %625 = arith.mulf %620, %624 : vector<2x32xf32>
    %cst_201 = arith.constant dense<0.000000e+00> : vector<2xf32>
    %626 = vector.multi_reduction <add>, %625, %cst_201 [1] : vector<2x32xf32> to vector<2xf32>
    %627 = vector.shape_cast %626 : vector<2xf32> to vector<2x1xf32>
    %cst_202 = arith.constant 3.200000e+01 : f32
    %628 = vector.broadcast %cst_202 : f32 to vector<2x1xf32>
    %629 = arith.divf %627, %628 : vector<2x1xf32>
    %630 = vector.broadcast %629 : vector<2x1xf32> to vector<2x32xf32>
    %631 = arith.subf %625, %630 : vector<2x32xf32>
    %632 = arith.mulf %631, %631 : vector<2x32xf32>
    %cst_203 = arith.constant dense<0.000000e+00> : vector<2xf32>
    %633 = vector.multi_reduction <add>, %632, %cst_203 [1] : vector<2x32xf32> to vector<2xf32>
    %634 = vector.shape_cast %633 : vector<2xf32> to vector<2x1xf32>
    %cst_204 = arith.constant 3.200000e+01 : f32
    %635 = vector.broadcast %cst_204 : f32 to vector<2x1xf32>
    %636 = arith.divf %634, %635 : vector<2x1xf32>
    %cst_205 = arith.constant 9.99999974E-6 : f32
    %637 = vector.broadcast %cst_205 : f32 to vector<2x1xf32>
    %638 = arith.addf %636, %637 : vector<2x1xf32>
    %639 = math.rsqrt %638 : vector<2x1xf32>
    %640 = vector.broadcast %639 : vector<2x1xf32> to vector<2x32xf32>
    %641 = arith.mulf %631, %640 : vector<2x32xf32>
    %642 = vector.broadcast %6 : vector<1x32xf32> to vector<2x32xf32>
    %643 = arith.mulf %641, %642 : vector<2x32xf32>
    %644 = vector.broadcast %7 : vector<1x32xf32> to vector<2x32xf32>
    %645 = arith.addf %643, %644 : vector<2x32xf32>
    %646 = arith.truncf %645 : vector<2x32xf32> to vector<2x32xbf16>
    %cst_206 = arith.constant dense<0.000000e+00> : vector<2x40xf32>
    %647 = tpu.matmul %646, %21, %cst_206 {dimension_numbers = #tpu.dot_dimension_numbers<[1], [0], [0], [1], [0, 0, 1, 1], [], []>} : vector<2x32xbf16>, vector<32x40xbf16>, vector<2x40xf32> -> vector<2x40xf32>
    %648 = vector.broadcast %15 : vector<1x40xf32> to vector<2x40xf32>
    %649 = arith.addf %647, %648 : vector<2x40xf32>
    %650 = vector.extract_strided_slice %649 {offsets = [0, 16], sizes = [2, 8], strides = [1, 1]} : vector<2x40xf32> to vector<2x8xf32>
    %cst_207 = arith.constant 5.000000e-01 : f32
    %651 = vector.broadcast %cst_207 : f32 to vector<2x8xf32>
    %652 = arith.mulf %651, %650 : vector<2x8xf32>
    %653 = math.tanh %652 : vector<2x8xf32>
    %cst_208 = arith.constant 5.000000e-01 : f32
    %654 = vector.broadcast %cst_208 : f32 to vector<2x8xf32>
    %655 = arith.mulf %654, %653 : vector<2x8xf32>
    %cst_209 = arith.constant 5.000000e-01 : f32
    %656 = vector.broadcast %cst_209 : f32 to vector<2x8xf32>
    %657 = arith.addf %655, %656 : vector<2x8xf32>
    %658 = vector.extract_strided_slice %649 {offsets = [0, 24], sizes = [2, 8], strides = [1, 1]} : vector<2x40xf32> to vector<2x8xf32>
    %659 = math.tanh %658 : vector<2x8xf32>
    %660 = vector.extract_strided_slice %649 {offsets = [0, 32], sizes = [2, 1], strides = [1, 1]} : vector<2x40xf32> to vector<2x1xf32>
    %cst_210 = arith.constant 5.000000e-01 : f32
    %661 = vector.broadcast %cst_210 : f32 to vector<2x1xf32>
    %662 = arith.mulf %661, %660 : vector<2x1xf32>
    %663 = math.tanh %662 : vector<2x1xf32>
    %cst_211 = arith.constant 5.000000e-01 : f32
    %664 = vector.broadcast %cst_211 : f32 to vector<2x1xf32>
    %665 = arith.mulf %664, %663 : vector<2x1xf32>
    %cst_212 = arith.constant 5.000000e-01 : f32
    %666 = vector.broadcast %cst_212 : f32 to vector<2x1xf32>
    %667 = arith.addf %665, %666 : vector<2x1xf32>
    %668 = vector.broadcast %667 : vector<2x1xf32> to vector<2x8xf32>
    %669 = arith.mulf %668, %657 : vector<2x8xf32>
    %670 = vector.shape_cast %669 : vector<2x8xf32> to vector<2x1x8xf32>
    %cst_213 = arith.constant 1.000000e+00 : f32
    %671 = vector.broadcast %cst_213 : f32 to vector<2x1x8xf32>
    %672 = arith.subf %671, %670 : vector<2x1x8xf32>
    %673 = vector.broadcast %672 : vector<2x1x8xf32> to vector<2x16x8xf32>
    %674 = arith.mulf %428, %673 : vector<2x16x8xf32>
    %675 = vector.broadcast %667 : vector<2x1xf32> to vector<2x8xf32>
    %676 = arith.mulf %675, %659 : vector<2x8xf32>
    %677 = vector.shape_cast %676 : vector<2x8xf32> to vector<2x1x8xf32>
    %678 = vector.broadcast %677 : vector<2x1x8xf32> to vector<2x16x8xf32>
    %679 = arith.addf %674, %678 : vector<2x16x8xf32>
    %cst_214 = arith.constant dense<0.000000e+00> : vector<2x16xf32>
    %680 = vector.multi_reduction <add>, %679, %cst_214 [2] : vector<2x16x8xf32> to vector<2x16xf32>
    %681 = vector.shape_cast %680 : vector<2x16xf32> to vector<2x16x1xf32>
    %cst_215 = arith.constant 8.000000e+00 : f32
    %682 = vector.broadcast %cst_215 : f32 to vector<2x16x1xf32>
    %683 = arith.divf %681, %682 : vector<2x16x1xf32>
    %684 = vector.broadcast %683 : vector<2x16x1xf32> to vector<2x16x8xf32>
    %685 = arith.subf %679, %684 : vector<2x16x8xf32>
    %686 = arith.mulf %685, %685 : vector<2x16x8xf32>
    %cst_216 = arith.constant dense<0.000000e+00> : vector<2x16xf32>
    %687 = vector.multi_reduction <add>, %686, %cst_216 [2] : vector<2x16x8xf32> to vector<2x16xf32>
    %688 = vector.shape_cast %687 : vector<2x16xf32> to vector<2x16x1xf32>
    %cst_217 = arith.constant 8.000000e+00 : f32
    %689 = vector.broadcast %cst_217 : f32 to vector<2x16x1xf32>
    %690 = arith.divf %688, %689 : vector<2x16x1xf32>
    %cst_218 = arith.constant 9.99999974E-6 : f32
    %691 = vector.broadcast %cst_218 : f32 to vector<2x16x1xf32>
    %692 = arith.addf %690, %691 : vector<2x16x1xf32>
    %693 = math.rsqrt %692 : vector<2x16x1xf32>
    %694 = vector.broadcast %693 : vector<2x16x1xf32> to vector<2x16x8xf32>
    %695 = arith.mulf %685, %694 : vector<2x16x8xf32>
    %696 = vector.shape_cast %10 : vector<1x8xf32> to vector<1x1x8xf32>
    %697 = vector.broadcast %696 : vector<1x1x8xf32> to vector<2x16x8xf32>
    %698 = arith.mulf %695, %697 : vector<2x16x8xf32>
    %699 = vector.shape_cast %11 : vector<1x8xf32> to vector<1x1x8xf32>
    %700 = vector.broadcast %699 : vector<1x1x8xf32> to vector<2x16x8xf32>
    %701 = arith.addf %698, %700 : vector<2x16x8xf32>
    %702 = arith.truncf %701 : vector<2x16x8xf32> to vector<2x16x8xbf16>
    %703 = arith.truncf %679 : vector<2x16x8xf32> to vector<2x16x8xbf16>
    %c4 = arith.constant 4 : index
    %c0_219 = arith.constant 0 : index
    %704 = vector.load %arg11[%c4, %c0_219] : memref<16x48xf32, #tpu.memory_space<vmem>>, vector<2x32xf32>
    tpu.vector_store %arg11[%c4, %c0_219], %645 {strides = array<i32>} : memref<16x48xf32, #tpu.memory_space<vmem>>, vector<2x32xf32>,
    %705 = vector.extract_strided_slice %649 {offsets = [0, 0], sizes = [2, 8], strides = [1, 1]} : vector<2x40xf32> to vector<2x8xf32>
    %cst_220 = arith.constant dense<0.000000e+00> : vector<2xf32>
    %706 = vector.multi_reduction <add>, %705, %cst_220 [1] : vector<2x8xf32> to vector<2xf32>
    %707 = vector.shape_cast %706 : vector<2xf32> to vector<2x1xf32>
    %cst_221 = arith.constant 8.000000e+00 : f32
    %708 = vector.broadcast %cst_221 : f32 to vector<2x1xf32>
    %709 = arith.divf %707, %708 : vector<2x1xf32>
    %710 = vector.broadcast %709 : vector<2x1xf32> to vector<2x8xf32>
    %711 = arith.subf %705, %710 : vector<2x8xf32>
    %712 = arith.mulf %711, %711 : vector<2x8xf32>
    %cst_222 = arith.constant dense<0.000000e+00> : vector<2xf32>
    %713 = vector.multi_reduction <add>, %712, %cst_222 [1] : vector<2x8xf32> to vector<2xf32>
    %714 = vector.shape_cast %713 : vector<2xf32> to vector<2x1xf32>
    %cst_223 = arith.constant 8.000000e+00 : f32
    %715 = vector.broadcast %cst_223 : f32 to vector<2x1xf32>
    %716 = arith.divf %714, %715 : vector<2x1xf32>
    %cst_224 = arith.constant 9.99999974E-6 : f32
    %717 = vector.broadcast %cst_224 : f32 to vector<2x1xf32>
    %718 = arith.addf %716, %717 : vector<2x1xf32>
    %719 = math.rsqrt %718 : vector<2x1xf32>
    %720 = vector.broadcast %719 : vector<2x1xf32> to vector<2x8xf32>
    %721 = arith.mulf %711, %720 : vector<2x8xf32>
    %722 = vector.broadcast %8 : vector<1x8xf32> to vector<2x8xf32>
    %723 = arith.mulf %721, %722 : vector<2x8xf32>
    %724 = vector.broadcast %9 : vector<1x8xf32> to vector<2x8xf32>
    %725 = arith.addf %723, %724 : vector<2x8xf32>
    %726 = vector.shape_cast %725 : vector<2x8xf32> to vector<2x1x8xf32>
    %727 = arith.truncf %726 : vector<2x1x8xf32> to vector<2x1x8xbf16>
    "tpu.trace_start"() <{level = 10 : i32, message = "bqd,bmd->bqm"}> : () -> ()
    %cst_225 = arith.constant dense<0.000000e+00> : vector<2x1x16xf32>
    %728 = tpu.matmul %727, %702, %cst_225 {dimension_numbers = #tpu.dot_dimension_numbers<[2], [2], [1], [1], [0, 0, 0, 1, 1, 1], [0], [0]>} : vector<2x1x8xbf16>, vector<2x16x8xbf16>, vector<2x1x16xf32> -> vector<2x1x16xf32>
    "tpu.trace_stop"() : () -> ()
    %cst_226 = arith.constant dense<0xFF800000> : vector<2x1xf32>
    %729 = vector.multi_reduction <maximumf>, %728, %cst_226 [2] : vector<2x1x16xf32> to vector<2x1xf32>
    %730 = vector.shape_cast %729 : vector<2x1xf32> to vector<2x1x1xf32>
    %731 = vector.broadcast %730 : vector<2x1x1xf32> to vector<2x1x16xf32>
    %732 = arith.subf %728, %731 : vector<2x1x16xf32>
    %733 = math.exp %732 : vector<2x1x16xf32>
    %cst_227 = arith.constant dense<0.000000e+00> : vector<2x1xf32>
    %734 = vector.multi_reduction <add>, %733, %cst_227 [2] : vector<2x1x16xf32> to vector<2x1xf32>
    %735 = vector.shape_cast %734 : vector<2x1xf32> to vector<2x1x1xf32>
    %736 = tpu.reciprocal %735 {approx = true} : vector<2x1x1xf32> -> vector<2x1x1xf32>
    %737 = vector.broadcast %736 : vector<2x1x1xf32> to vector<2x1x16xf32>
    %738 = arith.mulf %733, %737 : vector<2x1x16xf32>
    %739 = arith.truncf %738 : vector<2x1x16xf32> to vector<2x1x16xbf16>
    "tpu.trace_start"() <{level = 10 : i32, message = "bqm,bmd->bqd"}> : () -> ()
    %cst_228 = arith.constant dense<0.000000e+00> : vector<2x1x8xf32>
    %740 = tpu.matmul %739, %703, %cst_228 {dimension_numbers = #tpu.dot_dimension_numbers<[2], [1], [1], [2], [0, 0, 0, 1, 1, 2], [0], [0]>} : vector<2x1x16xbf16>, vector<2x16x8xbf16>, vector<2x1x8xf32> -> vector<2x1x8xf32>
    "tpu.trace_stop"() : () -> ()
    %cst_229 = arith.constant dense<0.000000e+00> : vector<2x8xf32>
    %741 = vector.multi_reduction <add>, %740, %cst_229 [1] : vector<2x1x8xf32> to vector<2x8xf32>
    %c4_230 = arith.constant 4 : index
    %c32_231 = arith.constant 32 : index
    %742 = vector.load %arg11[%c4_230, %c32_231] : memref<16x48xf32, #tpu.memory_space<vmem>>, vector<2x8xf32>
    tpu.vector_store %arg11[%c4_230, %c32_231], %741 {strides = array<i32>} : memref<16x48xf32, #tpu.memory_space<vmem>>, vector<2x8xf32>,
    %743 = vector.extract_strided_slice %649 {offsets = [0, 8], sizes = [2, 8], strides = [1, 1]} : vector<2x40xf32> to vector<2x8xf32>
    %cst_232 = arith.constant dense<0.000000e+00> : vector<2xf32>
    %744 = vector.multi_reduction <add>, %743, %cst_232 [1] : vector<2x8xf32> to vector<2xf32>
    %745 = vector.shape_cast %744 : vector<2xf32> to vector<2x1xf32>
    %cst_233 = arith.constant 8.000000e+00 : f32
    %746 = vector.broadcast %cst_233 : f32 to vector<2x1xf32>
    %747 = arith.divf %745, %746 : vector<2x1xf32>
    %748 = vector.broadcast %747 : vector<2x1xf32> to vector<2x8xf32>
    %749 = arith.subf %743, %748 : vector<2x8xf32>
    %750 = arith.mulf %749, %749 : vector<2x8xf32>
    %cst_234 = arith.constant dense<0.000000e+00> : vector<2xf32>
    %751 = vector.multi_reduction <add>, %750, %cst_234 [1] : vector<2x8xf32> to vector<2xf32>
    %752 = vector.shape_cast %751 : vector<2xf32> to vector<2x1xf32>
    %cst_235 = arith.constant 8.000000e+00 : f32
    %753 = vector.broadcast %cst_235 : f32 to vector<2x1xf32>
    %754 = arith.divf %752, %753 : vector<2x1xf32>
    %cst_236 = arith.constant 9.99999974E-6 : f32
    %755 = vector.broadcast %cst_236 : f32 to vector<2x1xf32>
    %756 = arith.addf %754, %755 : vector<2x1xf32>
    %757 = math.rsqrt %756 : vector<2x1xf32>
    %758 = vector.broadcast %757 : vector<2x1xf32> to vector<2x8xf32>
    %759 = arith.mulf %749, %758 : vector<2x8xf32>
    %760 = vector.broadcast %8 : vector<1x8xf32> to vector<2x8xf32>
    %761 = arith.mulf %759, %760 : vector<2x8xf32>
    %762 = vector.broadcast %9 : vector<1x8xf32> to vector<2x8xf32>
    %763 = arith.addf %761, %762 : vector<2x8xf32>
    %764 = vector.shape_cast %763 : vector<2x8xf32> to vector<2x1x8xf32>
    %765 = arith.truncf %764 : vector<2x1x8xf32> to vector<2x1x8xbf16>
    "tpu.trace_start"() <{level = 10 : i32, message = "bqd,bmd->bqm"}> : () -> ()
    %cst_237 = arith.constant dense<0.000000e+00> : vector<2x1x16xf32>
    %766 = tpu.matmul %765, %702, %cst_237 {dimension_numbers = #tpu.dot_dimension_numbers<[2], [2], [1], [1], [0, 0, 0, 1, 1, 1], [0], [0]>} : vector<2x1x8xbf16>, vector<2x16x8xbf16>, vector<2x1x16xf32> -> vector<2x1x16xf32>
    "tpu.trace_stop"() : () -> ()
    %cst_238 = arith.constant dense<0xFF800000> : vector<2x1xf32>
    %767 = vector.multi_reduction <maximumf>, %766, %cst_238 [2] : vector<2x1x16xf32> to vector<2x1xf32>
    %768 = vector.shape_cast %767 : vector<2x1xf32> to vector<2x1x1xf32>
    %769 = vector.broadcast %768 : vector<2x1x1xf32> to vector<2x1x16xf32>
    %770 = arith.subf %766, %769 : vector<2x1x16xf32>
    %771 = math.exp %770 : vector<2x1x16xf32>
    %cst_239 = arith.constant dense<0.000000e+00> : vector<2x1xf32>
    %772 = vector.multi_reduction <add>, %771, %cst_239 [2] : vector<2x1x16xf32> to vector<2x1xf32>
    %773 = vector.shape_cast %772 : vector<2x1xf32> to vector<2x1x1xf32>
    %774 = tpu.reciprocal %773 {approx = true} : vector<2x1x1xf32> -> vector<2x1x1xf32>
    %775 = vector.broadcast %774 : vector<2x1x1xf32> to vector<2x1x16xf32>
    %776 = arith.mulf %771, %775 : vector<2x1x16xf32>
    %777 = arith.truncf %776 : vector<2x1x16xf32> to vector<2x1x16xbf16>
    "tpu.trace_start"() <{level = 10 : i32, message = "bqm,bmd->bqd"}> : () -> ()
    %cst_240 = arith.constant dense<0.000000e+00> : vector<2x1x8xf32>
    %778 = tpu.matmul %777, %703, %cst_240 {dimension_numbers = #tpu.dot_dimension_numbers<[2], [1], [1], [2], [0, 0, 0, 1, 1, 2], [0], [0]>} : vector<2x1x16xbf16>, vector<2x16x8xbf16>, vector<2x1x8xf32> -> vector<2x1x8xf32>
    "tpu.trace_stop"() : () -> ()
    %cst_241 = arith.constant dense<0.000000e+00> : vector<2x8xf32>
    %779 = vector.multi_reduction <add>, %778, %cst_241 [1] : vector<2x1x8xf32> to vector<2x8xf32>
    %c4_242 = arith.constant 4 : index
    %c40_243 = arith.constant 40 : index
    %780 = vector.load %arg11[%c4_242, %c40_243] : memref<16x48xf32, #tpu.memory_space<vmem>>, vector<2x8xf32>
    tpu.vector_store %arg11[%c4_242, %c40_243], %779 {strides = array<i32>} : memref<16x48xf32, #tpu.memory_space<vmem>>, vector<2x8xf32>,
    %c3 = arith.constant 3 : index
    %c0_244 = arith.constant 0 : index
    %c0_245 = arith.constant 0 : index
    %781 = vector.load %arg1[%c3, %c0_244, %c0_245] : memref<8x2x16xf32, #tpu.memory_space<vmem>>, vector<1x2x16xf32>
    %782 = vector.shape_cast %781 : vector<1x2x16xf32> to vector<2x16xf32>
    %cst_246 = arith.constant dense<0.000000e+00> : vector<2xf32>
    %783 = vector.multi_reduction <add>, %782, %cst_246 [1] : vector<2x16xf32> to vector<2xf32>
    %784 = vector.shape_cast %783 : vector<2xf32> to vector<2x1xf32>
    %cst_247 = arith.constant dense<0.000000e+00> : vector<2xf32>
    %785 = vector.multi_reduction <add>, %741, %cst_247 [1] : vector<2x8xf32> to vector<2xf32>
    %786 = vector.shape_cast %785 : vector<2xf32> to vector<2x1xf32>
    %787 = arith.addf %784, %786 : vector<2x1xf32>
    %cst_248 = arith.constant dense<0.000000e+00> : vector<2xf32>
    %788 = vector.multi_reduction <add>, %779, %cst_248 [1] : vector<2x8xf32> to vector<2xf32>
    %789 = vector.shape_cast %788 : vector<2xf32> to vector<2x1xf32>
    %790 = arith.addf %787, %789 : vector<2x1xf32>
    %cst_249 = arith.constant 3.125000e-02 : f32
    %791 = vector.broadcast %cst_249 : f32 to vector<2x1xf32>
    %792 = arith.mulf %790, %791 : vector<2x1xf32>
    %793 = vector.broadcast %792 : vector<2x1xf32> to vector<2x16xf32>
    %794 = arith.subf %782, %793 : vector<2x16xf32>
    %795 = vector.broadcast %792 : vector<2x1xf32> to vector<2x8xf32>
    %796 = arith.subf %741, %795 : vector<2x8xf32>
    %797 = vector.broadcast %792 : vector<2x1xf32> to vector<2x8xf32>
    %798 = arith.subf %779, %797 : vector<2x8xf32>
    %799 = arith.mulf %794, %794 : vector<2x16xf32>
    %cst_250 = arith.constant dense<0.000000e+00> : vector<2xf32>
    %800 = vector.multi_reduction <add>, %799, %cst_250 [1] : vector<2x16xf32> to vector<2xf32>
    %801 = vector.shape_cast %800 : vector<2xf32> to vector<2x1xf32>
    %802 = arith.mulf %796, %796 : vector<2x8xf32>
    %cst_251 = arith.constant dense<0.000000e+00> : vector<2xf32>
    %803 = vector.multi_reduction <add>, %802, %cst_251 [1] : vector<2x8xf32> to vector<2xf32>
    %804 = vector.shape_cast %803 : vector<2xf32> to vector<2x1xf32>
    %805 = arith.addf %801, %804 : vector<2x1xf32>
    %806 = arith.mulf %798, %798 : vector<2x8xf32>
    %cst_252 = arith.constant dense<0.000000e+00> : vector<2xf32>
    %807 = vector.multi_reduction <add>, %806, %cst_252 [1] : vector<2x8xf32> to vector<2xf32>
    %808 = vector.shape_cast %807 : vector<2xf32> to vector<2x1xf32>
    %809 = arith.addf %805, %808 : vector<2x1xf32>
    %cst_253 = arith.constant 3.125000e-02 : f32
    %810 = vector.broadcast %cst_253 : f32 to vector<2x1xf32>
    %811 = arith.mulf %809, %810 : vector<2x1xf32>
    %cst_254 = arith.constant 9.99999974E-6 : f32
    %812 = vector.broadcast %cst_254 : f32 to vector<2x1xf32>
    %813 = arith.addf %811, %812 : vector<2x1xf32>
    %814 = math.rsqrt %813 : vector<2x1xf32>
    %815 = vector.broadcast %814 : vector<2x1xf32> to vector<2x16xf32>
    %816 = arith.mulf %794, %815 : vector<2x16xf32>
    %817 = vector.broadcast %0 : vector<1x16xf32> to vector<2x16xf32>
    %818 = arith.mulf %816, %817 : vector<2x16xf32>
    %819 = vector.broadcast %1 : vector<1x16xf32> to vector<2x16xf32>
    %820 = arith.addf %818, %819 : vector<2x16xf32>
    %821 = vector.broadcast %814 : vector<2x1xf32> to vector<2x8xf32>
    %822 = arith.mulf %796, %821 : vector<2x8xf32>
    %823 = vector.broadcast %2 : vector<1x8xf32> to vector<2x8xf32>
    %824 = arith.mulf %822, %823 : vector<2x8xf32>
    %825 = vector.broadcast %4 : vector<1x8xf32> to vector<2x8xf32>
    %826 = arith.addf %824, %825 : vector<2x8xf32>
    %827 = vector.broadcast %814 : vector<2x1xf32> to vector<2x8xf32>
    %828 = arith.mulf %798, %827 : vector<2x8xf32>
    %829 = vector.broadcast %3 : vector<1x8xf32> to vector<2x8xf32>
    %830 = arith.mulf %828, %829 : vector<2x8xf32>
    %831 = vector.broadcast %5 : vector<1x8xf32> to vector<2x8xf32>
    %832 = arith.addf %830, %831 : vector<2x8xf32>
    %833 = arith.truncf %820 : vector<2x16xf32> to vector<2x16xbf16>
    %cst_255 = arith.constant dense<0.000000e+00> : vector<2x128xf32>
    %834 = tpu.matmul %833, %17, %cst_255 {dimension_numbers = #tpu.dot_dimension_numbers<[1], [0], [0], [1], [0, 0, 1, 1], [], []>} : vector<2x16xbf16>, vector<16x128xbf16>, vector<2x128xf32> -> vector<2x128xf32>
    %835 = arith.truncf %625 : vector<2x32xf32> to vector<2x32xbf16>
    %cst_256 = arith.constant dense<0.000000e+00> : vector<2x128xf32>
    %836 = tpu.matmul %835, %20, %cst_256 {dimension_numbers = #tpu.dot_dimension_numbers<[1], [0], [0], [1], [0, 0, 1, 1], [], []>} : vector<2x32xbf16>, vector<32x128xbf16>, vector<2x128xf32> -> vector<2x128xf32>
    %837 = arith.addf %834, %836 : vector<2x128xf32>
    %838 = vector.broadcast %14 : vector<1x128xf32> to vector<2x128xf32>
    %839 = arith.addf %837, %838 : vector<2x128xf32>
    %840 = arith.truncf %826 : vector<2x8xf32> to vector<2x8xbf16>
    %cst_257 = arith.constant dense<0.000000e+00> : vector<2x128xf32>
    %841 = tpu.matmul %840, %18, %cst_257 {dimension_numbers = #tpu.dot_dimension_numbers<[1], [0], [0], [1], [0, 0, 1, 1], [], []>} : vector<2x8xbf16>, vector<8x128xbf16>, vector<2x128xf32> -> vector<2x128xf32>
    %842 = arith.addf %839, %841 : vector<2x128xf32>
    %843 = arith.truncf %832 : vector<2x8xf32> to vector<2x8xbf16>
    %cst_258 = arith.constant dense<0.000000e+00> : vector<2x128xf32>
    %844 = tpu.matmul %843, %19, %cst_258 {dimension_numbers = #tpu.dot_dimension_numbers<[1], [0], [0], [1], [0, 0, 1, 1], [], []>} : vector<2x8xbf16>, vector<8x128xbf16>, vector<2x128xf32> -> vector<2x128xf32>
    %845 = arith.addf %842, %844 : vector<2x128xf32>
    %846 = vector.extract_strided_slice %845 {offsets = [0, 0], sizes = [2, 32], strides = [1, 1]} : vector<2x128xf32> to vector<2x32xf32>
    %cst_259 = arith.constant 5.000000e-01 : f32
    %847 = vector.broadcast %cst_259 : f32 to vector<2x32xf32>
    %848 = arith.mulf %847, %846 : vector<2x32xf32>
    %849 = math.tanh %848 : vector<2x32xf32>
    %cst_260 = arith.constant 5.000000e-01 : f32
    %850 = vector.broadcast %cst_260 : f32 to vector<2x32xf32>
    %851 = arith.mulf %850, %849 : vector<2x32xf32>
    %cst_261 = arith.constant 5.000000e-01 : f32
    %852 = vector.broadcast %cst_261 : f32 to vector<2x32xf32>
    %853 = arith.addf %851, %852 : vector<2x32xf32>
    %854 = vector.extract_strided_slice %845 {offsets = [0, 32], sizes = [2, 32], strides = [1, 1]} : vector<2x128xf32> to vector<2x32xf32>
    %cst_262 = arith.constant 5.000000e-01 : f32
    %855 = vector.broadcast %cst_262 : f32 to vector<2x32xf32>
    %856 = arith.mulf %855, %854 : vector<2x32xf32>
    %857 = math.tanh %856 : vector<2x32xf32>
    %cst_263 = arith.constant 5.000000e-01 : f32
    %858 = vector.broadcast %cst_263 : f32 to vector<2x32xf32>
    %859 = arith.mulf %858, %857 : vector<2x32xf32>
    %cst_264 = arith.constant 5.000000e-01 : f32
    %860 = vector.broadcast %cst_264 : f32 to vector<2x32xf32>
    %861 = arith.addf %859, %860 : vector<2x32xf32>
    %862 = vector.extract_strided_slice %845 {offsets = [0, 64], sizes = [2, 32], strides = [1, 1]} : vector<2x128xf32> to vector<2x32xf32>
    %863 = math.tanh %862 : vector<2x32xf32>
    %864 = vector.extract_strided_slice %845 {offsets = [0, 96], sizes = [2, 32], strides = [1, 1]} : vector<2x128xf32> to vector<2x32xf32>
    %cst_265 = arith.constant 5.000000e-01 : f32
    %865 = vector.broadcast %cst_265 : f32 to vector<2x32xf32>
    %866 = arith.mulf %865, %864 : vector<2x32xf32>
    %867 = math.tanh %866 : vector<2x32xf32>
    %cst_266 = arith.constant 5.000000e-01 : f32
    %868 = vector.broadcast %cst_266 : f32 to vector<2x32xf32>
    %869 = arith.mulf %868, %867 : vector<2x32xf32>
    %cst_267 = arith.constant 5.000000e-01 : f32
    %870 = vector.broadcast %cst_267 : f32 to vector<2x32xf32>
    %871 = arith.addf %869, %870 : vector<2x32xf32>
    %872 = arith.mulf %861, %623 : vector<2x32xf32>
    %873 = arith.mulf %853, %863 : vector<2x32xf32>
    %874 = arith.addf %872, %873 : vector<2x32xf32>
    %875 = math.tanh %874 : vector<2x32xf32>
    %876 = arith.mulf %871, %875 : vector<2x32xf32>
    %cst_268 = arith.constant dense<0.000000e+00> : vector<2xf32>
    %877 = vector.multi_reduction <add>, %876, %cst_268 [1] : vector<2x32xf32> to vector<2xf32>
    %878 = vector.shape_cast %877 : vector<2xf32> to vector<2x1xf32>
    %cst_269 = arith.constant 3.200000e+01 : f32
    %879 = vector.broadcast %cst_269 : f32 to vector<2x1xf32>
    %880 = arith.divf %878, %879 : vector<2x1xf32>
    %881 = vector.broadcast %880 : vector<2x1xf32> to vector<2x32xf32>
    %882 = arith.subf %876, %881 : vector<2x32xf32>
    %883 = arith.mulf %882, %882 : vector<2x32xf32>
    %cst_270 = arith.constant dense<0.000000e+00> : vector<2xf32>
    %884 = vector.multi_reduction <add>, %883, %cst_270 [1] : vector<2x32xf32> to vector<2xf32>
    %885 = vector.shape_cast %884 : vector<2xf32> to vector<2x1xf32>
    %cst_271 = arith.constant 3.200000e+01 : f32
    %886 = vector.broadcast %cst_271 : f32 to vector<2x1xf32>
    %887 = arith.divf %885, %886 : vector<2x1xf32>
    %cst_272 = arith.constant 9.99999974E-6 : f32
    %888 = vector.broadcast %cst_272 : f32 to vector<2x1xf32>
    %889 = arith.addf %887, %888 : vector<2x1xf32>
    %890 = math.rsqrt %889 : vector<2x1xf32>
    %891 = vector.broadcast %890 : vector<2x1xf32> to vector<2x32xf32>
    %892 = arith.mulf %882, %891 : vector<2x32xf32>
    %893 = vector.broadcast %6 : vector<1x32xf32> to vector<2x32xf32>
    %894 = arith.mulf %892, %893 : vector<2x32xf32>
    %895 = vector.broadcast %7 : vector<1x32xf32> to vector<2x32xf32>
    %896 = arith.addf %894, %895 : vector<2x32xf32>
    %897 = arith.truncf %896 : vector<2x32xf32> to vector<2x32xbf16>
    %cst_273 = arith.constant dense<0.000000e+00> : vector<2x40xf32>
    %898 = tpu.matmul %897, %21, %cst_273 {dimension_numbers = #tpu.dot_dimension_numbers<[1], [0], [0], [1], [0, 0, 1, 1], [], []>} : vector<2x32xbf16>, vector<32x40xbf16>, vector<2x40xf32> -> vector<2x40xf32>
    %899 = vector.broadcast %15 : vector<1x40xf32> to vector<2x40xf32>
    %900 = arith.addf %898, %899 : vector<2x40xf32>
    %901 = vector.extract_strided_slice %900 {offsets = [0, 16], sizes = [2, 8], strides = [1, 1]} : vector<2x40xf32> to vector<2x8xf32>
    %cst_274 = arith.constant 5.000000e-01 : f32
    %902 = vector.broadcast %cst_274 : f32 to vector<2x8xf32>
    %903 = arith.mulf %902, %901 : vector<2x8xf32>
    %904 = math.tanh %903 : vector<2x8xf32>
    %cst_275 = arith.constant 5.000000e-01 : f32
    %905 = vector.broadcast %cst_275 : f32 to vector<2x8xf32>
    %906 = arith.mulf %905, %904 : vector<2x8xf32>
    %cst_276 = arith.constant 5.000000e-01 : f32
    %907 = vector.broadcast %cst_276 : f32 to vector<2x8xf32>
    %908 = arith.addf %906, %907 : vector<2x8xf32>
    %909 = vector.extract_strided_slice %900 {offsets = [0, 24], sizes = [2, 8], strides = [1, 1]} : vector<2x40xf32> to vector<2x8xf32>
    %910 = math.tanh %909 : vector<2x8xf32>
    %911 = vector.extract_strided_slice %900 {offsets = [0, 32], sizes = [2, 1], strides = [1, 1]} : vector<2x40xf32> to vector<2x1xf32>
    %cst_277 = arith.constant 5.000000e-01 : f32
    %912 = vector.broadcast %cst_277 : f32 to vector<2x1xf32>
    %913 = arith.mulf %912, %911 : vector<2x1xf32>
    %914 = math.tanh %913 : vector<2x1xf32>
    %cst_278 = arith.constant 5.000000e-01 : f32
    %915 = vector.broadcast %cst_278 : f32 to vector<2x1xf32>
    %916 = arith.mulf %915, %914 : vector<2x1xf32>
    %cst_279 = arith.constant 5.000000e-01 : f32
    %917 = vector.broadcast %cst_279 : f32 to vector<2x1xf32>
    %918 = arith.addf %916, %917 : vector<2x1xf32>
    %919 = vector.broadcast %918 : vector<2x1xf32> to vector<2x8xf32>
    %920 = arith.mulf %919, %908 : vector<2x8xf32>
    %921 = vector.shape_cast %920 : vector<2x8xf32> to vector<2x1x8xf32>
    %cst_280 = arith.constant 1.000000e+00 : f32
    %922 = vector.broadcast %cst_280 : f32 to vector<2x1x8xf32>
    %923 = arith.subf %922, %921 : vector<2x1x8xf32>
    %924 = vector.broadcast %923 : vector<2x1x8xf32> to vector<2x16x8xf32>
    %925 = arith.mulf %679, %924 : vector<2x16x8xf32>
    %926 = vector.broadcast %918 : vector<2x1xf32> to vector<2x8xf32>
    %927 = arith.mulf %926, %910 : vector<2x8xf32>
    %928 = vector.shape_cast %927 : vector<2x8xf32> to vector<2x1x8xf32>
    %929 = vector.broadcast %928 : vector<2x1x8xf32> to vector<2x16x8xf32>
    %930 = arith.addf %925, %929 : vector<2x16x8xf32>
    %cst_281 = arith.constant dense<0.000000e+00> : vector<2x16xf32>
    %931 = vector.multi_reduction <add>, %930, %cst_281 [2] : vector<2x16x8xf32> to vector<2x16xf32>
    %932 = vector.shape_cast %931 : vector<2x16xf32> to vector<2x16x1xf32>
    %cst_282 = arith.constant 8.000000e+00 : f32
    %933 = vector.broadcast %cst_282 : f32 to vector<2x16x1xf32>
    %934 = arith.divf %932, %933 : vector<2x16x1xf32>
    %935 = vector.broadcast %934 : vector<2x16x1xf32> to vector<2x16x8xf32>
    %936 = arith.subf %930, %935 : vector<2x16x8xf32>
    %937 = arith.mulf %936, %936 : vector<2x16x8xf32>
    %cst_283 = arith.constant dense<0.000000e+00> : vector<2x16xf32>
    %938 = vector.multi_reduction <add>, %937, %cst_283 [2] : vector<2x16x8xf32> to vector<2x16xf32>
    %939 = vector.shape_cast %938 : vector<2x16xf32> to vector<2x16x1xf32>
    %cst_284 = arith.constant 8.000000e+00 : f32
    %940 = vector.broadcast %cst_284 : f32 to vector<2x16x1xf32>
    %941 = arith.divf %939, %940 : vector<2x16x1xf32>
    %cst_285 = arith.constant 9.99999974E-6 : f32
    %942 = vector.broadcast %cst_285 : f32 to vector<2x16x1xf32>
    %943 = arith.addf %941, %942 : vector<2x16x1xf32>
    %944 = math.rsqrt %943 : vector<2x16x1xf32>
    %945 = vector.broadcast %944 : vector<2x16x1xf32> to vector<2x16x8xf32>
    %946 = arith.mulf %936, %945 : vector<2x16x8xf32>
    %947 = vector.shape_cast %10 : vector<1x8xf32> to vector<1x1x8xf32>
    %948 = vector.broadcast %947 : vector<1x1x8xf32> to vector<2x16x8xf32>
    %949 = arith.mulf %946, %948 : vector<2x16x8xf32>
    %950 = vector.shape_cast %11 : vector<1x8xf32> to vector<1x1x8xf32>
    %951 = vector.broadcast %950 : vector<1x1x8xf32> to vector<2x16x8xf32>
    %952 = arith.addf %949, %951 : vector<2x16x8xf32>
    %953 = arith.truncf %952 : vector<2x16x8xf32> to vector<2x16x8xbf16>
    %954 = arith.truncf %930 : vector<2x16x8xf32> to vector<2x16x8xbf16>
    %c6 = arith.constant 6 : index
    %c0_286 = arith.constant 0 : index
    %955 = vector.load %arg11[%c6, %c0_286] : memref<16x48xf32, #tpu.memory_space<vmem>>, vector<2x32xf32>
    tpu.vector_store %arg11[%c6, %c0_286], %896 {strides = array<i32>} : memref<16x48xf32, #tpu.memory_space<vmem>>, vector<2x32xf32>,
    %956 = vector.extract_strided_slice %900 {offsets = [0, 0], sizes = [2, 8], strides = [1, 1]} : vector<2x40xf32> to vector<2x8xf32>
    %cst_287 = arith.constant dense<0.000000e+00> : vector<2xf32>
    %957 = vector.multi_reduction <add>, %956, %cst_287 [1] : vector<2x8xf32> to vector<2xf32>
    %958 = vector.shape_cast %957 : vector<2xf32> to vector<2x1xf32>
    %cst_288 = arith.constant 8.000000e+00 : f32
    %959 = vector.broadcast %cst_288 : f32 to vector<2x1xf32>
    %960 = arith.divf %958, %959 : vector<2x1xf32>
    %961 = vector.broadcast %960 : vector<2x1xf32> to vector<2x8xf32>
    %962 = arith.subf %956, %961 : vector<2x8xf32>
    %963 = arith.mulf %962, %962 : vector<2x8xf32>
    %cst_289 = arith.constant dense<0.000000e+00> : vector<2xf32>
    %964 = vector.multi_reduction <add>, %963, %cst_289 [1] : vector<2x8xf32> to vector<2xf32>
    %965 = vector.shape_cast %964 : vector<2xf32> to vector<2x1xf32>
    %cst_290 = arith.constant 8.000000e+00 : f32
    %966 = vector.broadcast %cst_290 : f32 to vector<2x1xf32>
    %967 = arith.divf %965, %966 : vector<2x1xf32>
    %cst_291 = arith.constant 9.99999974E-6 : f32
    %968 = vector.broadcast %cst_291 : f32 to vector<2x1xf32>
    %969 = arith.addf %967, %968 : vector<2x1xf32>
    %970 = math.rsqrt %969 : vector<2x1xf32>
    %971 = vector.broadcast %970 : vector<2x1xf32> to vector<2x8xf32>
    %972 = arith.mulf %962, %971 : vector<2x8xf32>
    %973 = vector.broadcast %8 : vector<1x8xf32> to vector<2x8xf32>
    %974 = arith.mulf %972, %973 : vector<2x8xf32>
    %975 = vector.broadcast %9 : vector<1x8xf32> to vector<2x8xf32>
    %976 = arith.addf %974, %975 : vector<2x8xf32>
    %977 = vector.shape_cast %976 : vector<2x8xf32> to vector<2x1x8xf32>
    %978 = arith.truncf %977 : vector<2x1x8xf32> to vector<2x1x8xbf16>
    "tpu.trace_start"() <{level = 10 : i32, message = "bqd,bmd->bqm"}> : () -> ()
    %cst_292 = arith.constant dense<0.000000e+00> : vector<2x1x16xf32>
    %979 = tpu.matmul %978, %953, %cst_292 {dimension_numbers = #tpu.dot_dimension_numbers<[2], [2], [1], [1], [0, 0, 0, 1, 1, 1], [0], [0]>} : vector<2x1x8xbf16>, vector<2x16x8xbf16>, vector<2x1x16xf32> -> vector<2x1x16xf32>
    "tpu.trace_stop"() : () -> ()
    %cst_293 = arith.constant dense<0xFF800000> : vector<2x1xf32>
    %980 = vector.multi_reduction <maximumf>, %979, %cst_293 [2] : vector<2x1x16xf32> to vector<2x1xf32>
    %981 = vector.shape_cast %980 : vector<2x1xf32> to vector<2x1x1xf32>
    %982 = vector.broadcast %981 : vector<2x1x1xf32> to vector<2x1x16xf32>
    %983 = arith.subf %979, %982 : vector<2x1x16xf32>
    %984 = math.exp %983 : vector<2x1x16xf32>
    %cst_294 = arith.constant dense<0.000000e+00> : vector<2x1xf32>
    %985 = vector.multi_reduction <add>, %984, %cst_294 [2] : vector<2x1x16xf32> to vector<2x1xf32>
    %986 = vector.shape_cast %985 : vector<2x1xf32> to vector<2x1x1xf32>
    %987 = tpu.reciprocal %986 {approx = true} : vector<2x1x1xf32> -> vector<2x1x1xf32>
    %988 = vector.broadcast %987 : vector<2x1x1xf32> to vector<2x1x16xf32>
    %989 = arith.mulf %984, %988 : vector<2x1x16xf32>
    %990 = arith.truncf %989 : vector<2x1x16xf32> to vector<2x1x16xbf16>
    "tpu.trace_start"() <{level = 10 : i32, message = "bqm,bmd->bqd"}> : () -> ()
    %cst_295 = arith.constant dense<0.000000e+00> : vector<2x1x8xf32>
    %991 = tpu.matmul %990, %954, %cst_295 {dimension_numbers = #tpu.dot_dimension_numbers<[2], [1], [1], [2], [0, 0, 0, 1, 1, 2], [0], [0]>} : vector<2x1x16xbf16>, vector<2x16x8xbf16>, vector<2x1x8xf32> -> vector<2x1x8xf32>
    "tpu.trace_stop"() : () -> ()
    %cst_296 = arith.constant dense<0.000000e+00> : vector<2x8xf32>
    %992 = vector.multi_reduction <add>, %991, %cst_296 [1] : vector<2x1x8xf32> to vector<2x8xf32>
    %c6_297 = arith.constant 6 : index
    %c32_298 = arith.constant 32 : index
    %993 = vector.load %arg11[%c6_297, %c32_298] : memref<16x48xf32, #tpu.memory_space<vmem>>, vector<2x8xf32>
    tpu.vector_store %arg11[%c6_297, %c32_298], %992 {strides = array<i32>} : memref<16x48xf32, #tpu.memory_space<vmem>>, vector<2x8xf32>,
    %994 = vector.extract_strided_slice %900 {offsets = [0, 8], sizes = [2, 8], strides = [1, 1]} : vector<2x40xf32> to vector<2x8xf32>
    %cst_299 = arith.constant dense<0.000000e+00> : vector<2xf32>
    %995 = vector.multi_reduction <add>, %994, %cst_299 [1] : vector<2x8xf32> to vector<2xf32>
    %996 = vector.shape_cast %995 : vector<2xf32> to vector<2x1xf32>
    %cst_300 = arith.constant 8.000000e+00 : f32
    %997 = vector.broadcast %cst_300 : f32 to vector<2x1xf32>
    %998 = arith.divf %996, %997 : vector<2x1xf32>
    %999 = vector.broadcast %998 : vector<2x1xf32> to vector<2x8xf32>
    %1000 = arith.subf %994, %999 : vector<2x8xf32>
    %1001 = arith.mulf %1000, %1000 : vector<2x8xf32>
    %cst_301 = arith.constant dense<0.000000e+00> : vector<2xf32>
    %1002 = vector.multi_reduction <add>, %1001, %cst_301 [1] : vector<2x8xf32> to vector<2xf32>
    %1003 = vector.shape_cast %1002 : vector<2xf32> to vector<2x1xf32>
    %cst_302 = arith.constant 8.000000e+00 : f32
    %1004 = vector.broadcast %cst_302 : f32 to vector<2x1xf32>
    %1005 = arith.divf %1003, %1004 : vector<2x1xf32>
    %cst_303 = arith.constant 9.99999974E-6 : f32
    %1006 = vector.broadcast %cst_303 : f32 to vector<2x1xf32>
    %1007 = arith.addf %1005, %1006 : vector<2x1xf32>
    %1008 = math.rsqrt %1007 : vector<2x1xf32>
    %1009 = vector.broadcast %1008 : vector<2x1xf32> to vector<2x8xf32>
    %1010 = arith.mulf %1000, %1009 : vector<2x8xf32>
    %1011 = vector.broadcast %8 : vector<1x8xf32> to vector<2x8xf32>
    %1012 = arith.mulf %1010, %1011 : vector<2x8xf32>
    %1013 = vector.broadcast %9 : vector<1x8xf32> to vector<2x8xf32>
    %1014 = arith.addf %1012, %1013 : vector<2x8xf32>
    %1015 = vector.shape_cast %1014 : vector<2x8xf32> to vector<2x1x8xf32>
    %1016 = arith.truncf %1015 : vector<2x1x8xf32> to vector<2x1x8xbf16>
    "tpu.trace_start"() <{level = 10 : i32, message = "bqd,bmd->bqm"}> : () -> ()
    %cst_304 = arith.constant dense<0.000000e+00> : vector<2x1x16xf32>
    %1017 = tpu.matmul %1016, %953, %cst_304 {dimension_numbers = #tpu.dot_dimension_numbers<[2], [2], [1], [1], [0, 0, 0, 1, 1, 1], [0], [0]>} : vector<2x1x8xbf16>, vector<2x16x8xbf16>, vector<2x1x16xf32> -> vector<2x1x16xf32>
    "tpu.trace_stop"() : () -> ()
    %cst_305 = arith.constant dense<0xFF800000> : vector<2x1xf32>
    %1018 = vector.multi_reduction <maximumf>, %1017, %cst_305 [2] : vector<2x1x16xf32> to vector<2x1xf32>
    %1019 = vector.shape_cast %1018 : vector<2x1xf32> to vector<2x1x1xf32>
    %1020 = vector.broadcast %1019 : vector<2x1x1xf32> to vector<2x1x16xf32>
    %1021 = arith.subf %1017, %1020 : vector<2x1x16xf32>
    %1022 = math.exp %1021 : vector<2x1x16xf32>
    %cst_306 = arith.constant dense<0.000000e+00> : vector<2x1xf32>
    %1023 = vector.multi_reduction <add>, %1022, %cst_306 [2] : vector<2x1x16xf32> to vector<2x1xf32>
    %1024 = vector.shape_cast %1023 : vector<2x1xf32> to vector<2x1x1xf32>
    %1025 = tpu.reciprocal %1024 {approx = true} : vector<2x1x1xf32> -> vector<2x1x1xf32>
    %1026 = vector.broadcast %1025 : vector<2x1x1xf32> to vector<2x1x16xf32>
    %1027 = arith.mulf %1022, %1026 : vector<2x1x16xf32>
    %1028 = arith.truncf %1027 : vector<2x1x16xf32> to vector<2x1x16xbf16>
    "tpu.trace_start"() <{level = 10 : i32, message = "bqm,bmd->bqd"}> : () -> ()
    %cst_307 = arith.constant dense<0.000000e+00> : vector<2x1x8xf32>
    %1029 = tpu.matmul %1028, %954, %cst_307 {dimension_numbers = #tpu.dot_dimension_numbers<[2], [1], [1], [2], [0, 0, 0, 1, 1, 2], [0], [0]>} : vector<2x1x16xbf16>, vector<2x16x8xbf16>, vector<2x1x8xf32> -> vector<2x1x8xf32>
    "tpu.trace_stop"() : () -> ()
    %cst_308 = arith.constant dense<0.000000e+00> : vector<2x8xf32>
    %1030 = vector.multi_reduction <add>, %1029, %cst_308 [1] : vector<2x1x8xf32> to vector<2x8xf32>
    %c6_309 = arith.constant 6 : index
    %c40_310 = arith.constant 40 : index
    %1031 = vector.load %arg11[%c6_309, %c40_310] : memref<16x48xf32, #tpu.memory_space<vmem>>, vector<2x8xf32>
    tpu.vector_store %arg11[%c6_309, %c40_310], %1030 {strides = array<i32>} : memref<16x48xf32, #tpu.memory_space<vmem>>, vector<2x8xf32>,
    %c4_311 = arith.constant 4 : index
    %c0_312 = arith.constant 0 : index
    %c0_313 = arith.constant 0 : index
    %1032 = vector.load %arg1[%c4_311, %c0_312, %c0_313] : memref<8x2x16xf32, #tpu.memory_space<vmem>>, vector<1x2x16xf32>
    %1033 = vector.shape_cast %1032 : vector<1x2x16xf32> to vector<2x16xf32>
    %cst_314 = arith.constant dense<0.000000e+00> : vector<2xf32>
    %1034 = vector.multi_reduction <add>, %1033, %cst_314 [1] : vector<2x16xf32> to vector<2xf32>
    %1035 = vector.shape_cast %1034 : vector<2xf32> to vector<2x1xf32>
    %cst_315 = arith.constant dense<0.000000e+00> : vector<2xf32>
    %1036 = vector.multi_reduction <add>, %992, %cst_315 [1] : vector<2x8xf32> to vector<2xf32>
    %1037 = vector.shape_cast %1036 : vector<2xf32> to vector<2x1xf32>
    %1038 = arith.addf %1035, %1037 : vector<2x1xf32>
    %cst_316 = arith.constant dense<0.000000e+00> : vector<2xf32>
    %1039 = vector.multi_reduction <add>, %1030, %cst_316 [1] : vector<2x8xf32> to vector<2xf32>
    %1040 = vector.shape_cast %1039 : vector<2xf32> to vector<2x1xf32>
    %1041 = arith.addf %1038, %1040 : vector<2x1xf32>
    %cst_317 = arith.constant 3.125000e-02 : f32
    %1042 = vector.broadcast %cst_317 : f32 to vector<2x1xf32>
    %1043 = arith.mulf %1041, %1042 : vector<2x1xf32>
    %1044 = vector.broadcast %1043 : vector<2x1xf32> to vector<2x16xf32>
    %1045 = arith.subf %1033, %1044 : vector<2x16xf32>
    %1046 = vector.broadcast %1043 : vector<2x1xf32> to vector<2x8xf32>
    %1047 = arith.subf %992, %1046 : vector<2x8xf32>
    %1048 = vector.broadcast %1043 : vector<2x1xf32> to vector<2x8xf32>
    %1049 = arith.subf %1030, %1048 : vector<2x8xf32>
    %1050 = arith.mulf %1045, %1045 : vector<2x16xf32>
    %cst_318 = arith.constant dense<0.000000e+00> : vector<2xf32>
    %1051 = vector.multi_reduction <add>, %1050, %cst_318 [1] : vector<2x16xf32> to vector<2xf32>
    %1052 = vector.shape_cast %1051 : vector<2xf32> to vector<2x1xf32>
    %1053 = arith.mulf %1047, %1047 : vector<2x8xf32>
    %cst_319 = arith.constant dense<0.000000e+00> : vector<2xf32>
    %1054 = vector.multi_reduction <add>, %1053, %cst_319 [1] : vector<2x8xf32> to vector<2xf32>
    %1055 = vector.shape_cast %1054 : vector<2xf32> to vector<2x1xf32>
    %1056 = arith.addf %1052, %1055 : vector<2x1xf32>
    %1057 = arith.mulf %1049, %1049 : vector<2x8xf32>
    %cst_320 = arith.constant dense<0.000000e+00> : vector<2xf32>
    %1058 = vector.multi_reduction <add>, %1057, %cst_320 [1] : vector<2x8xf32> to vector<2xf32>
    %1059 = vector.shape_cast %1058 : vector<2xf32> to vector<2x1xf32>
    %1060 = arith.addf %1056, %1059 : vector<2x1xf32>
    %cst_321 = arith.constant 3.125000e-02 : f32
    %1061 = vector.broadcast %cst_321 : f32 to vector<2x1xf32>
    %1062 = arith.mulf %1060, %1061 : vector<2x1xf32>
    %cst_322 = arith.constant 9.99999974E-6 : f32
    %1063 = vector.broadcast %cst_322 : f32 to vector<2x1xf32>
    %1064 = arith.addf %1062, %1063 : vector<2x1xf32>
    %1065 = math.rsqrt %1064 : vector<2x1xf32>
    %1066 = vector.broadcast %1065 : vector<2x1xf32> to vector<2x16xf32>
    %1067 = arith.mulf %1045, %1066 : vector<2x16xf32>
    %1068 = vector.broadcast %0 : vector<1x16xf32> to vector<2x16xf32>
    %1069 = arith.mulf %1067, %1068 : vector<2x16xf32>
    %1070 = vector.broadcast %1 : vector<1x16xf32> to vector<2x16xf32>
    %1071 = arith.addf %1069, %1070 : vector<2x16xf32>
    %1072 = vector.broadcast %1065 : vector<2x1xf32> to vector<2x8xf32>
    %1073 = arith.mulf %1047, %1072 : vector<2x8xf32>
    %1074 = vector.broadcast %2 : vector<1x8xf32> to vector<2x8xf32>
    %1075 = arith.mulf %1073, %1074 : vector<2x8xf32>
    %1076 = vector.broadcast %4 : vector<1x8xf32> to vector<2x8xf32>
    %1077 = arith.addf %1075, %1076 : vector<2x8xf32>
    %1078 = vector.broadcast %1065 : vector<2x1xf32> to vector<2x8xf32>
    %1079 = arith.mulf %1049, %1078 : vector<2x8xf32>
    %1080 = vector.broadcast %3 : vector<1x8xf32> to vector<2x8xf32>
    %1081 = arith.mulf %1079, %1080 : vector<2x8xf32>
    %1082 = vector.broadcast %5 : vector<1x8xf32> to vector<2x8xf32>
    %1083 = arith.addf %1081, %1082 : vector<2x8xf32>
    %1084 = arith.truncf %1071 : vector<2x16xf32> to vector<2x16xbf16>
    %cst_323 = arith.constant dense<0.000000e+00> : vector<2x128xf32>
    %1085 = tpu.matmul %1084, %17, %cst_323 {dimension_numbers = #tpu.dot_dimension_numbers<[1], [0], [0], [1], [0, 0, 1, 1], [], []>} : vector<2x16xbf16>, vector<16x128xbf16>, vector<2x128xf32> -> vector<2x128xf32>
    %1086 = arith.truncf %876 : vector<2x32xf32> to vector<2x32xbf16>
    %cst_324 = arith.constant dense<0.000000e+00> : vector<2x128xf32>
    %1087 = tpu.matmul %1086, %20, %cst_324 {dimension_numbers = #tpu.dot_dimension_numbers<[1], [0], [0], [1], [0, 0, 1, 1], [], []>} : vector<2x32xbf16>, vector<32x128xbf16>, vector<2x128xf32> -> vector<2x128xf32>
    %1088 = arith.addf %1085, %1087 : vector<2x128xf32>
    %1089 = vector.broadcast %14 : vector<1x128xf32> to vector<2x128xf32>
    %1090 = arith.addf %1088, %1089 : vector<2x128xf32>
    %1091 = arith.truncf %1077 : vector<2x8xf32> to vector<2x8xbf16>
    %cst_325 = arith.constant dense<0.000000e+00> : vector<2x128xf32>
    %1092 = tpu.matmul %1091, %18, %cst_325 {dimension_numbers = #tpu.dot_dimension_numbers<[1], [0], [0], [1], [0, 0, 1, 1], [], []>} : vector<2x8xbf16>, vector<8x128xbf16>, vector<2x128xf32> -> vector<2x128xf32>
    %1093 = arith.addf %1090, %1092 : vector<2x128xf32>
    %1094 = arith.truncf %1083 : vector<2x8xf32> to vector<2x8xbf16>
    %cst_326 = arith.constant dense<0.000000e+00> : vector<2x128xf32>
    %1095 = tpu.matmul %1094, %19, %cst_326 {dimension_numbers = #tpu.dot_dimension_numbers<[1], [0], [0], [1], [0, 0, 1, 1], [], []>} : vector<2x8xbf16>, vector<8x128xbf16>, vector<2x128xf32> -> vector<2x128xf32>
    %1096 = arith.addf %1093, %1095 : vector<2x128xf32>
    %1097 = vector.extract_strided_slice %1096 {offsets = [0, 0], sizes = [2, 32], strides = [1, 1]} : vector<2x128xf32> to vector<2x32xf32>
    %cst_327 = arith.constant 5.000000e-01 : f32
    %1098 = vector.broadcast %cst_327 : f32 to vector<2x32xf32>
    %1099 = arith.mulf %1098, %1097 : vector<2x32xf32>
    %1100 = math.tanh %1099 : vector<2x32xf32>
    %cst_328 = arith.constant 5.000000e-01 : f32
    %1101 = vector.broadcast %cst_328 : f32 to vector<2x32xf32>
    %1102 = arith.mulf %1101, %1100 : vector<2x32xf32>
    %cst_329 = arith.constant 5.000000e-01 : f32
    %1103 = vector.broadcast %cst_329 : f32 to vector<2x32xf32>
    %1104 = arith.addf %1102, %1103 : vector<2x32xf32>
    %1105 = vector.extract_strided_slice %1096 {offsets = [0, 32], sizes = [2, 32], strides = [1, 1]} : vector<2x128xf32> to vector<2x32xf32>
    %cst_330 = arith.constant 5.000000e-01 : f32
    %1106 = vector.broadcast %cst_330 : f32 to vector<2x32xf32>
    %1107 = arith.mulf %1106, %1105 : vector<2x32xf32>
    %1108 = math.tanh %1107 : vector<2x32xf32>
    %cst_331 = arith.constant 5.000000e-01 : f32
    %1109 = vector.broadcast %cst_331 : f32 to vector<2x32xf32>
    %1110 = arith.mulf %1109, %1108 : vector<2x32xf32>
    %cst_332 = arith.constant 5.000000e-01 : f32
    %1111 = vector.broadcast %cst_332 : f32 to vector<2x32xf32>
    %1112 = arith.addf %1110, %1111 : vector<2x32xf32>
    %1113 = vector.extract_strided_slice %1096 {offsets = [0, 64], sizes = [2, 32], strides = [1, 1]} : vector<2x128xf32> to vector<2x32xf32>
    %1114 = math.tanh %1113 : vector<2x32xf32>
    %1115 = vector.extract_strided_slice %1096 {offsets = [0, 96], sizes = [2, 32], strides = [1, 1]} : vector<2x128xf32> to vector<2x32xf32>
    %cst_333 = arith.constant 5.000000e-01 : f32
    %1116 = vector.broadcast %cst_333 : f32 to vector<2x32xf32>
    %1117 = arith.mulf %1116, %1115 : vector<2x32xf32>
    %1118 = math.tanh %1117 : vector<2x32xf32>
    %cst_334 = arith.constant 5.000000e-01 : f32
    %1119 = vector.broadcast %cst_334 : f32 to vector<2x32xf32>
    %1120 = arith.mulf %1119, %1118 : vector<2x32xf32>
    %cst_335 = arith.constant 5.000000e-01 : f32
    %1121 = vector.broadcast %cst_335 : f32 to vector<2x32xf32>
    %1122 = arith.addf %1120, %1121 : vector<2x32xf32>
    %1123 = arith.mulf %1112, %874 : vector<2x32xf32>
    %1124 = arith.mulf %1104, %1114 : vector<2x32xf32>
    %1125 = arith.addf %1123, %1124 : vector<2x32xf32>
    %1126 = math.tanh %1125 : vector<2x32xf32>
    %1127 = arith.mulf %1122, %1126 : vector<2x32xf32>
    %cst_336 = arith.constant dense<0.000000e+00> : vector<2xf32>
    %1128 = vector.multi_reduction <add>, %1127, %cst_336 [1] : vector<2x32xf32> to vector<2xf32>
    %1129 = vector.shape_cast %1128 : vector<2xf32> to vector<2x1xf32>
    %cst_337 = arith.constant 3.200000e+01 : f32
    %1130 = vector.broadcast %cst_337 : f32 to vector<2x1xf32>
    %1131 = arith.divf %1129, %1130 : vector<2x1xf32>
    %1132 = vector.broadcast %1131 : vector<2x1xf32> to vector<2x32xf32>
    %1133 = arith.subf %1127, %1132 : vector<2x32xf32>
    %1134 = arith.mulf %1133, %1133 : vector<2x32xf32>
    %cst_338 = arith.constant dense<0.000000e+00> : vector<2xf32>
    %1135 = vector.multi_reduction <add>, %1134, %cst_338 [1] : vector<2x32xf32> to vector<2xf32>
    %1136 = vector.shape_cast %1135 : vector<2xf32> to vector<2x1xf32>
    %cst_339 = arith.constant 3.200000e+01 : f32
    %1137 = vector.broadcast %cst_339 : f32 to vector<2x1xf32>
    %1138 = arith.divf %1136, %1137 : vector<2x1xf32>
    %cst_340 = arith.constant 9.99999974E-6 : f32
    %1139 = vector.broadcast %cst_340 : f32 to vector<2x1xf32>
    %1140 = arith.addf %1138, %1139 : vector<2x1xf32>
    %1141 = math.rsqrt %1140 : vector<2x1xf32>
    %1142 = vector.broadcast %1141 : vector<2x1xf32> to vector<2x32xf32>
    %1143 = arith.mulf %1133, %1142 : vector<2x32xf32>
    %1144 = vector.broadcast %6 : vector<1x32xf32> to vector<2x32xf32>
    %1145 = arith.mulf %1143, %1144 : vector<2x32xf32>
    %1146 = vector.broadcast %7 : vector<1x32xf32> to vector<2x32xf32>
    %1147 = arith.addf %1145, %1146 : vector<2x32xf32>
    %1148 = arith.truncf %1147 : vector<2x32xf32> to vector<2x32xbf16>
    %cst_341 = arith.constant dense<0.000000e+00> : vector<2x40xf32>
    %1149 = tpu.matmul %1148, %21, %cst_341 {dimension_numbers = #tpu.dot_dimension_numbers<[1], [0], [0], [1], [0, 0, 1, 1], [], []>} : vector<2x32xbf16>, vector<32x40xbf16>, vector<2x40xf32> -> vector<2x40xf32>
    %1150 = vector.broadcast %15 : vector<1x40xf32> to vector<2x40xf32>
    %1151 = arith.addf %1149, %1150 : vector<2x40xf32>
    %1152 = vector.extract_strided_slice %1151 {offsets = [0, 16], sizes = [2, 8], strides = [1, 1]} : vector<2x40xf32> to vector<2x8xf32>
    %cst_342 = arith.constant 5.000000e-01 : f32
    %1153 = vector.broadcast %cst_342 : f32 to vector<2x8xf32>
    %1154 = arith.mulf %1153, %1152 : vector<2x8xf32>
    %1155 = math.tanh %1154 : vector<2x8xf32>
    %cst_343 = arith.constant 5.000000e-01 : f32
    %1156 = vector.broadcast %cst_343 : f32 to vector<2x8xf32>
    %1157 = arith.mulf %1156, %1155 : vector<2x8xf32>
    %cst_344 = arith.constant 5.000000e-01 : f32
    %1158 = vector.broadcast %cst_344 : f32 to vector<2x8xf32>
    %1159 = arith.addf %1157, %1158 : vector<2x8xf32>
    %1160 = vector.extract_strided_slice %1151 {offsets = [0, 24], sizes = [2, 8], strides = [1, 1]} : vector<2x40xf32> to vector<2x8xf32>
    %1161 = math.tanh %1160 : vector<2x8xf32>
    %1162 = vector.extract_strided_slice %1151 {offsets = [0, 32], sizes = [2, 1], strides = [1, 1]} : vector<2x40xf32> to vector<2x1xf32>
    %cst_345 = arith.constant 5.000000e-01 : f32
    %1163 = vector.broadcast %cst_345 : f32 to vector<2x1xf32>
    %1164 = arith.mulf %1163, %1162 : vector<2x1xf32>
    %1165 = math.tanh %1164 : vector<2x1xf32>
    %cst_346 = arith.constant 5.000000e-01 : f32
    %1166 = vector.broadcast %cst_346 : f32 to vector<2x1xf32>
    %1167 = arith.mulf %1166, %1165 : vector<2x1xf32>
    %cst_347 = arith.constant 5.000000e-01 : f32
    %1168 = vector.broadcast %cst_347 : f32 to vector<2x1xf32>
    %1169 = arith.addf %1167, %1168 : vector<2x1xf32>
    %1170 = vector.broadcast %1169 : vector<2x1xf32> to vector<2x8xf32>
    %1171 = arith.mulf %1170, %1159 : vector<2x8xf32>
    %1172 = vector.shape_cast %1171 : vector<2x8xf32> to vector<2x1x8xf32>
    %cst_348 = arith.constant 1.000000e+00 : f32
    %1173 = vector.broadcast %cst_348 : f32 to vector<2x1x8xf32>
    %1174 = arith.subf %1173, %1172 : vector<2x1x8xf32>
    %1175 = vector.broadcast %1174 : vector<2x1x8xf32> to vector<2x16x8xf32>
    %1176 = arith.mulf %930, %1175 : vector<2x16x8xf32>
    %1177 = vector.broadcast %1169 : vector<2x1xf32> to vector<2x8xf32>
    %1178 = arith.mulf %1177, %1161 : vector<2x8xf32>
    %1179 = vector.shape_cast %1178 : vector<2x8xf32> to vector<2x1x8xf32>
    %1180 = vector.broadcast %1179 : vector<2x1x8xf32> to vector<2x16x8xf32>
    %1181 = arith.addf %1176, %1180 : vector<2x16x8xf32>
    %cst_349 = arith.constant dense<0.000000e+00> : vector<2x16xf32>
    %1182 = vector.multi_reduction <add>, %1181, %cst_349 [2] : vector<2x16x8xf32> to vector<2x16xf32>
    %1183 = vector.shape_cast %1182 : vector<2x16xf32> to vector<2x16x1xf32>
    %cst_350 = arith.constant 8.000000e+00 : f32
    %1184 = vector.broadcast %cst_350 : f32 to vector<2x16x1xf32>
    %1185 = arith.divf %1183, %1184 : vector<2x16x1xf32>
    %1186 = vector.broadcast %1185 : vector<2x16x1xf32> to vector<2x16x8xf32>
    %1187 = arith.subf %1181, %1186 : vector<2x16x8xf32>
    %1188 = arith.mulf %1187, %1187 : vector<2x16x8xf32>
    %cst_351 = arith.constant dense<0.000000e+00> : vector<2x16xf32>
    %1189 = vector.multi_reduction <add>, %1188, %cst_351 [2] : vector<2x16x8xf32> to vector<2x16xf32>
    %1190 = vector.shape_cast %1189 : vector<2x16xf32> to vector<2x16x1xf32>
    %cst_352 = arith.constant 8.000000e+00 : f32
    %1191 = vector.broadcast %cst_352 : f32 to vector<2x16x1xf32>
    %1192 = arith.divf %1190, %1191 : vector<2x16x1xf32>
    %cst_353 = arith.constant 9.99999974E-6 : f32
    %1193 = vector.broadcast %cst_353 : f32 to vector<2x16x1xf32>
    %1194 = arith.addf %1192, %1193 : vector<2x16x1xf32>
    %1195 = math.rsqrt %1194 : vector<2x16x1xf32>
    %1196 = vector.broadcast %1195 : vector<2x16x1xf32> to vector<2x16x8xf32>
    %1197 = arith.mulf %1187, %1196 : vector<2x16x8xf32>
    %1198 = vector.shape_cast %10 : vector<1x8xf32> to vector<1x1x8xf32>
    %1199 = vector.broadcast %1198 : vector<1x1x8xf32> to vector<2x16x8xf32>
    %1200 = arith.mulf %1197, %1199 : vector<2x16x8xf32>
    %1201 = vector.shape_cast %11 : vector<1x8xf32> to vector<1x1x8xf32>
    %1202 = vector.broadcast %1201 : vector<1x1x8xf32> to vector<2x16x8xf32>
    %1203 = arith.addf %1200, %1202 : vector<2x16x8xf32>
    %1204 = arith.truncf %1203 : vector<2x16x8xf32> to vector<2x16x8xbf16>
    %1205 = arith.truncf %1181 : vector<2x16x8xf32> to vector<2x16x8xbf16>
    %c8 = arith.constant 8 : index
    %c0_354 = arith.constant 0 : index
    %1206 = vector.load %arg11[%c8, %c0_354] : memref<16x48xf32, #tpu.memory_space<vmem>>, vector<2x32xf32>
    tpu.vector_store %arg11[%c8, %c0_354], %1147 {strides = array<i32>} : memref<16x48xf32, #tpu.memory_space<vmem>>, vector<2x32xf32>,
    %1207 = vector.extract_strided_slice %1151 {offsets = [0, 0], sizes = [2, 8], strides = [1, 1]} : vector<2x40xf32> to vector<2x8xf32>
    %cst_355 = arith.constant dense<0.000000e+00> : vector<2xf32>
    %1208 = vector.multi_reduction <add>, %1207, %cst_355 [1] : vector<2x8xf32> to vector<2xf32>
    %1209 = vector.shape_cast %1208 : vector<2xf32> to vector<2x1xf32>
    %cst_356 = arith.constant 8.000000e+00 : f32
    %1210 = vector.broadcast %cst_356 : f32 to vector<2x1xf32>
    %1211 = arith.divf %1209, %1210 : vector<2x1xf32>
    %1212 = vector.broadcast %1211 : vector<2x1xf32> to vector<2x8xf32>
    %1213 = arith.subf %1207, %1212 : vector<2x8xf32>
    %1214 = arith.mulf %1213, %1213 : vector<2x8xf32>
    %cst_357 = arith.constant dense<0.000000e+00> : vector<2xf32>
    %1215 = vector.multi_reduction <add>, %1214, %cst_357 [1] : vector<2x8xf32> to vector<2xf32>
    %1216 = vector.shape_cast %1215 : vector<2xf32> to vector<2x1xf32>
    %cst_358 = arith.constant 8.000000e+00 : f32
    %1217 = vector.broadcast %cst_358 : f32 to vector<2x1xf32>
    %1218 = arith.divf %1216, %1217 : vector<2x1xf32>
    %cst_359 = arith.constant 9.99999974E-6 : f32
    %1219 = vector.broadcast %cst_359 : f32 to vector<2x1xf32>
    %1220 = arith.addf %1218, %1219 : vector<2x1xf32>
    %1221 = math.rsqrt %1220 : vector<2x1xf32>
    %1222 = vector.broadcast %1221 : vector<2x1xf32> to vector<2x8xf32>
    %1223 = arith.mulf %1213, %1222 : vector<2x8xf32>
    %1224 = vector.broadcast %8 : vector<1x8xf32> to vector<2x8xf32>
    %1225 = arith.mulf %1223, %1224 : vector<2x8xf32>
    %1226 = vector.broadcast %9 : vector<1x8xf32> to vector<2x8xf32>
    %1227 = arith.addf %1225, %1226 : vector<2x8xf32>
    %1228 = vector.shape_cast %1227 : vector<2x8xf32> to vector<2x1x8xf32>
    %1229 = arith.truncf %1228 : vector<2x1x8xf32> to vector<2x1x8xbf16>
    "tpu.trace_start"() <{level = 10 : i32, message = "bqd,bmd->bqm"}> : () -> ()
    %cst_360 = arith.constant dense<0.000000e+00> : vector<2x1x16xf32>
    %1230 = tpu.matmul %1229, %1204, %cst_360 {dimension_numbers = #tpu.dot_dimension_numbers<[2], [2], [1], [1], [0, 0, 0, 1, 1, 1], [0], [0]>} : vector<2x1x8xbf16>, vector<2x16x8xbf16>, vector<2x1x16xf32> -> vector<2x1x16xf32>
    "tpu.trace_stop"() : () -> ()
    %cst_361 = arith.constant dense<0xFF800000> : vector<2x1xf32>
    %1231 = vector.multi_reduction <maximumf>, %1230, %cst_361 [2] : vector<2x1x16xf32> to vector<2x1xf32>
    %1232 = vector.shape_cast %1231 : vector<2x1xf32> to vector<2x1x1xf32>
    %1233 = vector.broadcast %1232 : vector<2x1x1xf32> to vector<2x1x16xf32>
    %1234 = arith.subf %1230, %1233 : vector<2x1x16xf32>
    %1235 = math.exp %1234 : vector<2x1x16xf32>
    %cst_362 = arith.constant dense<0.000000e+00> : vector<2x1xf32>
    %1236 = vector.multi_reduction <add>, %1235, %cst_362 [2] : vector<2x1x16xf32> to vector<2x1xf32>
    %1237 = vector.shape_cast %1236 : vector<2x1xf32> to vector<2x1x1xf32>
    %1238 = tpu.reciprocal %1237 {approx = true} : vector<2x1x1xf32> -> vector<2x1x1xf32>
    %1239 = vector.broadcast %1238 : vector<2x1x1xf32> to vector<2x1x16xf32>
    %1240 = arith.mulf %1235, %1239 : vector<2x1x16xf32>
    %1241 = arith.truncf %1240 : vector<2x1x16xf32> to vector<2x1x16xbf16>
    "tpu.trace_start"() <{level = 10 : i32, message = "bqm,bmd->bqd"}> : () -> ()
    %cst_363 = arith.constant dense<0.000000e+00> : vector<2x1x8xf32>
    %1242 = tpu.matmul %1241, %1205, %cst_363 {dimension_numbers = #tpu.dot_dimension_numbers<[2], [1], [1], [2], [0, 0, 0, 1, 1, 2], [0], [0]>} : vector<2x1x16xbf16>, vector<2x16x8xbf16>, vector<2x1x8xf32> -> vector<2x1x8xf32>
    "tpu.trace_stop"() : () -> ()
    %cst_364 = arith.constant dense<0.000000e+00> : vector<2x8xf32>
    %1243 = vector.multi_reduction <add>, %1242, %cst_364 [1] : vector<2x1x8xf32> to vector<2x8xf32>
    %c8_365 = arith.constant 8 : index
    %c32_366 = arith.constant 32 : index
    %1244 = vector.load %arg11[%c8_365, %c32_366] : memref<16x48xf32, #tpu.memory_space<vmem>>, vector<2x8xf32>
    tpu.vector_store %arg11[%c8_365, %c32_366], %1243 {strides = array<i32>} : memref<16x48xf32, #tpu.memory_space<vmem>>, vector<2x8xf32>,
    %1245 = vector.extract_strided_slice %1151 {offsets = [0, 8], sizes = [2, 8], strides = [1, 1]} : vector<2x40xf32> to vector<2x8xf32>
    %cst_367 = arith.constant dense<0.000000e+00> : vector<2xf32>
    %1246 = vector.multi_reduction <add>, %1245, %cst_367 [1] : vector<2x8xf32> to vector<2xf32>
    %1247 = vector.shape_cast %1246 : vector<2xf32> to vector<2x1xf32>
    %cst_368 = arith.constant 8.000000e+00 : f32
    %1248 = vector.broadcast %cst_368 : f32 to vector<2x1xf32>
    %1249 = arith.divf %1247, %1248 : vector<2x1xf32>
    %1250 = vector.broadcast %1249 : vector<2x1xf32> to vector<2x8xf32>
    %1251 = arith.subf %1245, %1250 : vector<2x8xf32>
    %1252 = arith.mulf %1251, %1251 : vector<2x8xf32>
    %cst_369 = arith.constant dense<0.000000e+00> : vector<2xf32>
    %1253 = vector.multi_reduction <add>, %1252, %cst_369 [1] : vector<2x8xf32> to vector<2xf32>
    %1254 = vector.shape_cast %1253 : vector<2xf32> to vector<2x1xf32>
    %cst_370 = arith.constant 8.000000e+00 : f32
    %1255 = vector.broadcast %cst_370 : f32 to vector<2x1xf32>
    %1256 = arith.divf %1254, %1255 : vector<2x1xf32>
    %cst_371 = arith.constant 9.99999974E-6 : f32
    %1257 = vector.broadcast %cst_371 : f32 to vector<2x1xf32>
    %1258 = arith.addf %1256, %1257 : vector<2x1xf32>
    %1259 = math.rsqrt %1258 : vector<2x1xf32>
    %1260 = vector.broadcast %1259 : vector<2x1xf32> to vector<2x8xf32>
    %1261 = arith.mulf %1251, %1260 : vector<2x8xf32>
    %1262 = vector.broadcast %8 : vector<1x8xf32> to vector<2x8xf32>
    %1263 = arith.mulf %1261, %1262 : vector<2x8xf32>
    %1264 = vector.broadcast %9 : vector<1x8xf32> to vector<2x8xf32>
    %1265 = arith.addf %1263, %1264 : vector<2x8xf32>
    %1266 = vector.shape_cast %1265 : vector<2x8xf32> to vector<2x1x8xf32>
    %1267 = arith.truncf %1266 : vector<2x1x8xf32> to vector<2x1x8xbf16>
    "tpu.trace_start"() <{level = 10 : i32, message = "bqd,bmd->bqm"}> : () -> ()
    %cst_372 = arith.constant dense<0.000000e+00> : vector<2x1x16xf32>
    %1268 = tpu.matmul %1267, %1204, %cst_372 {dimension_numbers = #tpu.dot_dimension_numbers<[2], [2], [1], [1], [0, 0, 0, 1, 1, 1], [0], [0]>} : vector<2x1x8xbf16>, vector<2x16x8xbf16>, vector<2x1x16xf32> -> vector<2x1x16xf32>
    "tpu.trace_stop"() : () -> ()
    %cst_373 = arith.constant dense<0xFF800000> : vector<2x1xf32>
    %1269 = vector.multi_reduction <maximumf>, %1268, %cst_373 [2] : vector<2x1x16xf32> to vector<2x1xf32>
    %1270 = vector.shape_cast %1269 : vector<2x1xf32> to vector<2x1x1xf32>
    %1271 = vector.broadcast %1270 : vector<2x1x1xf32> to vector<2x1x16xf32>
    %1272 = arith.subf %1268, %1271 : vector<2x1x16xf32>
    %1273 = math.exp %1272 : vector<2x1x16xf32>
    %cst_374 = arith.constant dense<0.000000e+00> : vector<2x1xf32>
    %1274 = vector.multi_reduction <add>, %1273, %cst_374 [2] : vector<2x1x16xf32> to vector<2x1xf32>
    %1275 = vector.shape_cast %1274 : vector<2x1xf32> to vector<2x1x1xf32>
    %1276 = tpu.reciprocal %1275 {approx = true} : vector<2x1x1xf32> -> vector<2x1x1xf32>
    %1277 = vector.broadcast %1276 : vector<2x1x1xf32> to vector<2x1x16xf32>
    %1278 = arith.mulf %1273, %1277 : vector<2x1x16xf32>
    %1279 = arith.truncf %1278 : vector<2x1x16xf32> to vector<2x1x16xbf16>
    "tpu.trace_start"() <{level = 10 : i32, message = "bqm,bmd->bqd"}> : () -> ()
    %cst_375 = arith.constant dense<0.000000e+00> : vector<2x1x8xf32>
    %1280 = tpu.matmul %1279, %1205, %cst_375 {dimension_numbers = #tpu.dot_dimension_numbers<[2], [1], [1], [2], [0, 0, 0, 1, 1, 2], [0], [0]>} : vector<2x1x16xbf16>, vector<2x16x8xbf16>, vector<2x1x8xf32> -> vector<2x1x8xf32>
    "tpu.trace_stop"() : () -> ()
    %cst_376 = arith.constant dense<0.000000e+00> : vector<2x8xf32>
    %1281 = vector.multi_reduction <add>, %1280, %cst_376 [1] : vector<2x1x8xf32> to vector<2x8xf32>
    %c8_377 = arith.constant 8 : index
    %c40_378 = arith.constant 40 : index
    %1282 = vector.load %arg11[%c8_377, %c40_378] : memref<16x48xf32, #tpu.memory_space<vmem>>, vector<2x8xf32>
    tpu.vector_store %arg11[%c8_377, %c40_378], %1281 {strides = array<i32>} : memref<16x48xf32, #tpu.memory_space<vmem>>, vector<2x8xf32>,
    %c5 = arith.constant 5 : index
    %c0_379 = arith.constant 0 : index
    %c0_380 = arith.constant 0 : index
    %1283 = vector.load %arg1[%c5, %c0_379, %c0_380] : memref<8x2x16xf32, #tpu.memory_space<vmem>>, vector<1x2x16xf32>
    %1284 = vector.shape_cast %1283 : vector<1x2x16xf32> to vector<2x16xf32>
    %cst_381 = arith.constant dense<0.000000e+00> : vector<2xf32>
    %1285 = vector.multi_reduction <add>, %1284, %cst_381 [1] : vector<2x16xf32> to vector<2xf32>
    %1286 = vector.shape_cast %1285 : vector<2xf32> to vector<2x1xf32>
    %cst_382 = arith.constant dense<0.000000e+00> : vector<2xf32>
    %1287 = vector.multi_reduction <add>, %1243, %cst_382 [1] : vector<2x8xf32> to vector<2xf32>
    %1288 = vector.shape_cast %1287 : vector<2xf32> to vector<2x1xf32>
    %1289 = arith.addf %1286, %1288 : vector<2x1xf32>
    %cst_383 = arith.constant dense<0.000000e+00> : vector<2xf32>
    %1290 = vector.multi_reduction <add>, %1281, %cst_383 [1] : vector<2x8xf32> to vector<2xf32>
    %1291 = vector.shape_cast %1290 : vector<2xf32> to vector<2x1xf32>
    %1292 = arith.addf %1289, %1291 : vector<2x1xf32>
    %cst_384 = arith.constant 3.125000e-02 : f32
    %1293 = vector.broadcast %cst_384 : f32 to vector<2x1xf32>
    %1294 = arith.mulf %1292, %1293 : vector<2x1xf32>
    %1295 = vector.broadcast %1294 : vector<2x1xf32> to vector<2x16xf32>
    %1296 = arith.subf %1284, %1295 : vector<2x16xf32>
    %1297 = vector.broadcast %1294 : vector<2x1xf32> to vector<2x8xf32>
    %1298 = arith.subf %1243, %1297 : vector<2x8xf32>
    %1299 = vector.broadcast %1294 : vector<2x1xf32> to vector<2x8xf32>
    %1300 = arith.subf %1281, %1299 : vector<2x8xf32>
    %1301 = arith.mulf %1296, %1296 : vector<2x16xf32>
    %cst_385 = arith.constant dense<0.000000e+00> : vector<2xf32>
    %1302 = vector.multi_reduction <add>, %1301, %cst_385 [1] : vector<2x16xf32> to vector<2xf32>
    %1303 = vector.shape_cast %1302 : vector<2xf32> to vector<2x1xf32>
    %1304 = arith.mulf %1298, %1298 : vector<2x8xf32>
    %cst_386 = arith.constant dense<0.000000e+00> : vector<2xf32>
    %1305 = vector.multi_reduction <add>, %1304, %cst_386 [1] : vector<2x8xf32> to vector<2xf32>
    %1306 = vector.shape_cast %1305 : vector<2xf32> to vector<2x1xf32>
    %1307 = arith.addf %1303, %1306 : vector<2x1xf32>
    %1308 = arith.mulf %1300, %1300 : vector<2x8xf32>
    %cst_387 = arith.constant dense<0.000000e+00> : vector<2xf32>
    %1309 = vector.multi_reduction <add>, %1308, %cst_387 [1] : vector<2x8xf32> to vector<2xf32>
    %1310 = vector.shape_cast %1309 : vector<2xf32> to vector<2x1xf32>
    %1311 = arith.addf %1307, %1310 : vector<2x1xf32>
    %cst_388 = arith.constant 3.125000e-02 : f32
    %1312 = vector.broadcast %cst_388 : f32 to vector<2x1xf32>
    %1313 = arith.mulf %1311, %1312 : vector<2x1xf32>
    %cst_389 = arith.constant 9.99999974E-6 : f32
    %1314 = vector.broadcast %cst_389 : f32 to vector<2x1xf32>
    %1315 = arith.addf %1313, %1314 : vector<2x1xf32>
    %1316 = math.rsqrt %1315 : vector<2x1xf32>
    %1317 = vector.broadcast %1316 : vector<2x1xf32> to vector<2x16xf32>
    %1318 = arith.mulf %1296, %1317 : vector<2x16xf32>
    %1319 = vector.broadcast %0 : vector<1x16xf32> to vector<2x16xf32>
    %1320 = arith.mulf %1318, %1319 : vector<2x16xf32>
    %1321 = vector.broadcast %1 : vector<1x16xf32> to vector<2x16xf32>
    %1322 = arith.addf %1320, %1321 : vector<2x16xf32>
    %1323 = vector.broadcast %1316 : vector<2x1xf32> to vector<2x8xf32>
    %1324 = arith.mulf %1298, %1323 : vector<2x8xf32>
    %1325 = vector.broadcast %2 : vector<1x8xf32> to vector<2x8xf32>
    %1326 = arith.mulf %1324, %1325 : vector<2x8xf32>
    %1327 = vector.broadcast %4 : vector<1x8xf32> to vector<2x8xf32>
    %1328 = arith.addf %1326, %1327 : vector<2x8xf32>
    %1329 = vector.broadcast %1316 : vector<2x1xf32> to vector<2x8xf32>
    %1330 = arith.mulf %1300, %1329 : vector<2x8xf32>
    %1331 = vector.broadcast %3 : vector<1x8xf32> to vector<2x8xf32>
    %1332 = arith.mulf %1330, %1331 : vector<2x8xf32>
    %1333 = vector.broadcast %5 : vector<1x8xf32> to vector<2x8xf32>
    %1334 = arith.addf %1332, %1333 : vector<2x8xf32>
    %1335 = arith.truncf %1322 : vector<2x16xf32> to vector<2x16xbf16>
    %cst_390 = arith.constant dense<0.000000e+00> : vector<2x128xf32>
    %1336 = tpu.matmul %1335, %17, %cst_390 {dimension_numbers = #tpu.dot_dimension_numbers<[1], [0], [0], [1], [0, 0, 1, 1], [], []>} : vector<2x16xbf16>, vector<16x128xbf16>, vector<2x128xf32> -> vector<2x128xf32>
    %1337 = arith.truncf %1127 : vector<2x32xf32> to vector<2x32xbf16>
    %cst_391 = arith.constant dense<0.000000e+00> : vector<2x128xf32>
    %1338 = tpu.matmul %1337, %20, %cst_391 {dimension_numbers = #tpu.dot_dimension_numbers<[1], [0], [0], [1], [0, 0, 1, 1], [], []>} : vector<2x32xbf16>, vector<32x128xbf16>, vector<2x128xf32> -> vector<2x128xf32>
    %1339 = arith.addf %1336, %1338 : vector<2x128xf32>
    %1340 = vector.broadcast %14 : vector<1x128xf32> to vector<2x128xf32>
    %1341 = arith.addf %1339, %1340 : vector<2x128xf32>
    %1342 = arith.truncf %1328 : vector<2x8xf32> to vector<2x8xbf16>
    %cst_392 = arith.constant dense<0.000000e+00> : vector<2x128xf32>
    %1343 = tpu.matmul %1342, %18, %cst_392 {dimension_numbers = #tpu.dot_dimension_numbers<[1], [0], [0], [1], [0, 0, 1, 1], [], []>} : vector<2x8xbf16>, vector<8x128xbf16>, vector<2x128xf32> -> vector<2x128xf32>
    %1344 = arith.addf %1341, %1343 : vector<2x128xf32>
    %1345 = arith.truncf %1334 : vector<2x8xf32> to vector<2x8xbf16>
    %cst_393 = arith.constant dense<0.000000e+00> : vector<2x128xf32>
    %1346 = tpu.matmul %1345, %19, %cst_393 {dimension_numbers = #tpu.dot_dimension_numbers<[1], [0], [0], [1], [0, 0, 1, 1], [], []>} : vector<2x8xbf16>, vector<8x128xbf16>, vector<2x128xf32> -> vector<2x128xf32>
    %1347 = arith.addf %1344, %1346 : vector<2x128xf32>
    %1348 = vector.extract_strided_slice %1347 {offsets = [0, 0], sizes = [2, 32], strides = [1, 1]} : vector<2x128xf32> to vector<2x32xf32>
    %cst_394 = arith.constant 5.000000e-01 : f32
    %1349 = vector.broadcast %cst_394 : f32 to vector<2x32xf32>
    %1350 = arith.mulf %1349, %1348 : vector<2x32xf32>
    %1351 = math.tanh %1350 : vector<2x32xf32>
    %cst_395 = arith.constant 5.000000e-01 : f32
    %1352 = vector.broadcast %cst_395 : f32 to vector<2x32xf32>
    %1353 = arith.mulf %1352, %1351 : vector<2x32xf32>
    %cst_396 = arith.constant 5.000000e-01 : f32
    %1354 = vector.broadcast %cst_396 : f32 to vector<2x32xf32>
    %1355 = arith.addf %1353, %1354 : vector<2x32xf32>
    %1356 = vector.extract_strided_slice %1347 {offsets = [0, 32], sizes = [2, 32], strides = [1, 1]} : vector<2x128xf32> to vector<2x32xf32>
    %cst_397 = arith.constant 5.000000e-01 : f32
    %1357 = vector.broadcast %cst_397 : f32 to vector<2x32xf32>
    %1358 = arith.mulf %1357, %1356 : vector<2x32xf32>
    %1359 = math.tanh %1358 : vector<2x32xf32>
    %cst_398 = arith.constant 5.000000e-01 : f32
    %1360 = vector.broadcast %cst_398 : f32 to vector<2x32xf32>
    %1361 = arith.mulf %1360, %1359 : vector<2x32xf32>
    %cst_399 = arith.constant 5.000000e-01 : f32
    %1362 = vector.broadcast %cst_399 : f32 to vector<2x32xf32>
    %1363 = arith.addf %1361, %1362 : vector<2x32xf32>
    %1364 = vector.extract_strided_slice %1347 {offsets = [0, 64], sizes = [2, 32], strides = [1, 1]} : vector<2x128xf32> to vector<2x32xf32>
    %1365 = math.tanh %1364 : vector<2x32xf32>
    %1366 = vector.extract_strided_slice %1347 {offsets = [0, 96], sizes = [2, 32], strides = [1, 1]} : vector<2x128xf32> to vector<2x32xf32>
    %cst_400 = arith.constant 5.000000e-01 : f32
    %1367 = vector.broadcast %cst_400 : f32 to vector<2x32xf32>
    %1368 = arith.mulf %1367, %1366 : vector<2x32xf32>
    %1369 = math.tanh %1368 : vector<2x32xf32>
    %cst_401 = arith.constant 5.000000e-01 : f32
    %1370 = vector.broadcast %cst_401 : f32 to vector<2x32xf32>
    %1371 = arith.mulf %1370, %1369 : vector<2x32xf32>
    %cst_402 = arith.constant 5.000000e-01 : f32
    %1372 = vector.broadcast %cst_402 : f32 to vector<2x32xf32>
    %1373 = arith.addf %1371, %1372 : vector<2x32xf32>
    %1374 = arith.mulf %1363, %1125 : vector<2x32xf32>
    %1375 = arith.mulf %1355, %1365 : vector<2x32xf32>
    %1376 = arith.addf %1374, %1375 : vector<2x32xf32>
    %1377 = math.tanh %1376 : vector<2x32xf32>
    %1378 = arith.mulf %1373, %1377 : vector<2x32xf32>
    %cst_403 = arith.constant dense<0.000000e+00> : vector<2xf32>
    %1379 = vector.multi_reduction <add>, %1378, %cst_403 [1] : vector<2x32xf32> to vector<2xf32>
    %1380 = vector.shape_cast %1379 : vector<2xf32> to vector<2x1xf32>
    %cst_404 = arith.constant 3.200000e+01 : f32
    %1381 = vector.broadcast %cst_404 : f32 to vector<2x1xf32>
    %1382 = arith.divf %1380, %1381 : vector<2x1xf32>
    %1383 = vector.broadcast %1382 : vector<2x1xf32> to vector<2x32xf32>
    %1384 = arith.subf %1378, %1383 : vector<2x32xf32>
    %1385 = arith.mulf %1384, %1384 : vector<2x32xf32>
    %cst_405 = arith.constant dense<0.000000e+00> : vector<2xf32>
    %1386 = vector.multi_reduction <add>, %1385, %cst_405 [1] : vector<2x32xf32> to vector<2xf32>
    %1387 = vector.shape_cast %1386 : vector<2xf32> to vector<2x1xf32>
    %cst_406 = arith.constant 3.200000e+01 : f32
    %1388 = vector.broadcast %cst_406 : f32 to vector<2x1xf32>
    %1389 = arith.divf %1387, %1388 : vector<2x1xf32>
    %cst_407 = arith.constant 9.99999974E-6 : f32
    %1390 = vector.broadcast %cst_407 : f32 to vector<2x1xf32>
    %1391 = arith.addf %1389, %1390 : vector<2x1xf32>
    %1392 = math.rsqrt %1391 : vector<2x1xf32>
    %1393 = vector.broadcast %1392 : vector<2x1xf32> to vector<2x32xf32>
    %1394 = arith.mulf %1384, %1393 : vector<2x32xf32>
    %1395 = vector.broadcast %6 : vector<1x32xf32> to vector<2x32xf32>
    %1396 = arith.mulf %1394, %1395 : vector<2x32xf32>
    %1397 = vector.broadcast %7 : vector<1x32xf32> to vector<2x32xf32>
    %1398 = arith.addf %1396, %1397 : vector<2x32xf32>
    %1399 = arith.truncf %1398 : vector<2x32xf32> to vector<2x32xbf16>
    %cst_408 = arith.constant dense<0.000000e+00> : vector<2x40xf32>
    %1400 = tpu.matmul %1399, %21, %cst_408 {dimension_numbers = #tpu.dot_dimension_numbers<[1], [0], [0], [1], [0, 0, 1, 1], [], []>} : vector<2x32xbf16>, vector<32x40xbf16>, vector<2x40xf32> -> vector<2x40xf32>
    %1401 = vector.broadcast %15 : vector<1x40xf32> to vector<2x40xf32>
    %1402 = arith.addf %1400, %1401 : vector<2x40xf32>
    %1403 = vector.extract_strided_slice %1402 {offsets = [0, 16], sizes = [2, 8], strides = [1, 1]} : vector<2x40xf32> to vector<2x8xf32>
    %cst_409 = arith.constant 5.000000e-01 : f32
    %1404 = vector.broadcast %cst_409 : f32 to vector<2x8xf32>
    %1405 = arith.mulf %1404, %1403 : vector<2x8xf32>
    %1406 = math.tanh %1405 : vector<2x8xf32>
    %cst_410 = arith.constant 5.000000e-01 : f32
    %1407 = vector.broadcast %cst_410 : f32 to vector<2x8xf32>
    %1408 = arith.mulf %1407, %1406 : vector<2x8xf32>
    %cst_411 = arith.constant 5.000000e-01 : f32
    %1409 = vector.broadcast %cst_411 : f32 to vector<2x8xf32>
    %1410 = arith.addf %1408, %1409 : vector<2x8xf32>
    %1411 = vector.extract_strided_slice %1402 {offsets = [0, 24], sizes = [2, 8], strides = [1, 1]} : vector<2x40xf32> to vector<2x8xf32>
    %1412 = math.tanh %1411 : vector<2x8xf32>
    %1413 = vector.extract_strided_slice %1402 {offsets = [0, 32], sizes = [2, 1], strides = [1, 1]} : vector<2x40xf32> to vector<2x1xf32>
    %cst_412 = arith.constant 5.000000e-01 : f32
    %1414 = vector.broadcast %cst_412 : f32 to vector<2x1xf32>
    %1415 = arith.mulf %1414, %1413 : vector<2x1xf32>
    %1416 = math.tanh %1415 : vector<2x1xf32>
    %cst_413 = arith.constant 5.000000e-01 : f32
    %1417 = vector.broadcast %cst_413 : f32 to vector<2x1xf32>
    %1418 = arith.mulf %1417, %1416 : vector<2x1xf32>
    %cst_414 = arith.constant 5.000000e-01 : f32
    %1419 = vector.broadcast %cst_414 : f32 to vector<2x1xf32>
    %1420 = arith.addf %1418, %1419 : vector<2x1xf32>
    %1421 = vector.broadcast %1420 : vector<2x1xf32> to vector<2x8xf32>
    %1422 = arith.mulf %1421, %1410 : vector<2x8xf32>
    %1423 = vector.shape_cast %1422 : vector<2x8xf32> to vector<2x1x8xf32>
    %cst_415 = arith.constant 1.000000e+00 : f32
    %1424 = vector.broadcast %cst_415 : f32 to vector<2x1x8xf32>
    %1425 = arith.subf %1424, %1423 : vector<2x1x8xf32>
    %1426 = vector.broadcast %1425 : vector<2x1x8xf32> to vector<2x16x8xf32>
    %1427 = arith.mulf %1181, %1426 : vector<2x16x8xf32>
    %1428 = vector.broadcast %1420 : vector<2x1xf32> to vector<2x8xf32>
    %1429 = arith.mulf %1428, %1412 : vector<2x8xf32>
    %1430 = vector.shape_cast %1429 : vector<2x8xf32> to vector<2x1x8xf32>
    %1431 = vector.broadcast %1430 : vector<2x1x8xf32> to vector<2x16x8xf32>
    %1432 = arith.addf %1427, %1431 : vector<2x16x8xf32>
    %cst_416 = arith.constant dense<0.000000e+00> : vector<2x16xf32>
    %1433 = vector.multi_reduction <add>, %1432, %cst_416 [2] : vector<2x16x8xf32> to vector<2x16xf32>
    %1434 = vector.shape_cast %1433 : vector<2x16xf32> to vector<2x16x1xf32>
    %cst_417 = arith.constant 8.000000e+00 : f32
    %1435 = vector.broadcast %cst_417 : f32 to vector<2x16x1xf32>
    %1436 = arith.divf %1434, %1435 : vector<2x16x1xf32>
    %1437 = vector.broadcast %1436 : vector<2x16x1xf32> to vector<2x16x8xf32>
    %1438 = arith.subf %1432, %1437 : vector<2x16x8xf32>
    %1439 = arith.mulf %1438, %1438 : vector<2x16x8xf32>
    %cst_418 = arith.constant dense<0.000000e+00> : vector<2x16xf32>
    %1440 = vector.multi_reduction <add>, %1439, %cst_418 [2] : vector<2x16x8xf32> to vector<2x16xf32>
    %1441 = vector.shape_cast %1440 : vector<2x16xf32> to vector<2x16x1xf32>
    %cst_419 = arith.constant 8.000000e+00 : f32
    %1442 = vector.broadcast %cst_419 : f32 to vector<2x16x1xf32>
    %1443 = arith.divf %1441, %1442 : vector<2x16x1xf32>
    %cst_420 = arith.constant 9.99999974E-6 : f32
    %1444 = vector.broadcast %cst_420 : f32 to vector<2x16x1xf32>
    %1445 = arith.addf %1443, %1444 : vector<2x16x1xf32>
    %1446 = math.rsqrt %1445 : vector<2x16x1xf32>
    %1447 = vector.broadcast %1446 : vector<2x16x1xf32> to vector<2x16x8xf32>
    %1448 = arith.mulf %1438, %1447 : vector<2x16x8xf32>
    %1449 = vector.shape_cast %10 : vector<1x8xf32> to vector<1x1x8xf32>
    %1450 = vector.broadcast %1449 : vector<1x1x8xf32> to vector<2x16x8xf32>
    %1451 = arith.mulf %1448, %1450 : vector<2x16x8xf32>
    %1452 = vector.shape_cast %11 : vector<1x8xf32> to vector<1x1x8xf32>
    %1453 = vector.broadcast %1452 : vector<1x1x8xf32> to vector<2x16x8xf32>
    %1454 = arith.addf %1451, %1453 : vector<2x16x8xf32>
    %1455 = arith.truncf %1454 : vector<2x16x8xf32> to vector<2x16x8xbf16>
    %1456 = arith.truncf %1432 : vector<2x16x8xf32> to vector<2x16x8xbf16>
    %c10 = arith.constant 10 : index
    %c0_421 = arith.constant 0 : index
    %1457 = vector.load %arg11[%c10, %c0_421] : memref<16x48xf32, #tpu.memory_space<vmem>>, vector<2x32xf32>
    tpu.vector_store %arg11[%c10, %c0_421], %1398 {strides = array<i32>} : memref<16x48xf32, #tpu.memory_space<vmem>>, vector<2x32xf32>,
    %1458 = vector.extract_strided_slice %1402 {offsets = [0, 0], sizes = [2, 8], strides = [1, 1]} : vector<2x40xf32> to vector<2x8xf32>
    %cst_422 = arith.constant dense<0.000000e+00> : vector<2xf32>
    %1459 = vector.multi_reduction <add>, %1458, %cst_422 [1] : vector<2x8xf32> to vector<2xf32>
    %1460 = vector.shape_cast %1459 : vector<2xf32> to vector<2x1xf32>
    %cst_423 = arith.constant 8.000000e+00 : f32
    %1461 = vector.broadcast %cst_423 : f32 to vector<2x1xf32>
    %1462 = arith.divf %1460, %1461 : vector<2x1xf32>
    %1463 = vector.broadcast %1462 : vector<2x1xf32> to vector<2x8xf32>
    %1464 = arith.subf %1458, %1463 : vector<2x8xf32>
    %1465 = arith.mulf %1464, %1464 : vector<2x8xf32>
    %cst_424 = arith.constant dense<0.000000e+00> : vector<2xf32>
    %1466 = vector.multi_reduction <add>, %1465, %cst_424 [1] : vector<2x8xf32> to vector<2xf32>
    %1467 = vector.shape_cast %1466 : vector<2xf32> to vector<2x1xf32>
    %cst_425 = arith.constant 8.000000e+00 : f32
    %1468 = vector.broadcast %cst_425 : f32 to vector<2x1xf32>
    %1469 = arith.divf %1467, %1468 : vector<2x1xf32>
    %cst_426 = arith.constant 9.99999974E-6 : f32
    %1470 = vector.broadcast %cst_426 : f32 to vector<2x1xf32>
    %1471 = arith.addf %1469, %1470 : vector<2x1xf32>
    %1472 = math.rsqrt %1471 : vector<2x1xf32>
    %1473 = vector.broadcast %1472 : vector<2x1xf32> to vector<2x8xf32>
    %1474 = arith.mulf %1464, %1473 : vector<2x8xf32>
    %1475 = vector.broadcast %8 : vector<1x8xf32> to vector<2x8xf32>
    %1476 = arith.mulf %1474, %1475 : vector<2x8xf32>
    %1477 = vector.broadcast %9 : vector<1x8xf32> to vector<2x8xf32>
    %1478 = arith.addf %1476, %1477 : vector<2x8xf32>
    %1479 = vector.shape_cast %1478 : vector<2x8xf32> to vector<2x1x8xf32>
    %1480 = arith.truncf %1479 : vector<2x1x8xf32> to vector<2x1x8xbf16>
    "tpu.trace_start"() <{level = 10 : i32, message = "bqd,bmd->bqm"}> : () -> ()
    %cst_427 = arith.constant dense<0.000000e+00> : vector<2x1x16xf32>
    %1481 = tpu.matmul %1480, %1455, %cst_427 {dimension_numbers = #tpu.dot_dimension_numbers<[2], [2], [1], [1], [0, 0, 0, 1, 1, 1], [0], [0]>} : vector<2x1x8xbf16>, vector<2x16x8xbf16>, vector<2x1x16xf32> -> vector<2x1x16xf32>
    "tpu.trace_stop"() : () -> ()
    %cst_428 = arith.constant dense<0xFF800000> : vector<2x1xf32>
    %1482 = vector.multi_reduction <maximumf>, %1481, %cst_428 [2] : vector<2x1x16xf32> to vector<2x1xf32>
    %1483 = vector.shape_cast %1482 : vector<2x1xf32> to vector<2x1x1xf32>
    %1484 = vector.broadcast %1483 : vector<2x1x1xf32> to vector<2x1x16xf32>
    %1485 = arith.subf %1481, %1484 : vector<2x1x16xf32>
    %1486 = math.exp %1485 : vector<2x1x16xf32>
    %cst_429 = arith.constant dense<0.000000e+00> : vector<2x1xf32>
    %1487 = vector.multi_reduction <add>, %1486, %cst_429 [2] : vector<2x1x16xf32> to vector<2x1xf32>
    %1488 = vector.shape_cast %1487 : vector<2x1xf32> to vector<2x1x1xf32>
    %1489 = tpu.reciprocal %1488 {approx = true} : vector<2x1x1xf32> -> vector<2x1x1xf32>
    %1490 = vector.broadcast %1489 : vector<2x1x1xf32> to vector<2x1x16xf32>
    %1491 = arith.mulf %1486, %1490 : vector<2x1x16xf32>
    %1492 = arith.truncf %1491 : vector<2x1x16xf32> to vector<2x1x16xbf16>
    "tpu.trace_start"() <{level = 10 : i32, message = "bqm,bmd->bqd"}> : () -> ()
    %cst_430 = arith.constant dense<0.000000e+00> : vector<2x1x8xf32>
    %1493 = tpu.matmul %1492, %1456, %cst_430 {dimension_numbers = #tpu.dot_dimension_numbers<[2], [1], [1], [2], [0, 0, 0, 1, 1, 2], [0], [0]>} : vector<2x1x16xbf16>, vector<2x16x8xbf16>, vector<2x1x8xf32> -> vector<2x1x8xf32>
    "tpu.trace_stop"() : () -> ()
    %cst_431 = arith.constant dense<0.000000e+00> : vector<2x8xf32>
    %1494 = vector.multi_reduction <add>, %1493, %cst_431 [1] : vector<2x1x8xf32> to vector<2x8xf32>
    %c10_432 = arith.constant 10 : index
    %c32_433 = arith.constant 32 : index
    %1495 = vector.load %arg11[%c10_432, %c32_433] : memref<16x48xf32, #tpu.memory_space<vmem>>, vector<2x8xf32>
    tpu.vector_store %arg11[%c10_432, %c32_433], %1494 {strides = array<i32>} : memref<16x48xf32, #tpu.memory_space<vmem>>, vector<2x8xf32>,
    %1496 = vector.extract_strided_slice %1402 {offsets = [0, 8], sizes = [2, 8], strides = [1, 1]} : vector<2x40xf32> to vector<2x8xf32>
    %cst_434 = arith.constant dense<0.000000e+00> : vector<2xf32>
    %1497 = vector.multi_reduction <add>, %1496, %cst_434 [1] : vector<2x8xf32> to vector<2xf32>
    %1498 = vector.shape_cast %1497 : vector<2xf32> to vector<2x1xf32>
    %cst_435 = arith.constant 8.000000e+00 : f32
    %1499 = vector.broadcast %cst_435 : f32 to vector<2x1xf32>
    %1500 = arith.divf %1498, %1499 : vector<2x1xf32>
    %1501 = vector.broadcast %1500 : vector<2x1xf32> to vector<2x8xf32>
    %1502 = arith.subf %1496, %1501 : vector<2x8xf32>
    %1503 = arith.mulf %1502, %1502 : vector<2x8xf32>
    %cst_436 = arith.constant dense<0.000000e+00> : vector<2xf32>
    %1504 = vector.multi_reduction <add>, %1503, %cst_436 [1] : vector<2x8xf32> to vector<2xf32>
    %1505 = vector.shape_cast %1504 : vector<2xf32> to vector<2x1xf32>
    %cst_437 = arith.constant 8.000000e+00 : f32
    %1506 = vector.broadcast %cst_437 : f32 to vector<2x1xf32>
    %1507 = arith.divf %1505, %1506 : vector<2x1xf32>
    %cst_438 = arith.constant 9.99999974E-6 : f32
    %1508 = vector.broadcast %cst_438 : f32 to vector<2x1xf32>
    %1509 = arith.addf %1507, %1508 : vector<2x1xf32>
    %1510 = math.rsqrt %1509 : vector<2x1xf32>
    %1511 = vector.broadcast %1510 : vector<2x1xf32> to vector<2x8xf32>
    %1512 = arith.mulf %1502, %1511 : vector<2x8xf32>
    %1513 = vector.broadcast %8 : vector<1x8xf32> to vector<2x8xf32>
    %1514 = arith.mulf %1512, %1513 : vector<2x8xf32>
    %1515 = vector.broadcast %9 : vector<1x8xf32> to vector<2x8xf32>
    %1516 = arith.addf %1514, %1515 : vector<2x8xf32>
    %1517 = vector.shape_cast %1516 : vector<2x8xf32> to vector<2x1x8xf32>
    %1518 = arith.truncf %1517 : vector<2x1x8xf32> to vector<2x1x8xbf16>
    "tpu.trace_start"() <{level = 10 : i32, message = "bqd,bmd->bqm"}> : () -> ()
    %cst_439 = arith.constant dense<0.000000e+00> : vector<2x1x16xf32>
    %1519 = tpu.matmul %1518, %1455, %cst_439 {dimension_numbers = #tpu.dot_dimension_numbers<[2], [2], [1], [1], [0, 0, 0, 1, 1, 1], [0], [0]>} : vector<2x1x8xbf16>, vector<2x16x8xbf16>, vector<2x1x16xf32> -> vector<2x1x16xf32>
    "tpu.trace_stop"() : () -> ()
    %cst_440 = arith.constant dense<0xFF800000> : vector<2x1xf32>
    %1520 = vector.multi_reduction <maximumf>, %1519, %cst_440 [2] : vector<2x1x16xf32> to vector<2x1xf32>
    %1521 = vector.shape_cast %1520 : vector<2x1xf32> to vector<2x1x1xf32>
    %1522 = vector.broadcast %1521 : vector<2x1x1xf32> to vector<2x1x16xf32>
    %1523 = arith.subf %1519, %1522 : vector<2x1x16xf32>
    %1524 = math.exp %1523 : vector<2x1x16xf32>
    %cst_441 = arith.constant dense<0.000000e+00> : vector<2x1xf32>
    %1525 = vector.multi_reduction <add>, %1524, %cst_441 [2] : vector<2x1x16xf32> to vector<2x1xf32>
    %1526 = vector.shape_cast %1525 : vector<2x1xf32> to vector<2x1x1xf32>
    %1527 = tpu.reciprocal %1526 {approx = true} : vector<2x1x1xf32> -> vector<2x1x1xf32>
    %1528 = vector.broadcast %1527 : vector<2x1x1xf32> to vector<2x1x16xf32>
    %1529 = arith.mulf %1524, %1528 : vector<2x1x16xf32>
    %1530 = arith.truncf %1529 : vector<2x1x16xf32> to vector<2x1x16xbf16>
    "tpu.trace_start"() <{level = 10 : i32, message = "bqm,bmd->bqd"}> : () -> ()
    %cst_442 = arith.constant dense<0.000000e+00> : vector<2x1x8xf32>
    %1531 = tpu.matmul %1530, %1456, %cst_442 {dimension_numbers = #tpu.dot_dimension_numbers<[2], [1], [1], [2], [0, 0, 0, 1, 1, 2], [0], [0]>} : vector<2x1x16xbf16>, vector<2x16x8xbf16>, vector<2x1x8xf32> -> vector<2x1x8xf32>
    "tpu.trace_stop"() : () -> ()
    %cst_443 = arith.constant dense<0.000000e+00> : vector<2x8xf32>
    %1532 = vector.multi_reduction <add>, %1531, %cst_443 [1] : vector<2x1x8xf32> to vector<2x8xf32>
    %c10_444 = arith.constant 10 : index
    %c40_445 = arith.constant 40 : index
    %1533 = vector.load %arg11[%c10_444, %c40_445] : memref<16x48xf32, #tpu.memory_space<vmem>>, vector<2x8xf32>
    tpu.vector_store %arg11[%c10_444, %c40_445], %1532 {strides = array<i32>} : memref<16x48xf32, #tpu.memory_space<vmem>>, vector<2x8xf32>,
    %c6_446 = arith.constant 6 : index
    %c0_447 = arith.constant 0 : index
    %c0_448 = arith.constant 0 : index
    %1534 = vector.load %arg1[%c6_446, %c0_447, %c0_448] : memref<8x2x16xf32, #tpu.memory_space<vmem>>, vector<1x2x16xf32>
    %1535 = vector.shape_cast %1534 : vector<1x2x16xf32> to vector<2x16xf32>
    %cst_449 = arith.constant dense<0.000000e+00> : vector<2xf32>
    %1536 = vector.multi_reduction <add>, %1535, %cst_449 [1] : vector<2x16xf32> to vector<2xf32>
    %1537 = vector.shape_cast %1536 : vector<2xf32> to vector<2x1xf32>
    %cst_450 = arith.constant dense<0.000000e+00> : vector<2xf32>
    %1538 = vector.multi_reduction <add>, %1494, %cst_450 [1] : vector<2x8xf32> to vector<2xf32>
    %1539 = vector.shape_cast %1538 : vector<2xf32> to vector<2x1xf32>
    %1540 = arith.addf %1537, %1539 : vector<2x1xf32>
    %cst_451 = arith.constant dense<0.000000e+00> : vector<2xf32>
    %1541 = vector.multi_reduction <add>, %1532, %cst_451 [1] : vector<2x8xf32> to vector<2xf32>
    %1542 = vector.shape_cast %1541 : vector<2xf32> to vector<2x1xf32>
    %1543 = arith.addf %1540, %1542 : vector<2x1xf32>
    %cst_452 = arith.constant 3.125000e-02 : f32
    %1544 = vector.broadcast %cst_452 : f32 to vector<2x1xf32>
    %1545 = arith.mulf %1543, %1544 : vector<2x1xf32>
    %1546 = vector.broadcast %1545 : vector<2x1xf32> to vector<2x16xf32>
    %1547 = arith.subf %1535, %1546 : vector<2x16xf32>
    %1548 = vector.broadcast %1545 : vector<2x1xf32> to vector<2x8xf32>
    %1549 = arith.subf %1494, %1548 : vector<2x8xf32>
    %1550 = vector.broadcast %1545 : vector<2x1xf32> to vector<2x8xf32>
    %1551 = arith.subf %1532, %1550 : vector<2x8xf32>
    %1552 = arith.mulf %1547, %1547 : vector<2x16xf32>
    %cst_453 = arith.constant dense<0.000000e+00> : vector<2xf32>
    %1553 = vector.multi_reduction <add>, %1552, %cst_453 [1] : vector<2x16xf32> to vector<2xf32>
    %1554 = vector.shape_cast %1553 : vector<2xf32> to vector<2x1xf32>
    %1555 = arith.mulf %1549, %1549 : vector<2x8xf32>
    %cst_454 = arith.constant dense<0.000000e+00> : vector<2xf32>
    %1556 = vector.multi_reduction <add>, %1555, %cst_454 [1] : vector<2x8xf32> to vector<2xf32>
    %1557 = vector.shape_cast %1556 : vector<2xf32> to vector<2x1xf32>
    %1558 = arith.addf %1554, %1557 : vector<2x1xf32>
    %1559 = arith.mulf %1551, %1551 : vector<2x8xf32>
    %cst_455 = arith.constant dense<0.000000e+00> : vector<2xf32>
    %1560 = vector.multi_reduction <add>, %1559, %cst_455 [1] : vector<2x8xf32> to vector<2xf32>
    %1561 = vector.shape_cast %1560 : vector<2xf32> to vector<2x1xf32>
    %1562 = arith.addf %1558, %1561 : vector<2x1xf32>
    %cst_456 = arith.constant 3.125000e-02 : f32
    %1563 = vector.broadcast %cst_456 : f32 to vector<2x1xf32>
    %1564 = arith.mulf %1562, %1563 : vector<2x1xf32>
    %cst_457 = arith.constant 9.99999974E-6 : f32
    %1565 = vector.broadcast %cst_457 : f32 to vector<2x1xf32>
    %1566 = arith.addf %1564, %1565 : vector<2x1xf32>
    %1567 = math.rsqrt %1566 : vector<2x1xf32>
    %1568 = vector.broadcast %1567 : vector<2x1xf32> to vector<2x16xf32>
    %1569 = arith.mulf %1547, %1568 : vector<2x16xf32>
    %1570 = vector.broadcast %0 : vector<1x16xf32> to vector<2x16xf32>
    %1571 = arith.mulf %1569, %1570 : vector<2x16xf32>
    %1572 = vector.broadcast %1 : vector<1x16xf32> to vector<2x16xf32>
    %1573 = arith.addf %1571, %1572 : vector<2x16xf32>
    %1574 = vector.broadcast %1567 : vector<2x1xf32> to vector<2x8xf32>
    %1575 = arith.mulf %1549, %1574 : vector<2x8xf32>
    %1576 = vector.broadcast %2 : vector<1x8xf32> to vector<2x8xf32>
    %1577 = arith.mulf %1575, %1576 : vector<2x8xf32>
    %1578 = vector.broadcast %4 : vector<1x8xf32> to vector<2x8xf32>
    %1579 = arith.addf %1577, %1578 : vector<2x8xf32>
    %1580 = vector.broadcast %1567 : vector<2x1xf32> to vector<2x8xf32>
    %1581 = arith.mulf %1551, %1580 : vector<2x8xf32>
    %1582 = vector.broadcast %3 : vector<1x8xf32> to vector<2x8xf32>
    %1583 = arith.mulf %1581, %1582 : vector<2x8xf32>
    %1584 = vector.broadcast %5 : vector<1x8xf32> to vector<2x8xf32>
    %1585 = arith.addf %1583, %1584 : vector<2x8xf32>
    %1586 = arith.truncf %1573 : vector<2x16xf32> to vector<2x16xbf16>
    %cst_458 = arith.constant dense<0.000000e+00> : vector<2x128xf32>
    %1587 = tpu.matmul %1586, %17, %cst_458 {dimension_numbers = #tpu.dot_dimension_numbers<[1], [0], [0], [1], [0, 0, 1, 1], [], []>} : vector<2x16xbf16>, vector<16x128xbf16>, vector<2x128xf32> -> vector<2x128xf32>
    %1588 = arith.truncf %1378 : vector<2x32xf32> to vector<2x32xbf16>
    %cst_459 = arith.constant dense<0.000000e+00> : vector<2x128xf32>
    %1589 = tpu.matmul %1588, %20, %cst_459 {dimension_numbers = #tpu.dot_dimension_numbers<[1], [0], [0], [1], [0, 0, 1, 1], [], []>} : vector<2x32xbf16>, vector<32x128xbf16>, vector<2x128xf32> -> vector<2x128xf32>
    %1590 = arith.addf %1587, %1589 : vector<2x128xf32>
    %1591 = vector.broadcast %14 : vector<1x128xf32> to vector<2x128xf32>
    %1592 = arith.addf %1590, %1591 : vector<2x128xf32>
    %1593 = arith.truncf %1579 : vector<2x8xf32> to vector<2x8xbf16>
    %cst_460 = arith.constant dense<0.000000e+00> : vector<2x128xf32>
    %1594 = tpu.matmul %1593, %18, %cst_460 {dimension_numbers = #tpu.dot_dimension_numbers<[1], [0], [0], [1], [0, 0, 1, 1], [], []>} : vector<2x8xbf16>, vector<8x128xbf16>, vector<2x128xf32> -> vector<2x128xf32>
    %1595 = arith.addf %1592, %1594 : vector<2x128xf32>
    %1596 = arith.truncf %1585 : vector<2x8xf32> to vector<2x8xbf16>
    %cst_461 = arith.constant dense<0.000000e+00> : vector<2x128xf32>
    %1597 = tpu.matmul %1596, %19, %cst_461 {dimension_numbers = #tpu.dot_dimension_numbers<[1], [0], [0], [1], [0, 0, 1, 1], [], []>} : vector<2x8xbf16>, vector<8x128xbf16>, vector<2x128xf32> -> vector<2x128xf32>
    %1598 = arith.addf %1595, %1597 : vector<2x128xf32>
    %1599 = vector.extract_strided_slice %1598 {offsets = [0, 0], sizes = [2, 32], strides = [1, 1]} : vector<2x128xf32> to vector<2x32xf32>
    %cst_462 = arith.constant 5.000000e-01 : f32
    %1600 = vector.broadcast %cst_462 : f32 to vector<2x32xf32>
    %1601 = arith.mulf %1600, %1599 : vector<2x32xf32>
    %1602 = math.tanh %1601 : vector<2x32xf32>
    %cst_463 = arith.constant 5.000000e-01 : f32
    %1603 = vector.broadcast %cst_463 : f32 to vector<2x32xf32>
    %1604 = arith.mulf %1603, %1602 : vector<2x32xf32>
    %cst_464 = arith.constant 5.000000e-01 : f32
    %1605 = vector.broadcast %cst_464 : f32 to vector<2x32xf32>
    %1606 = arith.addf %1604, %1605 : vector<2x32xf32>
    %1607 = vector.extract_strided_slice %1598 {offsets = [0, 32], sizes = [2, 32], strides = [1, 1]} : vector<2x128xf32> to vector<2x32xf32>
    %cst_465 = arith.constant 5.000000e-01 : f32
    %1608 = vector.broadcast %cst_465 : f32 to vector<2x32xf32>
    %1609 = arith.mulf %1608, %1607 : vector<2x32xf32>
    %1610 = math.tanh %1609 : vector<2x32xf32>
    %cst_466 = arith.constant 5.000000e-01 : f32
    %1611 = vector.broadcast %cst_466 : f32 to vector<2x32xf32>
    %1612 = arith.mulf %1611, %1610 : vector<2x32xf32>
    %cst_467 = arith.constant 5.000000e-01 : f32
    %1613 = vector.broadcast %cst_467 : f32 to vector<2x32xf32>
    %1614 = arith.addf %1612, %1613 : vector<2x32xf32>
    %1615 = vector.extract_strided_slice %1598 {offsets = [0, 64], sizes = [2, 32], strides = [1, 1]} : vector<2x128xf32> to vector<2x32xf32>
    %1616 = math.tanh %1615 : vector<2x32xf32>
    %1617 = vector.extract_strided_slice %1598 {offsets = [0, 96], sizes = [2, 32], strides = [1, 1]} : vector<2x128xf32> to vector<2x32xf32>
    %cst_468 = arith.constant 5.000000e-01 : f32
    %1618 = vector.broadcast %cst_468 : f32 to vector<2x32xf32>
    %1619 = arith.mulf %1618, %1617 : vector<2x32xf32>
    %1620 = math.tanh %1619 : vector<2x32xf32>
    %cst_469 = arith.constant 5.000000e-01 : f32
    %1621 = vector.broadcast %cst_469 : f32 to vector<2x32xf32>
    %1622 = arith.mulf %1621, %1620 : vector<2x32xf32>
    %cst_470 = arith.constant 5.000000e-01 : f32
    %1623 = vector.broadcast %cst_470 : f32 to vector<2x32xf32>
    %1624 = arith.addf %1622, %1623 : vector<2x32xf32>
    %1625 = arith.mulf %1614, %1376 : vector<2x32xf32>
    %1626 = arith.mulf %1606, %1616 : vector<2x32xf32>
    %1627 = arith.addf %1625, %1626 : vector<2x32xf32>
    %1628 = math.tanh %1627 : vector<2x32xf32>
    %1629 = arith.mulf %1624, %1628 : vector<2x32xf32>
    %cst_471 = arith.constant dense<0.000000e+00> : vector<2xf32>
    %1630 = vector.multi_reduction <add>, %1629, %cst_471 [1] : vector<2x32xf32> to vector<2xf32>
    %1631 = vector.shape_cast %1630 : vector<2xf32> to vector<2x1xf32>
    %cst_472 = arith.constant 3.200000e+01 : f32
    %1632 = vector.broadcast %cst_472 : f32 to vector<2x1xf32>
    %1633 = arith.divf %1631, %1632 : vector<2x1xf32>
    %1634 = vector.broadcast %1633 : vector<2x1xf32> to vector<2x32xf32>
    %1635 = arith.subf %1629, %1634 : vector<2x32xf32>
    %1636 = arith.mulf %1635, %1635 : vector<2x32xf32>
    %cst_473 = arith.constant dense<0.000000e+00> : vector<2xf32>
    %1637 = vector.multi_reduction <add>, %1636, %cst_473 [1] : vector<2x32xf32> to vector<2xf32>
    %1638 = vector.shape_cast %1637 : vector<2xf32> to vector<2x1xf32>
    %cst_474 = arith.constant 3.200000e+01 : f32
    %1639 = vector.broadcast %cst_474 : f32 to vector<2x1xf32>
    %1640 = arith.divf %1638, %1639 : vector<2x1xf32>
    %cst_475 = arith.constant 9.99999974E-6 : f32
    %1641 = vector.broadcast %cst_475 : f32 to vector<2x1xf32>
    %1642 = arith.addf %1640, %1641 : vector<2x1xf32>
    %1643 = math.rsqrt %1642 : vector<2x1xf32>
    %1644 = vector.broadcast %1643 : vector<2x1xf32> to vector<2x32xf32>
    %1645 = arith.mulf %1635, %1644 : vector<2x32xf32>
    %1646 = vector.broadcast %6 : vector<1x32xf32> to vector<2x32xf32>
    %1647 = arith.mulf %1645, %1646 : vector<2x32xf32>
    %1648 = vector.broadcast %7 : vector<1x32xf32> to vector<2x32xf32>
    %1649 = arith.addf %1647, %1648 : vector<2x32xf32>
    %1650 = arith.truncf %1649 : vector<2x32xf32> to vector<2x32xbf16>
    %cst_476 = arith.constant dense<0.000000e+00> : vector<2x40xf32>
    %1651 = tpu.matmul %1650, %21, %cst_476 {dimension_numbers = #tpu.dot_dimension_numbers<[1], [0], [0], [1], [0, 0, 1, 1], [], []>} : vector<2x32xbf16>, vector<32x40xbf16>, vector<2x40xf32> -> vector<2x40xf32>
    %1652 = vector.broadcast %15 : vector<1x40xf32> to vector<2x40xf32>
    %1653 = arith.addf %1651, %1652 : vector<2x40xf32>
    %1654 = vector.extract_strided_slice %1653 {offsets = [0, 16], sizes = [2, 8], strides = [1, 1]} : vector<2x40xf32> to vector<2x8xf32>
    %cst_477 = arith.constant 5.000000e-01 : f32
    %1655 = vector.broadcast %cst_477 : f32 to vector<2x8xf32>
    %1656 = arith.mulf %1655, %1654 : vector<2x8xf32>
    %1657 = math.tanh %1656 : vector<2x8xf32>
    %cst_478 = arith.constant 5.000000e-01 : f32
    %1658 = vector.broadcast %cst_478 : f32 to vector<2x8xf32>
    %1659 = arith.mulf %1658, %1657 : vector<2x8xf32>
    %cst_479 = arith.constant 5.000000e-01 : f32
    %1660 = vector.broadcast %cst_479 : f32 to vector<2x8xf32>
    %1661 = arith.addf %1659, %1660 : vector<2x8xf32>
    %1662 = vector.extract_strided_slice %1653 {offsets = [0, 24], sizes = [2, 8], strides = [1, 1]} : vector<2x40xf32> to vector<2x8xf32>
    %1663 = math.tanh %1662 : vector<2x8xf32>
    %1664 = vector.extract_strided_slice %1653 {offsets = [0, 32], sizes = [2, 1], strides = [1, 1]} : vector<2x40xf32> to vector<2x1xf32>
    %cst_480 = arith.constant 5.000000e-01 : f32
    %1665 = vector.broadcast %cst_480 : f32 to vector<2x1xf32>
    %1666 = arith.mulf %1665, %1664 : vector<2x1xf32>
    %1667 = math.tanh %1666 : vector<2x1xf32>
    %cst_481 = arith.constant 5.000000e-01 : f32
    %1668 = vector.broadcast %cst_481 : f32 to vector<2x1xf32>
    %1669 = arith.mulf %1668, %1667 : vector<2x1xf32>
    %cst_482 = arith.constant 5.000000e-01 : f32
    %1670 = vector.broadcast %cst_482 : f32 to vector<2x1xf32>
    %1671 = arith.addf %1669, %1670 : vector<2x1xf32>
    %1672 = vector.broadcast %1671 : vector<2x1xf32> to vector<2x8xf32>
    %1673 = arith.mulf %1672, %1661 : vector<2x8xf32>
    %1674 = vector.shape_cast %1673 : vector<2x8xf32> to vector<2x1x8xf32>
    %cst_483 = arith.constant 1.000000e+00 : f32
    %1675 = vector.broadcast %cst_483 : f32 to vector<2x1x8xf32>
    %1676 = arith.subf %1675, %1674 : vector<2x1x8xf32>
    %1677 = vector.broadcast %1676 : vector<2x1x8xf32> to vector<2x16x8xf32>
    %1678 = arith.mulf %1432, %1677 : vector<2x16x8xf32>
    %1679 = vector.broadcast %1671 : vector<2x1xf32> to vector<2x8xf32>
    %1680 = arith.mulf %1679, %1663 : vector<2x8xf32>
    %1681 = vector.shape_cast %1680 : vector<2x8xf32> to vector<2x1x8xf32>
    %1682 = vector.broadcast %1681 : vector<2x1x8xf32> to vector<2x16x8xf32>
    %1683 = arith.addf %1678, %1682 : vector<2x16x8xf32>
    %cst_484 = arith.constant dense<0.000000e+00> : vector<2x16xf32>
    %1684 = vector.multi_reduction <add>, %1683, %cst_484 [2] : vector<2x16x8xf32> to vector<2x16xf32>
    %1685 = vector.shape_cast %1684 : vector<2x16xf32> to vector<2x16x1xf32>
    %cst_485 = arith.constant 8.000000e+00 : f32
    %1686 = vector.broadcast %cst_485 : f32 to vector<2x16x1xf32>
    %1687 = arith.divf %1685, %1686 : vector<2x16x1xf32>
    %1688 = vector.broadcast %1687 : vector<2x16x1xf32> to vector<2x16x8xf32>
    %1689 = arith.subf %1683, %1688 : vector<2x16x8xf32>
    %1690 = arith.mulf %1689, %1689 : vector<2x16x8xf32>
    %cst_486 = arith.constant dense<0.000000e+00> : vector<2x16xf32>
    %1691 = vector.multi_reduction <add>, %1690, %cst_486 [2] : vector<2x16x8xf32> to vector<2x16xf32>
    %1692 = vector.shape_cast %1691 : vector<2x16xf32> to vector<2x16x1xf32>
    %cst_487 = arith.constant 8.000000e+00 : f32
    %1693 = vector.broadcast %cst_487 : f32 to vector<2x16x1xf32>
    %1694 = arith.divf %1692, %1693 : vector<2x16x1xf32>
    %cst_488 = arith.constant 9.99999974E-6 : f32
    %1695 = vector.broadcast %cst_488 : f32 to vector<2x16x1xf32>
    %1696 = arith.addf %1694, %1695 : vector<2x16x1xf32>
    %1697 = math.rsqrt %1696 : vector<2x16x1xf32>
    %1698 = vector.broadcast %1697 : vector<2x16x1xf32> to vector<2x16x8xf32>
    %1699 = arith.mulf %1689, %1698 : vector<2x16x8xf32>
    %1700 = vector.shape_cast %10 : vector<1x8xf32> to vector<1x1x8xf32>
    %1701 = vector.broadcast %1700 : vector<1x1x8xf32> to vector<2x16x8xf32>
    %1702 = arith.mulf %1699, %1701 : vector<2x16x8xf32>
    %1703 = vector.shape_cast %11 : vector<1x8xf32> to vector<1x1x8xf32>
    %1704 = vector.broadcast %1703 : vector<1x1x8xf32> to vector<2x16x8xf32>
    %1705 = arith.addf %1702, %1704 : vector<2x16x8xf32>
    %1706 = arith.truncf %1705 : vector<2x16x8xf32> to vector<2x16x8xbf16>
    %1707 = arith.truncf %1683 : vector<2x16x8xf32> to vector<2x16x8xbf16>
    %c12 = arith.constant 12 : index
    %c0_489 = arith.constant 0 : index
    %1708 = vector.load %arg11[%c12, %c0_489] : memref<16x48xf32, #tpu.memory_space<vmem>>, vector<2x32xf32>
    tpu.vector_store %arg11[%c12, %c0_489], %1649 {strides = array<i32>} : memref<16x48xf32, #tpu.memory_space<vmem>>, vector<2x32xf32>,
    %1709 = vector.extract_strided_slice %1653 {offsets = [0, 0], sizes = [2, 8], strides = [1, 1]} : vector<2x40xf32> to vector<2x8xf32>
    %cst_490 = arith.constant dense<0.000000e+00> : vector<2xf32>
    %1710 = vector.multi_reduction <add>, %1709, %cst_490 [1] : vector<2x8xf32> to vector<2xf32>
    %1711 = vector.shape_cast %1710 : vector<2xf32> to vector<2x1xf32>
    %cst_491 = arith.constant 8.000000e+00 : f32
    %1712 = vector.broadcast %cst_491 : f32 to vector<2x1xf32>
    %1713 = arith.divf %1711, %1712 : vector<2x1xf32>
    %1714 = vector.broadcast %1713 : vector<2x1xf32> to vector<2x8xf32>
    %1715 = arith.subf %1709, %1714 : vector<2x8xf32>
    %1716 = arith.mulf %1715, %1715 : vector<2x8xf32>
    %cst_492 = arith.constant dense<0.000000e+00> : vector<2xf32>
    %1717 = vector.multi_reduction <add>, %1716, %cst_492 [1] : vector<2x8xf32> to vector<2xf32>
    %1718 = vector.shape_cast %1717 : vector<2xf32> to vector<2x1xf32>
    %cst_493 = arith.constant 8.000000e+00 : f32
    %1719 = vector.broadcast %cst_493 : f32 to vector<2x1xf32>
    %1720 = arith.divf %1718, %1719 : vector<2x1xf32>
    %cst_494 = arith.constant 9.99999974E-6 : f32
    %1721 = vector.broadcast %cst_494 : f32 to vector<2x1xf32>
    %1722 = arith.addf %1720, %1721 : vector<2x1xf32>
    %1723 = math.rsqrt %1722 : vector<2x1xf32>
    %1724 = vector.broadcast %1723 : vector<2x1xf32> to vector<2x8xf32>
    %1725 = arith.mulf %1715, %1724 : vector<2x8xf32>
    %1726 = vector.broadcast %8 : vector<1x8xf32> to vector<2x8xf32>
    %1727 = arith.mulf %1725, %1726 : vector<2x8xf32>
    %1728 = vector.broadcast %9 : vector<1x8xf32> to vector<2x8xf32>
    %1729 = arith.addf %1727, %1728 : vector<2x8xf32>
    %1730 = vector.shape_cast %1729 : vector<2x8xf32> to vector<2x1x8xf32>
    %1731 = arith.truncf %1730 : vector<2x1x8xf32> to vector<2x1x8xbf16>
    "tpu.trace_start"() <{level = 10 : i32, message = "bqd,bmd->bqm"}> : () -> ()
    %cst_495 = arith.constant dense<0.000000e+00> : vector<2x1x16xf32>
    %1732 = tpu.matmul %1731, %1706, %cst_495 {dimension_numbers = #tpu.dot_dimension_numbers<[2], [2], [1], [1], [0, 0, 0, 1, 1, 1], [0], [0]>} : vector<2x1x8xbf16>, vector<2x16x8xbf16>, vector<2x1x16xf32> -> vector<2x1x16xf32>
    "tpu.trace_stop"() : () -> ()
    %cst_496 = arith.constant dense<0xFF800000> : vector<2x1xf32>
    %1733 = vector.multi_reduction <maximumf>, %1732, %cst_496 [2] : vector<2x1x16xf32> to vector<2x1xf32>
    %1734 = vector.shape_cast %1733 : vector<2x1xf32> to vector<2x1x1xf32>
    %1735 = vector.broadcast %1734 : vector<2x1x1xf32> to vector<2x1x16xf32>
    %1736 = arith.subf %1732, %1735 : vector<2x1x16xf32>
    %1737 = math.exp %1736 : vector<2x1x16xf32>
    %cst_497 = arith.constant dense<0.000000e+00> : vector<2x1xf32>
    %1738 = vector.multi_reduction <add>, %1737, %cst_497 [2] : vector<2x1x16xf32> to vector<2x1xf32>
    %1739 = vector.shape_cast %1738 : vector<2x1xf32> to vector<2x1x1xf32>
    %1740 = tpu.reciprocal %1739 {approx = true} : vector<2x1x1xf32> -> vector<2x1x1xf32>
    %1741 = vector.broadcast %1740 : vector<2x1x1xf32> to vector<2x1x16xf32>
    %1742 = arith.mulf %1737, %1741 : vector<2x1x16xf32>
    %1743 = arith.truncf %1742 : vector<2x1x16xf32> to vector<2x1x16xbf16>
    "tpu.trace_start"() <{level = 10 : i32, message = "bqm,bmd->bqd"}> : () -> ()
    %cst_498 = arith.constant dense<0.000000e+00> : vector<2x1x8xf32>
    %1744 = tpu.matmul %1743, %1707, %cst_498 {dimension_numbers = #tpu.dot_dimension_numbers<[2], [1], [1], [2], [0, 0, 0, 1, 1, 2], [0], [0]>} : vector<2x1x16xbf16>, vector<2x16x8xbf16>, vector<2x1x8xf32> -> vector<2x1x8xf32>
    "tpu.trace_stop"() : () -> ()
    %cst_499 = arith.constant dense<0.000000e+00> : vector<2x8xf32>
    %1745 = vector.multi_reduction <add>, %1744, %cst_499 [1] : vector<2x1x8xf32> to vector<2x8xf32>
    %c12_500 = arith.constant 12 : index
    %c32_501 = arith.constant 32 : index
    %1746 = vector.load %arg11[%c12_500, %c32_501] : memref<16x48xf32, #tpu.memory_space<vmem>>, vector<2x8xf32>
    tpu.vector_store %arg11[%c12_500, %c32_501], %1745 {strides = array<i32>} : memref<16x48xf32, #tpu.memory_space<vmem>>, vector<2x8xf32>,
    %1747 = vector.extract_strided_slice %1653 {offsets = [0, 8], sizes = [2, 8], strides = [1, 1]} : vector<2x40xf32> to vector<2x8xf32>
    %cst_502 = arith.constant dense<0.000000e+00> : vector<2xf32>
    %1748 = vector.multi_reduction <add>, %1747, %cst_502 [1] : vector<2x8xf32> to vector<2xf32>
    %1749 = vector.shape_cast %1748 : vector<2xf32> to vector<2x1xf32>
    %cst_503 = arith.constant 8.000000e+00 : f32
    %1750 = vector.broadcast %cst_503 : f32 to vector<2x1xf32>
    %1751 = arith.divf %1749, %1750 : vector<2x1xf32>
    %1752 = vector.broadcast %1751 : vector<2x1xf32> to vector<2x8xf32>
    %1753 = arith.subf %1747, %1752 : vector<2x8xf32>
    %1754 = arith.mulf %1753, %1753 : vector<2x8xf32>
    %cst_504 = arith.constant dense<0.000000e+00> : vector<2xf32>
    %1755 = vector.multi_reduction <add>, %1754, %cst_504 [1] : vector<2x8xf32> to vector<2xf32>
    %1756 = vector.shape_cast %1755 : vector<2xf32> to vector<2x1xf32>
    %cst_505 = arith.constant 8.000000e+00 : f32
    %1757 = vector.broadcast %cst_505 : f32 to vector<2x1xf32>
    %1758 = arith.divf %1756, %1757 : vector<2x1xf32>
    %cst_506 = arith.constant 9.99999974E-6 : f32
    %1759 = vector.broadcast %cst_506 : f32 to vector<2x1xf32>
    %1760 = arith.addf %1758, %1759 : vector<2x1xf32>
    %1761 = math.rsqrt %1760 : vector<2x1xf32>
    %1762 = vector.broadcast %1761 : vector<2x1xf32> to vector<2x8xf32>
    %1763 = arith.mulf %1753, %1762 : vector<2x8xf32>
    %1764 = vector.broadcast %8 : vector<1x8xf32> to vector<2x8xf32>
    %1765 = arith.mulf %1763, %1764 : vector<2x8xf32>
    %1766 = vector.broadcast %9 : vector<1x8xf32> to vector<2x8xf32>
    %1767 = arith.addf %1765, %1766 : vector<2x8xf32>
    %1768 = vector.shape_cast %1767 : vector<2x8xf32> to vector<2x1x8xf32>
    %1769 = arith.truncf %1768 : vector<2x1x8xf32> to vector<2x1x8xbf16>
    "tpu.trace_start"() <{level = 10 : i32, message = "bqd,bmd->bqm"}> : () -> ()
    %cst_507 = arith.constant dense<0.000000e+00> : vector<2x1x16xf32>
    %1770 = tpu.matmul %1769, %1706, %cst_507 {dimension_numbers = #tpu.dot_dimension_numbers<[2], [2], [1], [1], [0, 0, 0, 1, 1, 1], [0], [0]>} : vector<2x1x8xbf16>, vector<2x16x8xbf16>, vector<2x1x16xf32> -> vector<2x1x16xf32>
    "tpu.trace_stop"() : () -> ()
    %cst_508 = arith.constant dense<0xFF800000> : vector<2x1xf32>
    %1771 = vector.multi_reduction <maximumf>, %1770, %cst_508 [2] : vector<2x1x16xf32> to vector<2x1xf32>
    %1772 = vector.shape_cast %1771 : vector<2x1xf32> to vector<2x1x1xf32>
    %1773 = vector.broadcast %1772 : vector<2x1x1xf32> to vector<2x1x16xf32>
    %1774 = arith.subf %1770, %1773 : vector<2x1x16xf32>
    %1775 = math.exp %1774 : vector<2x1x16xf32>
    %cst_509 = arith.constant dense<0.000000e+00> : vector<2x1xf32>
    %1776 = vector.multi_reduction <add>, %1775, %cst_509 [2] : vector<2x1x16xf32> to vector<2x1xf32>
    %1777 = vector.shape_cast %1776 : vector<2x1xf32> to vector<2x1x1xf32>
    %1778 = tpu.reciprocal %1777 {approx = true} : vector<2x1x1xf32> -> vector<2x1x1xf32>
    %1779 = vector.broadcast %1778 : vector<2x1x1xf32> to vector<2x1x16xf32>
    %1780 = arith.mulf %1775, %1779 : vector<2x1x16xf32>
    %1781 = arith.truncf %1780 : vector<2x1x16xf32> to vector<2x1x16xbf16>
    "tpu.trace_start"() <{level = 10 : i32, message = "bqm,bmd->bqd"}> : () -> ()
    %cst_510 = arith.constant dense<0.000000e+00> : vector<2x1x8xf32>
    %1782 = tpu.matmul %1781, %1707, %cst_510 {dimension_numbers = #tpu.dot_dimension_numbers<[2], [1], [1], [2], [0, 0, 0, 1, 1, 2], [0], [0]>} : vector<2x1x16xbf16>, vector<2x16x8xbf16>, vector<2x1x8xf32> -> vector<2x1x8xf32>
    "tpu.trace_stop"() : () -> ()
    %cst_511 = arith.constant dense<0.000000e+00> : vector<2x8xf32>
    %1783 = vector.multi_reduction <add>, %1782, %cst_511 [1] : vector<2x1x8xf32> to vector<2x8xf32>
    %c12_512 = arith.constant 12 : index
    %c40_513 = arith.constant 40 : index
    %1784 = vector.load %arg11[%c12_512, %c40_513] : memref<16x48xf32, #tpu.memory_space<vmem>>, vector<2x8xf32>
    tpu.vector_store %arg11[%c12_512, %c40_513], %1783 {strides = array<i32>} : memref<16x48xf32, #tpu.memory_space<vmem>>, vector<2x8xf32>,
    %c7 = arith.constant 7 : index
    %c0_514 = arith.constant 0 : index
    %c0_515 = arith.constant 0 : index
    %1785 = vector.load %arg1[%c7, %c0_514, %c0_515] : memref<8x2x16xf32, #tpu.memory_space<vmem>>, vector<1x2x16xf32>
    %1786 = vector.shape_cast %1785 : vector<1x2x16xf32> to vector<2x16xf32>
    %cst_516 = arith.constant dense<0.000000e+00> : vector<2xf32>
    %1787 = vector.multi_reduction <add>, %1786, %cst_516 [1] : vector<2x16xf32> to vector<2xf32>
    %1788 = vector.shape_cast %1787 : vector<2xf32> to vector<2x1xf32>
    %cst_517 = arith.constant dense<0.000000e+00> : vector<2xf32>
    %1789 = vector.multi_reduction <add>, %1745, %cst_517 [1] : vector<2x8xf32> to vector<2xf32>
    %1790 = vector.shape_cast %1789 : vector<2xf32> to vector<2x1xf32>
    %1791 = arith.addf %1788, %1790 : vector<2x1xf32>
    %cst_518 = arith.constant dense<0.000000e+00> : vector<2xf32>
    %1792 = vector.multi_reduction <add>, %1783, %cst_518 [1] : vector<2x8xf32> to vector<2xf32>
    %1793 = vector.shape_cast %1792 : vector<2xf32> to vector<2x1xf32>
    %1794 = arith.addf %1791, %1793 : vector<2x1xf32>
    %cst_519 = arith.constant 3.125000e-02 : f32
    %1795 = vector.broadcast %cst_519 : f32 to vector<2x1xf32>
    %1796 = arith.mulf %1794, %1795 : vector<2x1xf32>
    %1797 = vector.broadcast %1796 : vector<2x1xf32> to vector<2x16xf32>
    %1798 = arith.subf %1786, %1797 : vector<2x16xf32>
    %1799 = vector.broadcast %1796 : vector<2x1xf32> to vector<2x8xf32>
    %1800 = arith.subf %1745, %1799 : vector<2x8xf32>
    %1801 = vector.broadcast %1796 : vector<2x1xf32> to vector<2x8xf32>
    %1802 = arith.subf %1783, %1801 : vector<2x8xf32>
    %1803 = arith.mulf %1798, %1798 : vector<2x16xf32>
    %cst_520 = arith.constant dense<0.000000e+00> : vector<2xf32>
    %1804 = vector.multi_reduction <add>, %1803, %cst_520 [1] : vector<2x16xf32> to vector<2xf32>
    %1805 = vector.shape_cast %1804 : vector<2xf32> to vector<2x1xf32>
    %1806 = arith.mulf %1800, %1800 : vector<2x8xf32>
    %cst_521 = arith.constant dense<0.000000e+00> : vector<2xf32>
    %1807 = vector.multi_reduction <add>, %1806, %cst_521 [1] : vector<2x8xf32> to vector<2xf32>
    %1808 = vector.shape_cast %1807 : vector<2xf32> to vector<2x1xf32>
    %1809 = arith.addf %1805, %1808 : vector<2x1xf32>
    %1810 = arith.mulf %1802, %1802 : vector<2x8xf32>
    %cst_522 = arith.constant dense<0.000000e+00> : vector<2xf32>
    %1811 = vector.multi_reduction <add>, %1810, %cst_522 [1] : vector<2x8xf32> to vector<2xf32>
    %1812 = vector.shape_cast %1811 : vector<2xf32> to vector<2x1xf32>
    %1813 = arith.addf %1809, %1812 : vector<2x1xf32>
    %cst_523 = arith.constant 3.125000e-02 : f32
    %1814 = vector.broadcast %cst_523 : f32 to vector<2x1xf32>
    %1815 = arith.mulf %1813, %1814 : vector<2x1xf32>
    %cst_524 = arith.constant 9.99999974E-6 : f32
    %1816 = vector.broadcast %cst_524 : f32 to vector<2x1xf32>
    %1817 = arith.addf %1815, %1816 : vector<2x1xf32>
    %1818 = math.rsqrt %1817 : vector<2x1xf32>
    %1819 = vector.broadcast %1818 : vector<2x1xf32> to vector<2x16xf32>
    %1820 = arith.mulf %1798, %1819 : vector<2x16xf32>
    %1821 = vector.broadcast %0 : vector<1x16xf32> to vector<2x16xf32>
    %1822 = arith.mulf %1820, %1821 : vector<2x16xf32>
    %1823 = vector.broadcast %1 : vector<1x16xf32> to vector<2x16xf32>
    %1824 = arith.addf %1822, %1823 : vector<2x16xf32>
    %1825 = vector.broadcast %1818 : vector<2x1xf32> to vector<2x8xf32>
    %1826 = arith.mulf %1800, %1825 : vector<2x8xf32>
    %1827 = vector.broadcast %2 : vector<1x8xf32> to vector<2x8xf32>
    %1828 = arith.mulf %1826, %1827 : vector<2x8xf32>
    %1829 = vector.broadcast %4 : vector<1x8xf32> to vector<2x8xf32>
    %1830 = arith.addf %1828, %1829 : vector<2x8xf32>
    %1831 = vector.broadcast %1818 : vector<2x1xf32> to vector<2x8xf32>
    %1832 = arith.mulf %1802, %1831 : vector<2x8xf32>
    %1833 = vector.broadcast %3 : vector<1x8xf32> to vector<2x8xf32>
    %1834 = arith.mulf %1832, %1833 : vector<2x8xf32>
    %1835 = vector.broadcast %5 : vector<1x8xf32> to vector<2x8xf32>
    %1836 = arith.addf %1834, %1835 : vector<2x8xf32>
    %1837 = arith.truncf %1824 : vector<2x16xf32> to vector<2x16xbf16>
    %cst_525 = arith.constant dense<0.000000e+00> : vector<2x128xf32>
    %1838 = tpu.matmul %1837, %17, %cst_525 {dimension_numbers = #tpu.dot_dimension_numbers<[1], [0], [0], [1], [0, 0, 1, 1], [], []>} : vector<2x16xbf16>, vector<16x128xbf16>, vector<2x128xf32> -> vector<2x128xf32>
    %1839 = arith.truncf %1629 : vector<2x32xf32> to vector<2x32xbf16>
    %cst_526 = arith.constant dense<0.000000e+00> : vector<2x128xf32>
    %1840 = tpu.matmul %1839, %20, %cst_526 {dimension_numbers = #tpu.dot_dimension_numbers<[1], [0], [0], [1], [0, 0, 1, 1], [], []>} : vector<2x32xbf16>, vector<32x128xbf16>, vector<2x128xf32> -> vector<2x128xf32>
    %1841 = arith.addf %1838, %1840 : vector<2x128xf32>
    %1842 = vector.broadcast %14 : vector<1x128xf32> to vector<2x128xf32>
    %1843 = arith.addf %1841, %1842 : vector<2x128xf32>
    %1844 = arith.truncf %1830 : vector<2x8xf32> to vector<2x8xbf16>
    %cst_527 = arith.constant dense<0.000000e+00> : vector<2x128xf32>
    %1845 = tpu.matmul %1844, %18, %cst_527 {dimension_numbers = #tpu.dot_dimension_numbers<[1], [0], [0], [1], [0, 0, 1, 1], [], []>} : vector<2x8xbf16>, vector<8x128xbf16>, vector<2x128xf32> -> vector<2x128xf32>
    %1846 = arith.addf %1843, %1845 : vector<2x128xf32>
    %1847 = arith.truncf %1836 : vector<2x8xf32> to vector<2x8xbf16>
    %cst_528 = arith.constant dense<0.000000e+00> : vector<2x128xf32>
    %1848 = tpu.matmul %1847, %19, %cst_528 {dimension_numbers = #tpu.dot_dimension_numbers<[1], [0], [0], [1], [0, 0, 1, 1], [], []>} : vector<2x8xbf16>, vector<8x128xbf16>, vector<2x128xf32> -> vector<2x128xf32>
    %1849 = arith.addf %1846, %1848 : vector<2x128xf32>
    %1850 = vector.extract_strided_slice %1849 {offsets = [0, 0], sizes = [2, 32], strides = [1, 1]} : vector<2x128xf32> to vector<2x32xf32>
    %cst_529 = arith.constant 5.000000e-01 : f32
    %1851 = vector.broadcast %cst_529 : f32 to vector<2x32xf32>
    %1852 = arith.mulf %1851, %1850 : vector<2x32xf32>
    %1853 = math.tanh %1852 : vector<2x32xf32>
    %cst_530 = arith.constant 5.000000e-01 : f32
    %1854 = vector.broadcast %cst_530 : f32 to vector<2x32xf32>
    %1855 = arith.mulf %1854, %1853 : vector<2x32xf32>
    %cst_531 = arith.constant 5.000000e-01 : f32
    %1856 = vector.broadcast %cst_531 : f32 to vector<2x32xf32>
    %1857 = arith.addf %1855, %1856 : vector<2x32xf32>
    %1858 = vector.extract_strided_slice %1849 {offsets = [0, 32], sizes = [2, 32], strides = [1, 1]} : vector<2x128xf32> to vector<2x32xf32>
    %cst_532 = arith.constant 5.000000e-01 : f32
    %1859 = vector.broadcast %cst_532 : f32 to vector<2x32xf32>
    %1860 = arith.mulf %1859, %1858 : vector<2x32xf32>
    %1861 = math.tanh %1860 : vector<2x32xf32>
    %cst_533 = arith.constant 5.000000e-01 : f32
    %1862 = vector.broadcast %cst_533 : f32 to vector<2x32xf32>
    %1863 = arith.mulf %1862, %1861 : vector<2x32xf32>
    %cst_534 = arith.constant 5.000000e-01 : f32
    %1864 = vector.broadcast %cst_534 : f32 to vector<2x32xf32>
    %1865 = arith.addf %1863, %1864 : vector<2x32xf32>
    %1866 = vector.extract_strided_slice %1849 {offsets = [0, 64], sizes = [2, 32], strides = [1, 1]} : vector<2x128xf32> to vector<2x32xf32>
    %1867 = math.tanh %1866 : vector<2x32xf32>
    %1868 = vector.extract_strided_slice %1849 {offsets = [0, 96], sizes = [2, 32], strides = [1, 1]} : vector<2x128xf32> to vector<2x32xf32>
    %cst_535 = arith.constant 5.000000e-01 : f32
    %1869 = vector.broadcast %cst_535 : f32 to vector<2x32xf32>
    %1870 = arith.mulf %1869, %1868 : vector<2x32xf32>
    %1871 = math.tanh %1870 : vector<2x32xf32>
    %cst_536 = arith.constant 5.000000e-01 : f32
    %1872 = vector.broadcast %cst_536 : f32 to vector<2x32xf32>
    %1873 = arith.mulf %1872, %1871 : vector<2x32xf32>
    %cst_537 = arith.constant 5.000000e-01 : f32
    %1874 = vector.broadcast %cst_537 : f32 to vector<2x32xf32>
    %1875 = arith.addf %1873, %1874 : vector<2x32xf32>
    %1876 = arith.mulf %1865, %1627 : vector<2x32xf32>
    %1877 = arith.mulf %1857, %1867 : vector<2x32xf32>
    %1878 = arith.addf %1876, %1877 : vector<2x32xf32>
    %1879 = math.tanh %1878 : vector<2x32xf32>
    %1880 = arith.mulf %1875, %1879 : vector<2x32xf32>
    %cst_538 = arith.constant dense<0.000000e+00> : vector<2xf32>
    %1881 = vector.multi_reduction <add>, %1880, %cst_538 [1] : vector<2x32xf32> to vector<2xf32>
    %1882 = vector.shape_cast %1881 : vector<2xf32> to vector<2x1xf32>
    %cst_539 = arith.constant 3.200000e+01 : f32
    %1883 = vector.broadcast %cst_539 : f32 to vector<2x1xf32>
    %1884 = arith.divf %1882, %1883 : vector<2x1xf32>
    %1885 = vector.broadcast %1884 : vector<2x1xf32> to vector<2x32xf32>
    %1886 = arith.subf %1880, %1885 : vector<2x32xf32>
    %1887 = arith.mulf %1886, %1886 : vector<2x32xf32>
    %cst_540 = arith.constant dense<0.000000e+00> : vector<2xf32>
    %1888 = vector.multi_reduction <add>, %1887, %cst_540 [1] : vector<2x32xf32> to vector<2xf32>
    %1889 = vector.shape_cast %1888 : vector<2xf32> to vector<2x1xf32>
    %cst_541 = arith.constant 3.200000e+01 : f32
    %1890 = vector.broadcast %cst_541 : f32 to vector<2x1xf32>
    %1891 = arith.divf %1889, %1890 : vector<2x1xf32>
    %cst_542 = arith.constant 9.99999974E-6 : f32
    %1892 = vector.broadcast %cst_542 : f32 to vector<2x1xf32>
    %1893 = arith.addf %1891, %1892 : vector<2x1xf32>
    %1894 = math.rsqrt %1893 : vector<2x1xf32>
    %1895 = vector.broadcast %1894 : vector<2x1xf32> to vector<2x32xf32>
    %1896 = arith.mulf %1886, %1895 : vector<2x32xf32>
    %1897 = vector.broadcast %6 : vector<1x32xf32> to vector<2x32xf32>
    %1898 = arith.mulf %1896, %1897 : vector<2x32xf32>
    %1899 = vector.broadcast %7 : vector<1x32xf32> to vector<2x32xf32>
    %1900 = arith.addf %1898, %1899 : vector<2x32xf32>
    %1901 = arith.truncf %1900 : vector<2x32xf32> to vector<2x32xbf16>
    %cst_543 = arith.constant dense<0.000000e+00> : vector<2x40xf32>
    %1902 = tpu.matmul %1901, %21, %cst_543 {dimension_numbers = #tpu.dot_dimension_numbers<[1], [0], [0], [1], [0, 0, 1, 1], [], []>} : vector<2x32xbf16>, vector<32x40xbf16>, vector<2x40xf32> -> vector<2x40xf32>
    %1903 = vector.broadcast %15 : vector<1x40xf32> to vector<2x40xf32>
    %1904 = arith.addf %1902, %1903 : vector<2x40xf32>
    %1905 = vector.extract_strided_slice %1904 {offsets = [0, 16], sizes = [2, 8], strides = [1, 1]} : vector<2x40xf32> to vector<2x8xf32>
    %cst_544 = arith.constant 5.000000e-01 : f32
    %1906 = vector.broadcast %cst_544 : f32 to vector<2x8xf32>
    %1907 = arith.mulf %1906, %1905 : vector<2x8xf32>
    %1908 = math.tanh %1907 : vector<2x8xf32>
    %cst_545 = arith.constant 5.000000e-01 : f32
    %1909 = vector.broadcast %cst_545 : f32 to vector<2x8xf32>
    %1910 = arith.mulf %1909, %1908 : vector<2x8xf32>
    %cst_546 = arith.constant 5.000000e-01 : f32
    %1911 = vector.broadcast %cst_546 : f32 to vector<2x8xf32>
    %1912 = arith.addf %1910, %1911 : vector<2x8xf32>
    %1913 = vector.extract_strided_slice %1904 {offsets = [0, 24], sizes = [2, 8], strides = [1, 1]} : vector<2x40xf32> to vector<2x8xf32>
    %1914 = math.tanh %1913 : vector<2x8xf32>
    %1915 = vector.extract_strided_slice %1904 {offsets = [0, 32], sizes = [2, 1], strides = [1, 1]} : vector<2x40xf32> to vector<2x1xf32>
    %cst_547 = arith.constant 5.000000e-01 : f32
    %1916 = vector.broadcast %cst_547 : f32 to vector<2x1xf32>
    %1917 = arith.mulf %1916, %1915 : vector<2x1xf32>
    %1918 = math.tanh %1917 : vector<2x1xf32>
    %cst_548 = arith.constant 5.000000e-01 : f32
    %1919 = vector.broadcast %cst_548 : f32 to vector<2x1xf32>
    %1920 = arith.mulf %1919, %1918 : vector<2x1xf32>
    %cst_549 = arith.constant 5.000000e-01 : f32
    %1921 = vector.broadcast %cst_549 : f32 to vector<2x1xf32>
    %1922 = arith.addf %1920, %1921 : vector<2x1xf32>
    %1923 = vector.broadcast %1922 : vector<2x1xf32> to vector<2x8xf32>
    %1924 = arith.mulf %1923, %1912 : vector<2x8xf32>
    %1925 = vector.shape_cast %1924 : vector<2x8xf32> to vector<2x1x8xf32>
    %cst_550 = arith.constant 1.000000e+00 : f32
    %1926 = vector.broadcast %cst_550 : f32 to vector<2x1x8xf32>
    %1927 = arith.subf %1926, %1925 : vector<2x1x8xf32>
    %1928 = vector.broadcast %1927 : vector<2x1x8xf32> to vector<2x16x8xf32>
    %1929 = arith.mulf %1683, %1928 : vector<2x16x8xf32>
    %1930 = vector.broadcast %1922 : vector<2x1xf32> to vector<2x8xf32>
    %1931 = arith.mulf %1930, %1914 : vector<2x8xf32>
    %1932 = vector.shape_cast %1931 : vector<2x8xf32> to vector<2x1x8xf32>
    %1933 = vector.broadcast %1932 : vector<2x1x8xf32> to vector<2x16x8xf32>
    %1934 = arith.addf %1929, %1933 : vector<2x16x8xf32>
    %cst_551 = arith.constant dense<0.000000e+00> : vector<2x16xf32>
    %1935 = vector.multi_reduction <add>, %1934, %cst_551 [2] : vector<2x16x8xf32> to vector<2x16xf32>
    %1936 = vector.shape_cast %1935 : vector<2x16xf32> to vector<2x16x1xf32>
    %cst_552 = arith.constant 8.000000e+00 : f32
    %1937 = vector.broadcast %cst_552 : f32 to vector<2x16x1xf32>
    %1938 = arith.divf %1936, %1937 : vector<2x16x1xf32>
    %1939 = vector.broadcast %1938 : vector<2x16x1xf32> to vector<2x16x8xf32>
    %1940 = arith.subf %1934, %1939 : vector<2x16x8xf32>
    %1941 = arith.mulf %1940, %1940 : vector<2x16x8xf32>
    %cst_553 = arith.constant dense<0.000000e+00> : vector<2x16xf32>
    %1942 = vector.multi_reduction <add>, %1941, %cst_553 [2] : vector<2x16x8xf32> to vector<2x16xf32>
    %1943 = vector.shape_cast %1942 : vector<2x16xf32> to vector<2x16x1xf32>
    %cst_554 = arith.constant 8.000000e+00 : f32
    %1944 = vector.broadcast %cst_554 : f32 to vector<2x16x1xf32>
    %1945 = arith.divf %1943, %1944 : vector<2x16x1xf32>
    %cst_555 = arith.constant 9.99999974E-6 : f32
    %1946 = vector.broadcast %cst_555 : f32 to vector<2x16x1xf32>
    %1947 = arith.addf %1945, %1946 : vector<2x16x1xf32>
    %1948 = math.rsqrt %1947 : vector<2x16x1xf32>
    %1949 = vector.broadcast %1948 : vector<2x16x1xf32> to vector<2x16x8xf32>
    %1950 = arith.mulf %1940, %1949 : vector<2x16x8xf32>
    %1951 = vector.shape_cast %10 : vector<1x8xf32> to vector<1x1x8xf32>
    %1952 = vector.broadcast %1951 : vector<1x1x8xf32> to vector<2x16x8xf32>
    %1953 = arith.mulf %1950, %1952 : vector<2x16x8xf32>
    %1954 = vector.shape_cast %11 : vector<1x8xf32> to vector<1x1x8xf32>
    %1955 = vector.broadcast %1954 : vector<1x1x8xf32> to vector<2x16x8xf32>
    %1956 = arith.addf %1953, %1955 : vector<2x16x8xf32>
    %1957 = arith.truncf %1956 : vector<2x16x8xf32> to vector<2x16x8xbf16>
    %1958 = arith.truncf %1934 : vector<2x16x8xf32> to vector<2x16x8xbf16>
    %c14 = arith.constant 14 : index
    %c0_556 = arith.constant 0 : index
    %1959 = vector.load %arg11[%c14, %c0_556] : memref<16x48xf32, #tpu.memory_space<vmem>>, vector<2x32xf32>
    tpu.vector_store %arg11[%c14, %c0_556], %1900 {strides = array<i32>} : memref<16x48xf32, #tpu.memory_space<vmem>>, vector<2x32xf32>,
    %1960 = vector.extract_strided_slice %1904 {offsets = [0, 0], sizes = [2, 8], strides = [1, 1]} : vector<2x40xf32> to vector<2x8xf32>
    %cst_557 = arith.constant dense<0.000000e+00> : vector<2xf32>
    %1961 = vector.multi_reduction <add>, %1960, %cst_557 [1] : vector<2x8xf32> to vector<2xf32>
    %1962 = vector.shape_cast %1961 : vector<2xf32> to vector<2x1xf32>
    %cst_558 = arith.constant 8.000000e+00 : f32
    %1963 = vector.broadcast %cst_558 : f32 to vector<2x1xf32>
    %1964 = arith.divf %1962, %1963 : vector<2x1xf32>
    %1965 = vector.broadcast %1964 : vector<2x1xf32> to vector<2x8xf32>
    %1966 = arith.subf %1960, %1965 : vector<2x8xf32>
    %1967 = arith.mulf %1966, %1966 : vector<2x8xf32>
    %cst_559 = arith.constant dense<0.000000e+00> : vector<2xf32>
    %1968 = vector.multi_reduction <add>, %1967, %cst_559 [1] : vector<2x8xf32> to vector<2xf32>
    %1969 = vector.shape_cast %1968 : vector<2xf32> to vector<2x1xf32>
    %cst_560 = arith.constant 8.000000e+00 : f32
    %1970 = vector.broadcast %cst_560 : f32 to vector<2x1xf32>
    %1971 = arith.divf %1969, %1970 : vector<2x1xf32>
    %cst_561 = arith.constant 9.99999974E-6 : f32
    %1972 = vector.broadcast %cst_561 : f32 to vector<2x1xf32>
    %1973 = arith.addf %1971, %1972 : vector<2x1xf32>
    %1974 = math.rsqrt %1973 : vector<2x1xf32>
    %1975 = vector.broadcast %1974 : vector<2x1xf32> to vector<2x8xf32>
    %1976 = arith.mulf %1966, %1975 : vector<2x8xf32>
    %1977 = vector.broadcast %8 : vector<1x8xf32> to vector<2x8xf32>
    %1978 = arith.mulf %1976, %1977 : vector<2x8xf32>
    %1979 = vector.broadcast %9 : vector<1x8xf32> to vector<2x8xf32>
    %1980 = arith.addf %1978, %1979 : vector<2x8xf32>
    %1981 = vector.shape_cast %1980 : vector<2x8xf32> to vector<2x1x8xf32>
    %1982 = arith.truncf %1981 : vector<2x1x8xf32> to vector<2x1x8xbf16>
    "tpu.trace_start"() <{level = 10 : i32, message = "bqd,bmd->bqm"}> : () -> ()
    %cst_562 = arith.constant dense<0.000000e+00> : vector<2x1x16xf32>
    %1983 = tpu.matmul %1982, %1957, %cst_562 {dimension_numbers = #tpu.dot_dimension_numbers<[2], [2], [1], [1], [0, 0, 0, 1, 1, 1], [0], [0]>} : vector<2x1x8xbf16>, vector<2x16x8xbf16>, vector<2x1x16xf32> -> vector<2x1x16xf32>
    "tpu.trace_stop"() : () -> ()
    %cst_563 = arith.constant dense<0xFF800000> : vector<2x1xf32>
    %1984 = vector.multi_reduction <maximumf>, %1983, %cst_563 [2] : vector<2x1x16xf32> to vector<2x1xf32>
    %1985 = vector.shape_cast %1984 : vector<2x1xf32> to vector<2x1x1xf32>
    %1986 = vector.broadcast %1985 : vector<2x1x1xf32> to vector<2x1x16xf32>
    %1987 = arith.subf %1983, %1986 : vector<2x1x16xf32>
    %1988 = math.exp %1987 : vector<2x1x16xf32>
    %cst_564 = arith.constant dense<0.000000e+00> : vector<2x1xf32>
    %1989 = vector.multi_reduction <add>, %1988, %cst_564 [2] : vector<2x1x16xf32> to vector<2x1xf32>
    %1990 = vector.shape_cast %1989 : vector<2x1xf32> to vector<2x1x1xf32>
    %1991 = tpu.reciprocal %1990 {approx = true} : vector<2x1x1xf32> -> vector<2x1x1xf32>
    %1992 = vector.broadcast %1991 : vector<2x1x1xf32> to vector<2x1x16xf32>
    %1993 = arith.mulf %1988, %1992 : vector<2x1x16xf32>
    %1994 = arith.truncf %1993 : vector<2x1x16xf32> to vector<2x1x16xbf16>
    "tpu.trace_start"() <{level = 10 : i32, message = "bqm,bmd->bqd"}> : () -> ()
    %cst_565 = arith.constant dense<0.000000e+00> : vector<2x1x8xf32>
    %1995 = tpu.matmul %1994, %1958, %cst_565 {dimension_numbers = #tpu.dot_dimension_numbers<[2], [1], [1], [2], [0, 0, 0, 1, 1, 2], [0], [0]>} : vector<2x1x16xbf16>, vector<2x16x8xbf16>, vector<2x1x8xf32> -> vector<2x1x8xf32>
    "tpu.trace_stop"() : () -> ()
    %cst_566 = arith.constant dense<0.000000e+00> : vector<2x8xf32>
    %1996 = vector.multi_reduction <add>, %1995, %cst_566 [1] : vector<2x1x8xf32> to vector<2x8xf32>
    %c14_567 = arith.constant 14 : index
    %c32_568 = arith.constant 32 : index
    %1997 = vector.load %arg11[%c14_567, %c32_568] : memref<16x48xf32, #tpu.memory_space<vmem>>, vector<2x8xf32>
    tpu.vector_store %arg11[%c14_567, %c32_568], %1996 {strides = array<i32>} : memref<16x48xf32, #tpu.memory_space<vmem>>, vector<2x8xf32>,
    %1998 = vector.extract_strided_slice %1904 {offsets = [0, 8], sizes = [2, 8], strides = [1, 1]} : vector<2x40xf32> to vector<2x8xf32>
    %cst_569 = arith.constant dense<0.000000e+00> : vector<2xf32>
    %1999 = vector.multi_reduction <add>, %1998, %cst_569 [1] : vector<2x8xf32> to vector<2xf32>
    %2000 = vector.shape_cast %1999 : vector<2xf32> to vector<2x1xf32>
    %cst_570 = arith.constant 8.000000e+00 : f32
    %2001 = vector.broadcast %cst_570 : f32 to vector<2x1xf32>
    %2002 = arith.divf %2000, %2001 : vector<2x1xf32>
    %2003 = vector.broadcast %2002 : vector<2x1xf32> to vector<2x8xf32>
    %2004 = arith.subf %1998, %2003 : vector<2x8xf32>
    %2005 = arith.mulf %2004, %2004 : vector<2x8xf32>
    %cst_571 = arith.constant dense<0.000000e+00> : vector<2xf32>
    %2006 = vector.multi_reduction <add>, %2005, %cst_571 [1] : vector<2x8xf32> to vector<2xf32>
    %2007 = vector.shape_cast %2006 : vector<2xf32> to vector<2x1xf32>
    %cst_572 = arith.constant 8.000000e+00 : f32
    %2008 = vector.broadcast %cst_572 : f32 to vector<2x1xf32>
    %2009 = arith.divf %2007, %2008 : vector<2x1xf32>
    %cst_573 = arith.constant 9.99999974E-6 : f32
    %2010 = vector.broadcast %cst_573 : f32 to vector<2x1xf32>
    %2011 = arith.addf %2009, %2010 : vector<2x1xf32>
    %2012 = math.rsqrt %2011 : vector<2x1xf32>
    %2013 = vector.broadcast %2012 : vector<2x1xf32> to vector<2x8xf32>
    %2014 = arith.mulf %2004, %2013 : vector<2x8xf32>
    %2015 = vector.broadcast %8 : vector<1x8xf32> to vector<2x8xf32>
    %2016 = arith.mulf %2014, %2015 : vector<2x8xf32>
    %2017 = vector.broadcast %9 : vector<1x8xf32> to vector<2x8xf32>
    %2018 = arith.addf %2016, %2017 : vector<2x8xf32>
    %2019 = vector.shape_cast %2018 : vector<2x8xf32> to vector<2x1x8xf32>
    %2020 = arith.truncf %2019 : vector<2x1x8xf32> to vector<2x1x8xbf16>
    "tpu.trace_start"() <{level = 10 : i32, message = "bqd,bmd->bqm"}> : () -> ()
    %cst_574 = arith.constant dense<0.000000e+00> : vector<2x1x16xf32>
    %2021 = tpu.matmul %2020, %1957, %cst_574 {dimension_numbers = #tpu.dot_dimension_numbers<[2], [2], [1], [1], [0, 0, 0, 1, 1, 1], [0], [0]>} : vector<2x1x8xbf16>, vector<2x16x8xbf16>, vector<2x1x16xf32> -> vector<2x1x16xf32>
    "tpu.trace_stop"() : () -> ()
    %cst_575 = arith.constant dense<0xFF800000> : vector<2x1xf32>
    %2022 = vector.multi_reduction <maximumf>, %2021, %cst_575 [2] : vector<2x1x16xf32> to vector<2x1xf32>
    %2023 = vector.shape_cast %2022 : vector<2x1xf32> to vector<2x1x1xf32>
    %2024 = vector.broadcast %2023 : vector<2x1x1xf32> to vector<2x1x16xf32>
    %2025 = arith.subf %2021, %2024 : vector<2x1x16xf32>
    %2026 = math.exp %2025 : vector<2x1x16xf32>
    %cst_576 = arith.constant dense<0.000000e+00> : vector<2x1xf32>
    %2027 = vector.multi_reduction <add>, %2026, %cst_576 [2] : vector<2x1x16xf32> to vector<2x1xf32>
    %2028 = vector.shape_cast %2027 : vector<2x1xf32> to vector<2x1x1xf32>
    %2029 = tpu.reciprocal %2028 {approx = true} : vector<2x1x1xf32> -> vector<2x1x1xf32>
    %2030 = vector.broadcast %2029 : vector<2x1x1xf32> to vector<2x1x16xf32>
    %2031 = arith.mulf %2026, %2030 : vector<2x1x16xf32>
    %2032 = arith.truncf %2031 : vector<2x1x16xf32> to vector<2x1x16xbf16>
    "tpu.trace_start"() <{level = 10 : i32, message = "bqm,bmd->bqd"}> : () -> ()
    %cst_577 = arith.constant dense<0.000000e+00> : vector<2x1x8xf32>
    %2033 = tpu.matmul %2032, %1958, %cst_577 {dimension_numbers = #tpu.dot_dimension_numbers<[2], [1], [1], [2], [0, 0, 0, 1, 1, 2], [0], [0]>} : vector<2x1x16xbf16>, vector<2x16x8xbf16>, vector<2x1x8xf32> -> vector<2x1x8xf32>
    "tpu.trace_stop"() : () -> ()
    %cst_578 = arith.constant dense<0.000000e+00> : vector<2x8xf32>
    %2034 = vector.multi_reduction <add>, %2033, %cst_578 [1] : vector<2x1x8xf32> to vector<2x8xf32>
    %c14_579 = arith.constant 14 : index
    %c40_580 = arith.constant 40 : index
    %2035 = vector.load %arg11[%c14_579, %c40_580] : memref<16x48xf32, #tpu.memory_space<vmem>>, vector<2x8xf32>
    tpu.vector_store %arg11[%c14_579, %c40_580], %2034 {strides = array<i32>} : memref<16x48xf32, #tpu.memory_space<vmem>>, vector<2x8xf32>,
    %c0_581 = arith.constant 0 : index
    %c0_582 = arith.constant 0 : index
    %c0_583 = arith.constant 0 : index
    %2036 = vector.load %arg8[%c0_581, %c0_582, %c0_583] : memref<2x16x8xf32, #tpu.memory_space<vmem>>, vector<2x16x8xf32>
    tpu.vector_store %arg8[%c0_581, %c0_582, %c0_583], %1934 {strides = array<i32>} : memref<2x16x8xf32, #tpu.memory_space<vmem>>, vector<2x16x8xf32>,
    %c0_584 = arith.constant 0 : index
    %c0_585 = arith.constant 0 : index
    %2037 = vector.load %arg9[%c0_584, %c0_585] : memref<2x32xf32, #tpu.memory_space<vmem>>, vector<2x32xf32>
    tpu.vector_store %arg9[%c0_584, %c0_585], %1880 {strides = array<i32>} : memref<2x32xf32, #tpu.memory_space<vmem>>, vector<2x32xf32>,
    %c0_586 = arith.constant 0 : index
    %c0_587 = arith.constant 0 : index
    %2038 = vector.load %arg10[%c0_586, %c0_587] : memref<2x32xf32, #tpu.memory_space<vmem>>, vector<2x32xf32>
    tpu.vector_store %arg10[%c0_586, %c0_587], %1878 {strides = array<i32>} : memref<2x32xf32, #tpu.memory_space<vmem>>, vector<2x32xf32>,
    %c0_588 = arith.constant 0 : index
    %c0_589 = arith.constant 0 : index
    %2039 = vector.load %arg11[%c0_588, %c0_589] : memref<16x48xf32, #tpu.memory_space<vmem>>, vector<16x48xf32>
    %cst_590 = arith.constant dense<0.000000e+00> : vector<16xf32>
    %2040 = vector.multi_reduction <add>, %2039, %cst_590 [1] : vector<16x48xf32> to vector<16xf32>
    %2041 = vector.shape_cast %2040 : vector<16xf32> to vector<16x1xf32>
    %cst_591 = arith.constant 4.800000e+01 : f32
    %2042 = vector.broadcast %cst_591 : f32 to vector<16x1xf32>
    %2043 = arith.divf %2041, %2042 : vector<16x1xf32>
    %2044 = vector.broadcast %2043 : vector<16x1xf32> to vector<16x48xf32>
    %2045 = arith.subf %2039, %2044 : vector<16x48xf32>
    %2046 = arith.mulf %2045, %2045 : vector<16x48xf32>
    %cst_592 = arith.constant dense<0.000000e+00> : vector<16xf32>
    %2047 = vector.multi_reduction <add>, %2046, %cst_592 [1] : vector<16x48xf32> to vector<16xf32>
    %2048 = vector.shape_cast %2047 : vector<16xf32> to vector<16x1xf32>
    %cst_593 = arith.constant 4.800000e+01 : f32
    %2049 = vector.broadcast %cst_593 : f32 to vector<16x1xf32>
    %2050 = arith.divf %2048, %2049 : vector<16x1xf32>
    %cst_594 = arith.constant 9.99999974E-6 : f32
    %2051 = vector.broadcast %cst_594 : f32 to vector<16x1xf32>
    %2052 = arith.addf %2050, %2051 : vector<16x1xf32>
    %2053 = math.rsqrt %2052 : vector<16x1xf32>
    %2054 = vector.broadcast %2053 : vector<16x1xf32> to vector<16x48xf32>
    %2055 = arith.mulf %2045, %2054 : vector<16x48xf32>
    %2056 = vector.broadcast %12 : vector<1x48xf32> to vector<16x48xf32>
    %2057 = arith.mulf %2055, %2056 : vector<16x48xf32>
    %2058 = vector.broadcast %13 : vector<1x48xf32> to vector<16x48xf32>
    %2059 = arith.addf %2057, %2058 : vector<16x48xf32>
    %2060 = arith.truncf %2059 : vector<16x48xf32> to vector<16x48xbf16>
    %cst_595 = arith.constant dense<0.000000e+00> : vector<16x16xf32>
    %2061 = tpu.matmul %2060, %22, %cst_595 {dimension_numbers = #tpu.dot_dimension_numbers<[1], [0], [0], [1], [0, 0, 1, 1], [], []>} : vector<16x48xbf16>, vector<48x16xbf16>, vector<16x16xf32> -> vector<16x16xf32>
    %2062 = vector.broadcast %16 : vector<1x16xf32> to vector<16x16xf32>
    %2063 = arith.addf %2061, %2062 : vector<16x16xf32>
    %c0_596 = arith.constant 0 : index
    %c0_597 = arith.constant 0 : index
    %2064 = vector.load %arg7[%c0_596, %c0_597] : memref<16x16xf32, #tpu.memory_space<vmem>>, vector<16x16xf32>
    tpu.vector_store %arg7[%c0_596, %c0_597], %2063 {strides = array<i32>} : memref<16x16xf32, #tpu.memory_space<vmem>>, vector<16x16xf32>,
    return
  }
  func.func @transform_0(%arg0: i32) -> (i32, i32, i32) {
    %c0_i32 = arith.constant 0 : i32
    %c0_i32_0 = arith.constant 0 : i32
    %c0_i32_1 = arith.constant 0 : i32
    %c0_i32_2 = arith.constant 0 : i32
    return %c0_i32, %c0_i32_0, %c0_i32_1 : i32, i32, i32
  }
  func.func @transform_1(%arg0: i32) -> (i32, i32) {
    %c0_i32 = arith.constant 0 : i32
    %c0_i32_0 = arith.constant 0 : i32
    %c0_i32_1 = arith.constant 0 : i32
    return %c0_i32, %c0_i32_0 : i32, i32
  }
  func.func @transform_2(%arg0: i32) -> (i32, i32) {
    %c0_i32 = arith.constant 0 : i32
    %c0_i32_0 = arith.constant 0 : i32
    %c0_i32_1 = arith.constant 0 : i32
    return %c0_i32, %c0_i32_0 : i32, i32
  }
  func.func @transform_3(%arg0: i32) -> (i32, i32) {
    %c0_i32 = arith.constant 0 : i32
    %c0_i32_0 = arith.constant 0 : i32
    %c0_i32_1 = arith.constant 0 : i32
    return %c0_i32, %c0_i32_0 : i32, i32
  }
  func.func @transform_4(%arg0: i32) -> (i32, i32) {
    %c0_i32 = arith.constant 0 : i32
    %c0_i32_0 = arith.constant 0 : i32
    %c0_i32_1 = arith.constant 0 : i32
    return %c0_i32, %c0_i32_0 : i32, i32
  }
  func.func @transform_5(%arg0: i32) -> (i32, i32) {
    %c0_i32 = arith.constant 0 : i32
    %c0_i32_0 = arith.constant 0 : i32
    %c0_i32_1 = arith.constant 0 : i32
    return %c0_i32, %c0_i32_0 : i32, i32
  }
  func.func @transform_6(%arg0: i32) -> (i32, i32) {
    %c0_i32 = arith.constant 0 : i32
    %c0_i32_0 = arith.constant 0 : i32
    %c0_i32_1 = arith.constant 0 : i32
    return %c0_i32, %c0_i32_0 : i32, i32
  }
  func.func @transform_7(%arg0: i32) -> (i32, i32, i32) {
    %c0_i32 = arith.constant 0 : i32
    %c0_i32_0 = arith.constant 0 : i32
    %c0_i32_1 = arith.constant 0 : i32
    %c0_i32_2 = arith.constant 0 : i32
    return %c0_i32, %c0_i32_0, %c0_i32_1 : i32, i32, i32
  }
  func.func @transform_8(%arg0: i32) -> (i32, i32) {
    %c0_i32 = arith.constant 0 : i32
    %c0_i32_0 = arith.constant 0 : i32
    %c0_i32_1 = arith.constant 0 : i32
    return %c0_i32, %c0_i32_0 : i32, i32
  }
  func.func @transform_9(%arg0: i32) -> (i32, i32) {
    %c0_i32 = arith.constant 0 : i32
    %c0_i32_0 = arith.constant 0 : i32
    %c0_i32_1 = arith.constant 0 : i32
    return %c0_i32, %c0_i32_0 : i32, i32
  }
}

</mosaic_0001>

<bundles_post_ra>
// kernel: tpu_custom_call.1
= control target key start
LH: loop header
LB: loop body
LE: loop exit
PB: predicated region body
PF: predicated region fallthrough
CT: control target
= control target key end

     0   :  { %15 = vsyncpa [#allocation4], 0  ;;  %s12319_s0 = inlined_call_operand.hbm [shape: f32[8,2,16], index: 0, kind: input, shape index: {}]   ;;  %s12320_s1 = inlined_call_operand.vmem [shape: f32[2,128], index: 1, kind: input, shape index: {}]   ;;  %s12321_s2 = inlined_call_operand.vmem [shape: f32[1,184], index: 2, kind: input, shape index: {}]   ;;  %s12322_s3 = inlined_call_operand.vmem [shape: bf16[64,128], index: 3, kind: input, shape index: {}]   ;;  %s12323_s4 = inlined_call_operand.hbm [shape: bf16[32,40], index: 4, kind: input, shape index: {}]   ;;  %s12324_s5 = inlined_call_operand.vmem [shape: bf16[48,16], index: 5, kind: input, shape index: {}]   ;;  %s12325_s6 = inlined_call_operand.hbm [shape: f32[16,16], index: 6, kind: output, shape index: {0}]   ;;  %s12326_s7 = inlined_call_operand.vmem [shape: f32[2,16,8], index: 7, kind: output, shape index: {1}]   ;;  %s12327_s8 = inlined_call_operand.hbm [shape: f32[2,32], index: 8, kind: output, shape index: {2}]   ;;  %s12328_s9 = inlined_call_operand.hbm [shape: f32[2,32], index: 9, kind: output, shape index: {3}]  }
   0x1   :  { %16 = vsyncpa [#allocation7], 0 }
   0x2   :  { %17 = vsyncpa [#allocation5], 0 }
   0x3   :  { %18 = vsyncpa [#allocation10], 0  ;;  %s10200_s30 = smov [#allocation3]   ;;  %s10082_s13 = scalar_lea.hbm %s12319_s0, 256 }
   0x4   :  { %s24_s10 = sshll.u32 %s10200_s30, 4  ;;  %p10083_p0 = scmp.ne.s32.totalorder %s12319_s0, %s10082_s13  ;;  %s25_s10 = int_to_ptr.vmem [resolvable:$true] %s24_s10 }
   0x5   :  { %p10086_p1 = scmp.lt.u32.totalorder %s10082_s13, %s12319_s0 }
   0x7   :  { %p10088_p2 = pnand %p10086_p1, %p10083_p0 }
   0x9   :  { %10091 = shalt.err (!%p10088_p2)
}
   0xa   :  { %s10092_s18 = scalar_lea.vmem %s25_s10, 256  ;;  %p10097_p4 = scmp.lt.s32.totalorder %s25_s10, %s25_s10 }
   0xb   :  { %p10093_p3 = scmp.ne.s32.totalorder %s25_s10, %s10092_s18  ;;  %p10098_p5 = scmp.lt.s32.totalorder %s10092_s18, %s10092_s18 }
   0xd   :  { %p10099_p6 = por %p10098_p5, %p10097_p4 }
   0xf   :  { %p10100_p7 = pnand %p10099_p6, %p10093_p3 }
  0x11   :  { %10103 = shalt.err (!%p10100_p7)
}
  0x12   :  { %s10201_s19 = smov 32   ;;  %s10202_s20 = smov 2  }
  0x13   :  { %30 = dma.hbm_to_vmem [thread:$0]  %s12319_s0, 256, %s25_s10, [#allocation4], %s10201_s19, %s10201_s19, %s10202_s20  }
  0x14   :  { %s10203_s23 = smov [#allocation6]   ;;  %s10104_s27 = scalar_lea.hbm %s12323_s4, 256 }
  0x15   :  { %s42_s24 = sshll.u32 %s10203_s23, 4  ;;  %p10105_p8 = scmp.ne.s32.totalorder %s12323_s4, %s10104_s27  ;;  %s43_s24 = int_to_ptr.vmem [resolvable:$true] %s42_s24 }
  0x16   :  { %p10108_p9 = scmp.lt.u32.totalorder %s10104_s27, %s12323_s4 }
  0x18   :  { %p10110_p10 = pnand %p10108_p9, %p10105_p8 }
  0x1a   :  { %10113 = shalt.err (!%p10110_p10)
}
  0x1b   :  { %s10114_s12 = scalar_lea.vmem %s43_s24, 256  ;;  %p10119_p12 = scmp.lt.s32.totalorder %s43_s24, %s43_s24 }
  0x1c   :  { %p10115_p11 = scmp.ne.s32.totalorder %s43_s24, %s10114_s12  ;;  %p10120_p13 = scmp.lt.s32.totalorder %s10114_s12, %s10114_s12 }
  0x1e   :  { %p10121_p0 = por %p10120_p13, %p10119_p12 }
  0x20   :  { %p10122_p1 = pnand %p10121_p0, %p10115_p11 }
  0x22   :  { %10125 = shalt.err (!%p10122_p1)
}
  0x23   :  { %s10204_s0 = smov 64   ;;  %s10205_s10 = smov 4  }
  0x24   :  { %48 = dma.hbm_to_vmem [thread:$0]  %s12323_s4, 256, %s43_s24, [#allocation7], %s10204_s0, %s10204_s0, %s10205_s10  }
  0x25   :  { %10192 = dma.done.wait [#allocation4], 256  }
  0x26   :  { %10193 = vsyncadd [#allocation4], 4294967040 }
  0x27   :  { %10194 = dma.done.wait [#allocation7], 256  }
  0x28   :  { %10195 = vsyncadd [#allocation7], 4294967040  ;;  %v12329_v0 = vmov 0.0   ;;  %vm81_vm0 = vcmask 123904   ;;  %v80_v1 = vld [vmem:[#allocation3] sm:$0x3] }
  0x29   :  { %8947 = vmatprep.subr.bf16.mxu0 %v12329_v0  ;;  %8955 = vmatprep.subr.bf16.mxu1 %v12329_v0  ;;  %v82_v2 = vsel %vm81_vm0, %v80_v1, 0.0  ;;  %vm97_vm1 = vcmask 58368   ;;  %v10311_v14 = vld [vmem:[%s12322_s3 + $0x10] sm:$0xff]   ;;  %v10316_v15 = vld [vmem:[%s12322_s3] sm:$0xff]   ;;  %vm10207_vm2 = vmmov 0   ;;  %v10326_v16 = vld [vmem:[%s12322_s3 + $0x18] sm:$0xff]  }
  0x2a   :  { %83 = vadd.xlane.f32.xlu0 %v82_v2  ;;  %8951 = vmatprep.mubr.msk.bf16.mxu0 %vm10207_vm2, %v12329_v0  ;;  %v10208_v17 = vmov 0   ;;  %v64_v18 = vld [vmem:[%s12322_s3 + $0x8] sm:$0xf]  ;;  %vm242_vm3 = vcmask 1043456   ;;  %v10346_v27 = vld [vmem:[%s12320_s1] ss:$0 sm:$0xff] }
  0x2b   :  { %8957 = vmatprep.mubr.msk.bf16.mxu1 %vm10207_vm2, %v12329_v0  ;;  %8948 = vmatpush3.bf16.msra.mxu0 %v10311_v14  ;;  %v10339_v19 = vsel %vm242_vm3, %v64_v18, 0  ;;  %v10351_v30 = vld [vmem:[%s12320_s1 + $0x1] ss:$0 sm:$0xff]  ;;  %vm183_vm4 = vcmask 130048   ;;  %s10209_s27 = smov 104   ;;  %s10210_s28 = smov 112  }
  0x2c   :  { %8956 = vmatpush3.bf16.msra.mxu1 %v10316_v15  ;;  %8949 = vmatprep.subr.bf16.mxu0 %v12329_v0  ;;  %v65_v41 = vld [vmem:[%s12322_s3 + $0xc] sm:$0xf]  ;;  %vm238_vm5 = vcmask 64512   ;;  %v10379_v45 = vld [vmem:[%s12321_s2] ss:$0 sm:$0xff]  ;;  %vm362_vm6 = vcmask 254976  }
  0x2d   :  { %8973 = vmatprep.subr.bf16.mxu1 %v12329_v0  ;;  %v10366_v42 = vsel %vm242_vm3, %v65_v41, 0  ;;  %v10400_v18 = vld [vmem:[#allocation6] sm:$0xff]   ;;  %vm133_vm7 = vcmask 261120   ;;  %s10213_s14 = smov 120   ;;  %s10214_s4 = smov 72   ;;  %vm750_vm8 = vcmask 122880  }
  0x2e   :  { %85 = vadd.xlane.f32.xlu0 %v12329_v0  ;;  %vm874_vm9 = vcmask 1041409   ;;  %vm879_vm10 = vcmask 320768   ;;  %vm1142_vm11 = vcmask 386368   ;;  %vm8448_vm12 = vcmask 392192   ;;  %s10217_s26 = smov 48   ;;  %s10218_s15 = smov 88  }
  0x2f   :  { %8950 = vmatpush3.bf16.msra.mxu0 %v10326_v16 }
  0x30   :  { %8961 = vmatprep.subr.bf16.mxu0 %v12329_v0 }
  0x32   :  { %8952 = vmatmul.mubr.bf16.vlgmr.msra.gmra.mrb[0].mxu0 %v10208_v17 }
  0x33   :  { %8963 = vmatprep.mubr.msk.bf16.mxu0 %vm10207_vm2, %v12329_v0  ;;  %8962 = vmatpush3.bf16.msra.mxu0 %v10339_v19 }
  0x34   :  { %8967 = vmatprep.subr.bf16.mxu0 %v12329_v0 }
  0xb7   :  { %v84_v3 = vpop.xlane.xlu0 %83 }
  0xbb   :  { %v86_v4 = vpop.xlane.xlu0 %85 }
  0xbc   :  { %v87_v5 = vadd.f32 %v86_v4, %v84_v3 }
  0xbe   :  { %v88_v6 = vadd.f32 %v87_v5, %v86_v4 }
  0xc0   :  { %v89_v7 = vmul.f32 0.03125, %v88_v6 }
  0xc2   :  { %v90_v8 = vsub.f32 %v80_v1, %v89_v7  ;;  %v91_v9 = vsub.f32 0.0, %v89_v7 }
  0xc4   :  { %v92_v10 = vmul.f32 %v90_v8, %v90_v8  ;;  %v96_v12 = vmul.f32 %v91_v9, %v91_v9 }
  0xc6   :  { %v93_v11 = vsel %vm81_vm0, %v92_v10, 0.0  ;;  %v98_v13 = vsel %vm97_vm1, %v96_v12, 0.0 }
  0xc7   :  { %94 = vadd.xlane.f32.xlu1 %v93_v11 }
  0xcb   :  { %99 = vadd.xlane.f32.xlu1 %v98_v13 }
 0x105   :  { %v171_v37 = vpop.f32.mrb[0].mxu0 }
 0x106   :  { %v8953_v38 = vpop.f32.mrb[1].mxu0  ;;  %v9613_v46 = vadd.f32 %v10379_v45, %v171_v37 }
 0x107   :  { %v174_v39 = vpop.f32.mrb[2].mxu0 }
 0x108   :  { %v8954_v40 = vpop.f32.mrb[3].mxu0 }
 0x154   :  { %v95_v20 = vpop.xlane.xlu1 %94 }
 0x158   :  { %v100_v21 = vpop.xlane.xlu1 %99 }
 0x159   :  { %v101_v22 = vadd.f32 %v100_v21, %v95_v20  ;;  %v10403_v20 = vld [vmem:[#allocation6 + $0x8] sm:$0xff]  }
 0x15b   :  { %v102_v23 = vadd.f32 %v101_v22, %v100_v21 }
 0x15d   :  { %v103_v24 = vmul.f32 0.03125, %v102_v23 }
 0x15f   :  { %v104_v25 = vadd.f32 1e-05, %v103_v24 }
 0x161   :  { %9744 = vrsqrt.f32 %v104_v25 }
 0x16b   :  { %v9745_v26 = vpop.eup %9744 }
 0x16c   :  { %v117_v28 = vmul.f32 %v9745_v26, %v91_v9  ;;  %v106_v29 = vmul.f32 %v9745_v26, %v90_v8 }
 0x16e   :  { %v118_v31 = vmul.f32 %v10346_v27, %v117_v28  ;;  %v111_v32 = vmul.f32 %v10346_v27, %v106_v29 }
 0x170   :  { %v119_v33 = vadd.f32 %v10351_v30, %v118_v31  ;;  %v116_v34 = vadd.f32 %v10351_v30, %v111_v32 }
 0x172   :  { %v234_v35 = vpack.c.bf16 %v119_v33, %v119_v33  ;;  %v120_v36 = vpack.c.bf16 %v116_v34, %v116_v34  ;;  %v10211_v34 = vmov 32  }
 0x173   :  { %9735 = vset.pattern.permute.xlu0 %v10211_v34 }
 0x174   :  { %287 = vrot.lane.b32.xlu1 %v234_v35, %s10209_s27  ;;  %236 = vrot.lane.b32.xlu0 %v234_v35, %s10210_s28  ;;  %v10425_v35 = vld [vmem:[%s12321_s2 + $0x1] ss:$0 sm:$0xff] }
 0x175   :  { %8958 = vmatmul.mubr.msk.bf16.vlgmr.msra.gmra.mrb[0].mxu1 %vm183_vm4, %v120_v36 }
 0x176   :  { %8977 = vmatprep.mubr.msk.bf16.mxu1 %vm10207_vm2, %v12329_v0  ;;  %8974 = vmatpush3.bf16.msra.mxu1 %v10400_v18 }
 0x177   :  { %8975 = vmatprep.subr.bf16.mxu1 %v12329_v0 }
 0x17a   :  { %8976 = vmatpush3.bf16.msra.mxu1 %v10403_v20 }
 0x17b   :  { %8981 = vmatprep.subr.bf16.mxu1 %v12329_v0 }
 0x1e6   :  { %v237_v43 = vpop.permute.xlu0 %236  ;;  %v288_v44 = vpop.permute.xlu1 %287 }
 0x1e7   :  { %8964 = vmatmul.mubr.msk.bf16.vlgmr.msra.gmra.mrb[4].mxu0 %vm238_vm5, %v237_v43 }
 0x1e8   :  { %8968 = vmatpush3.bf16.msra.mxu0 %v10366_v42  ;;  %8969 = vmatprep.mubr.msk.bf16.mxu0 %vm10207_vm2, %v12329_v0 }
 0x1e9   :  { %8999 = vmatprep.subr.bf16.mxu0 %v12329_v0 }
 0x1f3   :  { %8970 = vmatmul.mubr.msk.bf16.vlgmr.msra.gmra.mrb[4].mxu0 %vm238_vm5, %v288_v44 }
 0x1f4   :  { %9001 = vmatprep.mubr.msk.bf16.mxu0 %vm10207_vm2, %v12329_v0 }
 0x248   :  { %v221_v47 = vpop.f32.mrb[0].mxu1 }
 0x249   :  { %v9614_v48 = vadd.f32 %v9613_v46, %v221_v47  ;;  %v8959_v49 = vpop.f32.mrb[1].mxu1  ;;  %v10212_v47 = vmov 1966171168  }
 0x24a   :  { %v224_v50 = vpop.f32.mrb[2].mxu1  ;;  %v471_v49 = vlaneseq }
 0x24b   :  { %v8960_v51 = vpop.f32.mrb[3].mxu1 }
 0x24c   :  { %v472_v51 = vshrl.u32 %v471_v49, 7 }
 0x2c6   :  { %v329_v52 = vpop.f32.mrb[4].mxu0 }
 0x2c7   :  { %v9615_v53 = vadd.f32 %v9614_v48, %v329_v52  ;;  %v8971_v54 = vpop.f32.mrb[5].mxu0  ;;  %v469_v48 = vunpack.c.l.s4 %v10212_v47 }
 0x2c8   :  { %v332_v55 = vpop.f32.mrb[6].mxu0 }
 0x2c9   :  { %9746 = vtanh.f32 %v9615_v53  ;;  %v8972_v56 = vpop.f32.mrb[7].mxu0  ;;  %v336_v58 = vmul.f32 0.5, %v9615_v53  ;;  %v470_v50 = vunpack.c.0.s8 %v469_v48 }
 0x2cb   :  { %9748 = vtanh.f32 %v336_v58  ;;  %v10432_v52 = vsub.s32 %v470_v50, %v472_v51 }
 0x2d3   :  { %v9747_v57 = vpop.eup %9746 }
 0x2d4   :  { %343 = vrot.lane.b32.xlu1 %v9747_v57, %s10204_s0  ;;  %v10435_v57 = vsub.s32 0, %v472_v51 }
 0x2d5   :  { %v9749_v59 = vpop.eup %9748 }
 0x2d6   :  { %v338_v60 = vmul.f32 0.5, %v9749_v59 }
 0x2d8   :  { %v339_v61 = vadd.f32 0.5, %v338_v60 }
 0x2da   :  { %v341_v1 = vmul.f32 0.0, %v339_v61 }
 0x346   :  { %v344_v62 = vpop.permute.xlu1 %343 }
 0x347   :  { %v346_v63 = vmul.f32 %v344_v62, %v339_v61 }
 0x349   :  { %348 = vrot.lane.b32.xlu1 %v346_v63, %s10201_s19 }
 0x3bb   :  { %v349_v2 = vpop.permute.xlu1 %348 }
 0x3bc   :  { %v10384_v3 = vadd.f32 %v349_v2, %v341_v1 }
 0x3be   :  { %9750 = vtanh.f32 %v10384_v3 }
 0x3c8   :  { %v9751_v4 = vpop.eup %9750 }
 0x3c9   :  { %354 = vrot.lane.b32.xlu0 %v9751_v4, %s10204_s0 }
 0x43b   :  { %v355_v5 = vpop.permute.xlu0 %354 }
 0x43c   :  { %v10388_v6 = vmul.f32 %v355_v5, %v339_v61 }
 0x43e   :  { %359 = vrot.lane.b32.xlu1 %v10388_v6, %s10201_s19 }
 0x4b0   :  { %v360_v7 = vpop.permute.xlu1 %359 }
 0x4b1   :  { %v363_v8 = vsel %vm362_vm6, %v360_v7, 0.0 }
 0x4b2   :  { %364 = vadd.xlane.f32.xlu0 %v363_v8 }
 0x4c8   :  { %382 = vrot.lane.b32.xlu0 %v10346_v27, %s10204_s0 }
 0x53f   :  { %v365_v9 = vpop.xlane.xlu0 %364 }
 0x540   :  { %v367_v10 = vmul.f32 0.03125, %v365_v9 }
 0x542   :  { %v368_v11 = vsub.f32 %v10388_v6, %v367_v10 }
 0x543   :  { %v10408_v25 = vpop.permute.xlu0 %382 }
 0x544   :  { %v369_v12 = vmul.f32 %v368_v11, %v368_v11 }
 0x546   :  { %371 = vrot.lane.b32.xlu1 %v369_v12, %s10201_s19 }
 0x5b8   :  { %v372_v13 = vpop.permute.xlu1 %371 }
 0x5b9   :  { %v374_v17 = vsel %vm362_vm6, %v372_v13, 0.0 }
 0x5ba   :  { %375 = vadd.xlane.f32.xlu1 %v374_v17 }
 0x5cb   :  { %387 = vrot.lane.b32.xlu1 %v10351_v30, %s10204_s0 }
 0x647   :  { %v376_v21 = vpop.xlane.xlu1 %375 }
 0x648   :  { %v377_v22 = vmul.f32 0.03125, %v376_v21 }
 0x64a   :  { %v378_v23 = vadd.f32 1e-05, %v377_v22 }
 0x64b   :  { %v10410_v28 = vpop.permute.xlu1 %387 }
 0x64c   :  { %9752 = vrsqrt.f32 %v378_v23 }
 0x656   :  { %v9753_v24 = vpop.eup %9752 }
 0x657   :  { %v380_v26 = vmul.f32 %v9753_v24, %v368_v11 }
 0x659   :  { %v385_v29 = vmul.f32 %v10408_v25, %v380_v26 }
 0x65b   :  { %v10414_v31 = vadd.f32 %v10410_v28, %v385_v29 }
 0x65d   :  { %v391_v32 = vpack.c.bf16 %v10414_v31, %v10414_v31 }
 0x65f   :  { %399 = vrot.lane.b32.xlu0 %v391_v32, %s10201_s19 }
 0x6d1   :  { %v400_v33 = vpop.permute.xlu0 %399 }
 0x6d2   :  { %8978 = vmatmul.mubr.msk.bf16.vlgmr.msra.gmra.mrb[4].mxu1 %vm133_vm7, %v400_v33 }
 0x6d3   :  { %8983 = vmatprep.mubr.msk.bf16.mxu1 %vm10207_vm2, %v12329_v0 }
 0x7a5   :  { %v450_v36 = vpop.f32.mrb[4].mxu1 }
 0x7a6   :  { %v10428_v37 = vadd.f32 %v10425_v35, %v450_v36  ;;  %v8979_v38 = vpop.f32.mrb[5].mxu1 }
 0x7a7   :  { %v453_v39 = vpop.f32.mrb[6].mxu1 }
 0x7a8   :  { %v8980_v40 = vpop.f32.mrb[7].mxu1  ;;  %v456_v41 = vmul.f32 0.5, %v10428_v37 }
 0x7aa   :  { %9754 = vtanh.f32 %v456_v41 }
 0x7ab   :  { %9756 = vtanh.f32 %v10428_v37 }
 0x7b4   :  { %v9755_v43 = vpop.eup %9754 }
 0x7b5   :  { %v458_v44 = vmul.f32 0.5, %v9755_v43  ;;  %v9757_v53 = vpop.eup %9756  ;;  %v610_v43 = vsel %vm97_vm1, %v10428_v37, 0.0 }
 0x7b7   :  { %v459_v46 = vadd.f32 0.5, %v458_v44 }
 0x7b9   :  { %463 = vperm.xlu0 %9735, %v459_v46  }
 0x838   :  { %v464_v54 = vpop.permute.xlu0 %463 }
 0x839   :  { %v508_v55 = vmul.f32 %v9757_v53, %v464_v54  ;;  %v466_v63 = vmul.f32 %v464_v54, %v459_v46 }
 0x83b   :  { %v516_v56 = vrot.slane %v508_v55, %v10432_v52  ;;  %v474_v1 = vrot.slane %v466_v63, %v10432_v52 }
 0x83d   :  { %v517_v58 = vcombine.high %v516_v56, %v516_v56  ;;  %v524_v59 = vrot.slane %v516_v56, %v10432_v52  ;;  %v475_v2 = vcombine.high %v474_v1, %v474_v1  ;;  %v482_v4 = vrot.slane %v474_v1, %v10432_v52 }
 0x83f   :  { %v535_v60 = vrot.slane %v524_v59, %v10435_v57  ;;  %v531_v61 = vrot.slane %v517_v58, %v10432_v52  ;;  %v492_v5 = vsub.f32 1.0, %v482_v4  ;;  %v489_v7 = vrot.slane %v475_v2, %v10432_v52 }
 0x841   :  { %540 = vrot.lane.b32.xlu1 %v535_v60, %s10213_s14  ;;  %v539_v62 = vrot.slane %v531_v61, %v10435_v57  ;;  %v499_v8 = vrot.slane %v492_v5, %v10435_v57  ;;  %v493_v9 = vsub.f32 1.0, %v489_v7 }
 0x843   :  { %v506_v10 = vmul.f32 0.0, %v499_v8  ;;  %v503_v11 = vrot.slane %v493_v9, %v10435_v57 }
 0x845   :  { %542 = vrot.lane.b32.xlu1 %v539_v62, %s10213_s14  ;;  %v507_v17 = vmul.f32 0.0, %v503_v11 }
 0x8b3   :  { %v541_v12 = vpop.permute.xlu1 %540 }
 0x8b4   :  { %v10448_v13 = vadd.f32 %v541_v12, %v506_v10 }
 0x8b6   :  { %550 = vrot.lane.b32.xlu0 %v10448_v13, %s10210_s28 }
 0x8b7   :  { %v543_v21 = vpop.permute.xlu1 %542 }
 0x8b8   :  { %v10452_v22 = vadd.f32 %v543_v21, %v507_v17 }
 0x8ba   :  { %552 = vrot.lane.b32.xlu1 %v10452_v22, %s10210_s28 }
 0x928   :  { %v551_v23 = vpop.permute.xlu0 %550 }
 0x929   :  { %v556_v24 = vsel %vm238_vm5, %v551_v23, 0.0 }
 0x92a   :  { %557 = vadd.xlane.f32.xlu0 %v556_v24 }
 0x92c   :  { %v553_v26 = vpop.permute.xlu1 %552 }
 0x92d   :  { %v559_v29 = vsel %vm238_vm5, %v553_v26, 0.0 }
 0x92e   :  { %560 = vadd.xlane.f32.xlu1 %v559_v29 }
 0x9b7   :  { %v558_v32 = vpop.xlane.xlu0 %557 }
 0x9b8   :  { %v563_v33 = vmul.f32 0.125, %v558_v32 }
 0x9ba   :  { %v565_v34 = vsub.f32 %v10448_v13, %v563_v33 }
 0x9bb   :  { %v561_v36 = vpop.xlane.xlu1 %560 }
 0x9bc   :  { %v564_v38 = vmul.f32 0.125, %v561_v36  ;;  %v567_v39 = vmul.f32 %v565_v34, %v565_v34 }
 0x9be   :  { %v566_v40 = vsub.f32 %v10452_v22, %v564_v38  ;;  %571 = vrot.lane.b32.xlu0 %v567_v39, %s10210_s28 }
 0x9c0   :  { %v568_v41 = vmul.f32 %v566_v40, %v566_v40 }
 0x9c2   :  { %573 = vrot.lane.b32.xlu1 %v568_v41, %s10210_s28 }
 0x9dd   :  { %611 = vadd.xlane.f32.xlu0 %v610_v43 }
 0xa30   :  { %v572_v44 = vpop.permute.xlu0 %571 }
 0xa31   :  { %v577_v46 = vsel %vm238_vm5, %v572_v44, 0.0 }
 0xa32   :  { %578 = vadd.xlane.f32.xlu1 %v577_v46 }
 0xa34   :  { %v574_v47 = vpop.permute.xlu1 %573 }
 0xa35   :  { %v580_v48 = vsel %vm238_vm5, %v574_v47, 0.0 }
 0xa36   :  { %581 = vadd.xlane.f32.xlu0 %v580_v48 }
 0xa43   :  { %596 = vrot.lane.b32.xlu1 %v10351_v30, %s10214_s4 }
 0xa4c   :  { %591 = vrot.lane.b32.xlu0 %v10346_v27, %s10214_s4 }
 0xa6a   :  { %v612_v49 = vpop.xlane.xlu0 %611 }
 0xa6b   :  { %v613_v50 = vmul.f32 0.125, %v612_v49 }
 0xa6d   :  { %v614_v51 = vsub.f32 %v10428_v37, %v613_v50 }
 0xa6f   :  { %v615_v53 = vmul.f32 %v614_v51, %v614_v51 }
 0xa71   :  { %v616_v54 = vsel %vm97_vm1, %v615_v53, 0.0 }
 0xa72   :  { %617 = vadd.xlane.f32.xlu1 %v616_v54 }
 0xabf   :  { %v579_v55 = vpop.xlane.xlu1 %578 }
 0xac0   :  { %v583_v56 = vmul.f32 0.125, %v579_v55 }
 0xac2   :  { %v585_v58 = vadd.f32 1e-05, %v583_v56 }
 0xac3   :  { %v582_v59 = vpop.xlane.xlu0 %581  ;;  %v10472_v2 = vpop.permute.xlu1 %596 }
 0xac4   :  { %9758 = vrsqrt.f32 %v585_v58  ;;  %v584_v60 = vmul.f32 0.125, %v582_v59 }
 0xac6   :  { %v586_v61 = vadd.f32 1e-05, %v584_v60 }
 0xac7   :  { %v10470_v63 = vpop.permute.xlu0 %591 }
 0xac8   :  { %9760 = vrsqrt.f32 %v586_v61 }
 0xace   :  { %v9759_v62 = vpop.eup %9758 }
 0xacf   :  { %v589_v1 = vmul.f32 %v9759_v62, %v565_v34 }
 0xad1   :  { %v594_v4 = vmul.f32 %v10470_v63, %v589_v1 }
 0xad2   :  { %v9761_v5 = vpop.eup %9760 }
 0xad3   :  { %v599_v7 = vadd.f32 %v10472_v2, %v594_v4  ;;  %v590_v8 = vmul.f32 %v9761_v5, %v566_v40 }
 0xad5   :  { %v601_v9 = vpack.c.bf16 %v599_v7, %v599_v7  ;;  %v595_v10 = vmul.f32 %v10470_v63, %v590_v8 }
 0xad7   :  { %653 = vrot.lane.b32.xlu0 %v601_v9, %s10210_s28  ;;  %v600_v11 = vadd.f32 %v10472_v2, %v595_v10 }
 0xad9   :  { %v602_v12 = vpack.c.bf16 %v600_v11, %v600_v11 }
 0xadb   :  { %702 = vrot.lane.b32.xlu0 %v602_v12, %s10210_s28 }
 0xadf   :  { %882 = vrot.lane.b32.xlu0 %v10428_v37, %s10213_s14 }
 0xaff   :  { %v618_v17 = vpop.xlane.xlu1 %617 }
 0xb00   :  { %v619_v21 = vmul.f32 0.125, %v618_v17 }
 0xb02   :  { %v620_v23 = vadd.f32 1e-05, %v619_v21 }
 0xb04   :  { %9762 = vrsqrt.f32 %v620_v23 }
 0xb0e   :  { %v9763_v24 = vpop.eup %9762 }
 0xb0f   :  { %v622_v26 = vmul.f32 %v9763_v24, %v614_v51 }
 0xb11   :  { %v623_v29 = vmul.f32 %v622_v26, %v10408_v25  ;;  %v604_v26 = vpack.c.bf16 %v10452_v22, %v10452_v22 }
 0xb13   :  { %v624_v32 = vadd.f32 %v623_v29, %v10410_v28 }
 0xb15   :  { %v632_v33 = vrot.slane %v624_v32, %v10432_v52 }
 0xb17   :  { %v640_v38 = vrot.slane %v632_v33, %v10432_v52  ;;  %v633_v41 = vcombine.high %v632_v33, %v632_v33  ;;  %v603_v33 = vpack.c.bf16 %v10448_v13, %v10448_v13 }
 0xb19   :  { %v650_v40 = vpack.c.bf16 %v640_v38, %v640_v38  ;;  %v647_v47 = vrot.slane %v633_v41, %v10432_v52 }
 0xb1b   :  { %v651_v48 = vpack.c.bf16 %v647_v47, %v647_v47 }
 0xb49   :  { %v654_v34 = vpop.permute.xlu0 %653 }
 0xb4a   :  { %v10486_v36 = vsel %vm238_vm5, %v654_v34, 0 }
 0xb4b   :  { %8982 = vmatpush3.bf16.xpose.msra.mxu1 %v10486_v36 }
 0xb4c   :  { %8987 = vmatprep.subr.bf16.mxu1 %v12329_v0 }
 0xb4d   :  { %v703_v39 = vpop.permute.xlu0 %702 }
 0xb4e   :  { %v10492_v44 = vsel %vm238_vm5, %v703_v39, 0 }
 0xb51   :  { %v883_v43 = vpop.permute.xlu0 %882 }
 0xb52   :  { %8984 = vmatmul.mubr.msk.bf16.vlgmr.msra.gmra.mrb[8].mxu1 %vm238_vm5, %v650_v40  ;;  %v885_v46 = vsel %vm97_vm1, %v883_v43, 0.0 }
 0xb53   :  { %886 = vadd.xlane.f32.xlu0 %v885_v46  ;;  %8988 = vmatpush3.bf16.xpose.msra.mxu1 %v10492_v44 }
 0xb54   :  { %8989 = vmatprep.mubr.msk.bf16.mxu1 %vm10207_vm2, %v12329_v0  ;;  %8993 = vmatprep.subr.bf16.mxu1 %v12329_v0 }
 0xb5a   :  { %8990 = vmatmul.mubr.msk.bf16.vlgmr.msra.gmra.mrb[12].mxu1 %vm238_vm5, %v651_v48 }
 0xb5b   :  { %8995 = vmatprep.mubr.msk.bf16.mxu1 %vm10207_vm2, %v12329_v0 }
 0xbe0   :  { %v887_v49 = vpop.xlane.xlu0 %886 }
 0xbe1   :  { %v888_v50 = vmul.f32 0.125, %v887_v49 }
 0xbe3   :  { %v889_v51 = vsub.f32 %v10428_v37, %v888_v50 }
 0xbe5   :  { %v890_v53 = vmul.f32 %v889_v51, %v889_v51 }
 0xbe7   :  { %892 = vrot.lane.b32.xlu1 %v890_v53, %s10213_s14 }
 0xc25   :  { %v695_v54 = vpop.f32.mrb[8].mxu1 }
 0xc26   :  { %v8985_v55 = vpop.f32.mrb[9].mxu1  ;;  %v751_v4 = vsel %vm750_vm8, %v695_v54, -inf }
 0xc27   :  { %v698_v56 = vpop.f32.mrb[10].mxu1 }
 0xc28   :  { %v8986_v58 = vpop.f32.mrb[11].mxu1 }
 0xc2d   :  { %v744_v59 = vpop.f32.mrb[12].mxu1 }
 0xc2e   :  { %v8991_v60 = vpop.f32.mrb[13].mxu1  ;;  %v754_v61 = vsel %vm750_vm8, %v744_v59, -inf }
 0xc2f   :  { %755 = vmax.xlane.f32.xlu0 %v754_v61  ;;  %v747_v62 = vpop.f32.mrb[14].mxu1 }
 0xc30   :  { %v8992_v1 = vpop.f32.mrb[15].mxu1 }
 0xc33   :  { %752 = vmax.xlane.f32.xlu0 %v751_v4 }
 0xc59   :  { %v893_v5 = vpop.permute.xlu1 %892 }
 0xc5a   :  { %v895_v37 = vsel %vm97_vm1, %v893_v5, 0.0 }
 0xc5b   :  { %896 = vadd.xlane.f32.xlu0 %v895_v37 }
 0xcbc   :  { %v756_v7 = vpop.xlane.xlu0 %755 }
 0xcbd   :  { %v758_v8 = vsub.f32 %v744_v59, %v756_v7 }
 0xcbf   :  { %v761_v9 = vmul.f32 1.442695, %v758_v8 }
 0xcc0   :  { %v753_v10 = vpop.xlane.xlu0 %752 }
 0xcc1   :  { %9764 = vpow2.f32 %v761_v9  ;;  %v757_v11 = vsub.f32 %v695_v54, %v753_v10 }
 0xcc3   :  { %v759_v12 = vmul.f32 1.442695, %v757_v11 }
 0xcc5   :  { %9766 = vpow2.f32 %v759_v12 }
 0xccb   :  { %v9765_v17 = vpop.eup %9764 }
 0xccc   :  { %v766_v21 = vsel %vm750_vm8, %v9765_v17, 0.0 }
 0xccd   :  { %767 = vadd.xlane.f32.xlu1 %v766_v21 }
 0xccf   :  { %v9767_v23 = vpop.eup %9766 }
 0xcd0   :  { %v763_v24 = vsel %vm750_vm8, %v9767_v23, 0.0 }
 0xcd1   :  { %764 = vadd.xlane.f32.xlu0 %v763_v24 }
 0xce7   :  { %823 = vrot.lane.b32.xlu0 %v604_v26, %s10210_s28 }
 0xce8   :  { %v897_v29 = vpop.xlane.xlu0 %896 }
 0xce9   :  { %v898_v32 = vmul.f32 0.125, %v897_v29 }
 0xceb   :  { %v899_v34 = vadd.f32 1e-05, %v898_v32  ;;  %776 = vrot.lane.b32.xlu0 %v603_v33, %s10210_s28 }
 0xced   :  { %9768 = vrsqrt.f32 %v899_v34 }
 0xcf7   :  { %v9769_v38 = vpop.eup %9768 }
 0xcf8   :  { %v901_v39 = vmul.f32 %v9769_v38, %v889_v51 }
 0xcfa   :  { %v902_v40 = vmul.f32 %v901_v39, %v10470_v63 }
 0xcfc   :  { %v903_v41 = vadd.f32 %v902_v40, %v10472_v2 }
 0xcfe   :  { %v911_v43 = vrot.slane %v903_v41, %v10432_v52 }
 0xd00   :  { %v919_v46 = vrot.slane %v911_v43, %v10432_v52  ;;  %v912_v47 = vcombine.high %v911_v43, %v911_v43 }
 0xd02   :  { %v929_v48 = vpack.c.bf16 %v919_v46, %v919_v46  ;;  %v926_v49 = vrot.slane %v912_v47, %v10432_v52 }
 0xd04   :  { %932 = vrot.lane.b32.xlu1 %v929_v48, %s10213_s14  ;;  %v930_v50 = vpack.c.bf16 %v926_v49, %v926_v49 }
 0xd06   :  { %978 = vrot.lane.b32.xlu0 %v930_v50, %s10213_s14 }
 0xd5a   :  { %v768_v53 = vpop.xlane.xlu1 %767 }
 0xd5b   :  { %9770 = vrcp.f32 %v768_v53  ;;  %v1145_v53 = vld [vmem:[#allocation3 + $0x2] sm:$0x3] }
 0xd5e   :  { %v765_v51 = vpop.xlane.xlu0 %764 }
 0xd5f   :  { %9772 = vrcp.f32 %v765_v51 }
 0xd62   :  { %v824_v54 = vpop.permute.xlu0 %823 }
 0xd63   :  { %9000 = vmatpush3.bf16.msra.mxu0 %v824_v54 }
 0xd64   :  { %9011 = vmatprep.subr.bf16.mxu0 %v12329_v0 }
 0xd65   :  { %v9771_v55 = vpop.eup %9770 }
 0xd66   :  { %v777_v56 = vpop.permute.xlu0 %776  ;;  %v772_v58 = vmul.f32 %v9771_v55, %v9765_v17 }
 0xd67   :  { %8994 = vmatpush3.bf16.msra.mxu1 %v777_v56 }
 0xd68   :  { %v774_v59 = vpack.c.bf16 %v772_v58, %v772_v58  ;;  %9005 = vmatprep.subr.bf16.mxu1 %v12329_v0 }
 0xd69   :  { %v9773_v60 = vpop.eup %9772 }
 0xd6a   :  { %9002 = vmatmul.mubr.msk.bf16.vlgmr.msra.gmra.mrb[8].mxu0 %vm183_vm4, %v774_v59  ;;  %v771_v61 = vmul.f32 %v9773_v60, %v9767_v23 }
 0xd6b   :  { %9013 = vmatprep.mubr.msk.bf16.mxu0 %vm10207_vm2, %v12329_v0 }
 0xd6c   :  { %9012 = vmatpush3.bf16.xpose.msra.mxu0 %v10492_v44  ;;  %v773_v62 = vpack.c.bf16 %v771_v61, %v771_v61 }
 0xd6d   :  { %9023 = vmatprep.subr.bf16.mxu0 %v12329_v0 }
 0xd6e   :  { %8996 = vmatmul.mubr.msk.bf16.vlgmr.msra.gmra.mrb[16].mxu1 %vm183_vm4, %v773_v62 }
 0xd6f   :  { %9007 = vmatprep.mubr.msk.bf16.mxu1 %vm10207_vm2, %v12329_v0 }
 0xd70   :  { %9006 = vmatpush3.bf16.xpose.msra.mxu1 %v10486_v36 }
 0xd71   :  { %9017 = vmatprep.subr.bf16.mxu1 %v12329_v0 }
 0xd76   :  { %v933_v1 = vpop.permute.xlu1 %932 }
 0xd77   :  { %9008 = vmatmul.mubr.msk.bf16.vlgmr.msra.gmra.mrb[20].mxu1 %vm238_vm5, %v933_v1 }
 0xd78   :  { %9018 = vmatpush3.bf16.msra.mxu1 %v777_v56  ;;  %v979_v4 = vpop.permute.xlu0 %978  ;;  %9019 = vmatprep.mubr.msk.bf16.mxu1 %vm10207_vm2, %v12329_v0 }
 0xd79   :  { %9014 = vmatmul.mubr.msk.bf16.vlgmr.msra.gmra.mrb[12].mxu0 %vm238_vm5, %v979_v4  ;;  %9029 = vmatprep.subr.bf16.mxu1 %v12329_v0 }
 0xd7a   :  { %9024 = vmatpush3.bf16.msra.mxu0 %v824_v54  ;;  %9025 = vmatprep.mubr.msk.bf16.mxu0 %vm10207_vm2, %v12329_v0  ;;  %v1146_v54 = vsel %vm81_vm0, %v1145_v53, 0.0 }
 0xd7b   :  { %9055 = vmatprep.subr.bf16.mxu0 %v12329_v0 }
 0xe3d   :  { %v10544_v36 = vpop.f32.mrb[8].mxu0 }
 0xe3e   :  { %v9003_v44 = vpop.f32.mrb[9].mxu0  ;;  %v873_v37 = vrot.slane %v10544_v36, 7 }
 0xe3f   :  { %v866_v5 = vpop.f32.mrb[10].mxu0 }
 0xe40   :  { %v9004_v7 = vpop.f32.mrb[11].mxu0 }
 0xe41   :  { %v10547_v8 = vpop.f32.mrb[16].mxu1 }
 0xe42   :  { %v8997_v9 = vpop.f32.mrb[17].mxu1  ;;  %v10551_v10 = vsel %vm874_vm9, %v873_v37, %v10547_v8 }
 0xe43   :  { %v819_v11 = vpop.f32.mrb[18].mxu1  ;;  %v1150_v55 = vsel %vm97_vm1, %v10551_v10, 0.0 }
 0xe44   :  { %v8998_v12 = vpop.f32.mrb[19].mxu1 }
 0xe4a   :  { %v971_v17 = vpop.f32.mrb[20].mxu1 }
 0xe4b   :  { %v9009_v21 = vpop.f32.mrb[21].mxu1  ;;  %v1023_v23 = vsel %vm750_vm8, %v971_v17, -inf }
 0xe4c   :  { %v1017_v24 = vpop.f32.mrb[12].mxu0  ;;  %1024 = vmax.xlane.f32.xlu1 %v1023_v23  ;;  %v974_v26 = vpop.f32.mrb[22].mxu1 }
 0xe4d   :  { %v9010_v29 = vpop.f32.mrb[23].mxu1  ;;  %v9015_v32 = vpop.f32.mrb[13].mxu0  ;;  %v1026_v33 = vsel %vm750_vm8, %v1017_v24, -inf }
 0xe4e   :  { %1027 = vmax.xlane.f32.xlu0 %v1026_v33  ;;  %v1020_v34 = vpop.f32.mrb[14].mxu0 }
 0xe4f   :  { %v9016_v38 = vpop.f32.mrb[15].mxu0 }
 0xed9   :  { %v1025_v39 = vpop.xlane.xlu1 %1024 }
 0xeda   :  { %v1029_v40 = vsub.f32 %v971_v17, %v1025_v39 }
 0xedb   :  { %v1028_v41 = vpop.xlane.xlu0 %1027 }
 0xedc   :  { %v1030_v43 = vsub.f32 %v1017_v24, %v1028_v41  ;;  %v1031_v46 = vmul.f32 1.442695, %v1029_v40 }
 0xede   :  { %v1033_v47 = vmul.f32 1.442695, %v1030_v43 }
 0xee0   :  { %9774 = vpow2.f32 %v1033_v47 }
 0xee1   :  { %9776 = vpow2.f32 %v1031_v46 }
 0xeea   :  { %v9775_v48 = vpop.eup %9774 }
 0xeeb   :  { %v1038_v49 = vsel %vm750_vm8, %v9775_v48, 0.0  ;;  %v9777_v50 = vpop.eup %9776 }
 0xeec   :  { %1039 = vadd.xlane.f32.xlu0 %v1038_v49  ;;  %v1035_v51 = vsel %vm750_vm8, %v9777_v50, 0.0 }
 0xef0   :  { %1036 = vadd.xlane.f32.xlu0 %v1035_v51 }
 0xef4   :  { %1147 = vadd.xlane.f32.xlu0 %v1146_v54 }
 0xef8   :  { %1151 = vadd.xlane.f32.xlu0 %v1150_v55 }
 0xf79   :  { %v1040_v56 = vpop.xlane.xlu0 %1039 }
 0xf7a   :  { %9778 = vrcp.f32 %v1040_v56 }
 0xf7d   :  { %v1037_v58 = vpop.xlane.xlu0 %1036 }
 0xf7e   :  { %9780 = vrcp.f32 %v1037_v58 }
 0xf81   :  { %v1148_v21 = vpop.xlane.xlu0 %1147 }
 0xf84   :  { %v9779_v59 = vpop.eup %9778 }
 0xf85   :  { %v1044_v60 = vmul.f32 %v9779_v59, %v9775_v48 }
 0xf87   :  { %v1046_v61 = vpack.c.bf16 %v1044_v60, %v1044_v60 }
 0xf88   :  { %v9781_v62 = vpop.eup %9780 }
 0xf89   :  { %9026 = vmatmul.mubr.msk.bf16.vlgmr.msra.gmra.mrb[16].mxu0 %vm183_vm4, %v1046_v61  ;;  %v1043_v1 = vmul.f32 %v9781_v62, %v9777_v50 }
 0xf8a   :  { %9056 = vmatpush3.bf16.msra.mxu0 %v10400_v18  ;;  %9059 = vmatprep.mubr.msk.bf16.mxu0 %vm10207_vm2, %v12329_v0 }
 0xf8b   :  { %v1045_v4 = vpack.c.bf16 %v1043_v1, %v1043_v1  ;;  %9057 = vmatprep.subr.bf16.mxu0 %v12329_v0 }
 0xf8d   :  { %9020 = vmatmul.mubr.msk.bf16.vlgmr.msra.gmra.mrb[24].mxu1 %vm183_vm4, %v1045_v4 }
 0xf8e   :  { %9030 = vmatpush3.bf16.msra.mxu1 %v10311_v14  ;;  %9033 = vmatprep.mubr.msk.bf16.mxu1 %vm10207_vm2, %v12329_v0 }
 0xf8f   :  { %9031 = vmatprep.subr.bf16.mxu1 %v12329_v0  ;;  %9058 = vmatpush3.bf16.msra.mxu0 %v10403_v20 }
 0xf90   :  { %9063 = vmatprep.subr.bf16.mxu0 %v12329_v0 }
 0xf92   :  { %9032 = vmatpush3.bf16.msra.mxu1 %v10326_v16  ;;  %v1152_v16 = vpop.xlane.xlu0 %1151 }
 0xf93   :  { %9037 = vmatprep.subr.bf16.mxu1 %v12329_v0  ;;  %v1153_v23 = vadd.f32 %v1152_v16, %v1148_v21 }
0x105c   :  { %v1127_v18 = vpop.f32.mrb[16].mxu0 }
0x105d   :  { %v9027_v44 = vpop.f32.mrb[17].mxu0  ;;  %v1137_v37 = vrot.slane %v1127_v18, 7 }
0x105e   :  { %v1130_v5 = vpop.f32.mrb[18].mxu0 }
0x105f   :  { %v9028_v7 = vpop.f32.mrb[19].mxu0 }
0x1060   :  { %v1084_v9 = vpop.f32.mrb[24].mxu1 }
0x1061   :  { %v9021_v14 = vpop.f32.mrb[25].mxu1  ;;  %v10575_v11 = vsel %vm874_vm9, %v1137_v37, %v1084_v9 }
0x1062   :  { %v1087_v12 = vpop.f32.mrb[26].mxu1  ;;  %v1155_v20 = vsel %vm97_vm1, %v10575_v11, 0.0 }
0x1063   :  { %1156 = vadd.xlane.f32.xlu0 %v1155_v20  ;;  %v9022_v17 = vpop.f32.mrb[27].mxu1 }
0x10f0   :  { %v1157_v24 = vpop.xlane.xlu0 %1156 }
0x10f1   :  { %v1158_v26 = vadd.f32 %v1157_v24, %v1153_v23 }
0x10f3   :  { %v1159_v29 = vmul.f32 0.03125, %v1158_v26 }
0x10f5   :  { %v1162_v32 = vrot.slane %v1159_v29, 1  ;;  %v1160_v33 = vsub.f32 %v1145_v53, %v1159_v29  ;;  %v1165_v34 = vsub.f32 %v10547_v8, %v1159_v29  ;;  %v1167_v40 = vsub.f32 %v1084_v9, %v1159_v29 }
0x10f7   :  { %v1169_v38 = vmul.f32 %v1160_v33, %v1160_v33  ;;  %v1166_v39 = vsub.f32 %v10544_v36, %v1162_v32  ;;  %v1168_v41 = vsub.f32 %v1127_v18, %v1162_v32  ;;  %v1173_v48 = vmul.f32 %v1165_v34, %v1165_v34 }
0x10f8   :  { %v1184_v50 = vmul.f32 %v1167_v40, %v1167_v40  ;;  %v1230_v36 = vpack.c.bf16 %v10388_v6, %v10388_v6 }
0x10f9   :  { %v1170_v43 = vsel %vm81_vm0, %v1169_v38, 0.0  ;;  %v1174_v46 = vmul.f32 %v1166_v39, %v1166_v39  ;;  %v1185_v47 = vmul.f32 %v1168_v41, %v1168_v41 }
0x10fa   :  { %1171 = vadd.xlane.f32.xlu0 %v1170_v43 }
0x10fb   :  { %v1177_v49 = vrot.slane %v1174_v46, 7  ;;  %v1188_v51 = vrot.slane %v1185_v47, 7 }
0x10fd   :  { %v1178_v54 = vsel %vm874_vm9, %v1177_v49, %v1173_v48  ;;  %v1189_v53 = vsel %vm874_vm9, %v1188_v51, %v1184_v50 }
0x10fe   :  { %v1180_v8 = vsel %vm97_vm1, %v1178_v54, 0.0  ;;  %v1191_v55 = vsel %vm97_vm1, %v1189_v53, 0.0 }
0x10ff   :  { %1181 = vadd.xlane.f32.xlu1 %v1180_v8  ;;  %1192 = vadd.xlane.f32.xlu0 %v1191_v55 }
0x1110   :  { %1232 = vrot.lane.b32.xlu1 %v1230_v36, %s10201_s19 }
0x1114   :  { %1212 = vrot.lane.b32.xlu1 %v10351_v30, %s10210_s28 }
0x1115   :  { %1207 = vrot.lane.b32.xlu0 %v10346_v27, %s10210_s28 }
0x1118   :  { %1219 = vrot.lane.b32.xlu1 %v10346_v27, %s10209_s27 }
0x1119   :  { %1224 = vrot.lane.b32.xlu0 %v10351_v30, %s10209_s27 }
0x1187   :  { %v1172_v56 = vpop.xlane.xlu0 %1171 }
0x118c   :  { %v1182_v58 = vpop.xlane.xlu1 %1181  ;;  %v1193_v60 = vpop.xlane.xlu0 %1192 }
0x118d   :  { %v1183_v59 = vadd.f32 %v1182_v58, %v1172_v56 }
0x118f   :  { %v1194_v61 = vadd.f32 %v1193_v60, %v1183_v59 }
0x1190   :  { %v1233_v6 = vpop.permute.xlu1 %1232  ;;  %v10604_v7 = vpop.permute.xlu0 %1207 }
0x1191   :  { %v1195_v62 = vmul.f32 0.03125, %v1194_v61  ;;  %9034 = vmatmul.mubr.msk.bf16.vlgmr.msra.gmra.mrb[28].mxu1 %vm133_vm7, %v1233_v6 }
0x1192   :  { %9038 = vmatpush3.bf16.msra.mxu1 %v10316_v15  ;;  %9039 = vmatprep.mubr.msk.bf16.mxu1 %vm10207_vm2, %v12329_v0 }
0x1193   :  { %v1196_v1 = vadd.f32 1e-05, %v1195_v62  ;;  %9043 = vmatprep.subr.bf16.mxu1 %v12329_v0 }
0x1194   :  { %v10602_v18 = vpop.permute.xlu1 %1212  ;;  %v10619_v32 = vpop.permute.xlu0 %1224 }
0x1195   :  { %9782 = vrsqrt.f32 %v1196_v1 }
0x1198   :  { %v10611_v16 = vpop.permute.xlu1 %1219 }
0x119f   :  { %v9783_v4 = vpop.eup %9782 }
0x11a0   :  { %v1198_v44 = vmul.f32 %v9783_v4, %v1160_v33  ;;  %v1202_v5 = vrot.slane %v9783_v4, 1  ;;  %v1205_v37 = vmul.f32 %v9783_v4, %v1165_v34  ;;  %v1217_v29 = vmul.f32 %v9783_v4, %v1167_v40 }
0x11a2   :  { %v1199_v9 = vmul.f32 %v10346_v27, %v1198_v44  ;;  %v1206_v14 = vmul.f32 %v1202_v5, %v1166_v39  ;;  %v1210_v15 = vmul.f32 %v10604_v7, %v1205_v37  ;;  %v1218_v12 = vmul.f32 %v1202_v5, %v1168_v41 }
0x11a3   :  { %v1222_v41 = vmul.f32 %v10611_v16, %v1217_v29 }
0x11a4   :  { %v1200_v20 = vadd.f32 %v10351_v30, %v1199_v9  ;;  %v1211_v17 = vmul.f32 %v10604_v7, %v1206_v14  ;;  %v1215_v21 = vadd.f32 %v10602_v18, %v1210_v15  ;;  %v1223_v26 = vmul.f32 %v10611_v16, %v1218_v12 }
0x11a5   :  { %v1227_v47 = vadd.f32 %v10619_v32, %v1222_v41 }
0x11a6   :  { %v1229_v23 = vpack.c.bf16 %v1200_v20, %v1200_v20  ;;  %v1216_v24 = vadd.f32 %v10602_v18, %v1211_v17  ;;  %v1321_v30 = vpack.c.bf16 %v1215_v21, %v1215_v21  ;;  %v1228_v34 = vadd.f32 %v10619_v32, %v1223_v26 }
0x11a7   :  { %v1374_v40 = vpack.c.bf16 %v1227_v47, %v1227_v47 }
0x11a8   :  { %9040 = vmatmul.mubr.msk.bf16.vlgmr.msra.gmra.mrb[28].mxu1 %vm183_vm4, %v1229_v23  ;;  %v1322_v27 = vpack.c.bf16 %v1216_v24, %v1216_v24  ;;  %v1325_v39 = vunpack.c.l.b16 %v1321_v30  ;;  %v1375_v46 = vpack.c.bf16 %v1228_v34, %v1228_v34 }
0x11a9   :  { %9044 = vmatpush3.bf16.msra.mxu1 %v10339_v19  ;;  %9045 = vmatprep.mubr.msk.bf16.mxu1 %vm10207_vm2, %v12329_v0  ;;  %v1378_v51 = vunpack.c.l.b16 %v1374_v40 }
0x11aa   :  { %9049 = vmatprep.subr.bf16.mxu1 %v12329_v0  ;;  %v1326_v33 = vunpack.c.l.b16 %v1322_v27  ;;  %v1379_v49 = vunpack.c.l.b16 %v1375_v46 }
0x11ac   :  { %v1327_v38 = vrot.slane %v1326_v33, 7  ;;  %v1380_v50 = vrot.slane %v1379_v49, 7 }
0x11ae   :  { %v1328_v43 = vsel %vm874_vm9, %v1327_v38, %v1325_v39  ;;  %v1381_v54 = vsel %vm874_vm9, %v1380_v50, %v1378_v51 }
0x11af   :  { %v1329_v48 = vpack.c.b16 %v1328_v43, %v1328_v43  ;;  %v1382_v53 = vpack.c.b16 %v1381_v54, %v1381_v54 }
0x11b4   :  { %9046 = vmatmul.mubr.msk.bf16.vlgmr.msra.gmra.mrb[28].mxu1 %vm238_vm5, %v1329_v48 }
0x11b5   :  { %9050 = vmatpush3.bf16.msra.mxu1 %v10366_v42  ;;  %9051 = vmatprep.mubr.msk.bf16.mxu1 %vm10207_vm2, %v12329_v0 }
0x11b6   :  { %9081 = vmatprep.subr.bf16.mxu1 %v12329_v0 }
0x11c0   :  { %9052 = vmatmul.mubr.msk.bf16.vlgmr.msra.gmra.mrb[28].mxu1 %vm238_vm5, %v1382_v53 }
0x11c1   :  { %9083 = vmatprep.mubr.msk.bf16.mxu1 %vm10207_vm2, %v12329_v0 }
0x1293   :  { %v1420_v8 = vpop.f32.mrb[28].mxu1 }
0x1294   :  { %v9616_v55 = vadd.f32 %v10379_v45, %v1420_v8  ;;  %v9053_v36 = vpop.f32.mrb[29].mxu1 }
0x1295   :  { %v1423_v56 = vpop.f32.mrb[30].mxu1 }
0x1296   :  { %9784 = vtanh.f32 %v9616_v55  ;;  %v9054_v58 = vpop.f32.mrb[31].mxu1  ;;  %v1427_v60 = vmul.f32 0.5, %v9616_v55 }
0x1298   :  { %9786 = vtanh.f32 %v1427_v60 }
0x12a0   :  { %v9785_v59 = vpop.eup %9784 }
0x12a1   :  { %1434 = vrot.lane.b32.xlu1 %v9785_v59, %s10204_s0 }
0x12a2   :  { %v9787_v61 = vpop.eup %9786 }
0x12a3   :  { %v1429_v6 = vmul.f32 0.5, %v9787_v61 }
0x12a5   :  { %v1430_v62 = vadd.f32 0.5, %v1429_v6 }
0x12a7   :  { %v1432_v44 = vmul.f32 %v1430_v62, %v10384_v3 }
0x1313   :  { %v1435_v1 = vpop.permute.xlu1 %1434 }
0x1314   :  { %v1437_v4 = vmul.f32 %v1435_v1, %v1430_v62 }
0x1316   :  { %1439 = vrot.lane.b32.xlu0 %v1437_v4, %s10201_s19 }
0x1388   :  { %v1440_v5 = vpop.permute.xlu0 %1439 }
0x1389   :  { %v10639_v45 = vadd.f32 %v1440_v5, %v1432_v44 }
0x138b   :  { %9788 = vtanh.f32 %v10639_v45 }
0x1395   :  { %v9789_v37 = vpop.eup %9788 }
0x1396   :  { %1445 = vrot.lane.b32.xlu1 %v9789_v37, %s10204_s0 }
0x1408   :  { %v1446_v9 = vpop.permute.xlu1 %1445 }
0x1409   :  { %v10643_v14 = vmul.f32 %v1446_v9, %v1430_v62 }
0x140b   :  { %1450 = vrot.lane.b32.xlu0 %v10643_v14, %s10201_s19 }
0x147d   :  { %v1451_v15 = vpop.permute.xlu0 %1450 }
0x147e   :  { %v1453_v12 = vsel %vm362_vm6, %v1451_v15, 0.0 }
0x147f   :  { %1454 = vadd.xlane.f32.xlu1 %v1453_v12 }
0x150c   :  { %v1455_v20 = vpop.xlane.xlu1 %1454 }
0x150d   :  { %v1456_v3 = vmul.f32 0.03125, %v1455_v20 }
0x150f   :  { %v1457_v17 = vsub.f32 %v10643_v14, %v1456_v3 }
0x1511   :  { %v1458_v21 = vmul.f32 %v1457_v17, %v1457_v17 }
0x1513   :  { %1460 = vrot.lane.b32.xlu0 %v1458_v21, %s10201_s19 }
0x1585   :  { %v1461_v23 = vpop.permute.xlu0 %1460 }
0x1586   :  { %v1463_v24 = vsel %vm362_vm6, %v1461_v23, 0.0 }
0x1587   :  { %1464 = vadd.xlane.f32.xlu0 %v1463_v24 }
0x1614   :  { %v1465_v26 = vpop.xlane.xlu0 %1464 }
0x1615   :  { %v1466_v27 = vmul.f32 0.03125, %v1465_v26 }
0x1617   :  { %v1467_v30 = vadd.f32 1e-05, %v1466_v27 }
0x1619   :  { %9790 = vrsqrt.f32 %v1467_v30 }
0x1623   :  { %v9791_v29 = vpop.eup %9790 }
0x1624   :  { %v1469_v33 = vmul.f32 %v9791_v29, %v1457_v17 }
0x1626   :  { %v1470_v34 = vmul.f32 %v1469_v33, %v10408_v25 }
0x1628   :  { %v10653_v38 = vadd.f32 %v1470_v34, %v10410_v28 }
0x162a   :  { %v1472_v39 = vpack.c.bf16 %v10653_v38, %v10653_v38 }
0x162c   :  { %1474 = vrot.lane.b32.xlu1 %v1472_v39, %s10201_s19 }
0x169e   :  { %v1475_v41 = vpop.permute.xlu1 %1474 }
0x169f   :  { %9060 = vmatmul.mubr.msk.bf16.vlgmr.msra.gmra.mrb[20].mxu0 %vm133_vm7, %v1475_v41 }
0x16a0   :  { %9065 = vmatprep.mubr.msk.bf16.mxu0 %vm10207_vm2, %v12329_v0 }
0x1772   :  { %v1513_v43 = vpop.f32.mrb[20].mxu0 }
0x1773   :  { %v10662_v46 = vadd.f32 %v10425_v35, %v1513_v43  ;;  %v9061_v47 = vpop.f32.mrb[21].mxu0 }
0x1774   :  { %v1516_v48 = vpop.f32.mrb[22].mxu0 }
0x1775   :  { %v9062_v49 = vpop.f32.mrb[23].mxu0  ;;  %v1519_v40 = vmul.f32 0.5, %v10662_v46  ;;  %v1666_v43 = vsel %vm97_vm1, %v10662_v46, 0.0 }
0x1777   :  { %9792 = vtanh.f32 %v1519_v40 }
0x1778   :  { %9794 = vtanh.f32 %v10662_v46 }
0x1781   :  { %v9793_v50 = vpop.eup %9792 }
0x1782   :  { %v1521_v51 = vmul.f32 0.5, %v9793_v50  ;;  %v9795_v53 = vpop.eup %9794 }
0x1784   :  { %v1522_v54 = vadd.f32 0.5, %v1521_v51 }
0x1786   :  { %1526 = vperm.xlu0 %9735, %v1522_v54  }
0x1805   :  { %v1527_v8 = vpop.permute.xlu0 %1526 }
0x1806   :  { %v1571_v55 = vmul.f32 %v9795_v53, %v1527_v8  ;;  %v1529_v61 = vmul.f32 %v1527_v8, %v1522_v54 }
0x1808   :  { %v1579_v36 = vrot.slane %v1571_v55, %v10432_v52  ;;  %v1537_v6 = vrot.slane %v1529_v61, %v10432_v52 }
0x180a   :  { %v1580_v56 = vcombine.high %v1579_v36, %v1579_v36  ;;  %v1587_v35 = vrot.slane %v1579_v36, %v10432_v52  ;;  %v1538_v62 = vcombine.high %v1537_v6, %v1537_v6  ;;  %v1545_v1 = vrot.slane %v1537_v6, %v10432_v52 }
0x180c   :  { %v1598_v58 = vrot.slane %v1587_v35, %v10435_v57  ;;  %v1594_v59 = vrot.slane %v1580_v56, %v10432_v52  ;;  %v1555_v4 = vsub.f32 1.0, %v1545_v1  ;;  %v1552_v44 = vrot.slane %v1538_v62, %v10432_v52 }
0x180e   :  { %1603 = vrot.lane.b32.xlu1 %v1598_v58, %s10213_s14  ;;  %v1602_v60 = vrot.slane %v1594_v59, %v10435_v57  ;;  %v1562_v5 = vrot.slane %v1555_v4, %v10435_v57  ;;  %v1556_v37 = vsub.f32 1.0, %v1552_v44 }
0x1810   :  { %v1569_v9 = vmul.f32 %v1562_v5, %v10448_v13  ;;  %v1566_v15 = vrot.slane %v1556_v37, %v10435_v57 }
0x1812   :  { %1605 = vrot.lane.b32.xlu1 %v1602_v60, %s10213_s14  ;;  %v1570_v3 = vmul.f32 %v1566_v15, %v10452_v22 }
0x1880   :  { %v1604_v12 = vpop.permute.xlu1 %1603 }
0x1881   :  { %v10679_v20 = vadd.f32 %v1604_v12, %v1569_v9 }
0x1883   :  { %1613 = vrot.lane.b32.xlu0 %v10679_v20, %s10210_s28 }
0x1884   :  { %v1606_v17 = vpop.permute.xlu1 %1605 }
0x1885   :  { %v10684_v21 = vadd.f32 %v1606_v17, %v1570_v3 }
0x1887   :  { %1615 = vrot.lane.b32.xlu1 %v10684_v21, %s10210_s28 }
0x18f5   :  { %v1614_v23 = vpop.permute.xlu0 %1613 }
0x18f6   :  { %v1619_v24 = vsel %vm238_vm5, %v1614_v23, 0.0 }
0x18f7   :  { %1620 = vadd.xlane.f32.xlu0 %v1619_v24 }
0x18f9   :  { %v1616_v13 = vpop.permute.xlu1 %1615 }
0x18fa   :  { %v1622_v26 = vsel %vm238_vm5, %v1616_v13, 0.0 }
0x18fb   :  { %1623 = vadd.xlane.f32.xlu1 %v1622_v26 }
0x1984   :  { %v1621_v27 = vpop.xlane.xlu0 %1620 }
0x1985   :  { %v1625_v30 = vmul.f32 0.125, %v1621_v27 }
0x1987   :  { %v1627_v29 = vsub.f32 %v10679_v20, %v1625_v30 }
0x1988   :  { %v1624_v33 = vpop.xlane.xlu1 %1623 }
0x1989   :  { %v1626_v22 = vmul.f32 0.125, %v1624_v33  ;;  %v1629_v34 = vmul.f32 %v1627_v29, %v1627_v29 }
0x198b   :  { %v1628_v39 = vsub.f32 %v10684_v21, %v1626_v22  ;;  %1633 = vrot.lane.b32.xlu0 %v1629_v34, %s10210_s28 }
0x198d   :  { %v1630_v41 = vmul.f32 %v1628_v39, %v1628_v39 }
0x198f   :  { %1635 = vrot.lane.b32.xlu1 %v1630_v41, %s10210_s28 }
0x19aa   :  { %1667 = vadd.xlane.f32.xlu0 %v1666_v43 }
0x19fd   :  { %v1634_v47 = vpop.permute.xlu0 %1633 }
0x19fe   :  { %v1639_v48 = vsel %vm238_vm5, %v1634_v47, 0.0 }
0x19ff   :  { %1640 = vadd.xlane.f32.xlu1 %v1639_v48 }
0x1a01   :  { %v1636_v49 = vpop.permute.xlu1 %1635 }
0x1a02   :  { %v1642_v40 = vsel %vm238_vm5, %v1636_v49, 0.0 }
0x1a03   :  { %1643 = vadd.xlane.f32.xlu0 %v1642_v40 }
0x1a37   :  { %v1668_v50 = vpop.xlane.xlu0 %1667 }
0x1a38   :  { %v1669_v51 = vmul.f32 0.125, %v1668_v50 }
0x1a3a   :  { %v1670_v54 = vsub.f32 %v10662_v46, %v1669_v51 }
0x1a3c   :  { %v1671_v53 = vmul.f32 %v1670_v54, %v1670_v54 }
0x1a3e   :  { %v1672_v8 = vsel %vm97_vm1, %v1671_v53, 0.0 }
0x1a3f   :  { %1673 = vadd.xlane.f32.xlu0 %v1672_v8 }
0x1a8c   :  { %v1641_v55 = vpop.xlane.xlu1 %1640 }
0x1a8d   :  { %v1645_v36 = vmul.f32 0.125, %v1641_v55 }
0x1a8f   :  { %v1647_v56 = vadd.f32 1e-05, %v1645_v36 }
0x1a90   :  { %v1644_v35 = vpop.xlane.xlu0 %1643 }
0x1a91   :  { %9796 = vrsqrt.f32 %v1647_v56  ;;  %v1646_v58 = vmul.f32 0.125, %v1644_v35 }
0x1a93   :  { %v1648_v59 = vadd.f32 1e-05, %v1646_v58 }
0x1a95   :  { %9798 = vrsqrt.f32 %v1648_v59 }
0x1a9b   :  { %v9797_v60 = vpop.eup %9796 }
0x1a9c   :  { %v1651_v61 = vmul.f32 %v9797_v60, %v1627_v29 }
0x1a9e   :  { %v1653_v6 = vmul.f32 %v1651_v61, %v10470_v63 }
0x1a9f   :  { %v9799_v62 = vpop.eup %9798 }
0x1aa0   :  { %v1655_v1 = vadd.f32 %v1653_v6, %v10472_v2  ;;  %v1652_v4 = vmul.f32 %v9799_v62, %v1628_v39 }
0x1aa2   :  { %v1657_v44 = vpack.c.bf16 %v1655_v1, %v1655_v1  ;;  %v1654_v5 = vmul.f32 %v1652_v4, %v10470_v63 }
0x1aa4   :  { %1709 = vrot.lane.b32.xlu1 %v1657_v44, %s10210_s28  ;;  %v1656_v37 = vadd.f32 %v1654_v5, %v10472_v2 }
0x1aa6   :  { %v1658_v9 = vpack.c.bf16 %v1656_v37, %v1656_v37 }
0x1aa8   :  { %1758 = vrot.lane.b32.xlu0 %v1658_v9, %s10210_s28  ;;  %1935 = vrot.lane.b32.xlu1 %v10662_v46, %s10213_s14 }
0x1acc   :  { %v1674_v15 = vpop.xlane.xlu0 %1673 }
0x1acd   :  { %v1675_v12 = vmul.f32 0.125, %v1674_v15 }
0x1acf   :  { %v1676_v3 = vadd.f32 1e-05, %v1675_v12 }
0x1ad1   :  { %9800 = vrsqrt.f32 %v1676_v3 }
0x1adb   :  { %v9801_v17 = vpop.eup %9800 }
0x1adc   :  { %v1678_v23 = vmul.f32 %v9801_v17, %v1670_v54 }
0x1ade   :  { %v1679_v24 = vmul.f32 %v1678_v23, %v10408_v25  ;;  %v1659_v23 = vpack.c.bf16 %v10679_v20, %v10679_v20 }
0x1ae0   :  { %v1680_v13 = vadd.f32 %v1679_v24, %v10410_v28 }
0x1ae2   :  { %v1688_v26 = vrot.slane %v1680_v13, %v10432_v52 }
0x1ae4   :  { %v1696_v29 = vrot.slane %v1688_v26, %v10432_v52  ;;  %v1689_v41 = vcombine.high %v1688_v26, %v1688_v26 }
0x1ae6   :  { %v1706_v39 = vpack.c.bf16 %v1696_v29, %v1696_v29  ;;  %v1703_v47 = vrot.slane %v1689_v41, %v10432_v52 }
0x1ae8   :  { %v1707_v48 = vpack.c.bf16 %v1703_v47, %v1703_v47 }
0x1b16   :  { %v1710_v27 = vpop.permute.xlu1 %1709 }
0x1b17   :  { %v10712_v30 = vsel %vm238_vm5, %v1710_v27, 0 }
0x1b18   :  { %9064 = vmatpush3.bf16.xpose.msra.mxu0 %v10712_v30 }
0x1b19   :  { %9069 = vmatprep.subr.bf16.mxu0 %v12329_v0 }
0x1b1a   :  { %v1936_v33 = vpop.permute.xlu1 %1935  ;;  %v1759_v34 = vpop.permute.xlu0 %1758 }
0x1b1b   :  { %v1938_v22 = vsel %vm97_vm1, %v1936_v33, 0.0  ;;  %v10719_v43 = vsel %vm238_vm5, %v1759_v34, 0 }
0x1b1c   :  { %1939 = vadd.xlane.f32.xlu1 %v1938_v22 }
0x1b1f   :  { %9066 = vmatmul.mubr.msk.bf16.vlgmr.msra.gmra.mrb[24].mxu0 %vm238_vm5, %v1706_v39 }
0x1b20   :  { %9070 = vmatpush3.bf16.xpose.msra.mxu0 %v10719_v43  ;;  %9071 = vmatprep.mubr.msk.bf16.mxu0 %vm10207_vm2, %v12329_v0 }
0x1b21   :  { %9075 = vmatprep.subr.bf16.mxu0 %v12329_v0 }
0x1b27   :  { %9072 = vmatmul.mubr.msk.bf16.vlgmr.msra.gmra.mrb[28].mxu0 %vm238_vm5, %v1707_v48 }
0x1b28   :  { %9077 = vmatprep.mubr.msk.bf16.mxu0 %vm10207_vm2, %v12329_v0 }
0x1ba9   :  { %v1940_v49 = vpop.xlane.xlu1 %1939 }
0x1baa   :  { %v1941_v40 = vmul.f32 0.125, %v1940_v49 }
0x1bac   :  { %v1942_v50 = vsub.f32 %v10662_v46, %v1941_v40  ;;  %v1660_v46 = vpack.c.bf16 %v10684_v21, %v10684_v21 }
0x1bae   :  { %v1943_v51 = vmul.f32 %v1942_v50, %v1942_v50 }
0x1bb0   :  { %1945 = vrot.lane.b32.xlu0 %v1943_v51, %s10213_s14 }
0x1bf2   :  { %v1751_v54 = vpop.f32.mrb[24].mxu0 }
0x1bf3   :  { %v9067_v53 = vpop.f32.mrb[25].mxu0  ;;  %v1806_v8 = vsel %vm750_vm8, %v1751_v54, -inf }
0x1bf4   :  { %1807 = vmax.xlane.f32.xlu1 %v1806_v8  ;;  %v1754_v55 = vpop.f32.mrb[26].mxu0 }
0x1bf5   :  { %v9068_v36 = vpop.f32.mrb[27].mxu0 }
0x1bfa   :  { %v1800_v56 = vpop.f32.mrb[28].mxu0 }
0x1bfb   :  { %v9073_v35 = vpop.f32.mrb[29].mxu0  ;;  %v1809_v58 = vsel %vm750_vm8, %v1800_v56, -inf }
0x1bfc   :  { %1810 = vmax.xlane.f32.xlu0 %v1809_v58  ;;  %v1803_v59 = vpop.f32.mrb[30].mxu0 }
0x1bfd   :  { %v9074_v60 = vpop.f32.mrb[31].mxu0 }
0x1c05   :  { %1878 = vrot.lane.b32.xlu1 %v1660_v46, %s10210_s28 }
0x1c22   :  { %v1946_v61 = vpop.permute.xlu0 %1945 }
0x1c23   :  { %v1948_v6 = vsel %vm97_vm1, %v1946_v61, 0.0 }
0x1c24   :  { %1949 = vadd.xlane.f32.xlu0 %v1948_v6 }
0x1c81   :  { %v1808_v62 = vpop.xlane.xlu1 %1807 }
0x1c82   :  { %v1812_v1 = vsub.f32 %v1751_v54, %v1808_v62 }
0x1c84   :  { %v1814_v4 = vmul.f32 1.442695, %v1812_v1 }
0x1c85   :  { %v1879_v44 = vpop.permute.xlu1 %1878 }
0x1c86   :  { %9802 = vpow2.f32 %v1814_v4  ;;  %9082 = vmatpush3.bf16.msra.mxu1 %v1879_v44 }
0x1c87   :  { %9093 = vmatprep.subr.bf16.mxu1 %v12329_v0 }
0x1c89   :  { %v1811_v5 = vpop.xlane.xlu0 %1810 }
0x1c8a   :  { %v1813_v37 = vsub.f32 %v1800_v56, %v1811_v5 }
0x1c8c   :  { %v1816_v9 = vmul.f32 1.442695, %v1813_v37 }
0x1c8e   :  { %9804 = vpow2.f32 %v1816_v9 }
0x1c90   :  { %v9803_v15 = vpop.eup %9802 }
0x1c91   :  { %v1818_v12 = vsel %vm750_vm8, %v9803_v15, 0.0 }
0x1c92   :  { %1819 = vadd.xlane.f32.xlu0 %v1818_v12 }
0x1c98   :  { %v9805_v3 = vpop.eup %9804 }
0x1c99   :  { %v1821_v17 = vsel %vm750_vm8, %v9805_v3, 0.0 }
0x1c9a   :  { %1822 = vadd.xlane.f32.xlu1 %v1821_v17 }
0x1ca8   :  { %1831 = vrot.lane.b32.xlu0 %v1659_v23, %s10210_s28 }
0x1cb1   :  { %v1950_v24 = vpop.xlane.xlu0 %1949 }
0x1cb2   :  { %v1951_v13 = vmul.f32 0.125, %v1950_v24 }
0x1cb4   :  { %v1952_v26 = vadd.f32 1e-05, %v1951_v13  ;;  %v10781_v13 = vld [vmem:[#allocation3 + $0x4] sm:$0x3] }
0x1cb6   :  { %9806 = vrsqrt.f32 %v1952_v26  ;;  %v2198_v26 = vsel %vm81_vm0, %v10781_v13, 0.0 }
0x1cc0   :  { %v9807_v27 = vpop.eup %9806 }
0x1cc1   :  { %v1954_v29 = vmul.f32 %v9807_v27, %v1942_v50 }
0x1cc3   :  { %v1955_v33 = vmul.f32 %v1954_v29, %v10470_v63 }
0x1cc5   :  { %v1956_v22 = vadd.f32 %v1955_v33, %v10472_v2 }
0x1cc7   :  { %v1964_v34 = vrot.slane %v1956_v22, %v10432_v52 }
0x1cc9   :  { %v1965_v39 = vcombine.high %v1964_v34, %v1964_v34  ;;  %v1972_v48 = vrot.slane %v1964_v34, %v10432_v52 }
0x1ccb   :  { %v1979_v41 = vrot.slane %v1965_v39, %v10432_v52  ;;  %v1982_v49 = vpack.c.bf16 %v1972_v48, %v1972_v48 }
0x1ccd   :  { %v1983_v47 = vpack.c.bf16 %v1979_v41, %v1979_v41 }
0x1ccf   :  { %2031 = vrot.lane.b32.xlu1 %v1983_v47, %s10213_s14 }
0x1cd3   :  { %1985 = vrot.lane.b32.xlu1 %v1982_v49, %s10213_s14 }
0x1d1f   :  { %v1820_v40 = vpop.xlane.xlu0 %1819 }
0x1d20   :  { %9808 = vrcp.f32 %v1820_v40 }
0x1d23   :  { %v1832_v50 = vpop.permute.xlu0 %1831 }
0x1d24   :  { %9076 = vmatpush3.bf16.msra.mxu0 %v1832_v50 }
0x1d25   :  { %9087 = vmatprep.subr.bf16.mxu0 %v12329_v0 }
0x1d27   :  { %v1823_v51 = vpop.xlane.xlu1 %1822 }
0x1d28   :  { %9810 = vrcp.f32 %v1823_v51 }
0x1d2a   :  { %v9809_v54 = vpop.eup %9808 }
0x1d2b   :  { %v1826_v53 = vmul.f32 %v9809_v54, %v9803_v15 }
0x1d2d   :  { %v1828_v8 = vpack.c.bf16 %v1826_v53, %v1826_v53 }
0x1d2f   :  { %9078 = vmatmul.mubr.msk.bf16.vlgmr.msra.gmra.mrb[32].mxu0 %vm183_vm4, %v1828_v8 }
0x1d30   :  { %9088 = vmatpush3.bf16.xpose.msra.mxu0 %v10712_v30  ;;  %9089 = vmatprep.mubr.msk.bf16.mxu0 %vm10207_vm2, %v12329_v0 }
0x1d31   :  { %9099 = vmatprep.subr.bf16.mxu0 %v12329_v0 }
0x1d32   :  { %v9811_v55 = vpop.eup %9810 }
0x1d33   :  { %v1827_v36 = vmul.f32 %v9811_v55, %v9805_v3 }
0x1d35   :  { %v1829_v56 = vpack.c.bf16 %v1827_v36, %v1827_v36 }
0x1d37   :  { %9084 = vmatmul.mubr.msk.bf16.vlgmr.msra.gmra.mrb[32].mxu1 %vm183_vm4, %v1829_v56  ;;  %v10790_v56 = vld [vmem:[#allocation6] sm:$0xff]  }
0x1d38   :  { %9094 = vmatpush3.bf16.xpose.msra.mxu1 %v10719_v43  ;;  %9095 = vmatprep.mubr.msk.bf16.mxu1 %vm10207_vm2, %v12329_v0 }
0x1d39   :  { %9105 = vmatprep.subr.bf16.mxu1 %v12329_v0 }
0x1d41   :  { %v2032_v35 = vpop.permute.xlu1 %2031 }
0x1d42   :  { %9096 = vmatmul.mubr.msk.bf16.vlgmr.msra.gmra.mrb[36].mxu1 %vm238_vm5, %v2032_v35 }
0x1d43   :  { %9106 = vmatpush3.bf16.msra.mxu1 %v1879_v44  ;;  %9107 = vmatprep.mubr.msk.bf16.mxu1 %vm10207_vm2, %v12329_v0 }
0x1d44   :  { %9137 = vmatprep.subr.bf16.mxu1 %v12329_v0 }
0x1d45   :  { %v1986_v30 = vpop.permute.xlu1 %1985 }
0x1d46   :  { %9090 = vmatmul.mubr.msk.bf16.vlgmr.msra.gmra.mrb[36].mxu0 %vm238_vm5, %v1986_v30  ;;  %v10800_v30 = vld [vmem:[%s12322_s3 + $0x10] sm:$0xff]  }
0x1d47   :  { %9100 = vmatpush3.bf16.msra.mxu0 %v1832_v50  ;;  %9101 = vmatprep.mubr.msk.bf16.mxu0 %vm10207_vm2, %v12329_v0 }
0x1d48   :  { %9111 = vmatprep.subr.bf16.mxu0 %v12329_v0 }
0x1e02   :  { %v10770_v43 = vpop.f32.mrb[32].mxu0 }
0x1e03   :  { %v9079_v58 = vpop.f32.mrb[33].mxu0 }
0x1e04   :  { %v1874_v59 = vpop.f32.mrb[34].mxu0  ;;  %v10806_v58 = vld [vmem:[#allocation6 + $0x8] sm:$0xff]  }
0x1e05   :  { %v9080_v60 = vpop.f32.mrb[35].mxu0  ;;  %v10813_v59 = vld [vmem:[%s12322_s3 + $0x18] sm:$0xff]  }
0x1e0a   :  { %v10772_v46 = vpop.f32.mrb[32].mxu1 }
0x1e0b   :  { %v1928_v61 = vrot.slane %v10772_v46, 7  ;;  %v9085_v6 = vpop.f32.mrb[33].mxu1 }
0x1e0c   :  { %v1921_v62 = vpop.f32.mrb[34].mxu1 }
0x1e0d   :  { %v9086_v1 = vpop.f32.mrb[35].mxu1  ;;  %v10777_v4 = vsel %vm874_vm9, %v1928_v61, %v10770_v43 }
0x1e0e   :  { %v2202_v40 = vsel %vm97_vm1, %v10777_v4, 0.0 }
0x1e15   :  { %v2070_v44 = vpop.f32.mrb[36].mxu1 }
0x1e16   :  { %v9097_v5 = vpop.f32.mrb[37].mxu1  ;;  %v2079_v37 = vsel %vm750_vm8, %v2070_v44, -inf }
0x1e17   :  { %2080 = vmax.xlane.f32.xlu0 %v2079_v37  ;;  %v2073_v9 = vpop.f32.mrb[38].mxu1 }
0x1e18   :  { %v9098_v15 = vpop.f32.mrb[39].mxu1 }
0x1e19   :  { %v2024_v12 = vpop.f32.mrb[36].mxu0 }
0x1e1a   :  { %v9091_v3 = vpop.f32.mrb[37].mxu0  ;;  %v2076_v17 = vsel %vm750_vm8, %v2024_v12, -inf }
0x1e1b   :  { %2077 = vmax.xlane.f32.xlu1 %v2076_v17  ;;  %v2027_v23 = vpop.f32.mrb[38].mxu0 }
0x1e1c   :  { %v9092_v24 = vpop.f32.mrb[39].mxu0 }
0x1e1f   :  { %2199 = vadd.xlane.f32.xlu1 %v2198_v26 }
0x1ea4   :  { %v2081_v27 = vpop.xlane.xlu0 %2080 }
0x1ea5   :  { %v2083_v29 = vsub.f32 %v2070_v44, %v2081_v27 }
0x1ea7   :  { %v2086_v33 = vmul.f32 1.442695, %v2083_v29 }
0x1ea8   :  { %v2078_v22 = vpop.xlane.xlu1 %2077 }
0x1ea9   :  { %9812 = vpow2.f32 %v2086_v33  ;;  %v2082_v34 = vsub.f32 %v2024_v12, %v2078_v22 }
0x1eab   :  { %v2084_v39 = vmul.f32 1.442695, %v2082_v34 }
0x1eac   :  { %v2200_v3 = vpop.xlane.xlu1 %2199 }
0x1ead   :  { %9814 = vpow2.f32 %v2084_v39 }
0x1eb3   :  { %v9813_v41 = vpop.eup %9812 }
0x1eb4   :  { %v2091_v47 = vsel %vm750_vm8, %v9813_v41, 0.0 }
0x1eb5   :  { %2092 = vadd.xlane.f32.xlu0 %v2091_v47 }
0x1eb7   :  { %v9815_v48 = vpop.eup %9814 }
0x1eb8   :  { %v2088_v49 = vsel %vm750_vm8, %v9815_v48, 0.0 }
0x1eb9   :  { %2089 = vadd.xlane.f32.xlu0 %v2088_v49 }
0x1ebd   :  { %2203 = vadd.xlane.f32.xlu0 %v2202_v40 }
0x1f42   :  { %v2093_v50 = vpop.xlane.xlu0 %2092 }
0x1f43   :  { %9816 = vrcp.f32 %v2093_v50 }
0x1f46   :  { %v2090_v51 = vpop.xlane.xlu0 %2089 }
0x1f47   :  { %9818 = vrcp.f32 %v2090_v51 }
0x1f4a   :  { %v2204_v17 = vpop.xlane.xlu0 %2203 }
0x1f4b   :  { %v2205_v23 = vadd.f32 %v2204_v17, %v2200_v3  ;;  %v10846_v3 = vld [vmem:[%s12320_s1] ss:$0 sm:$0xff] }
0x1f4d   :  { %v9817_v54 = vpop.eup %9816 }
0x1f4e   :  { %v2097_v53 = vmul.f32 %v9817_v54, %v9813_v41 }
0x1f50   :  { %v2099_v8 = vpack.c.bf16 %v2097_v53, %v2097_v53 }
0x1f51   :  { %v9819_v55 = vpop.eup %9818 }
0x1f52   :  { %9108 = vmatmul.mubr.msk.bf16.vlgmr.msra.gmra.mrb[40].mxu1 %vm183_vm4, %v2099_v8  ;;  %v2096_v36 = vmul.f32 %v9819_v55, %v9815_v48 }
0x1f53   :  { %9138 = vmatpush3.bf16.msra.mxu1 %v10790_v56  ;;  %9141 = vmatprep.mubr.msk.bf16.mxu1 %vm10207_vm2, %v12329_v0 }
0x1f54   :  { %v2098_v35 = vpack.c.bf16 %v2096_v36, %v2096_v36  ;;  %9139 = vmatprep.subr.bf16.mxu1 %v12329_v0 }
0x1f56   :  { %9102 = vmatmul.mubr.msk.bf16.vlgmr.msra.gmra.mrb[40].mxu0 %vm183_vm4, %v2098_v35 }
0x1f57   :  { %9112 = vmatpush3.bf16.msra.mxu0 %v10800_v30  ;;  %9115 = vmatprep.mubr.msk.bf16.mxu0 %vm10207_vm2, %v12329_v0 }
0x1f58   :  { %9113 = vmatprep.subr.bf16.mxu0 %v12329_v0  ;;  %9140 = vmatpush3.bf16.msra.mxu1 %v10806_v58 }
0x1f59   :  { %9145 = vmatprep.subr.bf16.mxu1 %v12329_v0 }
0x1f5b   :  { %9114 = vmatpush3.bf16.msra.mxu0 %v10813_v59 }
0x1f5c   :  { %9119 = vmatprep.subr.bf16.mxu0 %v12329_v0 }
0x2025   :  { %v2180_v60 = vpop.f32.mrb[40].mxu1 }
0x2026   :  { %v9109_v61 = vpop.f32.mrb[41].mxu1  ;;  %v2190_v62 = vrot.slane %v2180_v60, 7 }
0x2027   :  { %v2183_v6 = vpop.f32.mrb[42].mxu1 }
0x2028   :  { %v9110_v1 = vpop.f32.mrb[43].mxu1 }
0x2029   :  { %v2137_v44 = vpop.f32.mrb[40].mxu0 }
0x202a   :  { %v9103_v5 = vpop.f32.mrb[41].mxu0  ;;  %v10818_v37 = vsel %vm874_vm9, %v2190_v62, %v2137_v44 }
0x202b   :  { %v2140_v9 = vpop.f32.mrb[42].mxu0  ;;  %v2207_v15 = vsel %vm97_vm1, %v10818_v37, 0.0 }
0x202c   :  { %v9104_v12 = vpop.f32.mrb[43].mxu0  ;;  %2208 = vadd.xlane.f32.xlu1 %v2207_v15 }
0x20b9   :  { %v2209_v24 = vpop.xlane.xlu1 %2208 }
0x20ba   :  { %v2210_v26 = vadd.f32 %v2209_v24, %v2205_v23 }
0x20bc   :  { %v2211_v27 = vmul.f32 0.03125, %v2210_v26 }
0x20be   :  { %v2214_v29 = vrot.slane %v2211_v27, 1  ;;  %v2212_v33 = vsub.f32 %v10781_v13, %v2211_v27  ;;  %v2217_v22 = vsub.f32 %v10770_v43, %v2211_v27  ;;  %v2219_v41 = vsub.f32 %v2137_v44, %v2211_v27  ;;  %v10837_v44 = vld [vmem:[%s12322_s3] sm:$0xff]  }
0x20bf   :  { %v10853_v27 = vld [vmem:[%s12320_s1 + $0x1] ss:$0 sm:$0xff] }
0x20c0   :  { %v2221_v34 = vmul.f32 %v2212_v33, %v2212_v33  ;;  %v2218_v39 = vsub.f32 %v10772_v46, %v2214_v29  ;;  %v2220_v47 = vsub.f32 %v2180_v60, %v2214_v29  ;;  %v2225_v50 = vmul.f32 %v2217_v22, %v2217_v22 }
0x20c1   :  { %v2236_v54 = vmul.f32 %v2219_v41, %v2219_v41  ;;  %v2270_v46 = vpack.c.bf16 %v10643_v14, %v10643_v14 }
0x20c2   :  { %v2222_v48 = vsel %vm81_vm0, %v2221_v34, 0.0  ;;  %v2226_v49 = vmul.f32 %v2218_v39, %v2218_v39  ;;  %v2237_v40 = vmul.f32 %v2220_v47, %v2220_v47 }
0x20c3   :  { %2223 = vadd.xlane.f32.xlu0 %v2222_v48 }
0x20c4   :  { %v2229_v51 = vrot.slane %v2226_v49, 7  ;;  %v2240_v53 = vrot.slane %v2237_v40, 7 }
0x20c6   :  { %v2230_v8 = vsel %vm874_vm9, %v2229_v51, %v2225_v50  ;;  %v2241_v13 = vsel %vm874_vm9, %v2240_v53, %v2236_v54 }
0x20c7   :  { %v2232_v43 = vsel %vm97_vm1, %v2230_v8, 0.0  ;;  %v2243_v55 = vsel %vm97_vm1, %v2241_v13, 0.0 }
0x20c8   :  { %2233 = vadd.xlane.f32.xlu1 %v2232_v43  ;;  %2244 = vadd.xlane.f32.xlu0 %v2243_v55 }
0x20d9   :  { %2272 = vrot.lane.b32.xlu1 %v2270_v46, %s10201_s19 }
0x2150   :  { %v2224_v36 = vpop.xlane.xlu0 %2223 }
0x2155   :  { %v2234_v35 = vpop.xlane.xlu1 %2233  ;;  %v2245_v61 = vpop.xlane.xlu0 %2244 }
0x2156   :  { %v2235_v60 = vadd.f32 %v2234_v35, %v2224_v36 }
0x2158   :  { %v2246_v6 = vadd.f32 %v2245_v61, %v2235_v60 }
0x2159   :  { %v2273_v62 = vpop.permute.xlu1 %2272 }
0x215a   :  { %v2247_v1 = vmul.f32 0.03125, %v2246_v6  ;;  %9116 = vmatmul.mubr.msk.bf16.vlgmr.msra.gmra.mrb[44].mxu0 %vm133_vm7, %v2273_v62 }
0x215b   :  { %9120 = vmatpush3.bf16.msra.mxu0 %v10837_v44  ;;  %9121 = vmatprep.mubr.msk.bf16.mxu0 %vm10207_vm2, %v12329_v0 }
0x215c   :  { %v2248_v14 = vadd.f32 1e-05, %v2247_v1  ;;  %9125 = vmatprep.subr.bf16.mxu0 %v12329_v0  ;;  %v10881_v1 = vld [vmem:[%s12321_s2] ss:$0 sm:$0xff] }
0x215e   :  { %9820 = vrsqrt.f32 %v2248_v14 }
0x2168   :  { %v9821_v5 = vpop.eup %9820 }
0x2169   :  { %v2250_v9 = vmul.f32 %v9821_v5, %v2212_v33  ;;  %v2254_v15 = vrot.slane %v9821_v5, 1  ;;  %v2257_v12 = vmul.f32 %v9821_v5, %v2217_v22  ;;  %v2263_v40 = vmul.f32 %v9821_v5, %v2219_v41 }
0x216b   :  { %v2251_v17 = vmul.f32 %v10846_v3, %v2250_v9  ;;  %v2258_v23 = vmul.f32 %v2254_v15, %v2218_v39  ;;  %v2259_v24 = vmul.f32 %v2257_v12, %v10604_v7  ;;  %v2264_v26 = vmul.f32 %v2254_v15, %v2220_v47 }
0x216c   :  { %v2265_v8 = vmul.f32 %v2263_v40, %v10611_v16 }
0x216d   :  { %v2252_v29 = vadd.f32 %v10853_v27, %v2251_v17  ;;  %v2260_v33 = vmul.f32 %v2258_v23, %v10604_v7  ;;  %v2261_v22 = vadd.f32 %v2259_v24, %v10602_v18  ;;  %v2266_v49 = vmul.f32 %v2264_v26, %v10611_v16 }
0x216e   :  { %v2267_v55 = vadd.f32 %v2265_v8, %v10619_v32 }
0x216f   :  { %v2269_v34 = vpack.c.bf16 %v2252_v29, %v2252_v29  ;;  %v2262_v48 = vadd.f32 %v2260_v33, %v10602_v18  ;;  %v2361_v47 = vpack.c.bf16 %v2261_v22, %v2261_v22  ;;  %v2268_v51 = vadd.f32 %v2266_v49, %v10619_v32 }
0x2170   :  { %v2414_v41 = vpack.c.bf16 %v2267_v55, %v2267_v55 }
0x2171   :  { %9122 = vmatmul.mubr.msk.bf16.vlgmr.msra.gmra.mrb[44].mxu0 %vm183_vm4, %v2269_v34  ;;  %v2362_v39 = vpack.c.bf16 %v2262_v48, %v2262_v48  ;;  %v2365_v53 = vunpack.c.l.b16 %v2361_v47  ;;  %v2415_v43 = vpack.c.bf16 %v2268_v51, %v2268_v51 }
0x2172   :  { %9126 = vmatpush3.bf16.msra.mxu0 %v10339_v19  ;;  %9127 = vmatprep.mubr.msk.bf16.mxu0 %vm10207_vm2, %v12329_v0  ;;  %v2418_v60 = vunpack.c.l.b16 %v2414_v41 }
0x2173   :  { %9131 = vmatprep.subr.bf16.mxu0 %v12329_v0  ;;  %v2366_v50 = vunpack.c.l.b16 %v2362_v39  ;;  %v2419_v36 = vunpack.c.l.b16 %v2415_v43 }
0x2175   :  { %v2367_v54 = vrot.slane %v2366_v50, 7  ;;  %v2420_v35 = vrot.slane %v2419_v36, 7 }
0x2177   :  { %v2368_v13 = vsel %vm874_vm9, %v2367_v54, %v2365_v53  ;;  %v2421_v61 = vsel %vm874_vm9, %v2420_v35, %v2418_v60 }
0x2178   :  { %v2369_v46 = vpack.c.b16 %v2368_v13, %v2368_v13  ;;  %v2422_v6 = vpack.c.b16 %v2421_v61, %v2421_v61 }
0x217d   :  { %9128 = vmatmul.mubr.msk.bf16.vlgmr.msra.gmra.mrb[44].mxu0 %vm238_vm5, %v2369_v46 }
0x217e   :  { %9132 = vmatpush3.bf16.msra.mxu0 %v10366_v42  ;;  %9133 = vmatprep.mubr.msk.bf16.mxu0 %vm10207_vm2, %v12329_v0 }
0x217f   :  { %9163 = vmatprep.subr.bf16.mxu0 %v12329_v0 }
0x2189   :  { %9134 = vmatmul.mubr.msk.bf16.vlgmr.msra.gmra.mrb[44].mxu0 %vm238_vm5, %v2422_v6 }
0x218a   :  { %9165 = vmatprep.mubr.msk.bf16.mxu0 %vm10207_vm2, %v12329_v0 }
0x225c   :  { %v2460_v62 = vpop.f32.mrb[44].mxu0 }
0x225d   :  { %v9617_v14 = vadd.f32 %v10881_v1, %v2460_v62  ;;  %v9135_v5 = vpop.f32.mrb[45].mxu0 }
0x225e   :  { %v2463_v9 = vpop.f32.mrb[46].mxu0 }
0x225f   :  { %9822 = vtanh.f32 %v9617_v14  ;;  %v9136_v15 = vpop.f32.mrb[47].mxu0  ;;  %v2467_v17 = vmul.f32 0.5, %v9617_v14  ;;  %v10912_v14 = vld [vmem:[%s12321_s2 + $0x1] ss:$0 sm:$0xff] }
0x2261   :  { %9824 = vtanh.f32 %v2467_v17 }
0x2269   :  { %v9823_v12 = vpop.eup %9822 }
0x226a   :  { %2474 = vrot.lane.b32.xlu0 %v9823_v12, %s10204_s0 }
0x226b   :  { %v9825_v23 = vpop.eup %9824 }
0x226c   :  { %v2469_v24 = vmul.f32 0.5, %v9825_v23 }
0x226e   :  { %v2470_v26 = vadd.f32 0.5, %v2469_v24 }
0x2270   :  { %v2472_v22 = vmul.f32 %v2470_v26, %v10639_v45 }
0x22dc   :  { %v2475_v29 = vpop.permute.xlu0 %2474 }
0x22dd   :  { %v2477_v33 = vmul.f32 %v2475_v29, %v2470_v26 }
0x22df   :  { %2479 = vrot.lane.b32.xlu1 %v2477_v33, %s10201_s19 }
0x2351   :  { %v2480_v34 = vpop.permute.xlu1 %2479 }
0x2352   :  { %v10887_v48 = vadd.f32 %v2480_v34, %v2472_v22 }
0x2354   :  { %9826 = vtanh.f32 %v10887_v48 }
0x235e   :  { %v9827_v49 = vpop.eup %9826 }
0x235f   :  { %2485 = vrot.lane.b32.xlu1 %v9827_v49, %s10204_s0 }
0x23d1   :  { %v2486_v39 = vpop.permute.xlu1 %2485 }
0x23d2   :  { %v10891_v47 = vmul.f32 %v2486_v39, %v2470_v26 }
0x23d4   :  { %2490 = vrot.lane.b32.xlu0 %v10891_v47, %s10201_s19 }
0x2446   :  { %v2491_v40 = vpop.permute.xlu0 %2490 }
0x2447   :  { %v2493_v50 = vsel %vm362_vm6, %v2491_v40, 0.0 }
0x2448   :  { %2494 = vadd.xlane.f32.xlu1 %v2493_v50 }
0x24d5   :  { %v2495_v51 = vpop.xlane.xlu1 %2494 }
0x24d6   :  { %v2496_v45 = vmul.f32 0.03125, %v2495_v51 }
0x24d8   :  { %v2497_v54 = vsub.f32 %v10891_v47, %v2496_v45 }
0x24da   :  { %v2498_v53 = vmul.f32 %v2497_v54, %v2497_v54 }
0x24dc   :  { %2500 = vrot.lane.b32.xlu0 %v2498_v53, %s10201_s19 }
0x254e   :  { %v2501_v8 = vpop.permute.xlu0 %2500 }
0x254f   :  { %v2503_v13 = vsel %vm362_vm6, %v2501_v8, 0.0 }
0x2550   :  { %2504 = vadd.xlane.f32.xlu0 %v2503_v13 }
0x25dd   :  { %v2505_v43 = vpop.xlane.xlu0 %2504 }
0x25de   :  { %v2506_v55 = vmul.f32 0.03125, %v2505_v43 }
0x25e0   :  { %v2507_v46 = vadd.f32 1e-05, %v2506_v55 }
0x25e2   :  { %9828 = vrsqrt.f32 %v2507_v46 }
0x25ec   :  { %v9829_v36 = vpop.eup %9828 }
0x25ed   :  { %v2509_v41 = vmul.f32 %v9829_v36, %v2497_v54 }
0x25ef   :  { %v2510_v35 = vmul.f32 %v2509_v41, %v10408_v25 }
0x25f1   :  { %v10901_v60 = vadd.f32 %v2510_v35, %v10410_v28 }
0x25f3   :  { %v2512_v61 = vpack.c.bf16 %v10901_v60, %v10901_v60 }
0x25f5   :  { %2514 = vrot.lane.b32.xlu1 %v2512_v61, %s10201_s19 }
0x2667   :  { %v2515_v6 = vpop.permute.xlu1 %2514 }
0x2668   :  { %9142 = vmatmul.mubr.msk.bf16.vlgmr.msra.gmra.mrb[44].mxu1 %vm133_vm7, %v2515_v6 }
0x2669   :  { %9147 = vmatprep.mubr.msk.bf16.mxu1 %vm10207_vm2, %v12329_v0 }
0x273b   :  { %v2553_v62 = vpop.f32.mrb[44].mxu1 }
0x273c   :  { %v10915_v5 = vadd.f32 %v10912_v14, %v2553_v62  ;;  %v9143_v9 = vpop.f32.mrb[45].mxu1 }
0x273d   :  { %v2556_v15 = vpop.f32.mrb[46].mxu1 }
0x273e   :  { %v9144_v12 = vpop.f32.mrb[47].mxu1  ;;  %v2559_v17 = vmul.f32 0.5, %v10915_v5 }
0x2740   :  { %9830 = vtanh.f32 %v2559_v17 }
0x2741   :  { %9832 = vtanh.f32 %v10915_v5 }
0x274a   :  { %v9831_v23 = vpop.eup %9830 }
0x274b   :  { %v2561_v24 = vmul.f32 0.5, %v9831_v23  ;;  %v9833_v29 = vpop.eup %9832 }
0x274d   :  { %v2562_v26 = vadd.f32 0.5, %v2561_v24 }
0x274f   :  { %2566 = vperm.xlu0 %9735, %v2562_v26  }
0x27ce   :  { %v2567_v33 = vpop.permute.xlu0 %2566 }
0x27cf   :  { %v2611_v22 = vmul.f32 %v9833_v29, %v2567_v33  ;;  %v2569_v45 = vmul.f32 %v2567_v33, %v2562_v26 }
0x27d1   :  { %v2619_v34 = vrot.slane %v2611_v22, %v10432_v52  ;;  %v2577_v54 = vrot.slane %v2569_v45, %v10432_v52 }
0x27d3   :  { %v2620_v49 = vcombine.high %v2619_v34, %v2619_v34  ;;  %v2627_v39 = vrot.slane %v2619_v34, %v10432_v52  ;;  %v2578_v53 = vcombine.high %v2577_v54, %v2577_v54  ;;  %v2585_v8 = vrot.slane %v2577_v54, %v10432_v52 }
0x27d5   :  { %v2638_v40 = vrot.slane %v2627_v39, %v10435_v57  ;;  %v2634_v50 = vrot.slane %v2620_v49, %v10432_v52  ;;  %v2595_v13 = vsub.f32 1.0, %v2585_v8  ;;  %v2592_v43 = vrot.slane %v2578_v53, %v10432_v52 }
0x27d6   :  { %v2706_v49 = vsel %vm97_vm1, %v10915_v5, 0.0 }
0x27d7   :  { %2643 = vrot.lane.b32.xlu1 %v2638_v40, %s10213_s14  ;;  %v2642_v51 = vrot.slane %v2634_v50, %v10435_v57  ;;  %v2602_v55 = vrot.slane %v2595_v13, %v10435_v57  ;;  %v2596_v46 = vsub.f32 1.0, %v2592_v43 }
0x27d9   :  { %v2609_v36 = vmul.f32 %v2602_v55, %v10679_v20  ;;  %v2606_v41 = vrot.slane %v2596_v46, %v10435_v57 }
0x27db   :  { %2645 = vrot.lane.b32.xlu1 %v2642_v51, %s10213_s14  ;;  %v2610_v6 = vmul.f32 %v2606_v41, %v10684_v21 }
0x2849   :  { %v2644_v35 = vpop.permute.xlu1 %2643 }
0x284a   :  { %v10932_v61 = vadd.f32 %v2644_v35, %v2609_v36 }
0x284c   :  { %2653 = vrot.lane.b32.xlu0 %v10932_v61, %s10210_s28 }
0x284d   :  { %v2646_v62 = vpop.permute.xlu1 %2645 }
0x284e   :  { %v10937_v9 = vadd.f32 %v2646_v62, %v2610_v6 }
0x2850   :  { %2655 = vrot.lane.b32.xlu1 %v10937_v9, %s10210_s28 }
0x28be   :  { %v2654_v15 = vpop.permute.xlu0 %2653 }
0x28bf   :  { %v2659_v12 = vsel %vm238_vm5, %v2654_v15, 0.0 }
0x28c0   :  { %2660 = vadd.xlane.f32.xlu0 %v2659_v12 }
0x28c2   :  { %v2656_v20 = vpop.permute.xlu1 %2655 }
0x28c3   :  { %v2662_v17 = vsel %vm238_vm5, %v2656_v20, 0.0 }
0x28c4   :  { %2663 = vadd.xlane.f32.xlu1 %v2662_v17 }
0x294d   :  { %v2661_v23 = vpop.xlane.xlu0 %2660 }
0x294e   :  { %v2665_v24 = vmul.f32 0.125, %v2661_v23 }
0x2950   :  { %v2667_v26 = vsub.f32 %v10932_v61, %v2665_v24 }
0x2951   :  { %v2664_v29 = vpop.xlane.xlu1 %2663 }
0x2952   :  { %v2669_v21 = vmul.f32 %v2667_v26, %v2667_v26  ;;  %v2666_v33 = vmul.f32 0.125, %v2664_v29 }
0x2954   :  { %v2668_v22 = vsub.f32 %v10937_v9, %v2666_v33  ;;  %2673 = vrot.lane.b32.xlu0 %v2669_v21, %s10210_s28 }
0x2956   :  { %v2670_v34 = vmul.f32 %v2668_v22, %v2668_v22 }
0x2958   :  { %2675 = vrot.lane.b32.xlu1 %v2670_v34, %s10210_s28 }
0x2973   :  { %2707 = vadd.xlane.f32.xlu0 %v2706_v49 }
0x29c6   :  { %v2674_v39 = vpop.permute.xlu0 %2673 }
0x29c7   :  { %v2679_v40 = vsel %vm238_vm5, %v2674_v39, 0.0 }
0x29c8   :  { %2680 = vadd.xlane.f32.xlu1 %v2679_v40 }
0x29ca   :  { %v2676_v50 = vpop.permute.xlu1 %2675 }
0x29cb   :  { %v2682_v51 = vsel %vm238_vm5, %v2676_v50, 0.0 }
0x29cc   :  { %2683 = vadd.xlane.f32.xlu0 %v2682_v51 }
0x2a00   :  { %v2708_v45 = vpop.xlane.xlu0 %2707 }
0x2a01   :  { %v2709_v54 = vmul.f32 0.125, %v2708_v45 }
0x2a03   :  { %v2710_v53 = vsub.f32 %v10915_v5, %v2709_v54 }
0x2a05   :  { %v2711_v8 = vmul.f32 %v2710_v53, %v2710_v53 }
0x2a07   :  { %v2712_v13 = vsel %vm97_vm1, %v2711_v8, 0.0 }
0x2a08   :  { %2713 = vadd.xlane.f32.xlu0 %v2712_v13 }
0x2a55   :  { %v2681_v43 = vpop.xlane.xlu1 %2680 }
0x2a56   :  { %v2685_v55 = vmul.f32 0.125, %v2681_v43 }
0x2a58   :  { %v2687_v46 = vadd.f32 1e-05, %v2685_v55 }
0x2a59   :  { %v2684_v36 = vpop.xlane.xlu0 %2683 }
0x2a5a   :  { %9834 = vrsqrt.f32 %v2687_v46  ;;  %v2686_v41 = vmul.f32 0.125, %v2684_v36 }
0x2a5c   :  { %v2688_v35 = vadd.f32 1e-05, %v2686_v41 }
0x2a5e   :  { %9836 = vrsqrt.f32 %v2688_v35 }
0x2a64   :  { %v9835_v6 = vpop.eup %9834 }
0x2a65   :  { %v2691_v62 = vmul.f32 %v9835_v6, %v2667_v26 }
0x2a67   :  { %v2693_v15 = vmul.f32 %v2691_v62, %v10470_v63 }
0x2a68   :  { %v9837_v12 = vpop.eup %9836 }
0x2a69   :  { %v2695_v20 = vadd.f32 %v2693_v15, %v10472_v2  ;;  %v2692_v17 = vmul.f32 %v9837_v12, %v2668_v22 }
0x2a6b   :  { %v2697_v23 = vpack.c.bf16 %v2695_v20, %v2695_v20  ;;  %v2694_v24 = vmul.f32 %v2692_v17, %v10470_v63 }
0x2a6d   :  { %2749 = vrot.lane.b32.xlu1 %v2697_v23, %s10210_s28  ;;  %v2696_v29 = vadd.f32 %v2694_v24, %v10472_v2 }
0x2a6f   :  { %v2698_v21 = vpack.c.bf16 %v2696_v29, %v2696_v29 }
0x2a71   :  { %2798 = vrot.lane.b32.xlu0 %v2698_v21, %s10210_s28  ;;  %2975 = vrot.lane.b32.xlu1 %v10915_v5, %s10213_s14 }
0x2a95   :  { %v2714_v26 = vpop.xlane.xlu0 %2713 }
0x2a96   :  { %v2715_v33 = vmul.f32 0.125, %v2714_v26 }
0x2a98   :  { %v2716_v34 = vadd.f32 1e-05, %v2715_v33 }
0x2a9a   :  { %9838 = vrsqrt.f32 %v2716_v34 }
0x2aa4   :  { %v9839_v49 = vpop.eup %9838 }
0x2aa5   :  { %v2718_v39 = vmul.f32 %v9839_v49, %v2710_v53 }
0x2aa7   :  { %v2719_v22 = vmul.f32 %v2718_v39, %v10408_v25 }
0x2aa9   :  { %v2720_v40 = vadd.f32 %v2719_v22, %v10410_v28 }
0x2aab   :  { %v2728_v50 = vrot.slane %v2720_v40, %v10432_v52 }
0x2aad   :  { %v2736_v54 = vrot.slane %v2728_v50, %v10432_v52  ;;  %v2729_v55 = vcombine.high %v2728_v50, %v2728_v50 }
0x2aaf   :  { %v2746_v43 = vpack.c.bf16 %v2736_v54, %v2736_v54  ;;  %v2743_v36 = vrot.slane %v2729_v55, %v10432_v52 }
0x2ab1   :  { %v2747_v41 = vpack.c.bf16 %v2743_v36, %v2743_v36 }
0x2adf   :  { %v2750_v51 = vpop.permute.xlu1 %2749 }
0x2ae0   :  { %v10965_v45 = vsel %vm238_vm5, %v2750_v51, 0 }
0x2ae1   :  { %9146 = vmatpush3.bf16.xpose.msra.mxu1 %v10965_v45 }
0x2ae2   :  { %9151 = vmatprep.subr.bf16.mxu1 %v12329_v0 }
0x2ae3   :  { %v2976_v8 = vpop.permute.xlu1 %2975  ;;  %v2799_v53 = vpop.permute.xlu0 %2798 }
0x2ae4   :  { %v2978_v13 = vsel %vm97_vm1, %v2976_v8, 0.0  ;;  %v10972_v46 = vsel %vm238_vm5, %v2799_v53, 0 }
0x2ae5   :  { %2979 = vadd.xlane.f32.xlu1 %v2978_v13 }
0x2ae8   :  { %9148 = vmatmul.mubr.msk.bf16.vlgmr.msra.gmra.mrb[48].mxu1 %vm238_vm5, %v2746_v43 }
0x2ae9   :  { %9152 = vmatpush3.bf16.xpose.msra.mxu1 %v10972_v46  ;;  %9153 = vmatprep.mubr.msk.bf16.mxu1 %vm10207_vm2, %v12329_v0 }
0x2aea   :  { %9157 = vmatprep.subr.bf16.mxu1 %v12329_v0 }
0x2af0   :  { %9154 = vmatmul.mubr.msk.bf16.vlgmr.msra.gmra.mrb[52].mxu1 %vm238_vm5, %v2747_v41  ;;  %v2699_v41 = vpack.c.bf16 %v10932_v61, %v10932_v61 }
0x2af1   :  { %9159 = vmatprep.mubr.msk.bf16.mxu1 %vm10207_vm2, %v12329_v0 }
0x2b72   :  { %v2980_v35 = vpop.xlane.xlu1 %2979 }
0x2b73   :  { %v2981_v6 = vmul.f32 0.125, %v2980_v35 }
0x2b75   :  { %v2982_v62 = vsub.f32 %v10915_v5, %v2981_v6  ;;  %v2700_v5 = vpack.c.bf16 %v10937_v9, %v10937_v9 }
0x2b77   :  { %v2983_v15 = vmul.f32 %v2982_v62, %v2982_v62 }
0x2b79   :  { %2985 = vrot.lane.b32.xlu0 %v2983_v15, %s10213_s14 }
0x2bbb   :  { %v2791_v12 = vpop.f32.mrb[48].mxu1 }
0x2bbc   :  { %v9149_v20 = vpop.f32.mrb[49].mxu1  ;;  %v2846_v17 = vsel %vm750_vm8, %v2791_v12, -inf }
0x2bbd   :  { %2847 = vmax.xlane.f32.xlu1 %v2846_v17  ;;  %v2794_v23 = vpop.f32.mrb[50].mxu1 }
0x2bbe   :  { %v9150_v24 = vpop.f32.mrb[51].mxu1 }
0x2bc3   :  { %v2840_v29 = vpop.f32.mrb[52].mxu1 }
0x2bc4   :  { %v9155_v21 = vpop.f32.mrb[53].mxu1  ;;  %v2849_v26 = vsel %vm750_vm8, %v2840_v29, -inf }
0x2bc5   :  { %2850 = vmax.xlane.f32.xlu0 %v2849_v26  ;;  %v2843_v33 = vpop.f32.mrb[54].mxu1 }
0x2bc6   :  { %v9156_v34 = vpop.f32.mrb[55].mxu1 }
0x2bce   :  { %2918 = vrot.lane.b32.xlu1 %v2700_v5, %s10210_s28 }
0x2beb   :  { %v2986_v49 = vpop.permute.xlu0 %2985 }
0x2bec   :  { %v2988_v39 = vsel %vm97_vm1, %v2986_v49, 0.0 }
0x2bed   :  { %2989 = vadd.xlane.f32.xlu0 %v2988_v39 }
0x2c4a   :  { %v2848_v22 = vpop.xlane.xlu1 %2847 }
0x2c4b   :  { %v2852_v40 = vsub.f32 %v2791_v12, %v2848_v22 }
0x2c4d   :  { %v2854_v50 = vmul.f32 1.442695, %v2852_v40 }
0x2c4e   :  { %v2919_v51 = vpop.permute.xlu1 %2918 }
0x2c4f   :  { %9840 = vpow2.f32 %v2854_v50  ;;  %9164 = vmatpush3.bf16.msra.mxu0 %v2919_v51 }
0x2c50   :  { %9175 = vmatprep.subr.bf16.mxu0 %v12329_v0 }
0x2c52   :  { %v2851_v54 = vpop.xlane.xlu0 %2850 }
0x2c53   :  { %v2853_v8 = vsub.f32 %v2840_v29, %v2851_v54 }
0x2c55   :  { %v2856_v13 = vmul.f32 1.442695, %v2853_v8 }
0x2c57   :  { %9842 = vpow2.f32 %v2856_v13 }
0x2c59   :  { %v9841_v53 = vpop.eup %9840 }
0x2c5a   :  { %v2858_v43 = vsel %vm750_vm8, %v9841_v53, 0.0 }
0x2c5b   :  { %2859 = vadd.xlane.f32.xlu0 %v2858_v43 }
0x2c61   :  { %v9843_v55 = vpop.eup %9842 }
0x2c62   :  { %v2861_v36 = vsel %vm750_vm8, %v9843_v55, 0.0 }
0x2c63   :  { %2862 = vadd.xlane.f32.xlu1 %v2861_v36 }
0x2c71   :  { %2871 = vrot.lane.b32.xlu0 %v2699_v41, %s10210_s28 }
0x2c7a   :  { %v2990_v35 = vpop.xlane.xlu0 %2989 }
0x2c7b   :  { %v2991_v6 = vmul.f32 0.125, %v2990_v35 }
0x2c7d   :  { %v2992_v15 = vadd.f32 1e-05, %v2991_v6 }
0x2c7f   :  { %9844 = vrsqrt.f32 %v2992_v15 }
0x2c89   :  { %v9845_v12 = vpop.eup %9844 }
0x2c8a   :  { %v2994_v20 = vmul.f32 %v9845_v12, %v2982_v62 }
0x2c8c   :  { %v2995_v17 = vmul.f32 %v2994_v20, %v10470_v63 }
0x2c8e   :  { %v2996_v23 = vadd.f32 %v2995_v17, %v10472_v2 }
0x2c90   :  { %v3004_v24 = vrot.slane %v2996_v23, %v10432_v52 }
0x2c92   :  { %v3005_v29 = vcombine.high %v3004_v24, %v3004_v24  ;;  %v3012_v33 = vrot.slane %v3004_v24, %v10432_v52 }
0x2c94   :  { %v3019_v21 = vrot.slane %v3005_v29, %v10432_v52  ;;  %v3022_v34 = vpack.c.bf16 %v3012_v33, %v3012_v33 }
0x2c96   :  { %v3023_v26 = vpack.c.bf16 %v3019_v21, %v3019_v21 }
0x2c98   :  { %3071 = vrot.lane.b32.xlu1 %v3023_v26, %s10213_s14 }
0x2c9c   :  { %3025 = vrot.lane.b32.xlu1 %v3022_v34, %s10213_s14 }
0x2ce8   :  { %v2860_v5 = vpop.xlane.xlu0 %2859 }
0x2ce9   :  { %9846 = vrcp.f32 %v2860_v5  ;;  %v3237_v5 = vld [vmem:[#allocation3 + $0x6] sm:$0x3] }
0x2cec   :  { %v2872_v62 = vpop.permute.xlu0 %2871 }
0x2ced   :  { %9158 = vmatpush3.bf16.msra.mxu1 %v2872_v62 }
0x2cee   :  { %9169 = vmatprep.subr.bf16.mxu1 %v12329_v0 }
0x2cf0   :  { %v2863_v49 = vpop.xlane.xlu1 %2862 }
0x2cf1   :  { %9848 = vrcp.f32 %v2863_v49 }
0x2cf3   :  { %v9847_v39 = vpop.eup %9846 }
0x2cf4   :  { %v2866_v22 = vmul.f32 %v9847_v39, %v9841_v53 }
0x2cf6   :  { %v2868_v40 = vpack.c.bf16 %v2866_v22, %v2866_v22 }
0x2cf8   :  { %9160 = vmatmul.mubr.msk.bf16.vlgmr.msra.gmra.mrb[56].mxu1 %vm183_vm4, %v2868_v40 }
0x2cf9   :  { %9170 = vmatpush3.bf16.xpose.msra.mxu1 %v10965_v45  ;;  %9171 = vmatprep.mubr.msk.bf16.mxu1 %vm10207_vm2, %v12329_v0 }
0x2cfa   :  { %9181 = vmatprep.subr.bf16.mxu1 %v12329_v0 }
0x2cfb   :  { %v9849_v50 = vpop.eup %9848 }
0x2cfc   :  { %v2867_v54 = vmul.f32 %v9849_v50, %v9843_v55 }
0x2cfe   :  { %v2869_v8 = vpack.c.bf16 %v2867_v54, %v2867_v54 }
0x2d00   :  { %9166 = vmatmul.mubr.msk.bf16.vlgmr.msra.gmra.mrb[48].mxu0 %vm183_vm4, %v2869_v8 }
0x2d01   :  { %9176 = vmatpush3.bf16.xpose.msra.mxu0 %v10972_v46  ;;  %9177 = vmatprep.mubr.msk.bf16.mxu0 %vm10207_vm2, %v12329_v0 }
0x2d02   :  { %9187 = vmatprep.subr.bf16.mxu0 %v12329_v0 }
0x2d0a   :  { %v3072_v13 = vpop.permute.xlu1 %3071 }
0x2d0b   :  { %9178 = vmatmul.mubr.msk.bf16.vlgmr.msra.gmra.mrb[52].mxu0 %vm238_vm5, %v3072_v13 }
0x2d0c   :  { %9188 = vmatpush3.bf16.msra.mxu0 %v2919_v51  ;;  %9189 = vmatprep.mubr.msk.bf16.mxu0 %vm10207_vm2, %v12329_v0 }
0x2d0d   :  { %9219 = vmatprep.subr.bf16.mxu0 %v12329_v0 }
0x2d0e   :  { %v3026_v45 = vpop.permute.xlu1 %3025 }
0x2d0f   :  { %9172 = vmatmul.mubr.msk.bf16.vlgmr.msra.gmra.mrb[60].mxu1 %vm238_vm5, %v3026_v45 }
0x2d10   :  { %9182 = vmatpush3.bf16.msra.mxu1 %v2872_v62  ;;  %9183 = vmatprep.mubr.msk.bf16.mxu1 %vm10207_vm2, %v12329_v0  ;;  %v3238_v62 = vsel %vm81_vm0, %v3237_v5, 0.0 }
0x2d11   :  { %9193 = vmatprep.subr.bf16.mxu1 %v12329_v0 }
0x2dcb   :  { %v11023_v46 = vpop.f32.mrb[56].mxu1 }
0x2dcc   :  { %v9161_v53 = vpop.f32.mrb[57].mxu1 }
0x2dcd   :  { %v2914_v43 = vpop.f32.mrb[58].mxu1 }
0x2dce   :  { %v9162_v55 = vpop.f32.mrb[59].mxu1 }
0x2dd3   :  { %v11025_v51 = vpop.f32.mrb[48].mxu0 }
0x2dd4   :  { %v2968_v36 = vrot.slane %v11025_v51, 7  ;;  %v9167_v41 = vpop.f32.mrb[49].mxu0 }
0x2dd5   :  { %v2961_v35 = vpop.f32.mrb[50].mxu0 }
0x2dd6   :  { %v9168_v6 = vpop.f32.mrb[51].mxu0  ;;  %v11030_v15 = vsel %vm874_vm9, %v2968_v36, %v11023_v46 }
0x2dd7   :  { %v3242_v43 = vsel %vm97_vm1, %v11030_v15, 0.0 }
0x2dde   :  { %v3110_v12 = vpop.f32.mrb[52].mxu0 }
0x2ddf   :  { %v9179_v20 = vpop.f32.mrb[53].mxu0  ;;  %v3119_v17 = vsel %vm750_vm8, %v3110_v12, -inf }
0x2de0   :  { %3120 = vmax.xlane.f32.xlu0 %v3119_v17  ;;  %v3113_v23 = vpop.f32.mrb[54].mxu0 }
0x2de1   :  { %v9180_v24 = vpop.f32.mrb[55].mxu0 }
0x2de2   :  { %v3064_v29 = vpop.f32.mrb[60].mxu1 }
0x2de3   :  { %v9173_v21 = vpop.f32.mrb[61].mxu1  ;;  %v3116_v26 = vsel %vm750_vm8, %v3064_v29, -inf }
0x2de4   :  { %3117 = vmax.xlane.f32.xlu1 %v3116_v26  ;;  %v3067_v33 = vpop.f32.mrb[62].mxu1 }
0x2de5   :  { %v9174_v34 = vpop.f32.mrb[63].mxu1 }
0x2de8   :  { %3239 = vadd.xlane.f32.xlu1 %v3238_v62 }
0x2e6d   :  { %v3121_v49 = vpop.xlane.xlu0 %3120 }
0x2e6e   :  { %v3123_v39 = vsub.f32 %v3110_v12, %v3121_v49 }
0x2e70   :  { %v3126_v22 = vmul.f32 1.442695, %v3123_v39 }
0x2e71   :  { %v3118_v40 = vpop.xlane.xlu1 %3117 }
0x2e72   :  { %9850 = vpow2.f32 %v3126_v22  ;;  %v3122_v50 = vsub.f32 %v3064_v29, %v3118_v40 }
0x2e74   :  { %v3124_v54 = vmul.f32 1.442695, %v3122_v50 }
0x2e76   :  { %9852 = vpow2.f32 %v3124_v54 }
0x2e7c   :  { %v9851_v8 = vpop.eup %9850 }
0x2e7d   :  { %v3131_v13 = vsel %vm750_vm8, %v9851_v8, 0.0 }
0x2e7e   :  { %3132 = vadd.xlane.f32.xlu0 %v3131_v13 }
0x2e80   :  { %v9853_v45 = vpop.eup %9852 }
0x2e81   :  { %v3128_v53 = vsel %vm750_vm8, %v9853_v45, 0.0 }
0x2e82   :  { %3129 = vadd.xlane.f32.xlu0 %v3128_v53 }
0x2e86   :  { %3243 = vadd.xlane.f32.xlu0 %v3242_v43 }
0x2f0b   :  { %v3133_v55 = vpop.xlane.xlu0 %3132 }
0x2f0c   :  { %9854 = vrcp.f32 %v3133_v55 }
0x2f0f   :  { %v3130_v36 = vpop.xlane.xlu0 %3129 }
0x2f10   :  { %9856 = vrcp.f32 %v3130_v36 }
0x2f13   :  { %v3244_v49 = vpop.xlane.xlu0 %3243 }
0x2f16   :  { %v9855_v41 = vpop.eup %9854 }
0x2f17   :  { %v3137_v35 = vmul.f32 %v9855_v41, %v9851_v8 }
0x2f19   :  { %v3139_v6 = vpack.c.bf16 %v3137_v35, %v3137_v35 }
0x2f1a   :  { %v9857_v12 = vpop.eup %9856 }
0x2f1b   :  { %9190 = vmatmul.mubr.msk.bf16.vlgmr.msra.gmra.mrb[56].mxu0 %vm183_vm4, %v3139_v6  ;;  %v3136_v20 = vmul.f32 %v9857_v12, %v9853_v45 }
0x2f1c   :  { %9220 = vmatpush3.bf16.msra.mxu0 %v10790_v56  ;;  %9223 = vmatprep.mubr.msk.bf16.mxu0 %vm10207_vm2, %v12329_v0 }
0x2f1d   :  { %v3138_v17 = vpack.c.bf16 %v3136_v20, %v3136_v20  ;;  %9221 = vmatprep.subr.bf16.mxu0 %v12329_v0 }
0x2f1f   :  { %9184 = vmatmul.mubr.msk.bf16.vlgmr.msra.gmra.mrb[64].mxu1 %vm183_vm4, %v3138_v17 }
0x2f20   :  { %9194 = vmatpush3.bf16.msra.mxu1 %v10800_v30  ;;  %9197 = vmatprep.mubr.msk.bf16.mxu1 %vm10207_vm2, %v12329_v0 }
0x2f21   :  { %9195 = vmatprep.subr.bf16.mxu1 %v12329_v0  ;;  %9222 = vmatpush3.bf16.msra.mxu0 %v10806_v58 }
0x2f22   :  { %9227 = vmatprep.subr.bf16.mxu0 %v12329_v0 }
0x2f24   :  { %9196 = vmatpush3.bf16.msra.mxu1 %v10813_v59  ;;  %v3240_v59 = vpop.xlane.xlu1 %3239 }
0x2f25   :  { %9201 = vmatprep.subr.bf16.mxu1 %v12329_v0  ;;  %v3245_v39 = vadd.f32 %v3244_v49, %v3240_v59 }
0x2fee   :  { %v3220_v56 = vpop.f32.mrb[56].mxu0 }
0x2fef   :  { %v9191_v23 = vpop.f32.mrb[57].mxu0  ;;  %v3230_v29 = vrot.slane %v3220_v56, 7 }
0x2ff0   :  { %v3223_v24 = vpop.f32.mrb[58].mxu0 }
0x2ff1   :  { %v9192_v21 = vpop.f32.mrb[59].mxu0 }
0x2ff2   :  { %v3177_v26 = vpop.f32.mrb[64].mxu1 }
0x2ff3   :  { %v11054_v30 = vsel %vm874_vm9, %v3230_v29, %v3177_v26  ;;  %v9185_v33 = vpop.f32.mrb[65].mxu1 }
0x2ff4   :  { %v3180_v34 = vpop.f32.mrb[66].mxu1  ;;  %v3247_v58 = vsel %vm97_vm1, %v11054_v30, 0.0 }
0x2ff5   :  { %3248 = vadd.xlane.f32.xlu1 %v3247_v58  ;;  %v9186_v62 = vpop.f32.mrb[67].mxu1 }
0x3082   :  { %v3249_v22 = vpop.xlane.xlu1 %3248 }
0x3083   :  { %v3250_v40 = vadd.f32 %v3249_v22, %v3245_v39 }
0x3085   :  { %v3251_v50 = vmul.f32 0.03125, %v3250_v40 }
0x3087   :  { %v3254_v54 = vrot.slane %v3251_v50, 1  ;;  %v3252_v8 = vsub.f32 %v3237_v5, %v3251_v50  ;;  %v3257_v13 = vsub.f32 %v11023_v46, %v3251_v50  ;;  %v3259_v43 = vsub.f32 %v3177_v26, %v3251_v50 }
0x3089   :  { %v3261_v45 = vmul.f32 %v3252_v8, %v3252_v8  ;;  %v3258_v53 = vsub.f32 %v11025_v51, %v3254_v54  ;;  %v3260_v55 = vsub.f32 %v3220_v56, %v3254_v54  ;;  %v3265_v6 = vmul.f32 %v3257_v13, %v3257_v13 }
0x308a   :  { %v3276_v20 = vmul.f32 %v3259_v43, %v3259_v43  ;;  %v3310_v51 = vpack.c.bf16 %v10891_v47, %v10891_v47 }
0x308b   :  { %v3262_v36 = vsel %vm81_vm0, %v3261_v45, 0.0  ;;  %v3266_v41 = vmul.f32 %v3258_v53, %v3258_v53  ;;  %v3277_v35 = vmul.f32 %v3260_v55, %v3260_v55 }
0x308c   :  { %3263 = vadd.xlane.f32.xlu0 %v3262_v36 }
0x308d   :  { %v3269_v12 = vrot.slane %v3266_v41, 7  ;;  %v3280_v17 = vrot.slane %v3277_v35, 7 }
0x308f   :  { %v3270_v23 = vsel %vm874_vm9, %v3269_v12, %v3265_v6  ;;  %v3281_v5 = vsel %vm874_vm9, %v3280_v17, %v3276_v20 }
0x3090   :  { %v3272_v46 = vsel %vm97_vm1, %v3270_v23, 0.0  ;;  %v3283_v24 = vsel %vm97_vm1, %v3281_v5, 0.0 }
0x3091   :  { %3273 = vadd.xlane.f32.xlu1 %v3272_v46  ;;  %3284 = vadd.xlane.f32.xlu0 %v3283_v24 }
0x30a2   :  { %3312 = vrot.lane.b32.xlu1 %v3310_v51, %s10201_s19 }
0x3119   :  { %v3264_v56 = vpop.xlane.xlu0 %3263 }
0x311e   :  { %v3274_v29 = vpop.xlane.xlu1 %3273  ;;  %v3285_v26 = vpop.xlane.xlu0 %3284 }
0x311f   :  { %v3275_v21 = vadd.f32 %v3274_v29, %v3264_v56 }
0x3121   :  { %v3286_v33 = vadd.f32 %v3285_v26, %v3275_v21 }
0x3122   :  { %v3313_v34 = vpop.permute.xlu1 %3312 }
0x3123   :  { %v3287_v58 = vmul.f32 0.03125, %v3286_v33  ;;  %9198 = vmatmul.mubr.msk.bf16.vlgmr.msra.gmra.mrb[68].mxu1 %vm133_vm7, %v3313_v34 }
0x3124   :  { %9202 = vmatpush3.bf16.msra.mxu1 %v10837_v44  ;;  %9203 = vmatprep.mubr.msk.bf16.mxu1 %vm10207_vm2, %v12329_v0 }
0x3125   :  { %v3288_v62 = vadd.f32 1e-05, %v3287_v58  ;;  %9207 = vmatprep.subr.bf16.mxu1 %v12329_v0 }
0x3127   :  { %9858 = vrsqrt.f32 %v3288_v62 }
0x3131   :  { %v9859_v47 = vpop.eup %9858 }
0x3132   :  { %v3290_v49 = vmul.f32 %v9859_v47, %v3252_v8  ;;  %v3294_v59 = vrot.slane %v9859_v47, 1  ;;  %v3297_v39 = vmul.f32 %v9859_v47, %v3257_v13  ;;  %v3303_v13 = vmul.f32 %v9859_v47, %v3259_v43 }
0x3134   :  { %v3291_v22 = vmul.f32 %v10846_v3, %v3290_v49  ;;  %v3298_v40 = vmul.f32 %v3294_v59, %v3258_v53  ;;  %v3299_v50 = vmul.f32 %v3297_v39, %v10604_v7  ;;  %v3304_v54 = vmul.f32 %v3294_v59, %v3260_v55 }
0x3135   :  { %v3305_v20 = vmul.f32 %v3303_v13, %v10611_v16 }
0x3136   :  { %v3292_v45 = vadd.f32 %v10853_v27, %v3291_v22  ;;  %v3300_v44 = vmul.f32 %v3298_v40, %v10604_v7  ;;  %v3301_v36 = vadd.f32 %v3299_v50, %v10602_v18  ;;  %v3306_v6 = vmul.f32 %v3304_v54, %v10611_v16 }
0x3137   :  { %v3307_v5 = vadd.f32 %v3305_v20, %v10619_v32 }
0x3138   :  { %v3309_v41 = vpack.c.bf16 %v3292_v45, %v3292_v45  ;;  %v3302_v35 = vadd.f32 %v3300_v44, %v10602_v18  ;;  %v3401_v3 = vpack.c.bf16 %v3301_v36, %v3301_v36  ;;  %v3308_v53 = vadd.f32 %v3306_v6, %v10619_v32 }
0x3139   :  { %v3454_v43 = vpack.c.bf16 %v3307_v5, %v3307_v5 }
0x313a   :  { %9204 = vmatmul.mubr.msk.bf16.vlgmr.msra.gmra.mrb[68].mxu1 %vm183_vm4, %v3309_v41  ;;  %v3402_v8 = vpack.c.bf16 %v3302_v35, %v3302_v35  ;;  %v3405_v12 = vunpack.c.l.b16 %v3401_v3  ;;  %v3455_v23 = vpack.c.bf16 %v3308_v53, %v3308_v53 }
0x313b   :  { %9208 = vmatpush3.bf16.msra.mxu1 %v10339_v19  ;;  %9209 = vmatprep.mubr.msk.bf16.mxu1 %vm10207_vm2, %v12329_v0  ;;  %v3458_v56 = vunpack.c.l.b16 %v3454_v43 }
0x313c   :  { %9213 = vmatprep.subr.bf16.mxu1 %v12329_v0  ;;  %v3406_v27 = vunpack.c.l.b16 %v3402_v8  ;;  %v3459_v24 = vunpack.c.l.b16 %v3455_v23 }
0x313e   :  { %v3407_v55 = vrot.slane %v3406_v27, 7  ;;  %v3460_v51 = vrot.slane %v3459_v24, 7 }
0x3140   :  { %v3408_v17 = vsel %vm874_vm9, %v3407_v55, %v3405_v12  ;;  %v3461_v29 = vsel %vm874_vm9, %v3460_v51, %v3458_v56 }
0x3141   :  { %v3409_v46 = vpack.c.b16 %v3408_v17, %v3408_v17  ;;  %v3462_v21 = vpack.c.b16 %v3461_v29, %v3461_v29 }
0x3146   :  { %9210 = vmatmul.mubr.msk.bf16.vlgmr.msra.gmra.mrb[68].mxu1 %vm238_vm5, %v3409_v46 }
0x3147   :  { %9214 = vmatpush3.bf16.msra.mxu1 %v10366_v42  ;;  %9215 = vmatprep.mubr.msk.bf16.mxu1 %vm10207_vm2, %v12329_v0 }
0x3148   :  { %9245 = vmatprep.subr.bf16.mxu1 %v12329_v0 }
0x3152   :  { %9216 = vmatmul.mubr.msk.bf16.vlgmr.msra.gmra.mrb[68].mxu1 %vm238_vm5, %v3462_v21 }
0x3153   :  { %9247 = vmatprep.mubr.msk.bf16.mxu1 %vm10207_vm2, %v12329_v0 }
0x3225   :  { %v3500_v26 = vpop.f32.mrb[68].mxu1 }
0x3226   :  { %v9618_v33 = vadd.f32 %v10881_v1, %v3500_v26  ;;  %v9217_v34 = vpop.f32.mrb[69].mxu1 }
0x3227   :  { %v3503_v58 = vpop.f32.mrb[70].mxu1 }
0x3228   :  { %9860 = vtanh.f32 %v9618_v33  ;;  %v9218_v62 = vpop.f32.mrb[71].mxu1  ;;  %v3507_v49 = vmul.f32 0.5, %v9618_v33 }
0x322a   :  { %9862 = vtanh.f32 %v3507_v49 }
0x3232   :  { %v9861_v47 = vpop.eup %9860 }
0x3233   :  { %3514 = vrot.lane.b32.xlu0 %v9861_v47, %s10204_s0 }
0x3234   :  { %v9863_v59 = vpop.eup %9862 }
0x3235   :  { %v3509_v39 = vmul.f32 0.5, %v9863_v59 }
0x3237   :  { %v3510_v22 = vadd.f32 0.5, %v3509_v39 }
0x3239   :  { %v3512_v54 = vmul.f32 %v3510_v22, %v10887_v48 }
0x32a5   :  { %v3515_v40 = vpop.permute.xlu0 %3514 }
0x32a6   :  { %v3517_v50 = vmul.f32 %v3515_v40, %v3510_v22 }
0x32a8   :  { %3519 = vrot.lane.b32.xlu1 %v3517_v50, %s10201_s19 }
0x331a   :  { %v3520_v45 = vpop.permute.xlu1 %3519 }
0x331b   :  { %v11102_v1 = vadd.f32 %v3520_v45, %v3512_v54 }
0x331d   :  { %9864 = vtanh.f32 %v11102_v1 }
0x3327   :  { %v9865_v44 = vpop.eup %9864 }
0x3328   :  { %3525 = vrot.lane.b32.xlu1 %v9865_v44, %s10204_s0 }
0x339a   :  { %v3526_v36 = vpop.permute.xlu1 %3525 }
0x339b   :  { %v11106_v41 = vmul.f32 %v3526_v36, %v3510_v22 }
0x339d   :  { %3530 = vrot.lane.b32.xlu0 %v11106_v41, %s10201_s19 }
0x340f   :  { %v3531_v35 = vpop.permute.xlu0 %3530 }
0x3410   :  { %v3533_v6 = vsel %vm362_vm6, %v3531_v35, 0.0 }
0x3411   :  { %3534 = vadd.xlane.f32.xlu1 %v3533_v6 }
0x349e   :  { %v3535_v8 = vpop.xlane.xlu1 %3534 }
0x349f   :  { %v3536_v48 = vmul.f32 0.03125, %v3535_v8 }
0x34a1   :  { %v3537_v3 = vsub.f32 %v11106_v41, %v3536_v48 }
0x34a3   :  { %v3538_v13 = vmul.f32 %v3537_v3, %v3537_v3 }
0x34a5   :  { %3540 = vrot.lane.b32.xlu0 %v3538_v13, %s10201_s19 }
0x3517   :  { %v3541_v27 = vpop.permute.xlu0 %3540 }
0x3518   :  { %v3543_v53 = vsel %vm362_vm6, %v3541_v27, 0.0 }
0x3519   :  { %3544 = vadd.xlane.f32.xlu0 %v3543_v53 }
0x35a6   :  { %v3545_v55 = vpop.xlane.xlu0 %3544 }
0x35a7   :  { %v3546_v12 = vmul.f32 0.03125, %v3545_v55 }
0x35a9   :  { %v3547_v20 = vadd.f32 1e-05, %v3546_v12 }
0x35ab   :  { %9866 = vrsqrt.f32 %v3547_v20 }
0x35b5   :  { %v9867_v17 = vpop.eup %9866 }
0x35b6   :  { %v3549_v23 = vmul.f32 %v9867_v17, %v3537_v3 }
0x35b8   :  { %v3550_v5 = vmul.f32 %v3549_v23, %v10408_v25 }
0x35ba   :  { %v11116_v46 = vadd.f32 %v3550_v5, %v10410_v28 }
0x35bc   :  { %v3552_v24 = vpack.c.bf16 %v11116_v46, %v11116_v46 }
0x35be   :  { %3554 = vrot.lane.b32.xlu1 %v3552_v24, %s10201_s19 }
0x3630   :  { %v3555_v43 = vpop.permute.xlu1 %3554 }
0x3631   :  { %9224 = vmatmul.mubr.msk.bf16.vlgmr.msra.gmra.mrb[60].mxu0 %vm133_vm7, %v3555_v43 }
0x3632   :  { %9229 = vmatprep.mubr.msk.bf16.mxu0 %vm10207_vm2, %v12329_v0 }
0x3704   :  { %v3593_v51 = vpop.f32.mrb[60].mxu0 }
0x3705   :  { %v11125_v56 = vadd.f32 %v10912_v14, %v3593_v51  ;;  %v9225_v29 = vpop.f32.mrb[61].mxu0 }
0x3706   :  { %v3596_v21 = vpop.f32.mrb[62].mxu0 }
0x3707   :  { %v9226_v26 = vpop.f32.mrb[63].mxu0  ;;  %v3599_v33 = vmul.f32 0.5, %v11125_v56 }
0x3709   :  { %9868 = vtanh.f32 %v3599_v33 }
0x370a   :  { %9870 = vtanh.f32 %v11125_v56 }
0x3713   :  { %v9869_v34 = vpop.eup %9868 }
0x3714   :  { %v3601_v58 = vmul.f32 0.5, %v9869_v34  ;;  %v9871_v47 = vpop.eup %9870 }
0x3716   :  { %v3602_v62 = vadd.f32 0.5, %v3601_v58  ;;  %v3746_v58 = vsel %vm97_vm1, %v11125_v56, 0.0 }
0x3718   :  { %3606 = vperm.xlu0 %9735, %v3602_v62  }
0x3797   :  { %v3607_v49 = vpop.permute.xlu0 %3606 }
0x3798   :  { %v3651_v59 = vmul.f32 %v9871_v47, %v3607_v49  ;;  %v3609_v45 = vmul.f32 %v3607_v49, %v3602_v62 }
0x379a   :  { %v3659_v39 = vrot.slane %v3651_v59, %v10432_v52  ;;  %v3617_v44 = vrot.slane %v3609_v45, %v10432_v52 }
0x379c   :  { %v3660_v22 = vcombine.high %v3659_v39, %v3659_v39  ;;  %v3667_v14 = vrot.slane %v3659_v39, %v10432_v52  ;;  %v3618_v36 = vcombine.high %v3617_v44, %v3617_v44  ;;  %v3625_v35 = vrot.slane %v3617_v44, %v10432_v52 }
0x379e   :  { %v3678_v40 = vrot.slane %v3667_v14, %v10435_v57  ;;  %v3674_v50 = vrot.slane %v3660_v22, %v10432_v52  ;;  %v3635_v6 = vsub.f32 1.0, %v3625_v35  ;;  %v3632_v8 = vrot.slane %v3618_v36, %v10432_v52 }
0x37a0   :  { %3683 = vrot.lane.b32.xlu1 %v3678_v40, %s10213_s14  ;;  %v3682_v54 = vrot.slane %v3674_v50, %v10435_v57  ;;  %v3642_v48 = vrot.slane %v3635_v6, %v10435_v57  ;;  %v3636_v3 = vsub.f32 1.0, %v3632_v8 }
0x37a2   :  { %v3649_v13 = vmul.f32 %v3642_v48, %v10932_v61  ;;  %v3646_v27 = vrot.slane %v3636_v3, %v10435_v57 }
0x37a4   :  { %3685 = vrot.lane.b32.xlu1 %v3682_v54, %s10213_s14  ;;  %v3650_v12 = vmul.f32 %v3646_v27, %v10937_v9 }
0x3812   :  { %v3684_v53 = vpop.permute.xlu1 %3683 }
0x3813   :  { %v11142_v55 = vadd.f32 %v3684_v53, %v3649_v13 }
0x3815   :  { %3693 = vrot.lane.b32.xlu0 %v11142_v55, %s10210_s28 }
0x3816   :  { %v3686_v20 = vpop.permute.xlu1 %3685 }
0x3817   :  { %v11147_v17 = vadd.f32 %v3686_v20, %v3650_v12 }
0x3819   :  { %3695 = vrot.lane.b32.xlu1 %v11147_v17, %s10210_s28 }
0x3887   :  { %v3694_v23 = vpop.permute.xlu0 %3693 }
0x3888   :  { %v3699_v5 = vsel %vm238_vm5, %v3694_v23, 0.0 }
0x3889   :  { %3700 = vadd.xlane.f32.xlu0 %v3699_v5 }
0x388b   :  { %v3696_v61 = vpop.permute.xlu1 %3695 }
0x388c   :  { %v3702_v24 = vsel %vm238_vm5, %v3696_v61, 0.0 }
0x388d   :  { %3703 = vadd.xlane.f32.xlu1 %v3702_v24 }
0x3916   :  { %v3701_v43 = vpop.xlane.xlu0 %3700 }
0x3917   :  { %v3705_v51 = vmul.f32 0.125, %v3701_v43 }
0x3919   :  { %v3707_v29 = vsub.f32 %v11142_v55, %v3705_v51 }
0x391a   :  { %v3704_v21 = vpop.xlane.xlu1 %3703 }
0x391b   :  { %v3709_v9 = vmul.f32 %v3707_v29, %v3707_v29  ;;  %v3706_v26 = vmul.f32 0.125, %v3704_v21 }
0x391d   :  { %v3708_v33 = vsub.f32 %v11147_v17, %v3706_v26  ;;  %3713 = vrot.lane.b32.xlu0 %v3709_v9, %s10210_s28 }
0x391f   :  { %v3710_v34 = vmul.f32 %v3708_v33, %v3708_v33 }
0x3921   :  { %3715 = vrot.lane.b32.xlu1 %v3710_v34, %s10210_s28 }
0x393c   :  { %3747 = vadd.xlane.f32.xlu0 %v3746_v58 }
0x398f   :  { %v3714_v62 = vpop.permute.xlu0 %3713 }
0x3990   :  { %v3719_v47 = vsel %vm238_vm5, %v3714_v62, 0.0 }
0x3991   :  { %3720 = vadd.xlane.f32.xlu1 %v3719_v47 }
0x3993   :  { %v3716_v49 = vpop.permute.xlu1 %3715 }
0x3994   :  { %v3722_v59 = vsel %vm238_vm5, %v3716_v49, 0.0 }
0x3995   :  { %3723 = vadd.xlane.f32.xlu0 %v3722_v59 }
0x39c9   :  { %v3748_v39 = vpop.xlane.xlu0 %3747 }
0x39ca   :  { %v3749_v22 = vmul.f32 0.125, %v3748_v39 }
0x39cc   :  { %v3750_v14 = vsub.f32 %v11125_v56, %v3749_v22 }
0x39ce   :  { %v3751_v40 = vmul.f32 %v3750_v14, %v3750_v14 }
0x39d0   :  { %v3752_v50 = vsel %vm97_vm1, %v3751_v40, 0.0 }
0x39d1   :  { %3753 = vadd.xlane.f32.xlu0 %v3752_v50 }
0x3a1e   :  { %v3721_v54 = vpop.xlane.xlu1 %3720 }
0x3a1f   :  { %v3725_v45 = vmul.f32 0.125, %v3721_v54 }
0x3a21   :  { %v3727_v44 = vadd.f32 1e-05, %v3725_v45 }
0x3a22   :  { %v3724_v36 = vpop.xlane.xlu0 %3723 }
0x3a23   :  { %9872 = vrsqrt.f32 %v3727_v44  ;;  %v3726_v35 = vmul.f32 0.125, %v3724_v36 }
0x3a25   :  { %v3728_v6 = vadd.f32 1e-05, %v3726_v35 }
0x3a27   :  { %9874 = vrsqrt.f32 %v3728_v6 }
0x3a2d   :  { %v9873_v8 = vpop.eup %9872 }
0x3a2e   :  { %v3731_v48 = vmul.f32 %v9873_v8, %v3707_v29 }
0x3a30   :  { %v3733_v3 = vmul.f32 %v3731_v48, %v10470_v63 }
0x3a31   :  { %v9875_v13 = vpop.eup %9874 }
0x3a32   :  { %v3735_v27 = vadd.f32 %v3733_v3, %v10472_v2  ;;  %v3732_v53 = vmul.f32 %v9875_v13, %v3708_v33 }
0x3a34   :  { %v3737_v12 = vpack.c.bf16 %v3735_v27, %v3735_v27  ;;  %v3734_v20 = vmul.f32 %v3732_v53, %v10470_v63 }
0x3a36   :  { %3789 = vrot.lane.b32.xlu1 %v3737_v12, %s10210_s28  ;;  %v3736_v23 = vadd.f32 %v3734_v20, %v10472_v2 }
0x3a38   :  { %v3738_v5 = vpack.c.bf16 %v3736_v23, %v3736_v23 }
0x3a3a   :  { %3838 = vrot.lane.b32.xlu0 %v3738_v5, %s10210_s28  ;;  %4015 = vrot.lane.b32.xlu1 %v11125_v56, %s10213_s14 }
0x3a5e   :  { %v3754_v61 = vpop.xlane.xlu0 %3753 }
0x3a5f   :  { %v3755_v24 = vmul.f32 0.125, %v3754_v61 }
0x3a61   :  { %v3756_v43 = vadd.f32 1e-05, %v3755_v24 }
0x3a63   :  { %9876 = vrsqrt.f32 %v3756_v43 }
0x3a6d   :  { %v9877_v51 = vpop.eup %9876 }
0x3a6e   :  { %v3758_v29 = vmul.f32 %v9877_v51, %v3750_v14 }
0x3a70   :  { %v3759_v21 = vmul.f32 %v3758_v29, %v10408_v25 }
0x3a72   :  { %v3760_v9 = vadd.f32 %v3759_v21, %v10410_v28 }
0x3a74   :  { %v3768_v26 = vrot.slane %v3760_v9, %v10432_v52 }
0x3a76   :  { %v3776_v58 = vrot.slane %v3768_v26, %v10432_v52  ;;  %v3769_v39 = vcombine.high %v3768_v26, %v3768_v26 }
0x3a78   :  { %v3786_v59 = vpack.c.bf16 %v3776_v58, %v3776_v58  ;;  %v3783_v14 = vrot.slane %v3769_v39, %v10432_v52 }
0x3a7a   :  { %v3787_v40 = vpack.c.bf16 %v3783_v14, %v3783_v14 }
0x3aa8   :  { %v3790_v33 = vpop.permute.xlu1 %3789 }
0x3aa9   :  { %v11175_v34 = vsel %vm238_vm5, %v3790_v33, 0 }
0x3aaa   :  { %9228 = vmatpush3.bf16.xpose.msra.mxu0 %v11175_v34 }
0x3aab   :  { %9233 = vmatprep.subr.bf16.mxu0 %v12329_v0 }
0x3aac   :  { %v4016_v62 = vpop.permute.xlu1 %4015  ;;  %v3839_v49 = vpop.permute.xlu0 %3838 }
0x3aad   :  { %v4018_v47 = vsel %vm97_vm1, %v4016_v62, 0.0  ;;  %v11182_v22 = vsel %vm238_vm5, %v3839_v49, 0  ;;  %v3739_v62 = vpack.c.bf16 %v11142_v55, %v11142_v55 }
0x3aae   :  { %4019 = vadd.xlane.f32.xlu1 %v4018_v47 }
0x3ab1   :  { %9230 = vmatmul.mubr.msk.bf16.vlgmr.msra.gmra.mrb[64].mxu0 %vm238_vm5, %v3786_v59 }
0x3ab2   :  { %9234 = vmatpush3.bf16.xpose.msra.mxu0 %v11182_v22  ;;  %9235 = vmatprep.mubr.msk.bf16.mxu0 %vm10207_vm2, %v12329_v0 }
0x3ab3   :  { %9239 = vmatprep.subr.bf16.mxu0 %v12329_v0 }
0x3ab9   :  { %9236 = vmatmul.mubr.msk.bf16.vlgmr.msra.gmra.mrb[68].mxu0 %vm238_vm5, %v3787_v40 }
0x3aba   :  { %9241 = vmatprep.mubr.msk.bf16.mxu0 %vm10207_vm2, %v12329_v0 }
0x3b3b   :  { %v4020_v50 = vpop.xlane.xlu1 %4019 }
0x3b3c   :  { %v4021_v54 = vmul.f32 0.125, %v4020_v50 }
0x3b3e   :  { %v4022_v45 = vsub.f32 %v11125_v56, %v4021_v54  ;;  %v3740_v56 = vpack.c.bf16 %v11147_v17, %v11147_v17 }
0x3b40   :  { %v4023_v44 = vmul.f32 %v4022_v45, %v4022_v45 }
0x3b42   :  { %4025 = vrot.lane.b32.xlu0 %v4023_v44, %s10213_s14 }
0x3b84   :  { %v3831_v36 = vpop.f32.mrb[64].mxu0 }
0x3b85   :  { %v9231_v35 = vpop.f32.mrb[65].mxu0  ;;  %v3886_v6 = vsel %vm750_vm8, %v3831_v36, -inf }
0x3b86   :  { %3887 = vmax.xlane.f32.xlu1 %v3886_v6  ;;  %v3834_v8 = vpop.f32.mrb[66].mxu0 }
0x3b87   :  { %v9232_v48 = vpop.f32.mrb[67].mxu0 }
0x3b8c   :  { %v3880_v3 = vpop.f32.mrb[68].mxu0 }
0x3b8d   :  { %v9237_v13 = vpop.f32.mrb[69].mxu0  ;;  %v3889_v27 = vsel %vm750_vm8, %v3880_v3, -inf }
0x3b8e   :  { %3890 = vmax.xlane.f32.xlu0 %v3889_v27  ;;  %v3883_v53 = vpop.f32.mrb[70].mxu0 }
0x3b8f   :  { %v9238_v12 = vpop.f32.mrb[71].mxu0 }
0x3b97   :  { %3958 = vrot.lane.b32.xlu1 %v3740_v56, %s10210_s28 }
0x3bb4   :  { %v4026_v20 = vpop.permute.xlu0 %4025 }
0x3bb5   :  { %v4028_v23 = vsel %vm97_vm1, %v4026_v20, 0.0 }
0x3bb6   :  { %4029 = vadd.xlane.f32.xlu0 %v4028_v23 }
0x3c13   :  { %v3888_v5 = vpop.xlane.xlu1 %3887 }
0x3c14   :  { %v3892_v61 = vsub.f32 %v3831_v36, %v3888_v5 }
0x3c16   :  { %v3894_v24 = vmul.f32 1.442695, %v3892_v61 }
0x3c17   :  { %v3959_v43 = vpop.permute.xlu1 %3958 }
0x3c18   :  { %9878 = vpow2.f32 %v3894_v24  ;;  %9246 = vmatpush3.bf16.msra.mxu1 %v3959_v43 }
0x3c19   :  { %9257 = vmatprep.subr.bf16.mxu1 %v12329_v0 }
0x3c1b   :  { %v3891_v51 = vpop.xlane.xlu0 %3890 }
0x3c1c   :  { %v3893_v29 = vsub.f32 %v3880_v3, %v3891_v51 }
0x3c1e   :  { %v3896_v21 = vmul.f32 1.442695, %v3893_v29 }
0x3c20   :  { %9880 = vpow2.f32 %v3896_v21 }
0x3c22   :  { %v9879_v9 = vpop.eup %9878 }
0x3c23   :  { %v3898_v26 = vsel %vm750_vm8, %v9879_v9, 0.0 }
0x3c24   :  { %3899 = vadd.xlane.f32.xlu0 %v3898_v26 }
0x3c2a   :  { %v9881_v33 = vpop.eup %9880 }
0x3c2b   :  { %v3901_v58 = vsel %vm750_vm8, %v9881_v33, 0.0 }
0x3c2c   :  { %3902 = vadd.xlane.f32.xlu1 %v3901_v58 }
0x3c3a   :  { %3911 = vrot.lane.b32.xlu0 %v3739_v62, %s10210_s28 }
0x3c43   :  { %v4030_v47 = vpop.xlane.xlu0 %4029 }
0x3c44   :  { %v4031_v49 = vmul.f32 0.125, %v4030_v47 }
0x3c46   :  { %v4032_v59 = vadd.f32 1e-05, %v4031_v49 }
0x3c48   :  { %9882 = vrsqrt.f32 %v4032_v59 }
0x3c52   :  { %v9883_v39 = vpop.eup %9882 }
0x3c53   :  { %v4034_v14 = vmul.f32 %v9883_v39, %v4022_v45 }
0x3c55   :  { %v4035_v40 = vmul.f32 %v4034_v14, %v10470_v63 }
0x3c57   :  { %v4036_v50 = vadd.f32 %v4035_v40, %v10472_v2 }
0x3c59   :  { %v4044_v54 = vrot.slane %v4036_v50, %v10432_v52 }
0x3c5b   :  { %v4045_v44 = vcombine.high %v4044_v54, %v4044_v54  ;;  %v4052_v6 = vrot.slane %v4044_v54, %v10432_v52  ;;  %v11244_v54 = vld [vmem:[#allocation3 + $0x8] sm:$0x3] }
0x3c5d   :  { %v4059_v36 = vrot.slane %v4045_v44, %v10432_v52  ;;  %v4062_v8 = vpack.c.bf16 %v4052_v6, %v4052_v6  ;;  %v4278_v44 = vsel %vm81_vm0, %v11244_v54, 0.0 }
0x3c5f   :  { %v4063_v35 = vpack.c.bf16 %v4059_v36, %v4059_v36 }
0x3c61   :  { %4111 = vrot.lane.b32.xlu1 %v4063_v35, %s10213_s14 }
0x3c65   :  { %4065 = vrot.lane.b32.xlu1 %v4062_v8, %s10213_s14 }
0x3cb1   :  { %v3900_v48 = vpop.xlane.xlu0 %3899 }
0x3cb2   :  { %9884 = vrcp.f32 %v3900_v48 }
0x3cb5   :  { %v3912_v45 = vpop.permute.xlu0 %3911 }
0x3cb6   :  { %9240 = vmatpush3.bf16.msra.mxu0 %v3912_v45 }
0x3cb7   :  { %9251 = vmatprep.subr.bf16.mxu0 %v12329_v0 }
0x3cb9   :  { %v3903_v3 = vpop.xlane.xlu1 %3902 }
0x3cba   :  { %9886 = vrcp.f32 %v3903_v3 }
0x3cbc   :  { %v9885_v13 = vpop.eup %9884 }
0x3cbd   :  { %v3906_v27 = vmul.f32 %v9885_v13, %v9879_v9 }
0x3cbf   :  { %v3908_v53 = vpack.c.bf16 %v3906_v27, %v3906_v27 }
0x3cc1   :  { %9242 = vmatmul.mubr.msk.bf16.vlgmr.msra.gmra.mrb[72].mxu0 %vm183_vm4, %v3908_v53 }
0x3cc2   :  { %9252 = vmatpush3.bf16.xpose.msra.mxu0 %v11175_v34  ;;  %9253 = vmatprep.mubr.msk.bf16.mxu0 %vm10207_vm2, %v12329_v0 }
0x3cc3   :  { %9263 = vmatprep.subr.bf16.mxu0 %v12329_v0 }
0x3cc4   :  { %v9887_v12 = vpop.eup %9886 }
0x3cc5   :  { %v3907_v56 = vmul.f32 %v9887_v12, %v9881_v33 }
0x3cc7   :  { %v3909_v20 = vpack.c.bf16 %v3907_v56, %v3907_v56 }
0x3cc9   :  { %9248 = vmatmul.mubr.msk.bf16.vlgmr.msra.gmra.mrb[72].mxu1 %vm183_vm4, %v3909_v20 }
0x3cca   :  { %9258 = vmatpush3.bf16.xpose.msra.mxu1 %v11182_v22  ;;  %9259 = vmatprep.mubr.msk.bf16.mxu1 %vm10207_vm2, %v12329_v0 }
0x3ccb   :  { %9269 = vmatprep.subr.bf16.mxu1 %v12329_v0 }
0x3cd3   :  { %v4112_v23 = vpop.permute.xlu1 %4111 }
0x3cd4   :  { %9260 = vmatmul.mubr.msk.bf16.vlgmr.msra.gmra.mrb[76].mxu1 %vm238_vm5, %v4112_v23 }
0x3cd5   :  { %9270 = vmatpush3.bf16.msra.mxu1 %v3959_v43  ;;  %9271 = vmatprep.mubr.msk.bf16.mxu1 %vm10207_vm2, %v12329_v0 }
0x3cd6   :  { %9301 = vmatprep.subr.bf16.mxu1 %v12329_v0 }
0x3cd7   :  { %v4066_v34 = vpop.permute.xlu1 %4065 }
0x3cd8   :  { %9254 = vmatmul.mubr.msk.bf16.vlgmr.msra.gmra.mrb[76].mxu0 %vm238_vm5, %v4066_v34 }
0x3cd9   :  { %9264 = vmatpush3.bf16.msra.mxu0 %v3912_v45  ;;  %9265 = vmatprep.mubr.msk.bf16.mxu0 %vm10207_vm2, %v12329_v0 }
0x3cda   :  { %9275 = vmatprep.subr.bf16.mxu0 %v12329_v0 }
0x3d94   :  { %v11233_v22 = vpop.f32.mrb[72].mxu0 }
0x3d95   :  { %v9243_v5 = vpop.f32.mrb[73].mxu0 }
0x3d96   :  { %v3954_v61 = vpop.f32.mrb[74].mxu0 }
0x3d97   :  { %v9244_v24 = vpop.f32.mrb[75].mxu0 }
0x3d9c   :  { %v11235_v43 = vpop.f32.mrb[72].mxu1 }
0x3d9d   :  { %v4008_v51 = vrot.slane %v11235_v43, 7  ;;  %v9249_v29 = vpop.f32.mrb[73].mxu1 }
0x3d9e   :  { %v4001_v21 = vpop.f32.mrb[74].mxu1 }
0x3d9f   :  { %v9250_v9 = vpop.f32.mrb[75].mxu1  ;;  %v11240_v26 = vsel %vm874_vm9, %v4008_v51, %v11233_v22  ;;  %v11253_v51 = vld [vmem:[#allocation6] sm:$0xff]   ;;  %v11263_v21 = vld [vmem:[%s12322_s3 + $0x10] sm:$0xff]  }
0x3da0   :  { %v4282_v12 = vsel %vm97_vm1, %v11240_v26, 0.0  ;;  %v11269_v9 = vld [vmem:[#allocation6 + $0x8] sm:$0xff]  }
0x3da7   :  { %v4150_v33 = vpop.f32.mrb[76].mxu1 }
0x3da8   :  { %v9261_v58 = vpop.f32.mrb[77].mxu1  ;;  %v4159_v62 = vsel %vm750_vm8, %v4150_v33, -inf }
0x3da9   :  { %4160 = vmax.xlane.f32.xlu0 %v4159_v62  ;;  %v4153_v47 = vpop.f32.mrb[78].mxu1 }
0x3daa   :  { %v9262_v49 = vpop.f32.mrb[79].mxu1 }
0x3dab   :  { %v4104_v59 = vpop.f32.mrb[76].mxu0 }
0x3dac   :  { %v9255_v39 = vpop.f32.mrb[77].mxu0  ;;  %v4156_v14 = vsel %vm750_vm8, %v4104_v59, -inf }
0x3dad   :  { %4157 = vmax.xlane.f32.xlu1 %v4156_v14  ;;  %v4107_v40 = vpop.f32.mrb[78].mxu0 }
0x3dae   :  { %v9256_v50 = vpop.f32.mrb[79].mxu0 }
0x3db1   :  { %4279 = vadd.xlane.f32.xlu1 %v4278_v44 }
0x3e36   :  { %v4161_v36 = vpop.xlane.xlu0 %4160 }
0x3e37   :  { %v4163_v35 = vsub.f32 %v4150_v33, %v4161_v36  ;;  %v11276_v33 = vld [vmem:[%s12322_s3 + $0x18] sm:$0xff]  }
0x3e39   :  { %v4166_v6 = vmul.f32 1.442695, %v4163_v35 }
0x3e3a   :  { %v4158_v8 = vpop.xlane.xlu1 %4157 }
0x3e3b   :  { %9888 = vpow2.f32 %v4166_v6  ;;  %v4162_v48 = vsub.f32 %v4104_v59, %v4158_v8 }
0x3e3d   :  { %v4164_v45 = vmul.f32 1.442695, %v4162_v48 }
0x3e3e   :  { %v4280_v35 = vpop.xlane.xlu1 %4279 }
0x3e3f   :  { %9890 = vpow2.f32 %v4164_v45 }
0x3e45   :  { %v9889_v3 = vpop.eup %9888 }
0x3e46   :  { %v4171_v13 = vsel %vm750_vm8, %v9889_v3, 0.0 }
0x3e47   :  { %4172 = vadd.xlane.f32.xlu0 %v4171_v13 }
0x3e49   :  { %v9891_v27 = vpop.eup %9890 }
0x3e4a   :  { %v4168_v53 = vsel %vm750_vm8, %v9891_v27, 0.0 }
0x3e4b   :  { %4169 = vadd.xlane.f32.xlu0 %v4168_v53 }
0x3e4f   :  { %4283 = vadd.xlane.f32.xlu0 %v4282_v12 }
0x3ed4   :  { %v4173_v56 = vpop.xlane.xlu0 %4172 }
0x3ed5   :  { %9892 = vrcp.f32 %v4173_v56 }
0x3ed8   :  { %v4170_v20 = vpop.xlane.xlu0 %4169 }
0x3ed9   :  { %9894 = vrcp.f32 %v4170_v20 }
0x3edc   :  { %v4284_v6 = vpop.xlane.xlu0 %4283 }
0x3edd   :  { %v4285_v8 = vadd.f32 %v4284_v6, %v4280_v35  ;;  %v11300_v6 = vld [vmem:[%s12322_s3] sm:$0xff]  }
0x3edf   :  { %v9893_v23 = vpop.eup %9892 }
0x3ee0   :  { %v4177_v34 = vmul.f32 %v9893_v23, %v9889_v3 }
0x3ee2   :  { %v4179_v5 = vpack.c.bf16 %v4177_v34, %v4177_v34 }
0x3ee3   :  { %v9895_v61 = vpop.eup %9894 }
0x3ee4   :  { %9272 = vmatmul.mubr.msk.bf16.vlgmr.msra.gmra.mrb[80].mxu1 %vm183_vm4, %v4179_v5  ;;  %v4176_v24 = vmul.f32 %v9895_v61, %v9891_v27 }
0x3ee5   :  { %9302 = vmatpush3.bf16.msra.mxu1 %v11253_v51  ;;  %9305 = vmatprep.mubr.msk.bf16.mxu1 %vm10207_vm2, %v12329_v0 }
0x3ee6   :  { %v4178_v29 = vpack.c.bf16 %v4176_v24, %v4176_v24  ;;  %9303 = vmatprep.subr.bf16.mxu1 %v12329_v0 }
0x3ee8   :  { %9266 = vmatmul.mubr.msk.bf16.vlgmr.msra.gmra.mrb[80].mxu0 %vm183_vm4, %v4178_v29 }
0x3ee9   :  { %9276 = vmatpush3.bf16.msra.mxu0 %v11263_v21  ;;  %9279 = vmatprep.mubr.msk.bf16.mxu0 %vm10207_vm2, %v12329_v0 }
0x3eea   :  { %9277 = vmatprep.subr.bf16.mxu0 %v12329_v0  ;;  %9304 = vmatpush3.bf16.msra.mxu1 %v11269_v9 }
0x3eeb   :  { %9309 = vmatprep.subr.bf16.mxu1 %v12329_v0 }
0x3eed   :  { %9278 = vmatpush3.bf16.msra.mxu0 %v11276_v33 }
0x3eee   :  { %9283 = vmatprep.subr.bf16.mxu0 %v12329_v0 }
0x3fb7   :  { %v4260_v58 = vpop.f32.mrb[80].mxu1 }
0x3fb8   :  { %v9273_v62 = vpop.f32.mrb[81].mxu1  ;;  %v4270_v49 = vrot.slane %v4260_v58, 7 }
0x3fb9   :  { %v4263_v47 = vpop.f32.mrb[82].mxu1 }
0x3fba   :  { %v9274_v59 = vpop.f32.mrb[83].mxu1 }
0x3fbb   :  { %v4217_v39 = vpop.f32.mrb[80].mxu0 }
0x3fbc   :  { %v11281_v14 = vsel %vm874_vm9, %v4270_v49, %v4217_v39  ;;  %v9267_v40 = vpop.f32.mrb[81].mxu0 }
0x3fbd   :  { %v4220_v50 = vpop.f32.mrb[82].mxu0  ;;  %v4287_v44 = vsel %vm97_vm1, %v11281_v14, 0.0 }
0x3fbe   :  { %v9268_v36 = vpop.f32.mrb[83].mxu0  ;;  %4288 = vadd.xlane.f32.xlu1 %v4287_v44 }
0x404b   :  { %v4289_v48 = vpop.xlane.xlu1 %4288 }
0x404c   :  { %v4290_v45 = vadd.f32 %v4289_v48, %v4285_v8 }
0x404e   :  { %v4291_v3 = vmul.f32 0.03125, %v4290_v45 }
0x4050   :  { %v4294_v13 = vrot.slane %v4291_v3, 1  ;;  %v4292_v27 = vsub.f32 %v11244_v54, %v4291_v3  ;;  %v4297_v53 = vsub.f32 %v11233_v22, %v4291_v3  ;;  %v4299_v20 = vsub.f32 %v4217_v39, %v4291_v3 }
0x4052   :  { %v4301_v12 = vmul.f32 %v4292_v27, %v4292_v27  ;;  %v4298_v56 = vsub.f32 %v11235_v43, %v4294_v13  ;;  %v4300_v23 = vsub.f32 %v4260_v58, %v4294_v13  ;;  %v4305_v24 = vmul.f32 %v4297_v53, %v4297_v53  ;;  %v11309_v13 = vld [vmem:[%s12320_s1] ss:$0 sm:$0xff] }
0x4053   :  { %v4316_v62 = vmul.f32 %v4299_v20, %v4299_v20  ;;  %v4350_v43 = vpack.c.bf16 %v11106_v41, %v11106_v41 }
0x4054   :  { %v4302_v34 = vsel %vm81_vm0, %v4301_v12, 0.0  ;;  %v4306_v5 = vmul.f32 %v4298_v56, %v4298_v56  ;;  %v4317_v61 = vmul.f32 %v4300_v23, %v4300_v23 }
0x4055   :  { %4303 = vadd.xlane.f32.xlu0 %v4302_v34 }
0x4056   :  { %v4309_v29 = vrot.slane %v4306_v5, 7  ;;  %v4320_v47 = vrot.slane %v4317_v61, 7 }
0x4058   :  { %v4310_v49 = vsel %vm874_vm9, %v4309_v29, %v4305_v24  ;;  %v4321_v54 = vsel %vm874_vm9, %v4320_v47, %v4316_v62  ;;  %v11316_v24 = vld [vmem:[%s12320_s1 + $0x1] ss:$0 sm:$0xff] }
0x4059   :  { %v4312_v22 = vsel %vm97_vm1, %v4310_v49, 0.0  ;;  %v4323_v59 = vsel %vm97_vm1, %v4321_v54, 0.0 }
0x405a   :  { %4313 = vadd.xlane.f32.xlu1 %v4312_v22  ;;  %4324 = vadd.xlane.f32.xlu0 %v4323_v59 }
0x406b   :  { %4352 = vrot.lane.b32.xlu1 %v4350_v43, %s10201_s19 }
0x40e2   :  { %v4304_v58 = vpop.xlane.xlu0 %4303 }
0x40e7   :  { %v4314_v39 = vpop.xlane.xlu1 %4313  ;;  %v4325_v50 = vpop.xlane.xlu0 %4324 }
0x40e8   :  { %v4315_v40 = vadd.f32 %v4314_v39, %v4304_v58 }
0x40ea   :  { %v4326_v44 = vadd.f32 %v4325_v50, %v4315_v40 }
0x40eb   :  { %v4353_v36 = vpop.permute.xlu1 %4352 }
0x40ec   :  { %v4327_v35 = vmul.f32 0.03125, %v4326_v44  ;;  %9280 = vmatmul.mubr.msk.bf16.vlgmr.msra.gmra.mrb[84].mxu0 %vm133_vm7, %v4353_v36 }
0x40ed   :  { %9284 = vmatpush3.bf16.msra.mxu0 %v11300_v6  ;;  %9285 = vmatprep.mubr.msk.bf16.mxu0 %vm10207_vm2, %v12329_v0 }
0x40ee   :  { %v4328_v41 = vadd.f32 1e-05, %v4327_v35  ;;  %9289 = vmatprep.subr.bf16.mxu0 %v12329_v0 }
0x40f0   :  { %9896 = vrsqrt.f32 %v4328_v41 }
0x40fa   :  { %v9897_v8 = vpop.eup %9896 }
0x40fb   :  { %v4330_v48 = vmul.f32 %v9897_v8, %v4292_v27  ;;  %v4334_v45 = vrot.slane %v9897_v8, 1  ;;  %v4337_v3 = vmul.f32 %v9897_v8, %v4297_v53  ;;  %v4343_v54 = vmul.f32 %v9897_v8, %v4299_v20 }
0x40fd   :  { %v4331_v12 = vmul.f32 %v11309_v13, %v4330_v48  ;;  %v4338_v34 = vmul.f32 %v4334_v45, %v4298_v56  ;;  %v4339_v5 = vmul.f32 %v4337_v3, %v10604_v7  ;;  %v4344_v61 = vmul.f32 %v4334_v45, %v4300_v23 }
0x40fe   :  { %v4345_v39 = vmul.f32 %v4343_v54, %v10611_v16 }
0x40ff   :  { %v4332_v27 = vadd.f32 %v11316_v24, %v4331_v12  ;;  %v4340_v53 = vmul.f32 %v4338_v34, %v10604_v7  ;;  %v4341_v29 = vadd.f32 %v4339_v5, %v10602_v18  ;;  %v4346_v49 = vmul.f32 %v4344_v61, %v10611_v16  ;;  %v11344_v12 = vld [vmem:[%s12321_s2] ss:$0 sm:$0xff] }
0x4100   :  { %v4347_v44 = vadd.f32 %v4345_v39, %v10619_v32 }
0x4101   :  { %v4349_v62 = vpack.c.bf16 %v4332_v27, %v4332_v27  ;;  %v4342_v47 = vadd.f32 %v4340_v53, %v10602_v18  ;;  %v4441_v23 = vpack.c.bf16 %v4341_v29, %v4341_v29  ;;  %v4348_v59 = vadd.f32 %v4346_v49, %v10619_v32 }
0x4102   :  { %v4494_v20 = vpack.c.bf16 %v4347_v44, %v4347_v44 }
0x4103   :  { %9286 = vmatmul.mubr.msk.bf16.vlgmr.msra.gmra.mrb[84].mxu0 %vm183_vm4, %v4349_v62  ;;  %v4442_v56 = vpack.c.bf16 %v4342_v47, %v4342_v47  ;;  %v4445_v58 = vunpack.c.l.b16 %v4441_v23  ;;  %v4495_v50 = vpack.c.bf16 %v4348_v59, %v4348_v59 }
0x4104   :  { %9290 = vmatpush3.bf16.msra.mxu0 %v10339_v19  ;;  %9291 = vmatprep.mubr.msk.bf16.mxu0 %vm10207_vm2, %v12329_v0  ;;  %v4498_v8 = vunpack.c.l.b16 %v4494_v20 }
0x4105   :  { %9295 = vmatprep.subr.bf16.mxu0 %v12329_v0  ;;  %v4446_v22 = vunpack.c.l.b16 %v4442_v56  ;;  %v4499_v35 = vunpack.c.l.b16 %v4495_v50 }
0x4107   :  { %v4447_v43 = vrot.slane %v4446_v22, 7  ;;  %v4500_v41 = vrot.slane %v4499_v35, 7 }
0x4109   :  { %v4448_v40 = vsel %vm874_vm9, %v4447_v43, %v4445_v58  ;;  %v4501_v48 = vsel %vm874_vm9, %v4500_v41, %v4498_v8 }
0x410a   :  { %v4449_v36 = vpack.c.b16 %v4448_v40, %v4448_v40  ;;  %v4502_v45 = vpack.c.b16 %v4501_v48, %v4501_v48 }
0x410f   :  { %9292 = vmatmul.mubr.msk.bf16.vlgmr.msra.gmra.mrb[84].mxu0 %vm238_vm5, %v4449_v36 }
0x4110   :  { %9296 = vmatpush3.bf16.msra.mxu0 %v10366_v42  ;;  %9297 = vmatprep.mubr.msk.bf16.mxu0 %vm10207_vm2, %v12329_v0 }
0x4111   :  { %9327 = vmatprep.subr.bf16.mxu0 %v12329_v0 }
0x411b   :  { %9298 = vmatmul.mubr.msk.bf16.vlgmr.msra.gmra.mrb[84].mxu0 %vm238_vm5, %v4502_v45 }
0x411c   :  { %9329 = vmatprep.mubr.msk.bf16.mxu0 %vm10207_vm2, %v12329_v0 }
0x41ee   :  { %v4540_v3 = vpop.f32.mrb[84].mxu0 }
0x41ef   :  { %v9619_v34 = vadd.f32 %v11344_v12, %v4540_v3  ;;  %v9299_v5 = vpop.f32.mrb[85].mxu0 }
0x41f0   :  { %v4543_v61 = vpop.f32.mrb[86].mxu0 }
0x41f1   :  { %9898 = vtanh.f32 %v9619_v34  ;;  %v9300_v27 = vpop.f32.mrb[87].mxu0  ;;  %v4547_v29 = vmul.f32 0.5, %v9619_v34 }
0x41f3   :  { %9900 = vtanh.f32 %v4547_v29 }
0x41fb   :  { %v9899_v53 = vpop.eup %9898 }
0x41fc   :  { %4554 = vrot.lane.b32.xlu0 %v9899_v53, %s10204_s0 }
0x41fd   :  { %v9901_v62 = vpop.eup %9900 }
0x41fe   :  { %v4549_v47 = vmul.f32 0.5, %v9901_v62  ;;  %v11375_v62 = vld [vmem:[%s12321_s2 + $0x1] ss:$0 sm:$0xff] }
0x4200   :  { %v4550_v49 = vadd.f32 0.5, %v4549_v47 }
0x4202   :  { %v4552_v54 = vmul.f32 %v4550_v49, %v11102_v1 }
0x426e   :  { %v4555_v56 = vpop.permute.xlu0 %4554 }
0x426f   :  { %v4557_v23 = vmul.f32 %v4555_v56, %v4550_v49 }
0x4271   :  { %4559 = vrot.lane.b32.xlu1 %v4557_v23, %s10201_s19 }
0x42e3   :  { %v4560_v22 = vpop.permute.xlu1 %4559 }
0x42e4   :  { %v11350_v59 = vadd.f32 %v4560_v22, %v4552_v54 }
0x42e6   :  { %9902 = vtanh.f32 %v11350_v59 }
0x42f0   :  { %v9903_v43 = vpop.eup %9902 }
0x42f1   :  { %4565 = vrot.lane.b32.xlu1 %v9903_v43, %s10204_s0 }
0x4363   :  { %v4566_v58 = vpop.permute.xlu1 %4565 }
0x4364   :  { %v11354_v39 = vmul.f32 %v4566_v58, %v4550_v49 }
0x4366   :  { %4570 = vrot.lane.b32.xlu0 %v11354_v39, %s10201_s19 }
0x43d8   :  { %v4571_v40 = vpop.permute.xlu0 %4570 }
0x43d9   :  { %v4573_v50 = vsel %vm362_vm6, %v4571_v40, 0.0 }
0x43da   :  { %4574 = vadd.xlane.f32.xlu1 %v4573_v50 }
0x4467   :  { %v4575_v44 = vpop.xlane.xlu1 %4574 }
0x4468   :  { %v4576_v1 = vmul.f32 0.03125, %v4575_v44 }
0x446a   :  { %v4577_v36 = vsub.f32 %v11354_v39, %v4576_v1 }
0x446c   :  { %v4578_v35 = vmul.f32 %v4577_v36, %v4577_v36 }
0x446e   :  { %4580 = vrot.lane.b32.xlu0 %v4578_v35, %s10201_s19 }
0x44e0   :  { %v4581_v20 = vpop.permute.xlu0 %4580 }
0x44e1   :  { %v4583_v41 = vsel %vm362_vm6, %v4581_v20, 0.0 }
0x44e2   :  { %4584 = vadd.xlane.f32.xlu0 %v4583_v41 }
0x456f   :  { %v4585_v8 = vpop.xlane.xlu0 %4584 }
0x4570   :  { %v4586_v48 = vmul.f32 0.03125, %v4585_v8 }
0x4572   :  { %v4587_v45 = vadd.f32 1e-05, %v4586_v48 }
0x4574   :  { %9904 = vrsqrt.f32 %v4587_v45 }
0x457e   :  { %v9905_v3 = vpop.eup %9904 }
0x457f   :  { %v4589_v34 = vmul.f32 %v9905_v3, %v4577_v36 }
0x4581   :  { %v4590_v5 = vmul.f32 %v4589_v34, %v10408_v25 }
0x4583   :  { %v11364_v61 = vadd.f32 %v4590_v5, %v10410_v28 }
0x4585   :  { %v4592_v27 = vpack.c.bf16 %v11364_v61, %v11364_v61 }
0x4587   :  { %4594 = vrot.lane.b32.xlu1 %v4592_v27, %s10201_s19 }
0x45f9   :  { %v4595_v53 = vpop.permute.xlu1 %4594 }
0x45fa   :  { %9306 = vmatmul.mubr.msk.bf16.vlgmr.msra.gmra.mrb[84].mxu1 %vm133_vm7, %v4595_v53 }
0x45fb   :  { %9311 = vmatprep.mubr.msk.bf16.mxu1 %vm10207_vm2, %v12329_v0 }
0x46cd   :  { %v4633_v29 = vpop.f32.mrb[84].mxu1 }
0x46ce   :  { %v11378_v47 = vadd.f32 %v11375_v62, %v4633_v29  ;;  %v9307_v49 = vpop.f32.mrb[85].mxu1 }
0x46cf   :  { %v4636_v56 = vpop.f32.mrb[86].mxu1 }
0x46d0   :  { %v9308_v23 = vpop.f32.mrb[87].mxu1  ;;  %v4639_v54 = vmul.f32 0.5, %v11378_v47 }
0x46d2   :  { %9906 = vtanh.f32 %v4639_v54 }
0x46d3   :  { %9908 = vtanh.f32 %v11378_v47 }
0x46dc   :  { %v9907_v22 = vpop.eup %9906 }
0x46dd   :  { %v4641_v43 = vmul.f32 0.5, %v9907_v22  ;;  %v9909_v40 = vpop.eup %9908 }
0x46df   :  { %v4642_v58 = vadd.f32 0.5, %v4641_v43 }
0x46e1   :  { %4646 = vperm.xlu0 %9735, %v4642_v58  }
0x4760   :  { %v4647_v50 = vpop.permute.xlu0 %4646 }
0x4761   :  { %v4691_v44 = vmul.f32 %v9909_v40, %v4647_v50  ;;  %v4649_v48 = vmul.f32 %v4647_v50, %v4642_v58 }
0x4763   :  { %v4699_v1 = vrot.slane %v4691_v44, %v10432_v52  ;;  %v4657_v45 = vrot.slane %v4649_v48, %v10432_v52 }
0x4765   :  { %v4700_v36 = vcombine.high %v4699_v1, %v4699_v1  ;;  %v4707_v35 = vrot.slane %v4699_v1, %v10432_v52  ;;  %v4658_v3 = vcombine.high %v4657_v45, %v4657_v45  ;;  %v4665_v34 = vrot.slane %v4657_v45, %v10432_v52 }
0x4766   :  { %v4786_v45 = vsel %vm97_vm1, %v11378_v47, 0.0 }
0x4767   :  { %v4718_v20 = vrot.slane %v4707_v35, %v10435_v57  ;;  %v4714_v41 = vrot.slane %v4700_v36, %v10432_v52  ;;  %v4675_v5 = vsub.f32 1.0, %v4665_v34  ;;  %v4672_v27 = vrot.slane %v4658_v3, %v10432_v52 }
0x4769   :  { %4723 = vrot.lane.b32.xlu1 %v4718_v20, %s10213_s14  ;;  %v4722_v8 = vrot.slane %v4714_v41, %v10435_v57  ;;  %v4682_v53 = vrot.slane %v4675_v5, %v10435_v57  ;;  %v4676_v29 = vsub.f32 1.0, %v4672_v27 }
0x476b   :  { %v4689_v49 = vmul.f32 %v4682_v53, %v11142_v55  ;;  %v4686_v56 = vrot.slane %v4676_v29, %v10435_v57 }
0x476d   :  { %4725 = vrot.lane.b32.xlu1 %v4722_v8, %s10213_s14  ;;  %v4690_v22 = vmul.f32 %v4686_v56, %v11147_v17 }
0x47db   :  { %v4724_v23 = vpop.permute.xlu1 %4723 }
0x47dc   :  { %v11395_v54 = vadd.f32 %v4724_v23, %v4689_v49 }
0x47de   :  { %4733 = vrot.lane.b32.xlu0 %v11395_v54, %s10210_s28 }
0x47df   :  { %v4726_v43 = vpop.permute.xlu1 %4725 }
0x47e0   :  { %v11400_v58 = vadd.f32 %v4726_v43, %v4690_v22 }
0x47e2   :  { %4735 = vrot.lane.b32.xlu1 %v11400_v58, %s10210_s28 }
0x4850   :  { %v4734_v40 = vpop.permute.xlu0 %4733 }
0x4851   :  { %v4739_v50 = vsel %vm238_vm5, %v4734_v40, 0.0 }
0x4852   :  { %4740 = vadd.xlane.f32.xlu0 %v4739_v50 }
0x4854   :  { %v4736_v55 = vpop.permute.xlu1 %4735 }
0x4855   :  { %v4742_v44 = vsel %vm238_vm5, %v4736_v55, 0.0 }
0x4856   :  { %4743 = vadd.xlane.f32.xlu1 %v4742_v44 }
0x48df   :  { %v4741_v1 = vpop.xlane.xlu0 %4740 }
0x48e0   :  { %v4745_v36 = vmul.f32 0.125, %v4741_v1 }
0x48e2   :  { %v4747_v35 = vsub.f32 %v11395_v54, %v4745_v36 }
0x48e3   :  { %v4744_v20 = vpop.xlane.xlu1 %4743 }
0x48e4   :  { %v4749_v17 = vmul.f32 %v4747_v35, %v4747_v35  ;;  %v4746_v41 = vmul.f32 0.125, %v4744_v20 }
0x48e6   :  { %v4748_v8 = vsub.f32 %v11400_v58, %v4746_v41  ;;  %4753 = vrot.lane.b32.xlu0 %v4749_v17, %s10210_s28 }
0x48e8   :  { %v4750_v48 = vmul.f32 %v4748_v8, %v4748_v8 }
0x48ea   :  { %4755 = vrot.lane.b32.xlu1 %v4750_v48, %s10210_s28 }
0x4905   :  { %4787 = vadd.xlane.f32.xlu0 %v4786_v45 }
0x4958   :  { %v4754_v3 = vpop.permute.xlu0 %4753 }
0x4959   :  { %v4759_v34 = vsel %vm238_vm5, %v4754_v3, 0.0 }
0x495a   :  { %4760 = vadd.xlane.f32.xlu1 %v4759_v34 }
0x495c   :  { %v4756_v5 = vpop.permute.xlu1 %4755 }
0x495d   :  { %v4762_v27 = vsel %vm238_vm5, %v4756_v5, 0.0 }
0x495e   :  { %4763 = vadd.xlane.f32.xlu0 %v4762_v27 }
0x4992   :  { %v4788_v53 = vpop.xlane.xlu0 %4787 }
0x4993   :  { %v4789_v29 = vmul.f32 0.125, %v4788_v53 }
0x4995   :  { %v4790_v49 = vsub.f32 %v11378_v47, %v4789_v29 }
0x4997   :  { %v4791_v56 = vmul.f32 %v4790_v49, %v4790_v49 }
0x4999   :  { %v4792_v23 = vsel %vm97_vm1, %v4791_v56, 0.0 }
0x499a   :  { %4793 = vadd.xlane.f32.xlu0 %v4792_v23 }
0x49e7   :  { %v4761_v22 = vpop.xlane.xlu1 %4760 }
0x49e8   :  { %v4765_v43 = vmul.f32 0.125, %v4761_v22 }
0x49ea   :  { %v4767_v40 = vadd.f32 1e-05, %v4765_v43 }
0x49eb   :  { %v4764_v50 = vpop.xlane.xlu0 %4763 }
0x49ec   :  { %9910 = vrsqrt.f32 %v4767_v40  ;;  %v4766_v55 = vmul.f32 0.125, %v4764_v50 }
0x49ee   :  { %v4768_v44 = vadd.f32 1e-05, %v4766_v55 }
0x49f0   :  { %9912 = vrsqrt.f32 %v4768_v44 }
0x49f6   :  { %v9911_v1 = vpop.eup %9910 }
0x49f7   :  { %v4771_v36 = vmul.f32 %v9911_v1, %v4747_v35 }
0x49f9   :  { %v4773_v20 = vmul.f32 %v4771_v36, %v10470_v63 }
0x49fa   :  { %v9913_v17 = vpop.eup %9912 }
0x49fb   :  { %v4775_v41 = vadd.f32 %v4773_v20, %v10472_v2  ;;  %v4772_v48 = vmul.f32 %v9913_v17, %v4748_v8 }
0x49fd   :  { %v4777_v45 = vpack.c.bf16 %v4775_v41, %v4775_v41  ;;  %v4774_v3 = vmul.f32 %v4772_v48, %v10470_v63 }
0x49ff   :  { %4829 = vrot.lane.b32.xlu1 %v4777_v45, %s10210_s28  ;;  %v4776_v34 = vadd.f32 %v4774_v3, %v10472_v2 }
0x4a01   :  { %v4778_v5 = vpack.c.bf16 %v4776_v34, %v4776_v34 }
0x4a03   :  { %4878 = vrot.lane.b32.xlu0 %v4778_v5, %s10210_s28  ;;  %5055 = vrot.lane.b32.xlu1 %v11378_v47, %s10213_s14 }
0x4a27   :  { %v4794_v35 = vpop.xlane.xlu0 %4793 }
0x4a28   :  { %v4795_v27 = vmul.f32 0.125, %v4794_v35 }
0x4a2a   :  { %v4796_v53 = vadd.f32 1e-05, %v4795_v27 }
0x4a2c   :  { %9914 = vrsqrt.f32 %v4796_v53 }
0x4a36   :  { %v9915_v29 = vpop.eup %9914 }
0x4a37   :  { %v4798_v56 = vmul.f32 %v9915_v29, %v4790_v49 }
0x4a39   :  { %v4799_v8 = vmul.f32 %v4798_v56, %v10408_v25 }
0x4a3b   :  { %v4800_v23 = vadd.f32 %v4799_v8, %v10410_v28 }
0x4a3d   :  { %v4808_v22 = vrot.slane %v4800_v23, %v10432_v52 }
0x4a3f   :  { %v4816_v50 = vrot.slane %v4808_v22, %v10432_v52  ;;  %v4809_v36 = vcombine.high %v4808_v22, %v4808_v22 }
0x4a41   :  { %v4826_v1 = vpack.c.bf16 %v4816_v50, %v4816_v50  ;;  %v4823_v17 = vrot.slane %v4809_v36, %v10432_v52 }
0x4a43   :  { %v4827_v41 = vpack.c.bf16 %v4823_v17, %v4823_v17 }
0x4a71   :  { %v4830_v43 = vpop.permute.xlu1 %4829 }
0x4a72   :  { %v11428_v40 = vsel %vm238_vm5, %v4830_v43, 0 }
0x4a73   :  { %9310 = vmatpush3.bf16.xpose.msra.mxu1 %v11428_v40 }
0x4a74   :  { %9315 = vmatprep.subr.bf16.mxu1 %v12329_v0 }
0x4a75   :  { %v5056_v55 = vpop.permute.xlu1 %5055  ;;  %v4879_v49 = vpop.permute.xlu0 %4878 }
0x4a76   :  { %v5058_v44 = vsel %vm97_vm1, %v5056_v55, 0.0  ;;  %v11435_v20 = vsel %vm238_vm5, %v4879_v49, 0 }
0x4a77   :  { %5059 = vadd.xlane.f32.xlu1 %v5058_v44 }
0x4a7a   :  { %9312 = vmatmul.mubr.msk.bf16.vlgmr.msra.gmra.mrb[88].mxu1 %vm238_vm5, %v4826_v1 }
0x4a7b   :  { %9316 = vmatpush3.bf16.xpose.msra.mxu1 %v11435_v20  ;;  %9317 = vmatprep.mubr.msk.bf16.mxu1 %vm10207_vm2, %v12329_v0 }
0x4a7c   :  { %9321 = vmatprep.subr.bf16.mxu1 %v12329_v0 }
0x4a82   :  { %9318 = vmatmul.mubr.msk.bf16.vlgmr.msra.gmra.mrb[92].mxu1 %vm238_vm5, %v4827_v41 }
0x4a83   :  { %9323 = vmatprep.mubr.msk.bf16.mxu1 %vm10207_vm2, %v12329_v0 }
0x4b04   :  { %v5060_v48 = vpop.xlane.xlu1 %5059 }
0x4b05   :  { %v5061_v45 = vmul.f32 0.125, %v5060_v48 }
0x4b07   :  { %v5062_v3 = vsub.f32 %v11378_v47, %v5061_v45  ;;  %v4780_v47 = vpack.c.bf16 %v11400_v58, %v11400_v58 }
0x4b09   :  { %v5063_v34 = vmul.f32 %v5062_v3, %v5062_v3 }
0x4b0b   :  { %5065 = vrot.lane.b32.xlu0 %v5063_v34, %s10213_s14 }
0x4b4d   :  { %v4871_v5 = vpop.f32.mrb[88].mxu1 }
0x4b4e   :  { %v9313_v35 = vpop.f32.mrb[89].mxu1  ;;  %v4926_v27 = vsel %vm750_vm8, %v4871_v5, -inf }
0x4b4f   :  { %4927 = vmax.xlane.f32.xlu1 %v4926_v27  ;;  %v4874_v53 = vpop.f32.mrb[90].mxu1 }
0x4b50   :  { %v9314_v29 = vpop.f32.mrb[91].mxu1 }
0x4b55   :  { %v4920_v56 = vpop.f32.mrb[92].mxu1 }
0x4b56   :  { %v9319_v8 = vpop.f32.mrb[93].mxu1  ;;  %v4929_v23 = vsel %vm750_vm8, %v4920_v56, -inf }
0x4b57   :  { %4930 = vmax.xlane.f32.xlu0 %v4929_v23  ;;  %v4923_v22 = vpop.f32.mrb[94].mxu1 }
0x4b58   :  { %v9320_v43 = vpop.f32.mrb[95].mxu1 }
0x4b60   :  { %4998 = vrot.lane.b32.xlu1 %v4780_v47, %s10210_s28 }
0x4b7d   :  { %v5066_v50 = vpop.permute.xlu0 %5065 }
0x4b7e   :  { %v5068_v55 = vsel %vm97_vm1, %v5066_v50, 0.0 }
0x4b7f   :  { %5069 = vadd.xlane.f32.xlu0 %v5068_v55 }
0x4bdc   :  { %v4928_v44 = vpop.xlane.xlu1 %4927 }
0x4bdd   :  { %v4932_v49 = vsub.f32 %v4871_v5, %v4928_v44  ;;  %v4779_v5 = vpack.c.bf16 %v11395_v54, %v11395_v54 }
0x4bdf   :  { %v4934_v1 = vmul.f32 1.442695, %v4932_v49 }
0x4be0   :  { %v4999_v36 = vpop.permute.xlu1 %4998 }
0x4be1   :  { %9916 = vpow2.f32 %v4934_v1  ;;  %9328 = vmatpush3.bf16.msra.mxu0 %v4999_v36 }
0x4be2   :  { %9339 = vmatprep.subr.bf16.mxu0 %v12329_v0 }
0x4be4   :  { %v4931_v17 = vpop.xlane.xlu0 %4930 }
0x4be5   :  { %v4933_v41 = vsub.f32 %v4920_v56, %v4931_v17 }
0x4be7   :  { %v4936_v48 = vmul.f32 1.442695, %v4933_v41 }
0x4be9   :  { %9918 = vpow2.f32 %v4936_v48 }
0x4beb   :  { %v9917_v45 = vpop.eup %9916 }
0x4bec   :  { %v4938_v34 = vsel %vm750_vm8, %v9917_v45, 0.0 }
0x4bed   :  { %4939 = vadd.xlane.f32.xlu0 %v4938_v34 }
0x4bf3   :  { %v9919_v35 = vpop.eup %9918 }
0x4bf4   :  { %v4941_v27 = vsel %vm750_vm8, %v9919_v35, 0.0 }
0x4bf5   :  { %4942 = vadd.xlane.f32.xlu1 %v4941_v27 }
0x4c03   :  { %4951 = vrot.lane.b32.xlu0 %v4779_v5, %s10210_s28 }
0x4c0c   :  { %v5070_v53 = vpop.xlane.xlu0 %5069 }
0x4c0d   :  { %v5071_v29 = vmul.f32 0.125, %v5070_v53 }
0x4c0f   :  { %v5072_v8 = vadd.f32 1e-05, %v5071_v29 }
0x4c11   :  { %9920 = vrsqrt.f32 %v5072_v8 }
0x4c1b   :  { %v9921_v56 = vpop.eup %9920 }
0x4c1c   :  { %v5074_v23 = vmul.f32 %v9921_v56, %v5062_v3 }
0x4c1e   :  { %v5075_v22 = vmul.f32 %v5074_v23, %v10470_v63 }
0x4c20   :  { %v5076_v43 = vadd.f32 %v5075_v22, %v10472_v2 }
0x4c22   :  { %v5084_v47 = vrot.slane %v5076_v43, %v10432_v52 }
0x4c24   :  { %v5085_v50 = vcombine.high %v5084_v47, %v5084_v47  ;;  %v5092_v49 = vrot.slane %v5084_v47, %v10432_v52 }
0x4c26   :  { %v5099_v55 = vrot.slane %v5085_v50, %v10432_v52  ;;  %v5102_v1 = vpack.c.bf16 %v5092_v49, %v5092_v49 }
0x4c28   :  { %v5103_v44 = vpack.c.bf16 %v5099_v55, %v5099_v55 }
0x4c2a   :  { %5151 = vrot.lane.b32.xlu1 %v5103_v44, %s10213_s14 }
0x4c2e   :  { %5105 = vrot.lane.b32.xlu1 %v5102_v1, %s10213_s14 }
0x4c7a   :  { %v4940_v17 = vpop.xlane.xlu0 %4939 }
0x4c7b   :  { %9922 = vrcp.f32 %v4940_v17 }
0x4c7e   :  { %v4952_v3 = vpop.permute.xlu0 %4951 }
0x4c7f   :  { %9322 = vmatpush3.bf16.msra.mxu1 %v4952_v3 }
0x4c80   :  { %9333 = vmatprep.subr.bf16.mxu1 %v12329_v0 }
0x4c82   :  { %v4943_v41 = vpop.xlane.xlu1 %4942 }
0x4c83   :  { %9924 = vrcp.f32 %v4943_v41 }
0x4c85   :  { %v9923_v48 = vpop.eup %9922 }
0x4c86   :  { %v4946_v34 = vmul.f32 %v9923_v48, %v9917_v45 }
0x4c88   :  { %v4948_v27 = vpack.c.bf16 %v4946_v34, %v4946_v34 }
0x4c8a   :  { %9324 = vmatmul.mubr.msk.bf16.vlgmr.msra.gmra.mrb[96].mxu1 %vm183_vm4, %v4948_v27 }
0x4c8b   :  { %9334 = vmatpush3.bf16.xpose.msra.mxu1 %v11428_v40  ;;  %9335 = vmatprep.mubr.msk.bf16.mxu1 %vm10207_vm2, %v12329_v0 }
0x4c8c   :  { %9345 = vmatprep.subr.bf16.mxu1 %v12329_v0 }
0x4c8d   :  { %v9925_v5 = vpop.eup %9924 }
0x4c8e   :  { %v4947_v53 = vmul.f32 %v9925_v5, %v9919_v35  ;;  %v5317_v5 = vld [vmem:[#allocation3 + $0xa] sm:$0x3] }
0x4c90   :  { %v4949_v29 = vpack.c.bf16 %v4947_v53, %v4947_v53  ;;  %v5318_v53 = vsel %vm81_vm0, %v5317_v5, 0.0 }
0x4c92   :  { %9330 = vmatmul.mubr.msk.bf16.vlgmr.msra.gmra.mrb[88].mxu0 %vm183_vm4, %v4949_v29 }
0x4c93   :  { %9340 = vmatpush3.bf16.xpose.msra.mxu0 %v11435_v20  ;;  %9341 = vmatprep.mubr.msk.bf16.mxu0 %vm10207_vm2, %v12329_v0 }
0x4c94   :  { %9351 = vmatprep.subr.bf16.mxu0 %v12329_v0 }
0x4c9c   :  { %v5152_v45 = vpop.permute.xlu1 %5151 }
0x4c9d   :  { %9342 = vmatmul.mubr.msk.bf16.vlgmr.msra.gmra.mrb[92].mxu0 %vm238_vm5, %v5152_v45 }
0x4c9e   :  { %9352 = vmatpush3.bf16.msra.mxu0 %v4999_v36  ;;  %9353 = vmatprep.mubr.msk.bf16.mxu0 %vm10207_vm2, %v12329_v0 }
0x4c9f   :  { %9383 = vmatprep.subr.bf16.mxu0 %v12329_v0 }
0x4ca0   :  { %v5106_v40 = vpop.permute.xlu1 %5105 }
0x4ca1   :  { %9336 = vmatmul.mubr.msk.bf16.vlgmr.msra.gmra.mrb[100].mxu1 %vm238_vm5, %v5106_v40 }
0x4ca2   :  { %9346 = vmatpush3.bf16.msra.mxu1 %v4952_v3  ;;  %9347 = vmatprep.mubr.msk.bf16.mxu1 %vm10207_vm2, %v12329_v0 }
0x4ca3   :  { %9357 = vmatprep.subr.bf16.mxu1 %v12329_v0 }
0x4d5d   :  { %v11486_v20 = vpop.f32.mrb[96].mxu1 }
0x4d5e   :  { %v9325_v35 = vpop.f32.mrb[97].mxu1 }
0x4d5f   :  { %v4994_v8 = vpop.f32.mrb[98].mxu1 }
0x4d60   :  { %v9326_v56 = vpop.f32.mrb[99].mxu1 }
0x4d65   :  { %v11488_v36 = vpop.f32.mrb[88].mxu0 }
0x4d66   :  { %v5048_v23 = vrot.slane %v11488_v36, 7  ;;  %v9331_v22 = vpop.f32.mrb[89].mxu0 }
0x4d67   :  { %v5041_v43 = vpop.f32.mrb[90].mxu0 }
0x4d68   :  { %v9332_v47 = vpop.f32.mrb[91].mxu0  ;;  %v11493_v50 = vsel %vm874_vm9, %v5048_v23, %v11486_v20 }
0x4d70   :  { %v5190_v55 = vpop.f32.mrb[92].mxu0 }
0x4d71   :  { %v9343_v44 = vpop.f32.mrb[93].mxu0  ;;  %v5199_v49 = vsel %vm750_vm8, %v5190_v55, -inf }
0x4d72   :  { %5200 = vmax.xlane.f32.xlu0 %v5199_v49  ;;  %v5193_v1 = vpop.f32.mrb[94].mxu0  ;;  %v5322_v44 = vsel %vm97_vm1, %v11493_v50, 0.0 }
0x4d73   :  { %v9344_v17 = vpop.f32.mrb[95].mxu0 }
0x4d74   :  { %v5144_v3 = vpop.f32.mrb[100].mxu1 }
0x4d75   :  { %v9337_v41 = vpop.f32.mrb[101].mxu1  ;;  %v5196_v48 = vsel %vm750_vm8, %v5144_v3, -inf }
0x4d76   :  { %5197 = vmax.xlane.f32.xlu1 %v5196_v48  ;;  %v5147_v34 = vpop.f32.mrb[102].mxu1 }
0x4d77   :  { %v9338_v27 = vpop.f32.mrb[103].mxu1 }
0x4d7a   :  { %5319 = vadd.xlane.f32.xlu1 %v5318_v53 }
0x4dff   :  { %v5201_v29 = vpop.xlane.xlu0 %5200 }
0x4e00   :  { %v5203_v45 = vsub.f32 %v5190_v55, %v5201_v29 }
0x4e02   :  { %v5206_v40 = vmul.f32 1.442695, %v5203_v45 }
0x4e03   :  { %v5198_v35 = vpop.xlane.xlu1 %5197 }
0x4e04   :  { %9926 = vpow2.f32 %v5206_v40  ;;  %v5202_v8 = vsub.f32 %v5144_v3, %v5198_v35 }
0x4e06   :  { %v5204_v56 = vmul.f32 1.442695, %v5202_v8 }
0x4e08   :  { %9928 = vpow2.f32 %v5204_v56 }
0x4e0e   :  { %v9927_v23 = vpop.eup %9926 }
0x4e0f   :  { %v5211_v22 = vsel %vm750_vm8, %v9927_v23, 0.0 }
0x4e10   :  { %5212 = vadd.xlane.f32.xlu0 %v5211_v22 }
0x4e12   :  { %v9929_v43 = vpop.eup %9928 }
0x4e13   :  { %v5208_v47 = vsel %vm750_vm8, %v9929_v43, 0.0 }
0x4e14   :  { %5209 = vadd.xlane.f32.xlu0 %v5208_v47 }
0x4e18   :  { %5323 = vadd.xlane.f32.xlu0 %v5322_v44 }
0x4e9d   :  { %v5213_v49 = vpop.xlane.xlu0 %5212 }
0x4e9e   :  { %9930 = vrcp.f32 %v5213_v49 }
0x4ea1   :  { %v5210_v55 = vpop.xlane.xlu0 %5209 }
0x4ea2   :  { %9932 = vrcp.f32 %v5210_v55 }
0x4ea8   :  { %v9931_v1 = vpop.eup %9930 }
0x4ea9   :  { %v5217_v17 = vmul.f32 %v9931_v1, %v9927_v23  ;;  %v5324_v23 = vpop.xlane.xlu0 %5323 }
0x4eab   :  { %v5219_v3 = vpack.c.bf16 %v5217_v17, %v5217_v17 }
0x4eac   :  { %v9933_v41 = vpop.eup %9932 }
0x4ead   :  { %9354 = vmatmul.mubr.msk.bf16.vlgmr.msra.gmra.mrb[96].mxu0 %vm183_vm4, %v5219_v3  ;;  %v5216_v48 = vmul.f32 %v9933_v41, %v9929_v43 }
0x4eae   :  { %9384 = vmatpush3.bf16.msra.mxu0 %v11253_v51  ;;  %9387 = vmatprep.mubr.msk.bf16.mxu0 %vm10207_vm2, %v12329_v0 }
0x4eaf   :  { %v5218_v34 = vpack.c.bf16 %v5216_v48, %v5216_v48  ;;  %9385 = vmatprep.subr.bf16.mxu0 %v12329_v0 }
0x4eb1   :  { %9348 = vmatmul.mubr.msk.bf16.vlgmr.msra.gmra.mrb[104].mxu1 %vm183_vm4, %v5218_v34 }
0x4eb2   :  { %9358 = vmatpush3.bf16.msra.mxu1 %v11263_v21  ;;  %9361 = vmatprep.mubr.msk.bf16.mxu1 %vm10207_vm2, %v12329_v0 }
0x4eb3   :  { %9359 = vmatprep.subr.bf16.mxu1 %v12329_v0  ;;  %9386 = vmatpush3.bf16.msra.mxu0 %v11269_v9 }
0x4eb4   :  { %9391 = vmatprep.subr.bf16.mxu0 %v12329_v0 }
0x4eb6   :  { %9360 = vmatpush3.bf16.msra.mxu1 %v11276_v33  ;;  %v5320_v33 = vpop.xlane.xlu1 %5319 }
0x4eb7   :  { %9365 = vmatprep.subr.bf16.mxu1 %v12329_v0  ;;  %v5325_v22 = vadd.f32 %v5324_v23, %v5320_v33 }
0x4f80   :  { %v5300_v51 = vpop.f32.mrb[96].mxu0 }
0x4f81   :  { %v9355_v27 = vpop.f32.mrb[97].mxu0  ;;  %v5310_v29 = vrot.slane %v5300_v51, 7 }
0x4f82   :  { %v5303_v53 = vpop.f32.mrb[98].mxu0 }
0x4f83   :  { %v9356_v45 = vpop.f32.mrb[99].mxu0 }
0x4f84   :  { %v5257_v40 = vpop.f32.mrb[104].mxu1 }
0x4f85   :  { %v11517_v21 = vsel %vm874_vm9, %v5310_v29, %v5257_v40  ;;  %v9349_v35 = vpop.f32.mrb[105].mxu1 }
0x4f86   :  { %v5260_v8 = vpop.f32.mrb[106].mxu1  ;;  %v5327_v9 = vsel %vm97_vm1, %v11517_v21, 0.0 }
0x4f87   :  { %5328 = vadd.xlane.f32.xlu1 %v5327_v9  ;;  %v9350_v56 = vpop.f32.mrb[107].mxu1 }
0x5014   :  { %v5329_v43 = vpop.xlane.xlu1 %5328 }
0x5015   :  { %v5330_v47 = vadd.f32 %v5329_v43, %v5325_v22 }
0x5017   :  { %v5331_v44 = vmul.f32 0.03125, %v5330_v47 }
0x5019   :  { %v5334_v49 = vrot.slane %v5331_v44, 1  ;;  %v5332_v55 = vsub.f32 %v5317_v5, %v5331_v44  ;;  %v5337_v1 = vsub.f32 %v11486_v20, %v5331_v44  ;;  %v5339_v41 = vsub.f32 %v5257_v40, %v5331_v44 }
0x501b   :  { %v5341_v17 = vmul.f32 %v5332_v55, %v5332_v55  ;;  %v5338_v3 = vsub.f32 %v11488_v36, %v5334_v49  ;;  %v5340_v48 = vsub.f32 %v5300_v51, %v5334_v49  ;;  %v5345_v29 = vmul.f32 %v5337_v1, %v5337_v1 }
0x501c   :  { %v5356_v35 = vmul.f32 %v5339_v41, %v5339_v41  ;;  %v5390_v36 = vpack.c.bf16 %v11354_v39, %v11354_v39 }
0x501d   :  { %v5342_v34 = vsel %vm81_vm0, %v5341_v17, 0.0  ;;  %v5346_v27 = vmul.f32 %v5338_v3, %v5338_v3  ;;  %v5357_v53 = vmul.f32 %v5340_v48, %v5340_v48 }
0x501e   :  { %5343 = vadd.xlane.f32.xlu0 %v5342_v34 }
0x501f   :  { %v5349_v45 = vrot.slane %v5346_v27, 7  ;;  %v5360_v8 = vrot.slane %v5357_v53, 7 }
0x5021   :  { %v5350_v9 = vsel %vm874_vm9, %v5349_v45, %v5345_v29  ;;  %v5361_v5 = vsel %vm874_vm9, %v5360_v8, %v5356_v35 }
0x5022   :  { %v5352_v20 = vsel %vm97_vm1, %v5350_v9, 0.0  ;;  %v5363_v56 = vsel %vm97_vm1, %v5361_v5, 0.0 }
0x5023   :  { %5353 = vadd.xlane.f32.xlu1 %v5352_v20  ;;  %5364 = vadd.xlane.f32.xlu0 %v5363_v56 }
0x5034   :  { %5392 = vrot.lane.b32.xlu1 %v5390_v36, %s10201_s19 }
0x50ab   :  { %v5344_v51 = vpop.xlane.xlu0 %5343 }
0x50b0   :  { %v5354_v40 = vpop.xlane.xlu1 %5353  ;;  %v5365_v33 = vpop.xlane.xlu0 %5364 }
0x50b1   :  { %v5355_v23 = vadd.f32 %v5354_v40, %v5344_v51 }
0x50b3   :  { %v5366_v22 = vadd.f32 %v5365_v33, %v5355_v23 }
0x50b4   :  { %v5393_v43 = vpop.permute.xlu1 %5392 }
0x50b5   :  { %v5367_v47 = vmul.f32 0.03125, %v5366_v22  ;;  %9362 = vmatmul.mubr.msk.bf16.vlgmr.msra.gmra.mrb[108].mxu1 %vm133_vm7, %v5393_v43 }
0x50b6   :  { %9366 = vmatpush3.bf16.msra.mxu1 %v11300_v6  ;;  %9367 = vmatprep.mubr.msk.bf16.mxu1 %vm10207_vm2, %v12329_v0 }
0x50b7   :  { %v5368_v44 = vadd.f32 1e-05, %v5367_v47  ;;  %9371 = vmatprep.subr.bf16.mxu1 %v12329_v0 }
0x50b9   :  { %9934 = vrsqrt.f32 %v5368_v44 }
0x50c3   :  { %v9935_v39 = vpop.eup %9934 }
0x50c4   :  { %v5370_v49 = vmul.f32 %v9935_v39, %v5332_v55  ;;  %v5374_v17 = vrot.slane %v9935_v39, 1  ;;  %v5377_v34 = vmul.f32 %v9935_v39, %v5337_v1  ;;  %v5383_v1 = vmul.f32 %v9935_v39, %v5339_v41 }
0x50c6   :  { %v5371_v27 = vmul.f32 %v11309_v13, %v5370_v49  ;;  %v5378_v53 = vmul.f32 %v5374_v17, %v5338_v3  ;;  %v5379_v29 = vmul.f32 %v5377_v34, %v10604_v7  ;;  %v5384_v45 = vmul.f32 %v5374_v17, %v5340_v48 }
0x50c7   :  { %v5385_v36 = vmul.f32 %v5383_v1, %v10611_v16 }
0x50c8   :  { %v5372_v35 = vadd.f32 %v11316_v24, %v5371_v27  ;;  %v5380_v6 = vmul.f32 %v5378_v53, %v10604_v7  ;;  %v5381_v8 = vadd.f32 %v5379_v29, %v10602_v18  ;;  %v5386_v20 = vmul.f32 %v5384_v45, %v10611_v16 }
0x50c9   :  { %v5387_v23 = vadd.f32 %v5385_v36, %v10619_v32 }
0x50ca   :  { %v5389_v9 = vpack.c.bf16 %v5372_v35, %v5372_v35  ;;  %v5382_v5 = vadd.f32 %v5380_v6, %v10602_v18  ;;  %v5481_v13 = vpack.c.bf16 %v5381_v8, %v5381_v8  ;;  %v5388_v3 = vadd.f32 %v5386_v20, %v10619_v32 }
0x50cb   :  { %v5534_v41 = vpack.c.bf16 %v5387_v23, %v5387_v23 }
0x50cc   :  { %9368 = vmatmul.mubr.msk.bf16.vlgmr.msra.gmra.mrb[108].mxu1 %vm183_vm4, %v5389_v9  ;;  %v5482_v55 = vpack.c.bf16 %v5382_v5, %v5382_v5  ;;  %v5485_v56 = vunpack.c.l.b16 %v5481_v13  ;;  %v5535_v40 = vpack.c.bf16 %v5388_v3, %v5388_v3 }
0x50cd   :  { %9372 = vmatpush3.bf16.msra.mxu1 %v10339_v19  ;;  %9373 = vmatprep.mubr.msk.bf16.mxu1 %vm10207_vm2, %v12329_v0  ;;  %v5538_v47 = vunpack.c.l.b16 %v5534_v41 }
0x50ce   :  { %9377 = vmatprep.subr.bf16.mxu1 %v12329_v0  ;;  %v5486_v24 = vunpack.c.l.b16 %v5482_v55  ;;  %v5539_v22 = vunpack.c.l.b16 %v5535_v40 }
0x50d0   :  { %v5487_v48 = vrot.slane %v5486_v24, 7  ;;  %v5540_v43 = vrot.slane %v5539_v22, 7 }
0x50d2   :  { %v5488_v51 = vsel %vm874_vm9, %v5487_v48, %v5485_v56  ;;  %v5541_v44 = vsel %vm874_vm9, %v5540_v43, %v5538_v47 }
0x50d3   :  { %v5489_v33 = vpack.c.b16 %v5488_v51, %v5488_v51  ;;  %v5542_v39 = vpack.c.b16 %v5541_v44, %v5541_v44 }
0x50d8   :  { %9374 = vmatmul.mubr.msk.bf16.vlgmr.msra.gmra.mrb[108].mxu1 %vm238_vm5, %v5489_v33 }
0x50d9   :  { %9378 = vmatpush3.bf16.msra.mxu1 %v10366_v42  ;;  %9379 = vmatprep.mubr.msk.bf16.mxu1 %vm10207_vm2, %v12329_v0 }
0x50da   :  { %9409 = vmatprep.subr.bf16.mxu1 %v12329_v0 }
0x50e4   :  { %9380 = vmatmul.mubr.msk.bf16.vlgmr.msra.gmra.mrb[108].mxu1 %vm238_vm5, %v5542_v39 }
0x50e5   :  { %9411 = vmatprep.mubr.msk.bf16.mxu1 %vm10207_vm2, %v12329_v0 }
0x51b7   :  { %v5580_v49 = vpop.f32.mrb[108].mxu1 }
0x51b8   :  { %v9620_v17 = vadd.f32 %v11344_v12, %v5580_v49  ;;  %v9381_v34 = vpop.f32.mrb[109].mxu1 }
0x51b9   :  { %v5583_v27 = vpop.f32.mrb[110].mxu1 }
0x51ba   :  { %9936 = vtanh.f32 %v9620_v17  ;;  %v9382_v53 = vpop.f32.mrb[111].mxu1  ;;  %v5587_v45 = vmul.f32 0.5, %v9620_v17 }
0x51bc   :  { %9938 = vtanh.f32 %v5587_v45 }
0x51c4   :  { %v9937_v29 = vpop.eup %9936 }
0x51c5   :  { %5594 = vrot.lane.b32.xlu0 %v9937_v29, %s10204_s0 }
0x51c6   :  { %v9939_v35 = vpop.eup %9938 }
0x51c7   :  { %v5589_v6 = vmul.f32 0.5, %v9939_v35 }
0x51c9   :  { %v5590_v8 = vadd.f32 0.5, %v5589_v6 }
0x51cb   :  { %v5592_v20 = vmul.f32 %v5590_v8, %v11350_v59 }
0x5237   :  { %v5595_v9 = vpop.permute.xlu0 %5594 }
0x5238   :  { %v5597_v5 = vmul.f32 %v5595_v9, %v5590_v8 }
0x523a   :  { %5599 = vrot.lane.b32.xlu1 %v5597_v5, %s10201_s19 }
0x52ac   :  { %v5600_v55 = vpop.permute.xlu1 %5599 }
0x52ad   :  { %v11565_v12 = vadd.f32 %v5600_v55, %v5592_v20 }
0x52af   :  { %9940 = vtanh.f32 %v11565_v12 }
0x52b9   :  { %v9941_v13 = vpop.eup %9940 }
0x52ba   :  { %5605 = vrot.lane.b32.xlu1 %v9941_v13, %s10204_s0 }
0x532c   :  { %v5606_v1 = vpop.permute.xlu1 %5605 }
0x532d   :  { %v11569_v24 = vmul.f32 %v5606_v1, %v5590_v8 }
0x532f   :  { %5610 = vrot.lane.b32.xlu0 %v11569_v24, %s10201_s19 }
0x53a1   :  { %v5611_v3 = vpop.permute.xlu0 %5610 }
0x53a2   :  { %v5613_v48 = vsel %vm362_vm6, %v5611_v3, 0.0 }
0x53a3   :  { %5614 = vadd.xlane.f32.xlu1 %v5613_v48 }
0x5430   :  { %v5615_v56 = vpop.xlane.xlu1 %5614 }
0x5431   :  { %v5616_v59 = vmul.f32 0.03125, %v5615_v56 }
0x5433   :  { %v5617_v36 = vsub.f32 %v11569_v24, %v5616_v59 }
0x5435   :  { %v5618_v51 = vmul.f32 %v5617_v36, %v5617_v36 }
0x5437   :  { %5620 = vrot.lane.b32.xlu0 %v5618_v51, %s10201_s19 }
0x54a9   :  { %v5621_v40 = vpop.permute.xlu0 %5620 }
0x54aa   :  { %v5623_v23 = vsel %vm362_vm6, %v5621_v40, 0.0 }
0x54ab   :  { %5624 = vadd.xlane.f32.xlu0 %v5623_v23 }
0x5538   :  { %v5625_v33 = vpop.xlane.xlu0 %5624 }
0x5539   :  { %v5626_v22 = vmul.f32 0.03125, %v5625_v33 }
0x553b   :  { %v5627_v41 = vadd.f32 1e-05, %v5626_v22 }
0x553d   :  { %9942 = vrsqrt.f32 %v5627_v41 }
0x5547   :  { %v9943_v43 = vpop.eup %9942 }
0x5548   :  { %v5629_v47 = vmul.f32 %v9943_v43, %v5617_v36 }
0x554a   :  { %v5630_v44 = vmul.f32 %v5629_v47, %v10408_v25 }
0x554c   :  { %v11579_v39 = vadd.f32 %v5630_v44, %v10410_v28 }
0x554e   :  { %v5632_v49 = vpack.c.bf16 %v11579_v39, %v11579_v39 }
0x5550   :  { %5634 = vrot.lane.b32.xlu1 %v5632_v49, %s10201_s19 }
0x55c2   :  { %v5635_v17 = vpop.permute.xlu1 %5634 }
0x55c3   :  { %9388 = vmatmul.mubr.msk.bf16.vlgmr.msra.gmra.mrb[100].mxu0 %vm133_vm7, %v5635_v17 }
0x55c4   :  { %9393 = vmatprep.mubr.msk.bf16.mxu0 %vm10207_vm2, %v12329_v0 }
0x5696   :  { %v5673_v34 = vpop.f32.mrb[100].mxu0 }
0x5697   :  { %v11588_v27 = vadd.f32 %v11375_v62, %v5673_v34  ;;  %v9389_v53 = vpop.f32.mrb[101].mxu0 }
0x5698   :  { %v5676_v29 = vpop.f32.mrb[102].mxu0 }
0x5699   :  { %v9390_v45 = vpop.f32.mrb[103].mxu0  ;;  %v5679_v35 = vmul.f32 0.5, %v11588_v27 }
0x569b   :  { %9944 = vtanh.f32 %v5679_v35 }
0x569c   :  { %9946 = vtanh.f32 %v11588_v27 }
0x56a5   :  { %v9945_v6 = vpop.eup %9944 }
0x56a6   :  { %v5681_v8 = vmul.f32 0.5, %v9945_v6  ;;  %v9947_v5 = vpop.eup %9946 }
0x56a8   :  { %v5682_v9 = vadd.f32 0.5, %v5681_v8 }
0x56aa   :  { %5686 = vperm.xlu0 %9735, %v5682_v9  }
0x5729   :  { %v5687_v20 = vpop.permute.xlu0 %5686 }
0x572a   :  { %v5731_v55 = vmul.f32 %v9947_v5, %v5687_v20  ;;  %v5689_v59 = vmul.f32 %v5687_v20, %v5682_v9 }
0x572c   :  { %v5739_v13 = vrot.slane %v5731_v55, %v10432_v52  ;;  %v5697_v36 = vrot.slane %v5689_v59, %v10432_v52 }
0x572e   :  { %v5740_v1 = vcombine.high %v5739_v13, %v5739_v13  ;;  %v5747_v62 = vrot.slane %v5739_v13, %v10432_v52  ;;  %v5698_v51 = vcombine.high %v5697_v36, %v5697_v36  ;;  %v5705_v40 = vrot.slane %v5697_v36, %v10432_v52 }
0x5730   :  { %v5758_v3 = vrot.slane %v5747_v62, %v10435_v57  ;;  %v5754_v48 = vrot.slane %v5740_v1, %v10432_v52  ;;  %v5715_v23 = vsub.f32 1.0, %v5705_v40  ;;  %v5712_v33 = vrot.slane %v5698_v51, %v10432_v52 }
0x5731   :  { %v5826_v1 = vsel %vm97_vm1, %v11588_v27, 0.0 }
0x5732   :  { %5763 = vrot.lane.b32.xlu1 %v5758_v3, %s10213_s14  ;;  %v5762_v56 = vrot.slane %v5754_v48, %v10435_v57  ;;  %v5722_v22 = vrot.slane %v5715_v23, %v10435_v57  ;;  %v5716_v41 = vsub.f32 1.0, %v5712_v33 }
0x5734   :  { %v5729_v43 = vmul.f32 %v5722_v22, %v11395_v54  ;;  %v5726_v47 = vrot.slane %v5716_v41, %v10435_v57 }
0x5736   :  { %5765 = vrot.lane.b32.xlu1 %v5762_v56, %s10213_s14  ;;  %v5730_v17 = vmul.f32 %v5726_v47, %v11400_v58 }
0x57a4   :  { %v5764_v44 = vpop.permute.xlu1 %5763 }
0x57a5   :  { %v11605_v49 = vadd.f32 %v5764_v44, %v5729_v43 }
0x57a7   :  { %5773 = vrot.lane.b32.xlu0 %v11605_v49, %s10210_s28 }
0x57a8   :  { %v5766_v34 = vpop.permute.xlu1 %5765 }
0x57a9   :  { %v11610_v53 = vadd.f32 %v5766_v34, %v5730_v17 }
0x57ab   :  { %5775 = vrot.lane.b32.xlu1 %v11610_v53, %s10210_s28 }
0x5819   :  { %v5774_v29 = vpop.permute.xlu0 %5773 }
0x581a   :  { %v5779_v45 = vsel %vm238_vm5, %v5774_v29, 0.0 }
0x581b   :  { %5780 = vadd.xlane.f32.xlu0 %v5779_v45 }
0x581d   :  { %v5776_v54 = vpop.permute.xlu1 %5775 }
0x581e   :  { %v5782_v35 = vsel %vm238_vm5, %v5776_v54, 0.0 }
0x581f   :  { %5783 = vadd.xlane.f32.xlu1 %v5782_v35 }
0x58a8   :  { %v5781_v6 = vpop.xlane.xlu0 %5780 }
0x58a9   :  { %v5785_v8 = vmul.f32 0.125, %v5781_v6 }
0x58ab   :  { %v5787_v9 = vsub.f32 %v11605_v49, %v5785_v8 }
0x58ac   :  { %v5784_v5 = vpop.xlane.xlu1 %5783 }
0x58ad   :  { %v5789_v58 = vmul.f32 %v5787_v9, %v5787_v9  ;;  %v5786_v20 = vmul.f32 0.125, %v5784_v5 }
0x58af   :  { %v5788_v55 = vsub.f32 %v11610_v53, %v5786_v20  ;;  %5793 = vrot.lane.b32.xlu0 %v5789_v58, %s10210_s28 }
0x58b1   :  { %v5790_v13 = vmul.f32 %v5788_v55, %v5788_v55 }
0x58b3   :  { %5795 = vrot.lane.b32.xlu1 %v5790_v13, %s10210_s28 }
0x58ce   :  { %5827 = vadd.xlane.f32.xlu0 %v5826_v1 }
0x5921   :  { %v5794_v62 = vpop.permute.xlu0 %5793 }
0x5922   :  { %v5799_v3 = vsel %vm238_vm5, %v5794_v62, 0.0 }
0x5923   :  { %5800 = vadd.xlane.f32.xlu1 %v5799_v3 }
0x5925   :  { %v5796_v48 = vpop.permute.xlu1 %5795 }
0x5926   :  { %v5802_v56 = vsel %vm238_vm5, %v5796_v48, 0.0 }
0x5927   :  { %5803 = vadd.xlane.f32.xlu0 %v5802_v56 }
0x595b   :  { %v5828_v59 = vpop.xlane.xlu0 %5827 }
0x595c   :  { %v5829_v36 = vmul.f32 0.125, %v5828_v59 }
0x595e   :  { %v5830_v51 = vsub.f32 %v11588_v27, %v5829_v36 }
0x5960   :  { %v5831_v40 = vmul.f32 %v5830_v51, %v5830_v51 }
0x5962   :  { %v5832_v23 = vsel %vm97_vm1, %v5831_v40, 0.0 }
0x5963   :  { %5833 = vadd.xlane.f32.xlu0 %v5832_v23 }
0x59b0   :  { %v5801_v33 = vpop.xlane.xlu1 %5800 }
0x59b1   :  { %v5805_v22 = vmul.f32 0.125, %v5801_v33 }
0x59b3   :  { %v5807_v41 = vadd.f32 1e-05, %v5805_v22 }
0x59b4   :  { %v5804_v43 = vpop.xlane.xlu0 %5803 }
0x59b5   :  { %9948 = vrsqrt.f32 %v5807_v41  ;;  %v5806_v47 = vmul.f32 0.125, %v5804_v43 }
0x59b7   :  { %v5808_v44 = vadd.f32 1e-05, %v5806_v47 }
0x59b9   :  { %9950 = vrsqrt.f32 %v5808_v44 }
0x59bf   :  { %v9949_v17 = vpop.eup %9948 }
0x59c0   :  { %v5811_v34 = vmul.f32 %v9949_v17, %v5787_v9 }
0x59c2   :  { %v5813_v29 = vmul.f32 %v5811_v34, %v10470_v63 }
0x59c3   :  { %v9951_v45 = vpop.eup %9950 }
0x59c4   :  { %v5815_v54 = vadd.f32 %v5813_v29, %v10472_v2  ;;  %v5812_v35 = vmul.f32 %v9951_v45, %v5788_v55 }
0x59c6   :  { %v5817_v6 = vpack.c.bf16 %v5815_v54, %v5815_v54  ;;  %v5814_v8 = vmul.f32 %v5812_v35, %v10470_v63 }
0x59c8   :  { %5869 = vrot.lane.b32.xlu1 %v5817_v6, %s10210_s28  ;;  %v5816_v5 = vadd.f32 %v5814_v8, %v10472_v2 }
0x59ca   :  { %v5818_v58 = vpack.c.bf16 %v5816_v5, %v5816_v5 }
0x59cc   :  { %5918 = vrot.lane.b32.xlu0 %v5818_v58, %s10210_s28  ;;  %6095 = vrot.lane.b32.xlu1 %v11588_v27, %s10213_s14 }
0x59f0   :  { %v5834_v9 = vpop.xlane.xlu0 %5833 }
0x59f1   :  { %v5835_v20 = vmul.f32 0.125, %v5834_v9 }
0x59f3   :  { %v5836_v13 = vadd.f32 1e-05, %v5835_v20 }
0x59f5   :  { %9952 = vrsqrt.f32 %v5836_v13 }
0x59ff   :  { %v9953_v1 = vpop.eup %9952 }
0x5a00   :  { %v5838_v62 = vmul.f32 %v9953_v1, %v5830_v51 }
0x5a02   :  { %v5839_v55 = vmul.f32 %v5838_v62, %v10408_v25 }
0x5a04   :  { %v5840_v3 = vadd.f32 %v5839_v55, %v10410_v28 }
0x5a06   :  { %v5848_v48 = vrot.slane %v5840_v3, %v10432_v52 }
0x5a08   :  { %v5856_v36 = vrot.slane %v5848_v48, %v10432_v52  ;;  %v5849_v22 = vcombine.high %v5848_v48, %v5848_v48 }
0x5a0a   :  { %v5866_v33 = vpack.c.bf16 %v5856_v36, %v5856_v36  ;;  %v5863_v43 = vrot.slane %v5849_v22, %v10432_v52 }
0x5a0c   :  { %v5867_v47 = vpack.c.bf16 %v5863_v43, %v5863_v43 }
0x5a3a   :  { %v5870_v56 = vpop.permute.xlu1 %5869 }
0x5a3b   :  { %v11638_v59 = vsel %vm238_vm5, %v5870_v56, 0 }
0x5a3c   :  { %9392 = vmatpush3.bf16.xpose.msra.mxu0 %v11638_v59 }
0x5a3d   :  { %9397 = vmatprep.subr.bf16.mxu0 %v12329_v0 }
0x5a3e   :  { %v6096_v40 = vpop.permute.xlu1 %6095  ;;  %v5919_v51 = vpop.permute.xlu0 %5918 }
0x5a3f   :  { %v6098_v23 = vsel %vm97_vm1, %v6096_v40, 0.0  ;;  %v11645_v41 = vsel %vm238_vm5, %v5919_v51, 0 }
0x5a40   :  { %6099 = vadd.xlane.f32.xlu1 %v6098_v23 }
0x5a43   :  { %9394 = vmatmul.mubr.msk.bf16.vlgmr.msra.gmra.mrb[104].mxu0 %vm238_vm5, %v5866_v33 }
0x5a44   :  { %9398 = vmatpush3.bf16.xpose.msra.mxu0 %v11645_v41  ;;  %9399 = vmatprep.mubr.msk.bf16.mxu0 %vm10207_vm2, %v12329_v0 }
0x5a45   :  { %9403 = vmatprep.subr.bf16.mxu0 %v12329_v0 }
0x5a4b   :  { %9400 = vmatmul.mubr.msk.bf16.vlgmr.msra.gmra.mrb[108].mxu0 %vm238_vm5, %v5867_v47  ;;  %v5819_v47 = vpack.c.bf16 %v11605_v49, %v11605_v49 }
0x5a4c   :  { %9405 = vmatprep.mubr.msk.bf16.mxu0 %vm10207_vm2, %v12329_v0 }
0x5acd   :  { %v6100_v44 = vpop.xlane.xlu1 %6099 }
0x5ace   :  { %v6101_v17 = vmul.f32 0.125, %v6100_v44 }
0x5ad0   :  { %v6102_v34 = vsub.f32 %v11588_v27, %v6101_v17  ;;  %v5820_v27 = vpack.c.bf16 %v11610_v53, %v11610_v53 }
0x5ad2   :  { %v6103_v29 = vmul.f32 %v6102_v34, %v6102_v34 }
0x5ad4   :  { %6105 = vrot.lane.b32.xlu0 %v6103_v29, %s10213_s14 }
0x5b16   :  { %v5911_v45 = vpop.f32.mrb[104].mxu0 }
0x5b17   :  { %v9395_v54 = vpop.f32.mrb[105].mxu0  ;;  %v5966_v35 = vsel %vm750_vm8, %v5911_v45, -inf }
0x5b18   :  { %5967 = vmax.xlane.f32.xlu1 %v5966_v35  ;;  %v5914_v6 = vpop.f32.mrb[106].mxu0 }
0x5b19   :  { %v9396_v8 = vpop.f32.mrb[107].mxu0 }
0x5b1e   :  { %v5960_v5 = vpop.f32.mrb[108].mxu0 }
0x5b1f   :  { %v9401_v58 = vpop.f32.mrb[109].mxu0  ;;  %v5969_v9 = vsel %vm750_vm8, %v5960_v5, -inf }
0x5b20   :  { %5970 = vmax.xlane.f32.xlu0 %v5969_v9  ;;  %v5963_v20 = vpop.f32.mrb[110].mxu0 }
0x5b21   :  { %v9402_v13 = vpop.f32.mrb[111].mxu0 }
0x5b29   :  { %6038 = vrot.lane.b32.xlu1 %v5820_v27, %s10210_s28 }
0x5b46   :  { %v6106_v1 = vpop.permute.xlu0 %6105 }
0x5b47   :  { %v6108_v62 = vsel %vm97_vm1, %v6106_v1, 0.0 }
0x5b48   :  { %6109 = vadd.xlane.f32.xlu0 %v6108_v62 }
0x5ba5   :  { %v5968_v55 = vpop.xlane.xlu1 %5967 }
0x5ba6   :  { %v5972_v3 = vsub.f32 %v5911_v45, %v5968_v55 }
0x5ba8   :  { %v5974_v48 = vmul.f32 1.442695, %v5972_v3 }
0x5ba9   :  { %v6039_v56 = vpop.permute.xlu1 %6038 }
0x5baa   :  { %9954 = vpow2.f32 %v5974_v48  ;;  %9410 = vmatpush3.bf16.msra.mxu1 %v6039_v56 }
0x5bab   :  { %9421 = vmatprep.subr.bf16.mxu1 %v12329_v0 }
0x5bad   :  { %v5971_v36 = vpop.xlane.xlu0 %5970 }
0x5bae   :  { %v5973_v40 = vsub.f32 %v5960_v5, %v5971_v36 }
0x5bb0   :  { %v5976_v23 = vmul.f32 1.442695, %v5973_v40 }
0x5bb2   :  { %9956 = vpow2.f32 %v5976_v23 }
0x5bb4   :  { %v9955_v51 = vpop.eup %9954 }
0x5bb5   :  { %v5978_v33 = vsel %vm750_vm8, %v9955_v51, 0.0 }
0x5bb6   :  { %5979 = vadd.xlane.f32.xlu0 %v5978_v33 }
0x5bbc   :  { %v9957_v22 = vpop.eup %9956 }
0x5bbd   :  { %v5981_v43 = vsel %vm750_vm8, %v9957_v22, 0.0 }
0x5bbe   :  { %5982 = vadd.xlane.f32.xlu1 %v5981_v43 }
0x5bcc   :  { %5991 = vrot.lane.b32.xlu0 %v5819_v47, %s10210_s28 }
0x5bd5   :  { %v6110_v44 = vpop.xlane.xlu0 %6109 }
0x5bd6   :  { %v6111_v17 = vmul.f32 0.125, %v6110_v44 }
0x5bd8   :  { %v6112_v29 = vadd.f32 1e-05, %v6111_v17 }
0x5bda   :  { %9958 = vrsqrt.f32 %v6112_v29 }
0x5be4   :  { %v9959_v45 = vpop.eup %9958 }
0x5be5   :  { %v6114_v54 = vmul.f32 %v9959_v45, %v6102_v34 }
0x5be7   :  { %v6115_v35 = vmul.f32 %v6114_v54, %v10470_v63 }
0x5be9   :  { %v6116_v6 = vadd.f32 %v6115_v35, %v10472_v2 }
0x5beb   :  { %v6124_v8 = vrot.slane %v6116_v6, %v10432_v52 }
0x5bed   :  { %v6125_v5 = vcombine.high %v6124_v8, %v6124_v8  ;;  %v6132_v20 = vrot.slane %v6124_v8, %v10432_v52 }
0x5bef   :  { %v6139_v58 = vrot.slane %v6125_v5, %v10432_v52  ;;  %v6142_v13 = vpack.c.bf16 %v6132_v20, %v6132_v20 }
0x5bf1   :  { %v6143_v9 = vpack.c.bf16 %v6139_v58, %v6139_v58 }
0x5bf3   :  { %6191 = vrot.lane.b32.xlu1 %v6143_v9, %s10213_s14 }
0x5bf7   :  { %6145 = vrot.lane.b32.xlu1 %v6142_v13, %s10213_s14 }
0x5c43   :  { %v5980_v27 = vpop.xlane.xlu0 %5979 }
0x5c44   :  { %9960 = vrcp.f32 %v5980_v27  ;;  %v11707_v27 = vld [vmem:[#allocation3 + $0xc] sm:$0x3] }
0x5c47   :  { %v5992_v34 = vpop.permute.xlu0 %5991 }
0x5c48   :  { %9404 = vmatpush3.bf16.msra.mxu0 %v5992_v34 }
0x5c49   :  { %9415 = vmatprep.subr.bf16.mxu0 %v12329_v0 }
0x5c4b   :  { %v5983_v1 = vpop.xlane.xlu1 %5982 }
0x5c4c   :  { %9962 = vrcp.f32 %v5983_v1 }
0x5c4e   :  { %v9961_v62 = vpop.eup %9960 }
0x5c4f   :  { %v5986_v55 = vmul.f32 %v9961_v62, %v9955_v51 }
0x5c51   :  { %v5988_v3 = vpack.c.bf16 %v5986_v55, %v5986_v55 }
0x5c53   :  { %9406 = vmatmul.mubr.msk.bf16.vlgmr.msra.gmra.mrb[112].mxu0 %vm183_vm4, %v5988_v3 }
0x5c54   :  { %9416 = vmatpush3.bf16.xpose.msra.mxu0 %v11638_v59  ;;  %9417 = vmatprep.mubr.msk.bf16.mxu0 %vm10207_vm2, %v12329_v0 }
0x5c55   :  { %9427 = vmatprep.subr.bf16.mxu0 %v12329_v0 }
0x5c56   :  { %v9963_v48 = vpop.eup %9962 }
0x5c57   :  { %v5987_v36 = vmul.f32 %v9963_v48, %v9957_v22 }
0x5c59   :  { %v5989_v40 = vpack.c.bf16 %v5987_v36, %v5987_v36 }
0x5c5b   :  { %9412 = vmatmul.mubr.msk.bf16.vlgmr.msra.gmra.mrb[112].mxu1 %vm183_vm4, %v5989_v40 }
0x5c5c   :  { %9422 = vmatpush3.bf16.xpose.msra.mxu1 %v11645_v41  ;;  %9423 = vmatprep.mubr.msk.bf16.mxu1 %vm10207_vm2, %v12329_v0 }
0x5c5d   :  { %9433 = vmatprep.subr.bf16.mxu1 %v12329_v0 }
0x5c65   :  { %v6192_v23 = vpop.permute.xlu1 %6191 }
0x5c66   :  { %9424 = vmatmul.mubr.msk.bf16.vlgmr.msra.gmra.mrb[116].mxu1 %vm238_vm5, %v6192_v23 }
0x5c67   :  { %9434 = vmatpush3.bf16.msra.mxu1 %v6039_v56  ;;  %9435 = vmatprep.mubr.msk.bf16.mxu1 %vm10207_vm2, %v12329_v0 }
0x5c68   :  { %9465 = vmatprep.subr.bf16.mxu1 %v12329_v0 }
0x5c69   :  { %v6146_v59 = vpop.permute.xlu1 %6145 }
0x5c6a   :  { %9418 = vmatmul.mubr.msk.bf16.vlgmr.msra.gmra.mrb[116].mxu0 %vm238_vm5, %v6146_v59 }
0x5c6b   :  { %9428 = vmatpush3.bf16.msra.mxu0 %v5992_v34  ;;  %9429 = vmatprep.mubr.msk.bf16.mxu0 %vm10207_vm2, %v12329_v0  ;;  %v6358_v34 = vsel %vm81_vm0, %v11707_v27, 0.0 }
0x5c6c   :  { %9439 = vmatprep.subr.bf16.mxu0 %v12329_v0 }
0x5d26   :  { %v11696_v41 = vpop.f32.mrb[112].mxu0 }
0x5d27   :  { %v9407_v51 = vpop.f32.mrb[113].mxu0 }
0x5d28   :  { %v6034_v33 = vpop.f32.mrb[114].mxu0 }
0x5d29   :  { %v9408_v22 = vpop.f32.mrb[115].mxu0 }
0x5d2e   :  { %v11698_v56 = vpop.f32.mrb[112].mxu1 }
0x5d2f   :  { %v6088_v43 = vrot.slane %v11698_v56, 7  ;;  %v9413_v47 = vpop.f32.mrb[113].mxu1 }
0x5d30   :  { %v6081_v44 = vpop.f32.mrb[114].mxu1 }
0x5d31   :  { %v9414_v17 = vpop.f32.mrb[115].mxu1  ;;  %v11703_v29 = vsel %vm874_vm9, %v6088_v43, %v11696_v41 }
0x5d32   :  { %v6362_v33 = vsel %vm97_vm1, %v11703_v29, 0.0 }
0x5d39   :  { %v6230_v45 = vpop.f32.mrb[116].mxu1 }
0x5d3a   :  { %v9425_v54 = vpop.f32.mrb[117].mxu1  ;;  %v6239_v35 = vsel %vm750_vm8, %v6230_v45, -inf }
0x5d3b   :  { %6240 = vmax.xlane.f32.xlu0 %v6239_v35  ;;  %v6233_v6 = vpop.f32.mrb[118].mxu1  ;;  %v11716_v35 = vld [vmem:[#allocation6] sm:$0xff]  }
0x5d3c   :  { %v9426_v8 = vpop.f32.mrb[119].mxu1 }
0x5d3d   :  { %v6184_v5 = vpop.f32.mrb[116].mxu0  ;;  %v11726_v8 = vld [vmem:[%s12322_s3 + $0x10] sm:$0xff]  }
0x5d3e   :  { %v9419_v58 = vpop.f32.mrb[117].mxu0  ;;  %v6236_v9 = vsel %vm750_vm8, %v6184_v5, -inf }
0x5d3f   :  { %6237 = vmax.xlane.f32.xlu1 %v6236_v9  ;;  %v6187_v20 = vpop.f32.mrb[118].mxu0  ;;  %v11739_v58 = vld [vmem:[%s12322_s3 + $0x18] sm:$0xff]  }
0x5d40   :  { %v9420_v13 = vpop.f32.mrb[119].mxu0 }
0x5d43   :  { %6359 = vadd.xlane.f32.xlu1 %v6358_v34 }
0x5dc8   :  { %v6241_v1 = vpop.xlane.xlu0 %6240 }
0x5dc9   :  { %v6243_v62 = vsub.f32 %v6230_v45, %v6241_v1 }
0x5dcb   :  { %v6246_v55 = vmul.f32 1.442695, %v6243_v62 }
0x5dcc   :  { %v6238_v3 = vpop.xlane.xlu1 %6237 }
0x5dcd   :  { %9964 = vpow2.f32 %v6246_v55  ;;  %v6242_v48 = vsub.f32 %v6184_v5, %v6238_v3  ;;  %v11732_v5 = vld [vmem:[#allocation6 + $0x8] sm:$0xff]  }
0x5dcf   :  { %v6244_v36 = vmul.f32 1.442695, %v6242_v48 }
0x5dd1   :  { %9966 = vpow2.f32 %v6244_v36 }
0x5dd7   :  { %v9965_v40 = vpop.eup %9964 }
0x5dd8   :  { %v6251_v23 = vsel %vm750_vm8, %v9965_v40, 0.0 }
0x5dd9   :  { %6252 = vadd.xlane.f32.xlu0 %v6251_v23  ;;  %v6360_v23 = vpop.xlane.xlu1 %6359 }
0x5ddb   :  { %v9967_v59 = vpop.eup %9966 }
0x5ddc   :  { %v6248_v51 = vsel %vm750_vm8, %v9967_v59, 0.0 }
0x5ddd   :  { %6249 = vadd.xlane.f32.xlu0 %v6248_v51 }
0x5de1   :  { %6363 = vadd.xlane.f32.xlu0 %v6362_v33 }
0x5e66   :  { %v6253_v22 = vpop.xlane.xlu0 %6252 }
0x5e67   :  { %9968 = vrcp.f32 %v6253_v22 }
0x5e6a   :  { %v6250_v43 = vpop.xlane.xlu0 %6249 }
0x5e6b   :  { %9970 = vrcp.f32 %v6250_v43 }
0x5e71   :  { %v9969_v47 = vpop.eup %9968 }
0x5e72   :  { %v6257_v44 = vmul.f32 %v9969_v47, %v9965_v40 }
0x5e74   :  { %v6259_v17 = vpack.c.bf16 %v6257_v44, %v6257_v44 }
0x5e75   :  { %v9971_v45 = vpop.eup %9970 }
0x5e76   :  { %9436 = vmatmul.mubr.msk.bf16.vlgmr.msra.gmra.mrb[120].mxu1 %vm183_vm4, %v6259_v17  ;;  %v6256_v54 = vmul.f32 %v9971_v45, %v9967_v59  ;;  %v6364_v59 = vpop.xlane.xlu0 %6363 }
0x5e77   :  { %9466 = vmatpush3.bf16.msra.mxu1 %v11716_v35  ;;  %9469 = vmatprep.mubr.msk.bf16.mxu1 %vm10207_vm2, %v12329_v0  ;;  %v6365_v51 = vadd.f32 %v6364_v59, %v6360_v23 }
0x5e78   :  { %v6258_v6 = vpack.c.bf16 %v6256_v54, %v6256_v54  ;;  %9467 = vmatprep.subr.bf16.mxu1 %v12329_v0 }
0x5e7a   :  { %9430 = vmatmul.mubr.msk.bf16.vlgmr.msra.gmra.mrb[120].mxu0 %vm183_vm4, %v6258_v6 }
0x5e7b   :  { %9440 = vmatpush3.bf16.msra.mxu0 %v11726_v8  ;;  %9443 = vmatprep.mubr.msk.bf16.mxu0 %vm10207_vm2, %v12329_v0 }
0x5e7c   :  { %9441 = vmatprep.subr.bf16.mxu0 %v12329_v0  ;;  %9468 = vmatpush3.bf16.msra.mxu1 %v11732_v5 }
0x5e7d   :  { %9473 = vmatprep.subr.bf16.mxu1 %v12329_v0 }
0x5e7f   :  { %9442 = vmatpush3.bf16.msra.mxu0 %v11739_v58 }
0x5e80   :  { %9447 = vmatprep.subr.bf16.mxu0 %v12329_v0 }
0x5f49   :  { %v6340_v9 = vpop.f32.mrb[120].mxu1 }
0x5f4a   :  { %v9437_v20 = vpop.f32.mrb[121].mxu1  ;;  %v6350_v34 = vrot.slane %v6340_v9, 7 }
0x5f4b   :  { %v6343_v13 = vpop.f32.mrb[122].mxu1 }
0x5f4c   :  { %v9438_v1 = vpop.f32.mrb[123].mxu1 }
0x5f4d   :  { %v6297_v62 = vpop.f32.mrb[120].mxu0 }
0x5f4e   :  { %v11744_v55 = vsel %vm874_vm9, %v6350_v34, %v6297_v62  ;;  %v9431_v3 = vpop.f32.mrb[121].mxu0 }
0x5f4f   :  { %v6300_v48 = vpop.f32.mrb[122].mxu0  ;;  %v6367_v36 = vsel %vm97_vm1, %v11744_v55, 0.0 }
0x5f50   :  { %v9432_v40 = vpop.f32.mrb[123].mxu0  ;;  %6368 = vadd.xlane.f32.xlu1 %v6367_v36 }
0x5fdd   :  { %v6369_v33 = vpop.xlane.xlu1 %6368 }
0x5fde   :  { %v6370_v22 = vadd.f32 %v6369_v33, %v6365_v51 }
0x5fe0   :  { %v6371_v43 = vmul.f32 0.03125, %v6370_v22 }
0x5fe2   :  { %v6374_v47 = vrot.slane %v6371_v43, 1  ;;  %v6372_v44 = vsub.f32 %v11707_v27, %v6371_v43  ;;  %v6377_v17 = vsub.f32 %v11696_v41, %v6371_v43  ;;  %v6379_v6 = vsub.f32 %v6297_v62, %v6371_v43 }
0x5fe4   :  { %v6381_v45 = vmul.f32 %v6372_v44, %v6372_v44  ;;  %v6378_v54 = vsub.f32 %v11698_v56, %v6374_v47  ;;  %v6380_v20 = vsub.f32 %v6340_v9, %v6374_v47  ;;  %v6385_v3 = vmul.f32 %v6377_v17, %v6377_v17 }
0x5fe5   :  { %v6396_v36 = vmul.f32 %v6379_v6, %v6379_v6  ;;  %v6430_v56 = vpack.c.bf16 %v11569_v24, %v11569_v24 }
0x5fe6   :  { %v6382_v13 = vsel %vm81_vm0, %v6381_v45, 0.0  ;;  %v6386_v34 = vmul.f32 %v6378_v54, %v6378_v54  ;;  %v6397_v1 = vmul.f32 %v6380_v20, %v6380_v20  ;;  %v11763_v45 = vld [vmem:[%s12322_s3] sm:$0xff]  }
0x5fe7   :  { %6383 = vadd.xlane.f32.xlu0 %v6382_v13 }
0x5fe8   :  { %v6389_v48 = vrot.slane %v6386_v34, 7  ;;  %v6400_v40 = vrot.slane %v6397_v1, 7 }
0x5fea   :  { %v6390_v23 = vsel %vm874_vm9, %v6389_v48, %v6385_v3  ;;  %v6401_v27 = vsel %vm874_vm9, %v6400_v40, %v6396_v36  ;;  %v11772_v48 = vld [vmem:[%s12320_s1] ss:$0 sm:$0xff] }
0x5feb   :  { %v6392_v41 = vsel %vm97_vm1, %v6390_v23, 0.0  ;;  %v6403_v59 = vsel %vm97_vm1, %v6401_v27, 0.0 }
0x5fec   :  { %6393 = vadd.xlane.f32.xlu1 %v6392_v41  ;;  %6404 = vadd.xlane.f32.xlu0 %v6403_v59  ;;  %v11779_v41 = vld [vmem:[%s12320_s1 + $0x1] ss:$0 sm:$0xff] }
0x5ffd   :  { %6432 = vrot.lane.b32.xlu1 %v6430_v56, %s10201_s19 }
0x6074   :  { %v6384_v9 = vpop.xlane.xlu0 %6383 }
0x6079   :  { %v6394_v62 = vpop.xlane.xlu1 %6393  ;;  %v6405_v33 = vpop.xlane.xlu0 %6404 }
0x607a   :  { %v6395_v51 = vadd.f32 %v6394_v62, %v6384_v9 }
0x607c   :  { %v6406_v22 = vadd.f32 %v6405_v33, %v6395_v51 }
0x607d   :  { %v6433_v43 = vpop.permute.xlu1 %6432 }
0x607e   :  { %v6407_v47 = vmul.f32 0.03125, %v6406_v22  ;;  %9444 = vmatmul.mubr.msk.bf16.vlgmr.msra.gmra.mrb[124].mxu0 %vm133_vm7, %v6433_v43 }
0x607f   :  { %9448 = vmatpush3.bf16.msra.mxu0 %v11763_v45  ;;  %9449 = vmatprep.mubr.msk.bf16.mxu0 %vm10207_vm2, %v12329_v0 }
0x6080   :  { %v6408_v24 = vadd.f32 1e-05, %v6407_v47  ;;  %9453 = vmatprep.subr.bf16.mxu0 %v12329_v0 }
0x6082   :  { %9972 = vrsqrt.f32 %v6408_v24 }
0x608c   :  { %v9973_v13 = vpop.eup %9972 }
0x608d   :  { %v6410_v34 = vmul.f32 %v9973_v13, %v6372_v44  ;;  %v6414_v1 = vrot.slane %v9973_v13, 1  ;;  %v6417_v3 = vmul.f32 %v9973_v13, %v6377_v17  ;;  %v6423_v51 = vmul.f32 %v9973_v13, %v6379_v6 }
0x608f   :  { %v6411_v36 = vmul.f32 %v11772_v48, %v6410_v34  ;;  %v6418_v40 = vmul.f32 %v6414_v1, %v6378_v54  ;;  %v6419_v23 = vmul.f32 %v6417_v3, %v10604_v7  ;;  %v6424_v27 = vmul.f32 %v6414_v1, %v6380_v20 }
0x6090   :  { %v6425_v24 = vmul.f32 %v6423_v51, %v10611_v16 }
0x6091   :  { %v6412_v44 = vadd.f32 %v11779_v41, %v6411_v36  ;;  %v6420_v17 = vmul.f32 %v6418_v40, %v10604_v7  ;;  %v6421_v59 = vadd.f32 %v6419_v23, %v10602_v18  ;;  %v6426_v62 = vmul.f32 %v6424_v27, %v10611_v16 }
0x6092   :  { %v6427_v3 = vadd.f32 %v6425_v24, %v10619_v32 }
0x6093   :  { %v6429_v56 = vpack.c.bf16 %v6412_v44, %v6412_v44  ;;  %v6422_v9 = vadd.f32 %v6420_v17, %v10602_v18  ;;  %v6521_v20 = vpack.c.bf16 %v6421_v59, %v6421_v59  ;;  %v6428_v22 = vadd.f32 %v6426_v62, %v10619_v32  ;;  %v11807_v59 = vld [vmem:[%s12321_s2] ss:$0 sm:$0xff] }
0x6094   :  { %v6574_v6 = vpack.c.bf16 %v6427_v3, %v6427_v3 }
0x6095   :  { %9450 = vmatmul.mubr.msk.bf16.vlgmr.msra.gmra.mrb[124].mxu0 %vm183_vm4, %v6429_v56  ;;  %v6522_v54 = vpack.c.bf16 %v6422_v9, %v6422_v9  ;;  %v6525_v47 = vunpack.c.l.b16 %v6521_v20  ;;  %v6575_v1 = vpack.c.bf16 %v6428_v22, %v6428_v22 }
0x6096   :  { %9454 = vmatpush3.bf16.msra.mxu0 %v10339_v19  ;;  %9455 = vmatprep.mubr.msk.bf16.mxu0 %vm10207_vm2, %v12329_v0  ;;  %v6578_v23 = vunpack.c.l.b16 %v6574_v6 }
0x6097   :  { %9459 = vmatprep.subr.bf16.mxu0 %v12329_v0  ;;  %v6526_v33 = vunpack.c.l.b16 %v6522_v54  ;;  %v6579_v40 = vunpack.c.l.b16 %v6575_v1 }
0x6099   :  { %v6527_v43 = vrot.slane %v6526_v33, 7  ;;  %v6580_v13 = vrot.slane %v6579_v40, 7 }
0x609b   :  { %v6528_v34 = vsel %vm874_vm9, %v6527_v43, %v6525_v47  ;;  %v6581_v27 = vsel %vm874_vm9, %v6580_v13, %v6578_v23 }
0x609c   :  { %v6529_v36 = vpack.c.b16 %v6528_v34, %v6528_v34  ;;  %v6582_v44 = vpack.c.b16 %v6581_v27, %v6581_v27 }
0x60a1   :  { %9456 = vmatmul.mubr.msk.bf16.vlgmr.msra.gmra.mrb[124].mxu0 %vm238_vm5, %v6529_v36 }
0x60a2   :  { %9460 = vmatpush3.bf16.msra.mxu0 %v10366_v42  ;;  %9461 = vmatprep.mubr.msk.bf16.mxu0 %vm10207_vm2, %v12329_v0 }
0x60a3   :  { %9491 = vmatprep.subr.bf16.mxu0 %v12329_v0 }
0x60ad   :  { %9462 = vmatmul.mubr.msk.bf16.vlgmr.msra.gmra.mrb[124].mxu0 %vm238_vm5, %v6582_v44 }
0x60ae   :  { %9493 = vmatprep.mubr.msk.bf16.mxu0 %vm10207_vm2, %v12329_v0 }
0x6180   :  { %v6620_v17 = vpop.f32.mrb[124].mxu0 }
0x6181   :  { %v9621_v56 = vadd.f32 %v11807_v59, %v6620_v17  ;;  %v9463_v9 = vpop.f32.mrb[125].mxu0 }
0x6182   :  { %v6623_v62 = vpop.f32.mrb[126].mxu0 }
0x6183   :  { %9974 = vtanh.f32 %v9621_v56  ;;  %v9464_v54 = vpop.f32.mrb[127].mxu0  ;;  %v6627_v51 = vmul.f32 0.5, %v9621_v56 }
0x6185   :  { %9976 = vtanh.f32 %v6627_v51 }
0x618d   :  { %v9975_v20 = vpop.eup %9974 }
0x618e   :  { %6634 = vrot.lane.b32.xlu0 %v9975_v20, %s10204_s0 }
0x618f   :  { %v9977_v33 = vpop.eup %9976 }
0x6190   :  { %v6629_v22 = vmul.f32 0.5, %v9977_v33 }
0x6192   :  { %v6630_v43 = vadd.f32 0.5, %v6629_v22 }
0x6194   :  { %v6632_v34 = vmul.f32 %v6630_v43, %v11565_v12 }
0x6200   :  { %v6635_v47 = vpop.permute.xlu0 %6634 }
0x6201   :  { %v6637_v24 = vmul.f32 %v6635_v47, %v6630_v43 }
0x6203   :  { %6639 = vrot.lane.b32.xlu1 %v6637_v24, %s10201_s19 }
0x6275   :  { %v6640_v1 = vpop.permute.xlu1 %6639 }
0x6276   :  { %v11813_v3 = vadd.f32 %v6640_v1, %v6632_v34  ;;  %v11838_v1 = vld [vmem:[%s12321_s2 + $0x1] ss:$0 sm:$0xff] }
0x6278   :  { %9978 = vtanh.f32 %v11813_v3 }
0x6282   :  { %v9979_v36 = vpop.eup %9978 }
0x6283   :  { %6645 = vrot.lane.b32.xlu1 %v9979_v36, %s10204_s0 }
0x62f5   :  { %v6646_v40 = vpop.permute.xlu1 %6645 }
0x62f6   :  { %v11817_v6 = vmul.f32 %v6646_v40, %v6630_v43 }
0x62f8   :  { %6650 = vrot.lane.b32.xlu0 %v11817_v6, %s10201_s19 }
0x636a   :  { %v6651_v13 = vpop.permute.xlu0 %6650 }
0x636b   :  { %v6653_v23 = vsel %vm362_vm6, %v6651_v13, 0.0 }
0x636c   :  { %6654 = vadd.xlane.f32.xlu1 %v6653_v23 }
0x63f9   :  { %v6655_v27 = vpop.xlane.xlu1 %6654 }
0x63fa   :  { %v6656_v12 = vmul.f32 0.03125, %v6655_v27 }
0x63fc   :  { %v6657_v44 = vsub.f32 %v11817_v6, %v6656_v12 }
0x63fe   :  { %v6658_v17 = vmul.f32 %v6657_v44, %v6657_v44 }
0x6400   :  { %6660 = vrot.lane.b32.xlu0 %v6658_v17, %s10201_s19 }
0x6472   :  { %v6661_v56 = vpop.permute.xlu0 %6660 }
0x6473   :  { %v6663_v9 = vsel %vm362_vm6, %v6661_v56, 0.0 }
0x6474   :  { %6664 = vadd.xlane.f32.xlu0 %v6663_v9 }
0x6501   :  { %v6665_v62 = vpop.xlane.xlu0 %6664 }
0x6502   :  { %v6666_v54 = vmul.f32 0.03125, %v6665_v62 }
0x6504   :  { %v6667_v20 = vadd.f32 1e-05, %v6666_v54 }
0x6506   :  { %9980 = vrsqrt.f32 %v6667_v20 }
0x6510   :  { %v9981_v51 = vpop.eup %9980 }
0x6511   :  { %v6669_v33 = vmul.f32 %v9981_v51, %v6657_v44 }
0x6513   :  { %v6670_v22 = vmul.f32 %v6669_v33, %v10408_v25 }
0x6515   :  { %v11827_v43 = vadd.f32 %v6670_v22, %v10410_v28 }
0x6517   :  { %v6672_v47 = vpack.c.bf16 %v11827_v43, %v11827_v43 }
0x6519   :  { %6674 = vrot.lane.b32.xlu1 %v6672_v47, %s10201_s19 }
0x658b   :  { %v6675_v24 = vpop.permute.xlu1 %6674 }
0x658c   :  { %9470 = vmatmul.mubr.msk.bf16.vlgmr.msra.gmra.mrb[124].mxu1 %vm133_vm7, %v6675_v24 }
0x658d   :  { %9475 = vmatprep.mubr.msk.bf16.mxu1 %vm10207_vm2, %v12329_v0 }
0x665f   :  { %v6713_v34 = vpop.f32.mrb[124].mxu1 }
0x6660   :  { %v11841_v36 = vadd.f32 %v11838_v1, %v6713_v34  ;;  %v9471_v40 = vpop.f32.mrb[125].mxu1 }
0x6661   :  { %v6716_v13 = vpop.f32.mrb[126].mxu1 }
0x6662   :  { %v9472_v23 = vpop.f32.mrb[127].mxu1  ;;  %v6719_v27 = vmul.f32 0.5, %v11841_v36 }
0x6664   :  { %9982 = vtanh.f32 %v6719_v27 }
0x6665   :  { %9984 = vtanh.f32 %v11841_v36 }
0x666e   :  { %v9983_v12 = vpop.eup %9982 }
0x666f   :  { %v6721_v44 = vmul.f32 0.5, %v9983_v12  ;;  %v9985_v56 = vpop.eup %9984 }
0x6671   :  { %v6722_v17 = vadd.f32 0.5, %v6721_v44 }
0x6673   :  { %6726 = vperm.xlu0 %9735, %v6722_v17  }
0x66f2   :  { %v6727_v9 = vpop.permute.xlu0 %6726 }
0x66f3   :  { %v6771_v62 = vmul.f32 %v9985_v56, %v6727_v9  ;;  %v6729_v24 = vmul.f32 %v6727_v9, %v6722_v17 }
0x66f5   :  { %v6779_v54 = vrot.slane %v6771_v62, %v10432_v52  ;;  %v6737_v34 = vrot.slane %v6729_v24, %v10432_v52 }
0x66f7   :  { %v6780_v20 = vcombine.high %v6779_v54, %v6779_v54  ;;  %v6787_v51 = vrot.slane %v6779_v54, %v10432_v52  ;;  %v6738_v40 = vcombine.high %v6737_v34, %v6737_v34  ;;  %v6745_v13 = vrot.slane %v6737_v34, %v10432_v52 }
0x66f9   :  { %v6798_v33 = vrot.slane %v6787_v51, %v10435_v57  ;;  %v6794_v22 = vrot.slane %v6780_v20, %v10432_v52  ;;  %v6755_v23 = vsub.f32 1.0, %v6745_v13  ;;  %v6752_v27 = vrot.slane %v6738_v40, %v10432_v52 }
0x66fb   :  { %6803 = vrot.lane.b32.xlu1 %v6798_v33, %s10213_s14  ;;  %v6802_v47 = vrot.slane %v6794_v22, %v10435_v57  ;;  %v6762_v12 = vrot.slane %v6755_v23, %v10435_v57  ;;  %v6756_v44 = vsub.f32 1.0, %v6752_v27 }
0x66fd   :  { %v6769_v56 = vmul.f32 %v6762_v12, %v11605_v49  ;;  %v6766_v62 = vrot.slane %v6756_v44, %v10435_v57  ;;  %v6866_v44 = vsel %vm97_vm1, %v11841_v36, 0.0 }
0x66ff   :  { %6805 = vrot.lane.b32.xlu1 %v6802_v47, %s10213_s14  ;;  %v6770_v17 = vmul.f32 %v6766_v62, %v11610_v53 }
0x676d   :  { %v6804_v54 = vpop.permute.xlu1 %6803 }
0x676e   :  { %v11858_v20 = vadd.f32 %v6804_v54, %v6769_v56 }
0x6770   :  { %6813 = vrot.lane.b32.xlu0 %v11858_v20, %s10210_s28 }
0x6771   :  { %v6806_v9 = vpop.permute.xlu1 %6805 }
0x6772   :  { %v11863_v51 = vadd.f32 %v6806_v9, %v6770_v17 }
0x6774   :  { %6815 = vrot.lane.b32.xlu1 %v11863_v51, %s10210_s28 }
0x67e2   :  { %v6814_v33 = vpop.permute.xlu0 %6813 }
0x67e3   :  { %v6819_v22 = vsel %vm238_vm5, %v6814_v33, 0.0 }
0x67e4   :  { %6820 = vadd.xlane.f32.xlu0 %v6819_v22 }
0x67e6   :  { %v6816_v49 = vpop.permute.xlu1 %6815 }
0x67e7   :  { %v6822_v47 = vsel %vm238_vm5, %v6816_v49, 0.0 }
0x67e8   :  { %6823 = vadd.xlane.f32.xlu1 %v6822_v47 }
0x6871   :  { %v6821_v24 = vpop.xlane.xlu0 %6820 }
0x6872   :  { %v6825_v34 = vmul.f32 0.125, %v6821_v24 }
0x6874   :  { %v6827_v40 = vsub.f32 %v11858_v20, %v6825_v34 }
0x6875   :  { %v6824_v13 = vpop.xlane.xlu1 %6823 }
0x6876   :  { %v6829_v53 = vmul.f32 %v6827_v40, %v6827_v40  ;;  %v6826_v23 = vmul.f32 0.125, %v6824_v13 }
0x6878   :  { %v6828_v27 = vsub.f32 %v11863_v51, %v6826_v23  ;;  %6833 = vrot.lane.b32.xlu0 %v6829_v53, %s10210_s28 }
0x687a   :  { %v6830_v12 = vmul.f32 %v6828_v27, %v6828_v27 }
0x687c   :  { %6835 = vrot.lane.b32.xlu1 %v6830_v12, %s10210_s28 }
0x6897   :  { %6867 = vadd.xlane.f32.xlu0 %v6866_v44 }
0x68ea   :  { %v6834_v56 = vpop.permute.xlu0 %6833 }
0x68eb   :  { %v6839_v62 = vsel %vm238_vm5, %v6834_v56, 0.0 }
0x68ec   :  { %6840 = vadd.xlane.f32.xlu1 %v6839_v62 }
0x68ee   :  { %v6836_v54 = vpop.permute.xlu1 %6835 }
0x68ef   :  { %v6842_v17 = vsel %vm238_vm5, %v6836_v54, 0.0 }
0x68f0   :  { %6843 = vadd.xlane.f32.xlu0 %v6842_v17 }
0x6924   :  { %v6868_v9 = vpop.xlane.xlu0 %6867 }
0x6925   :  { %v6869_v33 = vmul.f32 0.125, %v6868_v9 }
0x6927   :  { %v6870_v22 = vsub.f32 %v11841_v36, %v6869_v33 }
0x6929   :  { %v6871_v49 = vmul.f32 %v6870_v22, %v6870_v22 }
0x692b   :  { %v6872_v47 = vsel %vm97_vm1, %v6871_v49, 0.0 }
0x692c   :  { %6873 = vadd.xlane.f32.xlu0 %v6872_v47 }
0x6979   :  { %v6841_v24 = vpop.xlane.xlu1 %6840 }
0x697a   :  { %v6845_v34 = vmul.f32 0.125, %v6841_v24 }
0x697c   :  { %v6847_v13 = vadd.f32 1e-05, %v6845_v34 }
0x697d   :  { %v6844_v53 = vpop.xlane.xlu0 %6843 }
0x697e   :  { %9986 = vrsqrt.f32 %v6847_v13  ;;  %v6846_v23 = vmul.f32 0.125, %v6844_v53 }
0x6980   :  { %v6848_v12 = vadd.f32 1e-05, %v6846_v23 }
0x6982   :  { %9988 = vrsqrt.f32 %v6848_v12 }
0x6988   :  { %v9987_v44 = vpop.eup %9986 }
0x6989   :  { %v6851_v56 = vmul.f32 %v9987_v44, %v6827_v40 }
0x698b   :  { %v6853_v62 = vmul.f32 %v6851_v56, %v10470_v63 }
0x698c   :  { %v9989_v54 = vpop.eup %9988 }
0x698d   :  { %v6855_v17 = vadd.f32 %v6853_v62, %v10472_v2  ;;  %v6852_v9 = vmul.f32 %v9989_v54, %v6828_v27 }
0x698f   :  { %v6857_v33 = vpack.c.bf16 %v6855_v17, %v6855_v17  ;;  %v6854_v49 = vmul.f32 %v6852_v9, %v10470_v63 }
0x6991   :  { %6909 = vrot.lane.b32.xlu1 %v6857_v33, %s10210_s28  ;;  %v6856_v47 = vadd.f32 %v6854_v49, %v10472_v2 }
0x6993   :  { %v6858_v24 = vpack.c.bf16 %v6856_v47, %v6856_v47 }
0x6995   :  { %6958 = vrot.lane.b32.xlu0 %v6858_v24, %s10210_s28  ;;  %7135 = vrot.lane.b32.xlu1 %v11841_v36, %s10213_s14 }
0x69b9   :  { %v6874_v40 = vpop.xlane.xlu0 %6873 }
0x69ba   :  { %v6875_v34 = vmul.f32 0.125, %v6874_v40 }
0x69bc   :  { %v6876_v13 = vadd.f32 1e-05, %v6875_v34 }
0x69be   :  { %9990 = vrsqrt.f32 %v6876_v13 }
0x69c8   :  { %v9991_v53 = vpop.eup %9990 }
0x69c9   :  { %v6878_v23 = vmul.f32 %v9991_v53, %v6870_v22 }
0x69cb   :  { %v6879_v27 = vmul.f32 %v6878_v23, %v10408_v25 }
0x69cd   :  { %v6880_v12 = vadd.f32 %v6879_v27, %v10410_v28 }
0x69cf   :  { %v6888_v44 = vrot.slane %v6880_v12, %v10432_v52 }
0x69d1   :  { %v6896_v54 = vrot.slane %v6888_v44, %v10432_v52  ;;  %v6889_v49 = vcombine.high %v6888_v44, %v6888_v44 }
0x69d3   :  { %v6906_v33 = vpack.c.bf16 %v6896_v54, %v6896_v54  ;;  %v6903_v24 = vrot.slane %v6889_v49, %v10432_v52 }
0x69d5   :  { %v6907_v40 = vpack.c.bf16 %v6903_v24, %v6903_v24 }
0x6a03   :  { %v6910_v56 = vpop.permute.xlu1 %6909 }
0x6a04   :  { %v11891_v62 = vsel %vm238_vm5, %v6910_v56, 0 }
0x6a05   :  { %9474 = vmatpush3.bf16.xpose.msra.mxu1 %v11891_v62 }
0x6a06   :  { %9479 = vmatprep.subr.bf16.mxu1 %v12329_v0 }
0x6a07   :  { %v7136_v17 = vpop.permute.xlu1 %7135  ;;  %v6959_v22 = vpop.permute.xlu0 %6958 }
0x6a08   :  { %v7138_v9 = vsel %vm97_vm1, %v7136_v17, 0.0  ;;  %v11898_v47 = vsel %vm238_vm5, %v6959_v22, 0 }
0x6a09   :  { %7139 = vadd.xlane.f32.xlu1 %v7138_v9 }
0x6a0c   :  { %9476 = vmatmul.mubr.msk.bf16.vlgmr.msra.gmra.mrb[128].mxu1 %vm238_vm5, %v6906_v33 }
0x6a0d   :  { %9480 = vmatpush3.bf16.xpose.msra.mxu1 %v11898_v47  ;;  %9481 = vmatprep.mubr.msk.bf16.mxu1 %vm10207_vm2, %v12329_v0 }
0x6a0e   :  { %9485 = vmatprep.subr.bf16.mxu1 %v12329_v0 }
0x6a14   :  { %9482 = vmatmul.mubr.msk.bf16.vlgmr.msra.gmra.mrb[132].mxu1 %vm238_vm5, %v6907_v40 }
0x6a15   :  { %9487 = vmatprep.mubr.msk.bf16.mxu1 %vm10207_vm2, %v12329_v0 }
0x6a96   :  { %v7140_v34 = vpop.xlane.xlu1 %7139 }
0x6a97   :  { %v7141_v13 = vmul.f32 0.125, %v7140_v34 }
0x6a99   :  { %v7142_v53 = vsub.f32 %v11841_v36, %v7141_v13  ;;  %v6860_v36 = vpack.c.bf16 %v11863_v51, %v11863_v51 }
0x6a9b   :  { %v7143_v23 = vmul.f32 %v7142_v53, %v7142_v53 }
0x6a9d   :  { %7145 = vrot.lane.b32.xlu0 %v7143_v23, %s10213_s14 }
0x6adf   :  { %v6951_v27 = vpop.f32.mrb[128].mxu1 }
0x6ae0   :  { %v9477_v12 = vpop.f32.mrb[129].mxu1  ;;  %v7006_v44 = vsel %vm750_vm8, %v6951_v27, -inf }
0x6ae1   :  { %7007 = vmax.xlane.f32.xlu1 %v7006_v44  ;;  %v6954_v56 = vpop.f32.mrb[130].mxu1 }
0x6ae2   :  { %v9478_v54 = vpop.f32.mrb[131].mxu1 }
0x6ae7   :  { %v7000_v17 = vpop.f32.mrb[132].mxu1 }
0x6ae8   :  { %v9483_v9 = vpop.f32.mrb[133].mxu1  ;;  %v7009_v22 = vsel %vm750_vm8, %v7000_v17, -inf }
0x6ae9   :  { %7010 = vmax.xlane.f32.xlu0 %v7009_v22  ;;  %v7003_v33 = vpop.f32.mrb[134].mxu1 }
0x6aea   :  { %v9484_v49 = vpop.f32.mrb[135].mxu1 }
0x6af2   :  { %7078 = vrot.lane.b32.xlu1 %v6860_v36, %s10210_s28 }
0x6b0f   :  { %v7146_v24 = vpop.permute.xlu0 %7145 }
0x6b10   :  { %v7148_v40 = vsel %vm97_vm1, %v7146_v24, 0.0 }
0x6b11   :  { %7149 = vadd.xlane.f32.xlu0 %v7148_v40 }
0x6b6e   :  { %v7008_v34 = vpop.xlane.xlu1 %7007 }
0x6b6f   :  { %v7012_v13 = vsub.f32 %v6951_v27, %v7008_v34  ;;  %v6859_v27 = vpack.c.bf16 %v11858_v20, %v11858_v20 }
0x6b71   :  { %v7014_v23 = vmul.f32 1.442695, %v7012_v13 }
0x6b72   :  { %v7079_v12 = vpop.permute.xlu1 %7078 }
0x6b73   :  { %9992 = vpow2.f32 %v7014_v23  ;;  %9492 = vmatpush3.bf16.msra.mxu0 %v7079_v12 }
0x6b74   :  { %9503 = vmatprep.subr.bf16.mxu0 %v12329_v0 }
0x6b76   :  { %v7011_v44 = vpop.xlane.xlu0 %7010 }
0x6b77   :  { %v7013_v56 = vsub.f32 %v7000_v17, %v7011_v44 }
0x6b79   :  { %v7016_v54 = vmul.f32 1.442695, %v7013_v56 }
0x6b7b   :  { %9994 = vpow2.f32 %v7016_v54 }
0x6b7d   :  { %v9993_v9 = vpop.eup %9992 }
0x6b7e   :  { %v7018_v22 = vsel %vm750_vm8, %v9993_v9, 0.0 }
0x6b7f   :  { %7019 = vadd.xlane.f32.xlu0 %v7018_v22 }
0x6b85   :  { %v9995_v33 = vpop.eup %9994 }
0x6b86   :  { %v7021_v49 = vsel %vm750_vm8, %v9995_v33, 0.0 }
0x6b87   :  { %7022 = vadd.xlane.f32.xlu1 %v7021_v49 }
0x6b95   :  { %7031 = vrot.lane.b32.xlu0 %v6859_v27, %s10210_s28 }
0x6b9e   :  { %v7150_v36 = vpop.xlane.xlu0 %7149 }
0x6b9f   :  { %v7151_v24 = vmul.f32 0.125, %v7150_v36 }
0x6ba1   :  { %v7152_v40 = vadd.f32 1e-05, %v7151_v24 }
0x6ba3   :  { %9996 = vrsqrt.f32 %v7152_v40 }
0x6bad   :  { %v9997_v17 = vpop.eup %9996 }
0x6bae   :  { %v7154_v34 = vmul.f32 %v9997_v17, %v7142_v53 }
0x6bb0   :  { %v7155_v13 = vmul.f32 %v7154_v34, %v10470_v63 }
0x6bb2   :  { %v7156_v23 = vadd.f32 %v7155_v13, %v10472_v2 }
0x6bb4   :  { %v7164_v44 = vrot.slane %v7156_v23, %v10432_v52 }
0x6bb6   :  { %v7165_v56 = vcombine.high %v7164_v44, %v7164_v44  ;;  %v7172_v49 = vrot.slane %v7164_v44, %v10432_v52 }
0x6bb8   :  { %v7179_v54 = vrot.slane %v7165_v56, %v10432_v52  ;;  %v7182_v27 = vpack.c.bf16 %v7172_v49, %v7172_v49 }
0x6bba   :  { %v7183_v22 = vpack.c.bf16 %v7179_v54, %v7179_v54 }
0x6bbc   :  { %7231 = vrot.lane.b32.xlu1 %v7183_v22, %s10213_s14 }
0x6bc0   :  { %7185 = vrot.lane.b32.xlu1 %v7182_v27, %s10213_s14 }
0x6c0c   :  { %v7020_v36 = vpop.xlane.xlu0 %7019 }
0x6c0d   :  { %9998 = vrcp.f32 %v7020_v36 }
0x6c10   :  { %v7032_v53 = vpop.permute.xlu0 %7031 }
0x6c11   :  { %9486 = vmatpush3.bf16.msra.mxu1 %v7032_v53 }
0x6c12   :  { %9497 = vmatprep.subr.bf16.mxu1 %v12329_v0 }
0x6c14   :  { %v7023_v24 = vpop.xlane.xlu1 %7022 }
0x6c15   :  { %10000 = vrcp.f32 %v7023_v24 }
0x6c17   :  { %v9999_v40 = vpop.eup %9998 }
0x6c18   :  { %v7026_v17 = vmul.f32 %v9999_v40, %v9993_v9 }
0x6c1a   :  { %v7028_v34 = vpack.c.bf16 %v7026_v17, %v7026_v17 }
0x6c1c   :  { %9488 = vmatmul.mubr.msk.bf16.vlgmr.msra.gmra.mrb[136].mxu1 %vm183_vm4, %v7028_v34 }
0x6c1d   :  { %9498 = vmatpush3.bf16.xpose.msra.mxu1 %v11891_v62  ;;  %9499 = vmatprep.mubr.msk.bf16.mxu1 %vm10207_vm2, %v12329_v0 }
0x6c1e   :  { %9509 = vmatprep.subr.bf16.mxu1 %v12329_v0 }
0x6c1f   :  { %v10001_v13 = vpop.eup %10000 }
0x6c20   :  { %v7027_v23 = vmul.f32 %v10001_v13, %v9995_v33 }
0x6c22   :  { %v7029_v44 = vpack.c.bf16 %v7027_v23, %v7027_v23 }
0x6c24   :  { %9494 = vmatmul.mubr.msk.bf16.vlgmr.msra.gmra.mrb[128].mxu0 %vm183_vm4, %v7029_v44 }
0x6c25   :  { %9504 = vmatpush3.bf16.xpose.msra.mxu0 %v11898_v47  ;;  %9505 = vmatprep.mubr.msk.bf16.mxu0 %vm10207_vm2, %v12329_v0 }
0x6c26   :  { %9515 = vmatprep.subr.bf16.mxu0 %v12329_v0 }
0x6c2e   :  { %v7232_v9 = vpop.permute.xlu1 %7231 }
0x6c2f   :  { %9506 = vmatmul.mubr.msk.bf16.vlgmr.msra.gmra.mrb[132].mxu0 %vm238_vm5, %v7232_v9 }
0x6c30   :  { %9516 = vmatpush3.bf16.msra.mxu0 %v7079_v12  ;;  %9517 = vmatprep.mubr.msk.bf16.mxu0 %vm10207_vm2, %v12329_v0 }
0x6c31   :  { %9547 = vmatprep.subr.bf16.mxu0 %v12329_v0 }
0x6c32   :  { %v7186_v62 = vpop.permute.xlu1 %7185 }
0x6c33   :  { %9500 = vmatmul.mubr.msk.bf16.vlgmr.msra.gmra.mrb[140].mxu1 %vm238_vm5, %v7186_v62 }
0x6c34   :  { %9510 = vmatpush3.bf16.msra.mxu1 %v7032_v53  ;;  %9511 = vmatprep.mubr.msk.bf16.mxu1 %vm10207_vm2, %v12329_v0 }
0x6c35   :  { %9521 = vmatprep.subr.bf16.mxu1 %v12329_v0 }
0x6cef   :  { %v11949_v47 = vpop.f32.mrb[136].mxu1 }
0x6cf0   :  { %v9489_v33 = vpop.f32.mrb[137].mxu1 }
0x6cf1   :  { %v7074_v56 = vpop.f32.mrb[138].mxu1 }
0x6cf2   :  { %v9490_v54 = vpop.f32.mrb[139].mxu1  ;;  %v7397_v56 = vld [vmem:[#allocation3 + $0xe] sm:$0x3] }
0x6cf3   :  { %v7398_v54 = vsel %vm81_vm0, %v7397_v56, 0.0 }
0x6cf7   :  { %v11951_v12 = vpop.f32.mrb[128].mxu0 }
0x6cf8   :  { %v7128_v22 = vrot.slane %v11951_v12, 7  ;;  %v9495_v49 = vpop.f32.mrb[129].mxu0 }
0x6cf9   :  { %v7121_v27 = vpop.f32.mrb[130].mxu0 }
0x6cfa   :  { %v9496_v36 = vpop.f32.mrb[131].mxu0  ;;  %v11956_v53 = vsel %vm874_vm9, %v7128_v22, %v11949_v47 }
0x6d02   :  { %v7270_v24 = vpop.f32.mrb[132].mxu0 }
0x6d03   :  { %v9507_v40 = vpop.f32.mrb[133].mxu0  ;;  %v7279_v17 = vsel %vm750_vm8, %v7270_v24, -inf }
0x6d04   :  { %7280 = vmax.xlane.f32.xlu0 %v7279_v17  ;;  %v7273_v34 = vpop.f32.mrb[134].mxu0 }
0x6d05   :  { %v9508_v13 = vpop.f32.mrb[135].mxu0 }
0x6d06   :  { %v7224_v23 = vpop.f32.mrb[140].mxu1 }
0x6d07   :  { %v9501_v44 = vpop.f32.mrb[141].mxu1  ;;  %v7276_v9 = vsel %vm750_vm8, %v7224_v23, -inf }
0x6d08   :  { %7277 = vmax.xlane.f32.xlu1 %v7276_v9  ;;  %v7227_v62 = vpop.f32.mrb[142].mxu1 }
0x6d09   :  { %v9502_v33 = vpop.f32.mrb[143].mxu1  ;;  %v7402_v62 = vsel %vm97_vm1, %v11956_v53, 0.0 }
0x6d0c   :  { %7399 = vadd.xlane.f32.xlu1 %v7398_v54 }
0x6d91   :  { %v7281_v22 = vpop.xlane.xlu0 %7280 }
0x6d92   :  { %v7283_v49 = vsub.f32 %v7270_v24, %v7281_v22 }
0x6d94   :  { %v7286_v27 = vmul.f32 1.442695, %v7283_v49 }
0x6d95   :  { %v7278_v36 = vpop.xlane.xlu1 %7277 }
0x6d96   :  { %10002 = vpow2.f32 %v7286_v27  ;;  %v7282_v40 = vsub.f32 %v7224_v23, %v7278_v36 }
0x6d98   :  { %v7284_v17 = vmul.f32 1.442695, %v7282_v40 }
0x6d9a   :  { %10004 = vpow2.f32 %v7284_v17 }
0x6da0   :  { %v10003_v34 = vpop.eup %10002 }
0x6da1   :  { %v7291_v13 = vsel %vm750_vm8, %v10003_v34, 0.0 }
0x6da2   :  { %7292 = vadd.xlane.f32.xlu0 %v7291_v13 }
0x6da4   :  { %v10005_v44 = vpop.eup %10004 }
0x6da5   :  { %v7288_v9 = vsel %vm750_vm8, %v10005_v44, 0.0 }
0x6da6   :  { %7289 = vadd.xlane.f32.xlu0 %v7288_v9 }
0x6daa   :  { %7403 = vadd.xlane.f32.xlu0 %v7402_v62 }
0x6e2f   :  { %v7293_v33 = vpop.xlane.xlu0 %7292 }
0x6e30   :  { %10006 = vrcp.f32 %v7293_v33 }
0x6e33   :  { %v7290_v24 = vpop.xlane.xlu0 %7289 }
0x6e34   :  { %10008 = vrcp.f32 %v7290_v24 }
0x6e37   :  { %v7404_v24 = vpop.xlane.xlu0 %7403 }
0x6e3a   :  { %v10007_v54 = vpop.eup %10006 }
0x6e3b   :  { %v7297_v23 = vmul.f32 %v10007_v54, %v10003_v34 }
0x6e3d   :  { %v7299_v22 = vpack.c.bf16 %v7297_v23, %v7297_v23 }
0x6e3e   :  { %v10009_v49 = vpop.eup %10008 }
0x6e3f   :  { %v7296_v27 = vmul.f32 %v10009_v49, %v10005_v44  ;;  %9518 = vmatmul.mubr.msk.bf16.vlgmr.msra.gmra.mrb[136].mxu0 %vm183_vm4, %v7299_v22 }
0x6e40   :  { %9548 = vmatpush3.bf16.msra.mxu0 %v11716_v35  ;;  %9551 = vmatprep.mubr.msk.bf16.mxu0 %vm10207_vm2, %v12329_v0 }
0x6e41   :  { %v7298_v36 = vpack.c.bf16 %v7296_v27, %v7296_v27  ;;  %9549 = vmatprep.subr.bf16.mxu0 %v12329_v0 }
0x6e43   :  { %9512 = vmatmul.mubr.msk.bf16.vlgmr.msra.gmra.mrb[144].mxu1 %vm183_vm4, %v7298_v36 }
0x6e44   :  { %9522 = vmatpush3.bf16.msra.mxu1 %v11726_v8  ;;  %9525 = vmatprep.mubr.msk.bf16.mxu1 %vm10207_vm2, %v12329_v0 }
0x6e45   :  { %9523 = vmatprep.subr.bf16.mxu1 %v12329_v0  ;;  %9550 = vmatpush3.bf16.msra.mxu0 %v11732_v5 }
0x6e46   :  { %9555 = vmatprep.subr.bf16.mxu0 %v12329_v0 }
0x6e48   :  { %9524 = vmatpush3.bf16.msra.mxu1 %v11739_v58  ;;  %v7400_v58 = vpop.xlane.xlu1 %7399 }
0x6e49   :  { %9529 = vmatprep.subr.bf16.mxu1 %v12329_v0  ;;  %v7405_v54 = vadd.f32 %v7404_v24, %v7400_v58 }
0x6f12   :  { %v7380_v35 = vpop.f32.mrb[136].mxu0 }
0x6f13   :  { %v9519_v40 = vpop.f32.mrb[137].mxu0  ;;  %v7390_v34 = vrot.slane %v7380_v35, 7 }
0x6f14   :  { %v7383_v17 = vpop.f32.mrb[138].mxu0 }
0x6f15   :  { %v9520_v13 = vpop.f32.mrb[139].mxu0 }
0x6f16   :  { %v7337_v44 = vpop.f32.mrb[144].mxu1 }
0x6f17   :  { %v11980_v8 = vsel %vm874_vm9, %v7390_v34, %v7337_v44  ;;  %v9513_v9 = vpop.f32.mrb[145].mxu1 }
0x6f18   :  { %12332 = vst [vmem:[#allocation16_spill] sm:$0xff] %v11980_v8  ;;  %v7340_v62 = vpop.f32.mrb[146].mxu1  ;;  %v7407_v5 = vsel %vm97_vm1, %v11980_v8, 0.0 }
0x6f19   :  { %7408 = vadd.xlane.f32.xlu1 %v7407_v5  ;;  %v9514_v33 = vpop.f32.mrb[147].mxu1 }
0x6fa6   :  { %v7409_v23 = vpop.xlane.xlu1 %7408 }
0x6fa7   :  { %v7410_v22 = vadd.f32 %v7409_v23, %v7405_v54 }
0x6fa9   :  { %v7411_v49 = vmul.f32 0.03125, %v7410_v22 }
0x6fab   :  { %v7414_v27 = vrot.slane %v7411_v49, 1  ;;  %v7412_v36 = vsub.f32 %v7397_v56, %v7411_v49  ;;  %v7417_v40 = vsub.f32 %v11949_v47, %v7411_v49  ;;  %v7419_v17 = vsub.f32 %v7337_v44, %v7411_v49 }
0x6fad   :  { %v7421_v34 = vmul.f32 %v7412_v36, %v7412_v36  ;;  %v7418_v13 = vsub.f32 %v11951_v12, %v7414_v27  ;;  %v7420_v9 = vsub.f32 %v7380_v35, %v7414_v27  ;;  %v7425_v33 = vmul.f32 %v7417_v40, %v7417_v40 }
0x6fae   :  { %v7436_v24 = vmul.f32 %v7419_v17, %v7419_v17  ;;  %v7470_v12 = vpack.c.bf16 %v11817_v6, %v11817_v6 }
0x6faf   :  { %v7422_v62 = vsel %vm81_vm0, %v7421_v34, 0.0  ;;  %v7426_v0 = vmul.f32 %v7418_v13, %v7418_v13  ;;  %v7437_v5 = vmul.f32 %v7420_v9, %v7420_v9  ;;  %v12333_v34 = vmov 0.0  }
0x6fb0   :  { %7423 = vadd.xlane.f32.xlu0 %v7422_v62 }
0x6fb1   :  { %v7429_v8 = vrot.slane %v7426_v0, 7  ;;  %v7440_v58 = vrot.slane %v7437_v5, 7 }
0x6fb3   :  { %v7430_v54 = vsel %vm874_vm9, %v7429_v8, %v7425_v33  ;;  %v7441_v56 = vsel %vm874_vm9, %v7440_v58, %v7436_v24 }
0x6fb4   :  { %v7432_v47 = vsel %vm97_vm1, %v7430_v54, 0.0  ;;  %v7443_v44 = vsel %vm97_vm1, %v7441_v56, 0.0 }
0x6fb5   :  { %7433 = vadd.xlane.f32.xlu1 %v7432_v47  ;;  %7444 = vadd.xlane.f32.xlu0 %v7443_v44 }
0x6fc6   :  { %7472 = vrot.lane.b32.xlu1 %v7470_v12, %s10201_s19 }
0x703d   :  { %v7424_v35 = vpop.xlane.xlu0 %7423 }
0x7042   :  { %v7434_v23 = vpop.xlane.xlu1 %7433  ;;  %v7445_v22 = vpop.xlane.xlu0 %7444 }
0x7043   :  { %v7435_v0 = vadd.f32 %v7434_v23, %v7424_v35 }
0x7045   :  { %v7446_v49 = vadd.f32 %v7445_v22, %v7435_v0 }
0x7046   :  { %v7473_v27 = vpop.permute.xlu1 %7472 }
0x7047   :  { %v7447_v8 = vmul.f32 0.03125, %v7446_v49  ;;  %9526 = vmatmul.mubr.msk.bf16.vlgmr.msra.gmra.mrb[148].mxu1 %vm133_vm7, %v7473_v27 }
0x7048   :  { %9530 = vmatpush3.bf16.msra.mxu1 %v11763_v45  ;;  %9531 = vmatprep.mubr.msk.bf16.mxu1 %vm10207_vm2, %v12333_v34 }
0x7049   :  { %v7448_v62 = vadd.f32 1e-05, %v7447_v8  ;;  %9535 = vmatprep.subr.bf16.mxu1 %v12333_v34 }
0x704b   :  { %10010 = vrsqrt.f32 %v7448_v62 }
0x7055   :  { %v10011_v6 = vpop.eup %10010 }
0x7056   :  { %v7450_v5 = vmul.f32 %v10011_v6, %v7412_v36  ;;  %v7454_v33 = vrot.slane %v10011_v6, 1  ;;  %v7457_v24 = vmul.f32 %v10011_v6, %v7417_v40  ;;  %v7463_v40 = vmul.f32 %v10011_v6, %v7419_v17 }
0x7058   :  { %v7451_v58 = vmul.f32 %v11772_v48, %v7450_v5  ;;  %v7458_v54 = vmul.f32 %v7454_v33, %v7418_v13  ;;  %v7459_v56 = vmul.f32 %v7457_v24, %v10604_v7  ;;  %v7464_v47 = vmul.f32 %v7454_v33, %v7420_v9 }
0x705a   :  { %v7452_v44 = vadd.f32 %v11779_v41, %v7451_v58  ;;  %v7460_v45 = vmul.f32 %v7458_v54, %v10604_v7  ;;  %v7461_v12 = vadd.f32 %v7459_v56, %v10602_v18  ;;  %v7466_v0 = vmul.f32 %v7464_v47, %v10611_v16 }
0x705c   :  { %v7469_v35 = vpack.c.bf16 %v7452_v44, %v7452_v44  ;;  %v7462_v23 = vadd.f32 %v7460_v45, %v10602_v18  ;;  %v7561_v48 = vpack.c.bf16 %v7461_v12, %v7461_v12  ;;  %v7468_v41 = vadd.f32 %v7466_v0, %v10619_v32 }
0x705d   :  { %v7465_v18 = vmul.f32 %v7463_v40, %v10611_v16 }
0x705e   :  { %9532 = vmatmul.mubr.msk.bf16.vlgmr.msra.gmra.mrb[148].mxu1 %vm183_vm4, %v7469_v35  ;;  %v7562_v36 = vpack.c.bf16 %v7462_v23, %v7462_v23  ;;  %v7565_v9 = vunpack.c.l.b16 %v7561_v48  ;;  %v7615_v49 = vpack.c.bf16 %v7468_v41, %v7468_v41 }
0x705f   :  { %9536 = vmatpush3.bf16.msra.mxu1 %v10339_v19  ;;  %9537 = vmatprep.mubr.msk.bf16.mxu1 %vm10207_vm2, %v12333_v34  ;;  %v7467_v27 = vadd.f32 %v7465_v18, %v10619_v32 }
0x7060   :  { %9541 = vmatprep.subr.bf16.mxu1 %v12333_v34  ;;  %v7566_v7 = vunpack.c.l.b16 %v7562_v36  ;;  %v7619_v8 = vunpack.c.l.b16 %v7615_v49 }
0x7061   :  { %v7614_v17 = vpack.c.bf16 %v7467_v27, %v7467_v27 }
0x7062   :  { %v7567_v13 = vrot.slane %v7566_v7, 7  ;;  %v7620_v62 = vrot.slane %v7619_v8, 7 }
0x7063   :  { %v7618_v6 = vunpack.c.l.b16 %v7614_v17 }
0x7064   :  { %v7568_v22 = vsel %vm874_vm9, %v7567_v13, %v7565_v9 }
0x7065   :  { %v7569_v19 = vpack.c.b16 %v7568_v22, %v7568_v22  ;;  %v7621_v16 = vsel %vm874_vm9, %v7620_v62, %v7618_v6 }
0x7066   :  { %v7622_v5 = vpack.c.b16 %v7621_v16, %v7621_v16 }
0x706a   :  { %9538 = vmatmul.mubr.msk.bf16.vlgmr.msra.gmra.mrb[148].mxu1 %vm238_vm5, %v7569_v19 }
0x706b   :  { %9542 = vmatpush3.bf16.msra.mxu1 %v10366_v42  ;;  %9543 = vmatprep.mubr.msk.bf16.mxu1 %vm10207_vm2, %v12333_v34 }
0x706c   :  { %9573 = vmatprep.subr.bf16.mxu1 %v12333_v34 }
0x7076   :  { %9544 = vmatmul.mubr.msk.bf16.vlgmr.msra.gmra.mrb[148].mxu1 %vm238_vm5, %v7622_v5 }
0x7077   :  { %9575 = vmatprep.mubr.msk.bf16.mxu1 %vm10207_vm2, %v12333_v34 }
0x7149   :  { %v7660_v32 = vpop.f32.mrb[148].mxu1 }
0x714a   :  { %v9622_v33 = vadd.f32 %v11807_v59, %v7660_v32  ;;  %v9545_v42 = vpop.f32.mrb[149].mxu1 }
0x714b   :  { %v7663_v24 = vpop.f32.mrb[150].mxu1 }
0x714c   :  { %10012 = vtanh.f32 %v9622_v33  ;;  %v9546_v58 = vpop.f32.mrb[151].mxu1  ;;  %v7667_v56 = vmul.f32 0.5, %v9622_v33 }
0x714e   :  { %10014 = vtanh.f32 %v7667_v56 }
0x7156   :  { %v10013_v54 = vpop.eup %10012 }
0x7157   :  { %7674 = vrot.lane.b32.xlu0 %v10013_v54, %s10204_s0 }
0x7158   :  { %v10015_v47 = vpop.eup %10014 }
0x7159   :  { %v7669_v44 = vmul.f32 0.5, %v10015_v47 }
0x715b   :  { %v7670_v45 = vadd.f32 0.5, %v7669_v44 }
0x715d   :  { %v7672_v23 = vmul.f32 %v7670_v45, %v11813_v3 }
0x71c9   :  { %v7675_v12 = vpop.permute.xlu0 %7674 }
0x71ca   :  { %v7677_v35 = vmul.f32 %v7675_v12, %v7670_v45 }
0x71cc   :  { %7679 = vrot.lane.b32.xlu1 %v7677_v35, %s10201_s19 }
0x723e   :  { %v7680_v0 = vpop.permute.xlu1 %7679 }
0x723f   :  { %v12028_v59 = vadd.f32 %v7680_v0, %v7672_v23 }
0x7241   :  { %10016 = vtanh.f32 %v12028_v59 }
0x724b   :  { %v10017_v36 = vpop.eup %10016 }
0x724c   :  { %7685 = vrot.lane.b32.xlu1 %v10017_v36, %s10204_s0 }
0x72be   :  { %v7686_v48 = vpop.permute.xlu1 %7685 }
0x72bf   :  { %v7688_v40 = vmul.f32 %v7686_v48, %v7670_v45 }
0x72c1   :  { %7690 = vrot.lane.b32.xlu0 %v7688_v40, %s10201_s19 }
0x7333   :  { %v7691_v7 = vpop.permute.xlu0 %7690 }
0x7334   :  { %8440 = vst.msk [vmem:[#allocation9] sm:$0x3] %vm362_vm6, %v7691_v7  ;;  %v7693_v41 = vsel %vm362_vm6, %v7691_v7, 0.0 }
0x7335   :  { %7694 = vadd.xlane.f32.xlu1 %v7693_v41 }
0x73c2   :  { %v7695_v13 = vpop.xlane.xlu1 %7694 }
0x73c3   :  { %v7696_v3 = vmul.f32 0.03125, %v7695_v13 }
0x73c5   :  { %v7697_v9 = vsub.f32 %v7688_v40, %v7696_v3 }
0x73c7   :  { %v7698_v18 = vmul.f32 %v7697_v9, %v7697_v9 }
0x73c9   :  { %7700 = vrot.lane.b32.xlu0 %v7698_v18, %s10201_s19 }
0x743b   :  { %v7701_v22 = vpop.permute.xlu0 %7700 }
0x743c   :  { %v7703_v49 = vsel %vm362_vm6, %v7701_v22, 0.0 }
0x743d   :  { %7704 = vadd.xlane.f32.xlu0 %v7703_v49 }
0x74ca   :  { %v7705_v27 = vpop.xlane.xlu0 %7704 }
0x74cb   :  { %v7706_v19 = vmul.f32 0.03125, %v7705_v27 }
0x74cd   :  { %v7707_v8 = vadd.f32 1e-05, %v7706_v19 }
0x74cf   :  { %10018 = vrsqrt.f32 %v7707_v8 }
0x74d9   :  { %v10019_v17 = vpop.eup %10018 }
0x74da   :  { %v7709_v62 = vmul.f32 %v10019_v17, %v7697_v9 }
0x74dc   :  { %v7710_v6 = vmul.f32 %v7709_v62, %v10408_v25 }
0x74de   :  { %v12039_v16 = vadd.f32 %v7710_v6, %v10410_v28 }
0x74e0   :  { %v7712_v5 = vpack.c.bf16 %v12039_v16, %v12039_v16 }
0x74e2   :  { %7714 = vrot.lane.b32.xlu1 %v7712_v5, %s10201_s19 }
0x7554   :  { %v7715_v32 = vpop.permute.xlu1 %7714 }
0x7555   :  { %9552 = vmatmul.mubr.msk.bf16.vlgmr.msra.gmra.mrb[140].mxu0 %vm133_vm7, %v7715_v32 }
0x7556   :  { %9557 = vmatprep.mubr.msk.bf16.mxu0 %vm10207_vm2, %v12333_v34 }
0x7628   :  { %v7753_v33 = vpop.f32.mrb[140].mxu0 }
0x7629   :  { %v12048_v42 = vadd.f32 %v11838_v1, %v7753_v33  ;;  %v9553_v24 = vpop.f32.mrb[141].mxu0 }
0x762a   :  { %v7756_v58 = vpop.f32.mrb[142].mxu0 }
0x762b   :  { %v9554_v54 = vpop.f32.mrb[143].mxu0  ;;  %v7759_v56 = vmul.f32 0.5, %v12048_v42 }
0x762d   :  { %10020 = vtanh.f32 %v7759_v56 }
0x762e   :  { %10022 = vtanh.f32 %v12048_v42 }
0x7637   :  { %v10021_v47 = vpop.eup %10020 }
0x7638   :  { %v7761_v44 = vmul.f32 0.5, %v10021_v47  ;;  %v10023_v12 = vpop.eup %10022 }
0x763a   :  { %v7762_v45 = vadd.f32 0.5, %v7761_v44 }
0x763c   :  { %7766 = vperm.xlu0 %9735, %v7762_v45  }
0x76bb   :  { %v7767_v35 = vpop.permute.xlu0 %7766 }
0x76bc   :  { %v7811_v23 = vmul.f32 %v10023_v12, %v7767_v35  ;;  %v7769_v41 = vmul.f32 %v7767_v35, %v7762_v45  ;;  %v7906_v35 = vsel %vm97_vm1, %v12048_v42, 0.0 }
0x76be   :  { %v7819_v0 = vrot.slane %v7811_v23, %v10432_v52  ;;  %v7777_v13 = vrot.slane %v7769_v41, %v10432_v52 }
0x76c0   :  { %v7820_v36 = vcombine.high %v7819_v0, %v7819_v0  ;;  %v7827_v1 = vrot.slane %v7819_v0, %v10432_v52  ;;  %v7778_v3 = vcombine.high %v7777_v13, %v7777_v13  ;;  %v7785_v9 = vrot.slane %v7777_v13, %v10432_v52 }
0x76c2   :  { %v7834_v48 = vrot.slane %v7820_v36, %v10432_v52  ;;  %v7838_v40 = vrot.slane %v7827_v1, %v10435_v57  ;;  %v7795_v18 = vsub.f32 1.0, %v7785_v9  ;;  %v7792_v22 = vrot.slane %v7778_v3, %v10432_v52 }
0x76c4   :  { %7843 = vrot.lane.b32.xlu1 %v7838_v40, %s10213_s14  ;;  %v7842_v7 = vrot.slane %v7834_v48, %v10435_v57  ;;  %v7802_v49 = vrot.slane %v7795_v18, %v10435_v57  ;;  %v7796_v27 = vsub.f32 1.0, %v7792_v22 }
0x76c6   :  { %v7809_v19 = vmul.f32 %v7802_v49, %v11858_v20  ;;  %v7806_v8 = vrot.slane %v7796_v27, %v10435_v57 }
0x76c8   :  { %7845 = vrot.lane.b32.xlu1 %v7842_v7, %s10213_s14  ;;  %v7810_v6 = vmul.f32 %v7806_v8, %v11863_v51 }
0x7736   :  { %v7844_v17 = vpop.permute.xlu1 %7843 }
0x7737   :  { %v12065_v62 = vadd.f32 %v7844_v17, %v7809_v19 }
0x7739   :  { %7853 = vrot.lane.b32.xlu0 %v12065_v62, %s10210_s28 }
0x773a   :  { %v7846_v5 = vpop.permute.xlu1 %7845 }
0x773b   :  { %v12070_v32 = vadd.f32 %v7846_v5, %v7810_v6 }
0x773d   :  { %7855 = vrot.lane.b32.xlu1 %v12070_v32, %s10210_s28 }
0x77ab   :  { %v7854_v33 = vpop.permute.xlu0 %7853 }
0x77ac   :  { %8436 = vst.msk [vmem:[%s12326_s7] sm:$0xff] %vm238_vm5, %v7854_v33  ;;  %8437 = vst.msk [vmem:[%s12326_s7 + $0x8] sm:$0xff] %vm238_vm5, %v7854_v33  ;;  %v7859_v57 = vsel %vm238_vm5, %v7854_v33, 0.0 }
0x77ad   :  { %7860 = vadd.xlane.f32.xlu0 %v7859_v57 }
0x77af   :  { %v7856_v20 = vpop.permute.xlu1 %7855 }
0x77b0   :  { %8438 = vst.msk [vmem:[%s12326_s7 + $0x10] sm:$0xff] %vm238_vm5, %v7856_v20  ;;  %8439 = vst.msk [vmem:[%s12326_s7 + $0x18] sm:$0xff] %vm238_vm5, %v7856_v20  ;;  %v7862_v51 = vsel %vm238_vm5, %v7856_v20, 0.0  ;;  %s10215_s7 = smov 40  }
0x77b1   :  { %7863 = vadd.xlane.f32.xlu1 %v7862_v51 }
0x783a   :  { %v7861_v24 = vpop.xlane.xlu0 %7860 }
0x783b   :  { %v7865_v58 = vmul.f32 0.125, %v7861_v24 }
0x783d   :  { %v7867_v54 = vsub.f32 %v12065_v62, %v7865_v58 }
0x783e   :  { %v7864_v56 = vpop.xlane.xlu1 %7863 }
0x783f   :  { %v7869_v47 = vmul.f32 %v7867_v54, %v7867_v54  ;;  %v7866_v44 = vmul.f32 0.125, %v7864_v56 }
0x7841   :  { %v7868_v45 = vsub.f32 %v12070_v32, %v7866_v44  ;;  %7873 = vrot.lane.b32.xlu0 %v7869_v47, %s10210_s28 }
0x7843   :  { %v7870_v12 = vmul.f32 %v7868_v45, %v7868_v45 }
0x7845   :  { %7875 = vrot.lane.b32.xlu1 %v7870_v12, %s10210_s28 }
0x7860   :  { %7907 = vadd.xlane.f32.xlu0 %v7906_v35 }
0x78b3   :  { %v7874_v23 = vpop.permute.xlu0 %7873 }
0x78b4   :  { %v7879_v0 = vsel %vm238_vm5, %v7874_v23, 0.0 }
0x78b5   :  { %7880 = vadd.xlane.f32.xlu1 %v7879_v0 }
0x78b7   :  { %v7876_v36 = vpop.permute.xlu1 %7875 }
0x78b8   :  { %v7882_v1 = vsel %vm238_vm5, %v7876_v36, 0.0 }
0x78b9   :  { %7883 = vadd.xlane.f32.xlu0 %v7882_v1 }
0x78ed   :  { %v7908_v48 = vpop.xlane.xlu0 %7907 }
0x78ee   :  { %v7909_v40 = vmul.f32 0.125, %v7908_v48 }
0x78f0   :  { %v7910_v7 = vsub.f32 %v12048_v42, %v7909_v40 }
0x78f2   :  { %v7911_v41 = vmul.f32 %v7910_v7, %v7910_v7 }
0x78f4   :  { %v7912_v13 = vsel %vm97_vm1, %v7911_v41, 0.0 }
0x78f5   :  { %7913 = vadd.xlane.f32.xlu0 %v7912_v13 }
0x7942   :  { %v7881_v3 = vpop.xlane.xlu1 %7880 }
0x7943   :  { %v7885_v9 = vmul.f32 0.125, %v7881_v3 }
0x7945   :  { %v7887_v18 = vadd.f32 1e-05, %v7885_v9 }
0x7946   :  { %v7884_v22 = vpop.xlane.xlu0 %7883 }
0x7947   :  { %10024 = vrsqrt.f32 %v7887_v18  ;;  %v7886_v49 = vmul.f32 0.125, %v7884_v22 }
0x7949   :  { %v7888_v27 = vadd.f32 1e-05, %v7886_v49 }
0x794b   :  { %10026 = vrsqrt.f32 %v7888_v27 }
0x7951   :  { %v10025_v19 = vpop.eup %10024 }
0x7952   :  { %v7891_v8 = vmul.f32 %v10025_v19, %v7867_v54 }
0x7954   :  { %v7893_v17 = vmul.f32 %v7891_v8, %v10470_v63 }
0x7955   :  { %v10027_v6 = vpop.eup %10026 }
0x7956   :  { %v7895_v5 = vadd.f32 %v7893_v17, %v10472_v2  ;;  %v7892_v33 = vmul.f32 %v10027_v6, %v7868_v45 }
0x7958   :  { %v7897_v57 = vpack.c.bf16 %v7895_v5, %v7895_v5  ;;  %v7894_v20 = vmul.f32 %v7892_v33, %v10470_v63 }
0x795a   :  { %7949 = vrot.lane.b32.xlu1 %v7897_v57, %s10210_s28  ;;  %v7896_v51 = vadd.f32 %v7894_v20, %v10472_v2 }
0x795c   :  { %v7898_v24 = vpack.c.bf16 %v7896_v51, %v7896_v51 }
0x795e   :  { %7998 = vrot.lane.b32.xlu0 %v7898_v24, %s10210_s28  ;;  %8175 = vrot.lane.b32.xlu1 %v12048_v42, %s10213_s14 }
0x7982   :  { %v7914_v58 = vpop.xlane.xlu0 %7913 }
0x7983   :  { %v7915_v54 = vmul.f32 0.125, %v7914_v58 }
0x7985   :  { %v7916_v56 = vadd.f32 1e-05, %v7915_v54 }
0x7987   :  { %10028 = vrsqrt.f32 %v7916_v56 }
0x7991   :  { %v10029_v47 = vpop.eup %10028 }
0x7992   :  { %v7918_v44 = vmul.f32 %v10029_v47, %v7910_v7 }
0x7994   :  { %v7919_v45 = vmul.f32 %v7918_v44, %v10408_v25 }
0x7996   :  { %v7920_v12 = vadd.f32 %v7919_v45, %v10410_v28 }
0x7998   :  { %v7928_v35 = vrot.slane %v7920_v12, %v10432_v52 }
0x799a   :  { %v7936_v36 = vrot.slane %v7928_v35, %v10432_v52  ;;  %v7929_v7 = vcombine.high %v7928_v35, %v7928_v35 }
0x799c   :  { %v7946_v25 = vpack.c.bf16 %v7936_v36, %v7936_v36  ;;  %v7943_v41 = vrot.slane %v7929_v7, %v10432_v52 }
0x799e   :  { %v7947_v13 = vpack.c.bf16 %v7943_v41, %v7943_v41 }
0x79cc   :  { %v7950_v23 = vpop.permute.xlu1 %7949 }
0x79cd   :  { %v12114_v0 = vsel %vm238_vm5, %v7950_v23, 0 }
0x79ce   :  { %9556 = vmatpush3.bf16.xpose.msra.mxu0 %v12114_v0 }
0x79cf   :  { %9561 = vmatprep.subr.bf16.mxu0 %v12333_v34 }
0x79d0   :  { %v8176_v1 = vpop.permute.xlu1 %8175  ;;  %v7999_v40 = vpop.permute.xlu0 %7998 }
0x79d1   :  { %v8178_v48 = vsel %vm97_vm1, %v8176_v1, 0.0  ;;  %v12121_v28 = vsel %vm238_vm5, %v7999_v40, 0  ;;  %v7899_v1 = vpack.c.bf16 %v12065_v62, %v12065_v62 }
0x79d2   :  { %8179 = vadd.xlane.f32.xlu1 %v8178_v48 }
0x79d5   :  { %9558 = vmatmul.mubr.msk.bf16.vlgmr.msra.gmra.mrb[144].mxu0 %vm238_vm5, %v7946_v25 }
0x79d6   :  { %9562 = vmatpush3.bf16.xpose.msra.mxu0 %v12121_v28  ;;  %9563 = vmatprep.mubr.msk.bf16.mxu0 %vm10207_vm2, %v12333_v34 }
0x79d7   :  { %9567 = vmatprep.subr.bf16.mxu0 %v12333_v34 }
0x79dd   :  { %9564 = vmatmul.mubr.msk.bf16.vlgmr.msra.gmra.mrb[148].mxu0 %vm238_vm5, %v7947_v13 }
0x79de   :  { %9569 = vmatprep.mubr.msk.bf16.mxu0 %vm10207_vm2, %v12333_v34 }
0x7a5f   :  { %v8180_v3 = vpop.xlane.xlu1 %8179 }
0x7a60   :  { %v8181_v9 = vmul.f32 0.125, %v8180_v3 }
0x7a62   :  { %v8182_v18 = vsub.f32 %v12048_v42, %v8181_v9  ;;  %v7900_v42 = vpack.c.bf16 %v12070_v32, %v12070_v32 }
0x7a64   :  { %v8183_v22 = vmul.f32 %v8182_v18, %v8182_v18 }
0x7a66   :  { %8185 = vrot.lane.b32.xlu0 %v8183_v22, %s10213_s14 }
0x7aa8   :  { %v7991_v49 = vpop.f32.mrb[144].mxu0 }
0x7aa9   :  { %v9559_v27 = vpop.f32.mrb[145].mxu0  ;;  %v8046_v19 = vsel %vm750_vm8, %v7991_v49, -inf }
0x7aaa   :  { %8047 = vmax.xlane.f32.xlu1 %v8046_v19  ;;  %v7994_v8 = vpop.f32.mrb[146].mxu0 }
0x7aab   :  { %v9560_v17 = vpop.f32.mrb[147].mxu0 }
0x7ab0   :  { %v8040_v6 = vpop.f32.mrb[148].mxu0 }
0x7ab1   :  { %v9565_v5 = vpop.f32.mrb[149].mxu0  ;;  %v8049_v33 = vsel %vm750_vm8, %v8040_v6, -inf }
0x7ab2   :  { %8050 = vmax.xlane.f32.xlu0 %v8049_v33  ;;  %v8043_v57 = vpop.f32.mrb[150].mxu0 }
0x7ab3   :  { %v9566_v20 = vpop.f32.mrb[151].mxu0 }
0x7abb   :  { %8118 = vrot.lane.b32.xlu1 %v7900_v42, %s10210_s28 }
0x7ad8   :  { %v8186_v51 = vpop.permute.xlu0 %8185 }
0x7ad9   :  { %v8188_v24 = vsel %vm97_vm1, %v8186_v51, 0.0 }
0x7ada   :  { %8189 = vadd.xlane.f32.xlu0 %v8188_v24 }
0x7b37   :  { %v8048_v58 = vpop.xlane.xlu1 %8047 }
0x7b38   :  { %v8052_v54 = vsub.f32 %v7991_v49, %v8048_v58 }
0x7b3a   :  { %v8054_v56 = vmul.f32 1.442695, %v8052_v54 }
0x7b3b   :  { %v8119_v47 = vpop.permute.xlu1 %8118 }
0x7b3c   :  { %10030 = vpow2.f32 %v8054_v56  ;;  %9574 = vmatpush3.bf16.msra.mxu1 %v8119_v47 }
0x7b3d   :  { %9585 = vmatprep.subr.bf16.mxu1 %v12333_v34 }
0x7b3f   :  { %v8051_v44 = vpop.xlane.xlu0 %8050 }
0x7b40   :  { %v8053_v45 = vsub.f32 %v8040_v6, %v8051_v44 }
0x7b42   :  { %v8056_v12 = vmul.f32 1.442695, %v8053_v45 }
0x7b44   :  { %10032 = vpow2.f32 %v8056_v12 }
0x7b46   :  { %v10031_v35 = vpop.eup %10030 }
0x7b47   :  { %v8058_v32 = vsel %vm750_vm8, %v10031_v35, 0.0 }
0x7b48   :  { %8059 = vadd.xlane.f32.xlu0 %v8058_v32 }
0x7b4e   :  { %v10033_v23 = vpop.eup %10032 }
0x7b4f   :  { %v8061_v36 = vsel %vm750_vm8, %v10033_v23, 0.0 }
0x7b50   :  { %8062 = vadd.xlane.f32.xlu1 %v8061_v36 }
0x7b5e   :  { %8071 = vrot.lane.b32.xlu0 %v7899_v1, %s10210_s28  ;;  %s10216_s28 = smov 96  }
0x7b67   :  { %v8190_v48 = vpop.xlane.xlu0 %8189 }
0x7b68   :  { %v8191_v40 = vmul.f32 0.125, %v8190_v48 }
0x7b6a   :  { %v8192_v25 = vadd.f32 1e-05, %v8191_v40 }
0x7b6c   :  { %10034 = vrsqrt.f32 %v8192_v25 }
0x7b76   :  { %v10035_v7 = vpop.eup %10034 }
0x7b77   :  { %v8194_v41 = vmul.f32 %v10035_v7, %v8182_v18 }
0x7b79   :  { %v8195_v13 = vmul.f32 %v8194_v41, %v10470_v63 }
0x7b7b   :  { %v8196_v3 = vadd.f32 %v8195_v13, %v10472_v2 }
0x7b7d   :  { %v8204_v9 = vrot.slane %v8196_v3, %v10432_v52 }
0x7b7f   :  { %v8205_v22 = vcombine.high %v8204_v9, %v8204_v9  ;;  %v8212_v62 = vrot.slane %v8204_v9, %v10432_v52 }
0x7b81   :  { %v8219_v49 = vrot.slane %v8205_v22, %v10432_v52  ;;  %v8222_v19 = vpack.c.bf16 %v8212_v62, %v8212_v62 }
0x7b83   :  { %v8223_v27 = vpack.c.bf16 %v8219_v49, %v8219_v49 }
0x7b85   :  { %8271 = vrot.lane.b32.xlu1 %v8223_v27, %s10213_s14 }
0x7b89   :  { %8225 = vrot.lane.b32.xlu1 %v8222_v19, %s10213_s14 }
0x7bd5   :  { %v8060_v8 = vpop.xlane.xlu0 %8059 }
0x7bd6   :  { %10036 = vrcp.f32 %v8060_v8 }
0x7bd9   :  { %v8072_v18 = vpop.permute.xlu0 %8071 }
0x7bda   :  { %9568 = vmatpush3.bf16.msra.mxu0 %v8072_v18 }
0x7bdb   :  { %9579 = vmatprep.subr.bf16.mxu0 %v12333_v34 }
0x7bdd   :  { %v8063_v63 = vpop.xlane.xlu1 %8062 }
0x7bde   :  { %10038 = vrcp.f32 %v8063_v63 }
0x7be0   :  { %v10037_v2 = vpop.eup %10036 }
0x7be1   :  { %v8066_v17 = vmul.f32 %v10037_v2, %v10031_v35 }
0x7be3   :  { %v8068_v6 = vpack.c.bf16 %v8066_v17, %v8066_v17 }
0x7be5   :  { %9570 = vmatmul.mubr.msk.bf16.vlgmr.msra.gmra.mrb[152].mxu0 %vm183_vm4, %v8068_v6 }
0x7be6   :  { %9580 = vmatpush3.bf16.xpose.msra.mxu0 %v12114_v0  ;;  %9581 = vmatprep.mubr.msk.bf16.mxu0 %vm10207_vm2, %v12333_v34 }
0x7be7   :  { %9591 = vmatprep.subr.bf16.mxu0 %v12333_v34 }
0x7be8   :  { %v10039_v52 = vpop.eup %10038 }
0x7be9   :  { %v8067_v5 = vmul.f32 %v10039_v52, %v10033_v23 }
0x7beb   :  { %v8069_v33 = vpack.c.bf16 %v8067_v5, %v8067_v5 }
0x7bed   :  { %9576 = vmatmul.mubr.msk.bf16.vlgmr.msra.gmra.mrb[152].mxu1 %vm183_vm4, %v8069_v33 }
0x7bee   :  { %9586 = vmatpush3.bf16.xpose.msra.mxu1 %v12121_v28  ;;  %9587 = vmatprep.mubr.msk.bf16.mxu1 %vm10207_vm2, %v12333_v34 }
0x7bef   :  { %9597 = vmatprep.subr.bf16.mxu1 %v12333_v34 }
0x7bf7   :  { %v8272_v57 = vpop.permute.xlu1 %8271 }
0x7bf8   :  { %9588 = vmatmul.mubr.msk.bf16.vlgmr.msra.gmra.mrb[156].mxu1 %vm238_vm5, %v8272_v57 }
0x7bf9   :  { %9598 = vmatpush3.bf16.msra.mxu1 %v8119_v47  ;;  %9599 = vmatprep.mubr.msk.bf16.mxu1 %vm10207_vm2, %v12333_v34 }
0x7bfb   :  { %v8226_v0 = vpop.permute.xlu1 %8225 }
0x7bfc   :  { %9582 = vmatmul.mubr.msk.bf16.vlgmr.msra.gmra.mrb[156].mxu0 %vm238_vm5, %v8226_v0 }
0x7bfd   :  { %9592 = vmatpush3.bf16.msra.mxu0 %v8072_v18  ;;  %9593 = vmatprep.mubr.msk.bf16.mxu0 %vm10207_vm2, %v12333_v34 }
0x7bfe   :  { %9603 = vmatprep.subr.bf16.mxu0 %v12333_v34 }
0x7cb8   :  { %v8111_v28 = vpop.f32.mrb[152].mxu0 }
0x7cb9   :  { %v9571_v20 = vpop.f32.mrb[153].mxu0 }
0x7cba   :  { %v8114_v42 = vpop.f32.mrb[154].mxu0 }
0x7cbb   :  { %v9572_v51 = vpop.f32.mrb[155].mxu0 }
0x7cc0   :  { %v8158_v24 = vpop.f32.mrb[152].mxu1 }
0x7cc1   :  { %v8168_v58 = vrot.slane %v8158_v24, 7  ;;  %v9577_v54 = vpop.f32.mrb[153].mxu1 }
0x7cc2   :  { %v8161_v56 = vpop.f32.mrb[154].mxu1 }
0x7cc3   :  { %v9578_v47 = vpop.f32.mrb[155].mxu1  ;;  %v12172_v44 = vsel %vm874_vm9, %v8168_v58, %v8111_v28 }
0x7ccb   :  { %v8310_v45 = vpop.f32.mrb[156].mxu1 }
0x7ccc   :  { %v9589_v12 = vpop.f32.mrb[157].mxu1  ;;  %v8319_v35 = vsel %vm750_vm8, %v8310_v45, -inf }
0x7ccd   :  { %8320 = vmax.xlane.f32.xlu0 %v8319_v35  ;;  %v8313_v32 = vpop.f32.mrb[158].mxu1 }
0x7cce   :  { %v9590_v23 = vpop.f32.mrb[159].mxu1 }
0x7ccf   :  { %v8264_v36 = vpop.f32.mrb[156].mxu0 }
0x7cd0   :  { %v9583_v1 = vpop.f32.mrb[157].mxu0  ;;  %v8316_v48 = vsel %vm750_vm8, %v8264_v36, -inf }
0x7cd1   :  { %8317 = vmax.xlane.f32.xlu1 %v8316_v48  ;;  %v8267_v40 = vpop.f32.mrb[158].mxu0 }
0x7cd2   :  { %v9584_v25 = vpop.f32.mrb[159].mxu0 }
0x7ce2   :  { %606 = vrot.lane.b32.xlu1 %v10414_v31, %s10201_s19 }
0x7ce6   :  { %1139 = vrot.lane.b32.xlu1 %v10575_v11, %s10215_s7 }
0x7cea   :  { %1662 = vrot.lane.b32.xlu1 %v10653_v38, %s10201_s19 }
0x7cee   :  { %2192 = vrot.lane.b32.xlu1 %v10818_v37, %s10215_s7 }
0x7cf2   :  { %2970 = vrot.lane.b32.xlu1 %v11030_v15, %s10201_s19 }
0x7cf6   :  { %3742 = vrot.lane.b32.xlu1 %v11116_v46, %s10201_s19 }
0x7cfa   :  { %4272 = vrot.lane.b32.xlu1 %v11281_v14, %s10215_s7 }
0x7cfe   :  { %5050 = vrot.lane.b32.xlu1 %v11493_v50, %s10201_s19 }
0x7d02   :  { %5822 = vrot.lane.b32.xlu1 %v11579_v39, %s10201_s19 }
0x7d06   :  { %6352 = vrot.lane.b32.xlu1 %v11744_v55, %s10215_s7 }
0x7d0a   :  { %7130 = vrot.lane.b32.xlu1 %v11956_v53, %s10201_s19 }
0x7d0e   :  { %7902 = vrot.lane.b32.xlu1 %v12039_v16, %s10201_s19 }
0x7d5a   :  { %v8321_v31 = vpop.xlane.xlu0 %8320 }
0x7d5b   :  { %v8323_v11 = vsub.f32 %v8310_v45, %v8321_v31  ;;  %v10079_v31 = vld [vmem:[%s12320_s1] ss:$0 sm:$0xff] }
0x7d5d   :  { %v8326_v38 = vmul.f32 1.442695, %v8323_v11 }
0x7d5e   :  { %v8318_v37 = vpop.xlane.xlu1 %8317 }
0x7d5f   :  { %10040 = vpow2.f32 %v8326_v38  ;;  %v8322_v15 = vsub.f32 %v8264_v36, %v8318_v37 }
0x7d61   :  { %v8324_v46 = vmul.f32 1.442695, %v8322_v15 }
0x7d62   :  { %v607_v14 = vpop.permute.xlu1 %606 }
0x7d63   :  { %10042 = vpow2.f32 %v8324_v46  ;;  %609 = vst.msk [vmem:[#allocation2] sm:$0x3] %vm362_vm6, %v607_v14  ;;  %v10080_v14 = vld [vmem:[%s12320_s1 + $0x1] ss:$0 sm:$0xff] }
0x7d66   :  { %v1140_v50 = vpop.permute.xlu1 %1139 }
0x7d69   :  { %v10041_v39 = vpop.eup %10040 }
0x7d6a   :  { %v1663_v55 = vpop.permute.xlu1 %1662  ;;  %v8331_v7 = vsel %vm750_vm8, %v10041_v39, 0.0 }
0x7d6b   :  { %1665 = vst.msk [vmem:[#allocation2 + $0x2] sm:$0x3] %vm362_vm6, %v1663_v55  ;;  %8332 = vadd.xlane.f32.xlu0 %v8331_v7  ;;  %v9743_v55 = vld [vmem:[%s12324_s5 + $0x10] sm:$0xff]   ;;  %v10081_v7 = vld [vmem:[%s12321_s2 + $0x1] ss:$0 sm:$0xff]  ;;  %s10219_s2 = smov [#allocation9]  }
0x7d6d   :  { %v10043_v53 = vpop.eup %10042 }
0x7d6e   :  { %v2193_v16 = vpop.permute.xlu1 %2192  ;;  %v8328_v41 = vsel %vm750_vm8, %v10043_v53, 0.0 }
0x7d6f   :  { %8329 = vadd.xlane.f32.xlu0 %v8328_v41 }
0x7d72   :  { %v2971_v13 = vpop.permute.xlu1 %2970 }
0x7d76   :  { %v3743_v3 = vpop.permute.xlu1 %3742 }
0x7d77   :  { %3745 = vst.msk [vmem:[#allocation2 + $0x6] sm:$0x3] %vm362_vm6, %v3743_v3 }
0x7d7a   :  { %v4273_v9 = vpop.permute.xlu1 %4272 }
0x7d7e   :  { %v5051_v22 = vpop.permute.xlu1 %5050 }
0x7d82   :  { %v5823_v49 = vpop.permute.xlu1 %5822 }
0x7d83   :  { %5825 = vst.msk [vmem:[#allocation2 + $0xa] sm:$0x3] %vm362_vm6, %v5823_v49 }
0x7d85   :  { %876 = vrot.lane.b32.xlu0 %v10551_v10, %s10201_s19  ;;  %v12334_v10 = vld [vmem:[#allocation16_spill] sm:$0xff] }
0x7d86   :  { %v6353_v27 = vpop.permute.xlu1 %6352 }
0x7d89   :  { %1930 = vrot.lane.b32.xlu0 %v10777_v4, %s10201_s19 }
0x7d8a   :  { %v7131_v62 = vpop.permute.xlu1 %7130 }
0x7d8d   :  { %2702 = vrot.lane.b32.xlu0 %v10901_v60, %s10201_s19 }
0x7d8e   :  { %v7903_v19 = vpop.permute.xlu1 %7902 }
0x7d8f   :  { %7905 = vst.msk [vmem:[#allocation2 + $0xe] sm:$0x3] %vm362_vm6, %v7903_v19 }
0x7d91   :  { %3232 = vrot.lane.b32.xlu0 %v11054_v30, %s10215_s7 }
0x7d95   :  { %4010 = vrot.lane.b32.xlu0 %v11240_v26, %s10201_s19 }
0x7d99   :  { %4782 = vrot.lane.b32.xlu0 %v11364_v61, %s10201_s19 }
0x7d9d   :  { %5312 = vrot.lane.b32.xlu0 %v11517_v21, %s10215_s7 }
0x7da1   :  { %6090 = vrot.lane.b32.xlu0 %v11703_v29, %s10201_s19 }
0x7da5   :  { %6862 = vrot.lane.b32.xlu0 %v11827_v43, %s10201_s19 }
0x7da9   :  { %7392 = vrot.lane.b32.xlu0 %v12334_v10, %s10215_s7 }
0x7dad   :  { %8170 = vrot.lane.b32.xlu0 %v12172_v44, %s10201_s19 }
0x7db1   :  { %8442 = vrot.lane.b32.xlu0 %v12028_v59, %s10216_s28 }
0x7df8   :  { %v8333_v4 = vpop.xlane.xlu0 %8332 }
0x7df9   :  { %10044 = vrcp.f32 %v8333_v4 }
0x7dfc   :  { %v8330_v60 = vpop.xlane.xlu0 %8329 }
0x7dfd   :  { %10046 = vrcp.f32 %v8330_v60 }
0x7e00   :  { %v877_v30 = vpop.permute.xlu0 %876 }
0x7e01   :  { %880 = vst.msk [vmem:[#allocation2] sm:$0x3] %vm879_vm10, %v877_v30 }
0x7e02   :  { %1143 = vst.msk [vmem:[#allocation2] sm:$0x3] %vm1142_vm11, %v1140_v50  ;;  %v9741_v50 = vld [vmem:[%s12324_s5] sm:$0xff]  }
0x7e03   :  { %v10045_v26 = vpop.eup %10044 }
0x7e04   :  { %v8337_v61 = vmul.f32 %v10045_v26, %v10041_v39  ;;  %v1931_v21 = vpop.permute.xlu0 %1930  ;;  %v9742_v39 = vld [vmem:[%s12324_s5 + $0x8] sm:$0xff]   ;;  %s8574_s5 = sshll.u32 %s10219_s2, 4  ;;  %s8575_s5 = int_to_ptr.vmem [resolvable:$true] %s8574_s5 }
0x7e05   :  { %1933 = vst.msk [vmem:[#allocation2 + $0x2] sm:$0x3] %vm879_vm10, %v1931_v21  ;;  %s10126_s16 = scalar_lea.vmem %s8575_s5, 32  ;;  %p10131_p3 = scmp.lt.s32.totalorder %s8575_s5, %s8575_s5 }
0x7e06   :  { %2195 = vst.msk [vmem:[#allocation2 + $0x2] sm:$0x3] %vm1142_vm11, %v2193_v16  ;;  %v8339_v29 = vpack.c.bf16 %v8337_v61, %v8337_v61  ;;  %p10127_p2 = scmp.ne.s32.totalorder %s8575_s5, %s10126_s16  ;;  %p10132_p4 = scmp.lt.s32.totalorder %s10126_s16, %s10126_s16 }
0x7e07   :  { %v10047_v43 = vpop.eup %10046 }
0x7e08   :  { %v8336_v59 = vmul.f32 %v10047_v43, %v10043_v53  ;;  %9600 = vmatmul.mubr.msk.bf16.vlgmr.msra.gmra.mrb[160].mxu1 %vm183_vm4, %v8339_v29  ;;  %v2703_v8 = vpop.permute.xlu0 %2702  ;;  %p10133_p5 = por %p10132_p4, %p10131_p3 }
0x7e09   :  { %2705 = vst.msk [vmem:[#allocation2 + $0x4] sm:$0x3] %vm362_vm6, %v2703_v8 }
0x7e0a   :  { %2973 = vst.msk [vmem:[#allocation2 + $0x4] sm:$0x3] %vm879_vm10, %v2971_v13  ;;  %v8338_v18 = vpack.c.bf16 %v8336_v59, %v8336_v59  ;;  %p10134_p6 = pnand %p10133_p5, %p10127_p2 }
0x7e0c   :  { %9594 = vmatmul.mubr.msk.bf16.vlgmr.msra.gmra.mrb[160].mxu0 %vm183_vm4, %v8338_v18  ;;  %v3233_v63 = vpop.permute.xlu0 %3232 }
0x7e0d   :  { %3235 = vst.msk [vmem:[#allocation2 + $0x4] sm:$0x3] %vm1142_vm11, %v3233_v63  ;;  %9609 = vmatprep.mubr.msk.bf16.mxu0 %vm10207_vm2, %v12333_v34  ;;  %9604 = vmatpush3.bf16.msra.mxu0 %v9741_v50 }
0x7e0e   :  { %9605 = vmatprep.subr.bf16.mxu0 %v12333_v34 }
0x7e10   :  { %v4011_v2 = vpop.permute.xlu0 %4010 }
0x7e11   :  { %4013 = vst.msk [vmem:[#allocation2 + $0x6] sm:$0x3] %vm879_vm10, %v4011_v2  ;;  %9606 = vmatpush3.bf16.msra.mxu0 %v9742_v39 }
0x7e12   :  { %4275 = vst.msk [vmem:[#allocation2 + $0x6] sm:$0x3] %vm1142_vm11, %v4273_v9  ;;  %9607 = vmatprep.subr.bf16.mxu0 %v12333_v34 }
0x7e14   :  { %v4783_v17 = vpop.permute.xlu0 %4782 }
0x7e15   :  { %4785 = vst.msk [vmem:[#allocation2 + $0x8] sm:$0x3] %vm362_vm6, %v4783_v17  ;;  %9608 = vmatpush3.bf16.msra.mxu0 %v9743_v55 }
0x7e16   :  { %5053 = vst.msk [vmem:[#allocation2 + $0x8] sm:$0x3] %vm879_vm10, %v5051_v22 }
0x7e18   :  { %v5313_v6 = vpop.permute.xlu0 %5312 }
0x7e19   :  { %5315 = vst.msk [vmem:[#allocation2 + $0x8] sm:$0x3] %vm1142_vm11, %v5313_v6  ;;  %v8446_v45 = vld [vmem:[#allocation2] sm:$0xff] }
0x7e1a   :  { %v8449_v12 = vsel %vm8448_vm12, %v8446_v45, 0.0 }
0x7e1c   :  { %v6091_v52 = vpop.permute.xlu0 %6090 }
0x7e1d   :  { %6093 = vst.msk [vmem:[#allocation2 + $0xa] sm:$0x3] %vm879_vm10, %v6091_v52 }
0x7e1e   :  { %6355 = vst.msk [vmem:[#allocation2 + $0xa] sm:$0x3] %vm1142_vm11, %v6353_v27 }
0x7e20   :  { %v6863_v5 = vpop.permute.xlu0 %6862 }
0x7e21   :  { %6865 = vst.msk [vmem:[#allocation2 + $0xc] sm:$0x3] %vm362_vm6, %v6863_v5 }
0x7e22   :  { %7133 = vst.msk [vmem:[#allocation2 + $0xc] sm:$0x3] %vm879_vm10, %v7131_v62 }
0x7e24   :  { %v7393_v33 = vpop.permute.xlu0 %7392 }
0x7e25   :  { %7395 = vst.msk [vmem:[#allocation2 + $0xc] sm:$0x3] %vm1142_vm11, %v7393_v33 }
0x7e28   :  { %v8171_v57 = vpop.permute.xlu0 %8170 }
0x7e29   :  { %8173 = vst.msk [vmem:[#allocation2 + $0xe] sm:$0x3] %vm879_vm10, %v8171_v57 }
0x7e2c   :  { %v8443_v0 = vpop.permute.xlu0 %8442 }
0x7e2d   :  { %8445 = vst.msk [vmem:[#allocation11] sm:$0x3] %vm362_vm6, %v8443_v0 }
0x7edb   :  { %v8420_v28 = vpop.f32.mrb[160].mxu1 }
0x7edc   :  { %v9601_v20 = vpop.f32.mrb[161].mxu1  ;;  %v8430_v51 = vrot.slane %v8420_v28, 7 }
0x7edd   :  { %v8423_v42 = vpop.f32.mrb[162].mxu1 }
0x7ede   :  { %v9602_v24 = vpop.f32.mrb[163].mxu1 }
0x7edf   :  { %v8377_v58 = vpop.f32.mrb[160].mxu0 }
0x7ee0   :  { %v8431_v54 = vsel %vm874_vm9, %v8430_v51, %v8377_v58  ;;  %v9595_v56 = vpop.f32.mrb[161].mxu0 }
0x7ee1   :  { %v8380_v47 = vpop.f32.mrb[162].mxu0  ;;  %8432 = vrot.lane.b32.xlu1 %v8431_v54, %s10215_s7 }
0x7ee2   :  { %v9596_v44 = vpop.f32.mrb[163].mxu0 }
0x7f05   :  { %8450 = vadd.xlane.f32.xlu1 %v8449_v12 }
0x7f53   :  { %v8433_v35 = vpop.permute.xlu1 %8432 }
0x7f54   :  { %8435 = vst.msk [vmem:[#allocation2 + $0xe] sm:$0x3] %vm1142_vm11, %v8433_v35 }
0x7f5b   :  { %v8447_v32 = vld [vmem:[#allocation2 + $0x8] sm:$0xff] }
0x7f5c   :  { %v8452_v23 = vsel %vm8448_vm12, %v8447_v32, 0.0 }
0x7f5d   :  { %8453 = vadd.xlane.f32.xlu0 %v8452_v23 }
0x7f92   :  { %v8451_v36 = vpop.xlane.xlu1 %8450 }
0x7f93   :  { %v8456_v1 = vmul.f32 0.020833334, %v8451_v36 }
0x7f95   :  { %v8458_v48 = vsub.f32 %v8446_v45, %v8456_v1 }
0x7f97   :  { %v8460_v40 = vmul.f32 %v8458_v48, %v8458_v48 }
0x7f99   :  { %v8462_v25 = vsel %vm8448_vm12, %v8460_v40, 0.0 }
0x7f9a   :  { %8463 = vadd.xlane.f32.xlu0 %v8462_v25 }
0x7fb0   :  { %8476 = vrot.lane.b32.xlu0 %v10079_v31, %s10217_s26 }
0x7fea   :  { %v8454_v11 = vpop.xlane.xlu0 %8453 }
0x7feb   :  { %v8457_v38 = vmul.f32 0.020833334, %v8454_v11 }
0x7fed   :  { %v8459_v37 = vsub.f32 %v8447_v32, %v8457_v38 }
0x7fef   :  { %v8461_v15 = vmul.f32 %v8459_v37, %v8459_v37 }
0x7ff1   :  { %v8465_v46 = vsel %vm8448_vm12, %v8461_v15, 0.0 }
0x7ff2   :  { %8466 = vadd.xlane.f32.xlu1 %v8465_v46 }
0x8003   :  { %8481 = vrot.lane.b32.xlu1 %v10080_v14, %s10217_s26 }
0x8007   :  { %8505 = vrot.lane.b32.xlu1 %v10081_v7, %s10218_s15 }
0x8027   :  { %v8464_v53 = vpop.xlane.xlu0 %8463 }
0x8028   :  { %v8468_v16 = vmul.f32 0.020833334, %v8464_v53 }
0x802a   :  { %v8470_v41 = vadd.f32 1e-05, %v8468_v16 }
0x802b   :  { %v8477_v27 = vpop.permute.xlu0 %8476 }
0x802c   :  { %10048 = vrsqrt.f32 %v8470_v41 }
0x8036   :  { %v10049_v34 = vpop.eup %10048 }
0x8037   :  { %v8474_v22 = vmul.f32 %v10049_v34, %v8458_v48 }
0x8039   :  { %v8479_v10 = vmul.f32 %v8477_v27, %v8474_v22 }
0x807f   :  { %v8467_v13 = vpop.xlane.xlu1 %8466 }
0x8080   :  { %v8469_v3 = vmul.f32 0.020833334, %v8467_v13 }
0x8082   :  { %v8471_v9 = vadd.f32 1e-05, %v8469_v3 }
0x8083   :  { %v8482_v19 = vpop.permute.xlu1 %8481 }
0x8084   :  { %10050 = vrsqrt.f32 %v8471_v9  ;;  %v8484_v60 = vadd.f32 %v8482_v19, %v8479_v10 }
0x808e   :  { %v10051_v49 = vpop.eup %10050 }
0x808f   :  { %v8475_v62 = vmul.f32 %v10051_v49, %v8459_v37 }
0x8091   :  { %v8480_v4 = vmul.f32 %v8477_v27, %v8475_v62 }
0x8093   :  { %v8485_v30 = vadd.f32 %v8482_v19, %v8480_v4 }
0x8095   :  { %v8486_v26 = vpack.c.bf16 %v8485_v30, %v8484_v60 }
0x8097   :  { %9610 = vmatmul.mubr.msk.bf16.vlgmr.msra.gmra.mrb[164].mxu0 %vm8448_vm12, %v8486_v26 }
0x8098   :  { %10137 = shalt.err (!%p10134_p6)
}
0x8099   :  { %s10138_s18 = scalar_lea.hbm %s12327_s8, 32 }
0x809a   :  { %p10139_p7 = scmp.ne.s32.totalorder %s12327_s8, %s10138_s18  ;;  %p10142_p8 = scmp.lt.u32.totalorder %s10138_s18, %s12327_s8 }
0x809c   :  { %p10144_p9 = pnand %p10142_p8, %p10139_p7 }
0x809e   :  { %10147 = shalt.err (!%p10144_p9)
}
0x809f   :  { %8577 = dma.vmem_to_hbm [thread:$0]  %s8575_s5, 32, %s12327_s8, [#allocation10]  }
0x80a0   :  { %s10220_s7 = smov [#allocation11]  }
0x80a1   :  { %s8584_s28 = sshll.u32 %s10220_s7, 4  ;;  %s8585_s28 = int_to_ptr.vmem [resolvable:$true] %s8584_s28 }
0x80a2   :  { %s10148_s19 = scalar_lea.vmem %s8585_s28, 32  ;;  %p10153_p11 = scmp.lt.s32.totalorder %s8585_s28, %s8585_s28 }
0x80a3   :  { %p10149_p10 = scmp.ne.s32.totalorder %s8585_s28, %s10148_s19  ;;  %p10154_p12 = scmp.lt.s32.totalorder %s10148_s19, %s10148_s19 }
0x80a5   :  { %p10155_p13 = por %p10154_p12, %p10153_p11 }
0x80a7   :  { %p10156_p0 = pnand %p10155_p13, %p10149_p10 }
0x80a9   :  { %10159 = shalt.err (!%p10156_p0)
}
0x80aa   :  { %s10160_s27 = scalar_lea.hbm %s12328_s9, 32 }
0x80ab   :  { %p10161_p1 = scmp.ne.s32.totalorder %s12328_s9, %s10160_s27  ;;  %p10164_p2 = scmp.lt.u32.totalorder %s10160_s27, %s12328_s9 }
0x80ad   :  { %p10166_p3 = pnand %p10164_p2, %p10161_p1 }
0x80af   :  { %10169 = shalt.err (!%p10166_p3)
}
0x80b0   :  { %8587 = dma.vmem_to_hbm [thread:$0]  %s8585_s28, 32, %s12328_s9, [#allocation10]   ;;  %v8506_v61 = vpop.permute.xlu1 %8505 }
0x80b1   :  { %s10221_s3 = smov [#allocation8]  }
0x80b2   :  { %s8559_s13 = sshll.u32 %s10221_s3, 4  ;;  %s8560_s13 = int_to_ptr.vmem [resolvable:$true] %s8559_s13 }
0x80b3   :  { %s10170_s1 = scalar_lea.vmem %s8560_s13, 256  ;;  %p10175_p5 = scmp.lt.s32.totalorder %s8560_s13, %s8560_s13 }
0x80b4   :  { %p10171_p4 = scmp.ne.s32.totalorder %s8560_s13, %s10170_s1  ;;  %p10176_p6 = scmp.lt.s32.totalorder %s10170_s1, %s10170_s1 }
0x80b6   :  { %p10177_p7 = por %p10176_p6, %p10175_p5 }
0x80b8   :  { %p10178_p8 = pnand %p10177_p7, %p10171_p4 }
0x816a   :  { %v8545_v21 = vpop.f32.mrb[164].mxu0 }
0x816b   :  { %v8546_v29 = vadd.f32 %v8545_v21, %v8506_v61  ;;  %v9611_v43 = vpop.f32.mrb[165].mxu0 }
0x816c   :  { %v8548_v59 = vpop.f32.mrb[166].mxu0 }
0x816d   :  { %8552 = vst.msk [vmem:[#allocation8] sm:$0xff] %vm183_vm4, %v8546_v29  ;;  %v8549_v8 = vadd.f32 %v8548_v59, %v8506_v61  ;;  %v9612_v18 = vpop.f32.mrb[167].mxu0 }
0x816f   :  { %8553 = vst.msk [vmem:[#allocation8 + $0x8] sm:$0xff] %vm183_vm4, %v8549_v8 }
0x8170   :  { %10181 = shalt.err (!%p10178_p8)
}
0x8171   :  { %s10182_s15 = scalar_lea.hbm %s12325_s6, 256 }
0x8172   :  { %p10183_p9 = scmp.ne.s32.totalorder %s12325_s6, %s10182_s15  ;;  %p10186_p10 = scmp.lt.u32.totalorder %s10182_s15, %s12325_s6 }
0x8174   :  { %p10188_p11 = pnand %p10186_p10, %p10183_p9 }
0x8176   :  { %10191 = shalt.err (!%p10188_p11)
}
0x8177   :  { %s10222_s0 = smov 128   ;;  %s10223_s18 = smov 8  }
0x8178   :  { %8565 = dma.vmem_to_hbm [thread:$0]  %s8560_s13, 256, %s12325_s6, [#allocation5], %s10222_s0, %s10222_s0, %s10223_s18  }
0x8179   :  { %10196 = dma.done.wait [#allocation5], 256  }
0x817a   :  { %10197 = vsyncadd [#allocation5], 4294967040 }
0x817b   :  { %10198 = dma.done.wait [#allocation10], 64  }
0x817c   :  { %10199 = vsyncadd [#allocation10], 4294967232 }
0x817d   :  { %8599 = vsyncpa [#allocation4], 1 }
0x817e   :  { %8600 = vsyncpa [#allocation7], 1 }
0x817f   :  { %8601 = vsyncpa [#allocation5], 1 }
0x8180   :  { %8602 = vsyncpa [#allocation10], 1 }

</bundles_post_ra>
